<compile_context>
chip_gen: v7x
topology: tpu7x:2x2x1
jax: 0.10.0
libtpu: 0.0.40
codegen_flags: <defaults>
</compile_context>

<pallas_src>
import functools

import jax
import jax.numpy as jnp
from jax import lax
from jax.experimental import pallas as pl
from jax.experimental.pallas import tpu as pltpu


# ----------------------------------------------------------------------------
# Architecture constants (VAE defaults: image_channels=3, h_dim=1024, z_dim=64)
# ----------------------------------------------------------------------------
_ENC_K = 4
_ENC_S = 2
_ENC_COUT = (32, 64, 128, 256)
_DEC0_COUT, _DEC0_K = 32, 5                              # 1x1-input ConvTranspose
_DEC_SCATTER_CFG = ((32, 5, 2), (16, 6, 2), (3, 6, 2))   # (Cout, k, stride)


def _round_up(x, m):
    return ((x + m - 1) // m) * m


def _pick_tm(m):
    """Row-tile: big-M GEMMs get multi-step grids so megacore can shard them."""
    if m <= 256:
        return m                                # single exact (full-dim) block
    if m <= 1024:
        return _round_up(-(-m // 2), 16)        # 2 grid steps
    return 512


def _pad_cols(m, mult=128):
    """Zero-pad last dim up to a multiple of `mult` (hoisted, init-time only)."""
    n = m.shape[-1]
    npad = _round_up(n, mult)
    if npad == n:
        return m
    return jnp.pad(m, [(0, 0)] * (m.ndim - 1) + [(0, npad - n)])


# ----------------------------------------------------------------------------
# Pallas kernels
# ----------------------------------------------------------------------------
def _gemm_kernel(*refs, act, has_bias):
    """act(A @ B [+ bias]) -- bf16 operands, f32 accumulation/epilogue."""
    if has_bias:
        a_ref, b_ref, bias_ref, o_ref = refs
    else:
        a_ref, b_ref, o_ref = refs
    acc = jnp.dot(a_ref[...], b_ref[...], preferred_element_type=jnp.float32)
    if has_bias:
        acc = acc + bias_ref[...]
    if act == "relu":
        acc = jnp.maximum(acc, 0.0)
    elif act == "sigmoid":
        acc = jax.nn.sigmoid(acc)
    o_ref[...] = acc.astype(o_ref.dtype)


def _fc_reparam_kernel(h_ref, w_ref, b_ref, eps_ref,
                       mu_ref, logvar_ref, z_ref, *, z_dim):
    """Fused fc1 + fc2 (concatenated along N) + reparameterize."""
    acc = jnp.dot(h_ref[...], w_ref[...], preferred_element_type=jnp.float32)
    acc = acc + b_ref[...]
    mu = acc[:, :z_dim]
    logvar = acc[:, z_dim:]
    mu_ref[...] = mu
    logvar_ref[...] = logvar
    z_ref[...] = mu + jnp.exp(0.5 * logvar) * eps_ref[...]


# ----------------------------------------------------------------------------
# Pallas wrappers
# ----------------------------------------------------------------------------
def matmul_bias_act(a, w, bias=None, act="none", out_dtype=jnp.float32,
                    n_valid=None):
    """act(a @ w + bias).  a:(M,K) bf16, w:(K,Np) bf16 (lane-padded at init),
    bias:(1,Np) f32 or None.  Returns (M, n_valid or Np)."""
    m, k = a.shape
    kw, n = w.shape
    assert k == kw, (k, kw)
    tm = _pick_tm(m)
    grid_m = -(-m // tm)

    in_specs = [pl.BlockSpec((tm, k), lambda i: (i, 0)),
                pl.BlockSpec((k, n), lambda i: (0, 0))]
    args = [a, w]
    if bias is not None:
        in_specs.append(pl.BlockSpec((1, n), lambda i: (0, 0)))
        args.append(bias)

    out = pl.pallas_call(
        functools.partial(_gemm_kernel, act=act, has_bias=bias is not None),
        out_shape=jax.ShapeDtypeStruct((m, n), out_dtype),
        grid_spec=pltpu.PrefetchScalarGridSpec(
            num_scalar_prefetch=0,
            grid=(grid_m,),
            in_specs=in_specs,
            out_specs=pl.BlockSpec((tm, n), lambda i: (i, 0)),
        ),
        compiler_params=pltpu.CompilerParams(
            dimension_semantics=("parallel",)),
    )(*args)
    if n_valid is not None and n_valid != n:
        out = out[:, :n_valid]
    return out


def fc_bottleneck(h, w12, b12, eps):
    """One Pallas call: [mu|logvar] = h @ [W1|W2] + [b1|b2];  z = mu+exp(.5lv)*eps."""
    b = h.shape[0]
    z_dim = w12.shape[1] // 2
    mu, logvar, z = pl.pallas_call(
        functools.partial(_fc_reparam_kernel, z_dim=z_dim),
        out_shape=(jax.ShapeDtypeStruct((b, z_dim), jnp.float32),
                   jax.ShapeDtypeStruct((b, z_dim), jnp.float32),
                   jax.ShapeDtypeStruct((b, z_dim), jnp.float32)),
    )(h, w12, b12, eps)
    return mu, logvar, z


# ----------------------------------------------------------------------------
# Conv / ConvTranspose lowered to Pallas GEMMs (im2col / overlap-add are glue)
# ----------------------------------------------------------------------------
def _im2col_nhwc(x, k, s):
    b, h, w, c = x.shape
    ho = (h - k) // s + 1
    wo = (w - k) // s + 1
    cols = []
    for di in range(k):
        for dj in range(k):
            cols.append(x[:, di:di + s * (ho - 1) + 1:s,
                          dj:dj + s * (wo - 1) + 1:s, :])
    p = jnp.stack(cols, axis=3)                     # (B, Ho, Wo, k*k, C)
    return p.reshape(b * ho * wo, k * k * c), ho, wo


def conv2d_nhwc(x, w_gemm, bias, cout, k, s, act):
    b = x.shape[0]
    cols, ho, wo = _im2col_nhwc(x, k, s)
    y = matmul_bias_act(cols, w_gemm, bias, act=act,
                        out_dtype=jnp.bfloat16, n_valid=cout)
    return y.reshape(b, ho, wo, cout)


def conv_transpose_scatter(x, w_gemm, bias, cout, k, s, act):
    """nn.ConvTranspose2d via output-scatter GEMM + dense overlap-add."""
    b, h, w, cin = x.shape
    y = matmul_bias_act(x.reshape(b * h * w, cin), w_gemm, None, act="none",
                        out_dtype=jnp.float32, n_valid=k * k * cout)
    cont = y.reshape(b, h, w, k, k, cout)
    ho = (h - 1) * s + k
    wo = (w - 1) * s + k
    out = jnp.zeros((b, ho, wo, cout), jnp.float32)
    zero = jnp.array(0.0, jnp.float32)
    for di in range(k):
        for dj in range(k):
            piece = lax.pad(cont[:, :, :, di, dj, :], zero,
                            ((0, 0, 0),
                             (di, k - 1 - di, s - 1),
                             (dj, k - 1 - dj, s - 1),
                             (0, 0, 0)))
            out = out + piece
    # bias + activation after the overlap-add (cannot be fused into the GEMM
    # because output pixels sum contributions from several kernel taps).
    out = out + bias
    if act == "relu":
        out = jnp.maximum(out, 0.0)
    elif act == "sigmoid":
        out = jax.nn.sigmoid(out)
    return out


# ----------------------------------------------------------------------------
# Parameters (PyTorch layout) + one-time GEMM-ready preparation
# ----------------------------------------------------------------------------
def init_params(key, image_channels=3, h_dim=1024, z_dim=64):
    def w(key, shape, fan_in):
        return jax.random.normal(key, shape, jnp.float32) / jnp.sqrt(float(fan_in))

    keys = jax.random.split(key, 16)
    enc_shapes = [(32, image_channels, 4, 4), (64, 32, 4, 4),
                  (128, 64, 4, 4), (256, 128, 4, 4)]
    dec_shapes = [(h_dim, 32, 5, 5), (32, 32, 5, 5),
                  (32, 16, 6, 6), (16, image_channels, 6, 6)]
    params = {"enc": [], "dec": []}
    ki = 0
    for s in enc_shapes:
        fan_in = s[1] * s[2] * s[3]
        params["enc"].append((w(keys[ki], s, fan_in), jnp.zeros((s[0],), jnp.float32)))
        ki += 1
    for s in dec_shapes:
        fan_in = s[0] * s[2] * s[3]
        params["dec"].append((w(keys[ki], s, fan_in), jnp.zeros((s[1],), jnp.float32)))
        ki += 1
    params["fc1_w"] = w(keys[ki], (z_dim, h_dim), h_dim); ki += 1
    params["fc1_b"] = jnp.zeros((z_dim,), jnp.float32)
    params["fc2_w"] = w(keys[ki], (z_dim, h_dim), h_dim); ki += 1
    params["fc2_b"] = jnp.zeros((z_dim,), jnp.float32)
    params["fc3_w"] = w(keys[ki], (h_dim, z_dim), z_dim); ki += 1
    params["fc3_b"] = jnp.zeros((h_dim,), jnp.float32)
    return params


def prepare_params(params):
    """Hoisted (called once): PyTorch-layout weights -> GEMM-ready bf16 matrices
    with lane-padded N, f32 biases in (1, Np) layout, fc1/fc2 concatenated."""
    prep = {"enc": [], "dec_sc": []}
    # Encoder convs: w (Cout,Cin,k,k) -> (k*k*Cin, Cout)
    for w, b in params["enc"]:
        cout, cin, k, _ = w.shape
        wg = jnp.transpose(w, (2, 3, 1, 0)).reshape(k * k * cin, cout)
        prep["enc"].append((_pad_cols(wg).astype(jnp.bfloat16),
                            _pad_cols(b.reshape(1, cout)).astype(jnp.float32)))
    # Decoder layer 0 (1x1 input): w (Cin,Cout,k,k) -> (Cin, k*k*Cout), bias tiled
    w0, b0 = params["dec"][0]
    cin0, cout0, k0, _ = w0.shape
    wg0 = jnp.transpose(w0, (0, 2, 3, 1)).reshape(cin0, k0 * k0 * cout0)
    prep["dec0"] = (_pad_cols(wg0).astype(jnp.bfloat16),
                    _pad_cols(jnp.tile(b0, k0 * k0).reshape(1, -1)).astype(jnp.float32))
    # Remaining transposed convs (output-scatter GEMM; bias added after scatter)
    for w, b in params["dec"][1:]:
        cin, cout, k, _ = w.shape
        wg = jnp.transpose(w, (0, 2, 3, 1)).reshape(cin, k * k * cout)
        prep["dec_sc"].append((_pad_cols(wg).astype(jnp.bfloat16),
                               b.astype(jnp.float32)))
    # fc1 + fc2 fused along N (N = 2*z_dim = 128), fc3 transposed
    prep["w12"] = jnp.concatenate(
        [params["fc1_w"].T, params["fc2_w"].T], axis=1).astype(jnp.bfloat16)
    prep["b12"] = jnp.concatenate(
        [params["fc1_b"], params["fc2_b"]]).reshape(1, -1).astype(jnp.float32)
    prep["w3"] = params["fc3_w"].T.astype(jnp.bfloat16)
    prep["b3"] = params["fc3_b"].reshape(1, -1).astype(jnp.float32)
    return prep


# ----------------------------------------------------------------------------
# Forward
# ----------------------------------------------------------------------------
def vae_forward(prep, x, eps):
    b = x.shape[0]
    # NHWC + bf16 activations end-to-end (f32 accumulation inside every kernel).
    h = jnp.transpose(x, (0, 2, 3, 1)).astype(jnp.bfloat16)

    # Encoder: 4x (Conv k4 s2 + ReLU) as im2col + Pallas GEMM (bias+ReLU fused)
    for (wg, bg), cout in zip(prep["enc"], _ENC_COUT):
        h = conv2d_nhwc(h, wg, bg, cout, _ENC_K, _ENC_S, act="relu")

    # Flatten: channel-major, equivalent to PyTorch .view(B, -1) on NCHW
    hf = jnp.transpose(h, (0, 3, 1, 2)).reshape(b, -1)

    # Fused fc1 + fc2 + reparameterize (single Pallas kernel)
    mu, logvar, z = fc_bottleneck(hf, prep["w12"], prep["b12"], eps)

    # fc3 (UnFlatten is just a reshape handled by the next GEMM's layout)
    d = matmul_bias_act(z.astype(jnp.bfloat16), prep["w3"], prep["b3"],
                        act="none", out_dtype=jnp.bfloat16)

    # Decoder layer 0: 1x1 spatial input => pure GEMM, bias + ReLU fused
    wg0, bg0 = prep["dec0"]
    y = matmul_bias_act(d, wg0, bg0, act="relu", out_dtype=jnp.bfloat16,
                        n_valid=_DEC0_K * _DEC0_K * _DEC0_COUT)
    h = y.reshape(b, _DEC0_K, _DEC0_K, _DEC0_COUT)

    # Remaining transposed convs: output-scatter GEMM + overlap-add glue
    n_last = len(_DEC_SCATTER_CFG) - 1
    for idx, ((wg, bias), (cout, k, s)) in enumerate(
            zip(prep["dec_sc"], _DEC_SCATTER_CFG)):
        act = "sigmoid" if idx == n_last else "relu"
        h = conv_transpose_scatter(h, wg, bias, cout, k, s, act)
        if idx != n_last:
            h = h.astype(jnp.bfloat16)

    x_rec = jnp.transpose(h, (0, 3, 1, 2))   # back to NCHW (PyTorch convention)
    return x_rec, z, mu, logvar


# TODO(synk): torch.randn inside reparmeterize is replaced by an explicit eps
# input drawn from jax.random (torch/jax RNG semantics differ); save()/load()
# (torch checkpoint I/O) are omitted.

if __name__ == "__main__":
    key = jax.random.PRNGKey(0)
    k_param, k_x, k_eps = jax.random.split(key, 3)

    B, C, H, W = 2, 3, 64, 64          # h_dim=1024 requires 64x64 inputs
    Z = 64
    x = jax.random.uniform(k_x, (B, C, H, W), jnp.float32)
    eps = jax.random.normal(k_eps, (B, Z), jnp.float32)

    params = init_params(k_param, image_channels=C, h_dim=1024, z_dim=Z)
    prep = prepare_params(params)      # hoisted, one-time weight preparation

    fwd = jax.jit(vae_forward)
    x_rec, z, mu, logvar = fwd(prep, x, eps)
    jax.block_until_ready((x_rec, z, mu, logvar))

    assert x_rec.shape == (B, C, H, W)
    assert z.shape == (B, Z) and mu.shape == (B, Z) and logvar.shape == (B, Z)
    assert bool(jnp.all(jnp.isfinite(x_rec)))
    assert bool(jnp.all(jnp.isfinite(z)))
    print("KERNEL_OK")
</pallas_src>

<mosaic_0001>
module attributes {stable_mosaic.version = 11 : i64} {
  func.func @_gemm_kernel(%arg0: i32, %arg1: memref<512x48xbf16, #tpu.memory_space<vmem>>, %arg2: memref<48x128xbf16, #tpu.memory_space<vmem>>, %arg3: memref<1x128xf32, #tpu.memory_space<vmem>>, %arg4: memref<512x128xbf16, #tpu.memory_space<vmem>>) attributes {dimension_semantics = [#tpu.dimension_semantics<parallel>], iteration_bounds = array<i64: 4>, scalar_prefetch = 0 : i64, scratch_operands = 0 : i64, tpu.core_type = #tpu.core_type<tc>, window_params = [{transform_indices = @transform_0, window_bounds = array<i64: 512, 48>}, {pipeline_mode = #tpu.pipeline_mode<synchronous>, transform_indices = @transform_1, window_bounds = array<i64: 48, 128>}, {pipeline_mode = #tpu.pipeline_mode<synchronous>, transform_indices = @transform_2, window_bounds = array<i64: 1, 128>}, {transform_indices = @transform_3, window_bounds = array<i64: 512, 128>}]} {
    %c0 = arith.constant 0 : index
    %c0_0 = arith.constant 0 : index
    %0 = vector.load %arg1[%c0, %c0_0] : memref<512x48xbf16, #tpu.memory_space<vmem>>, vector<512x48xbf16>
    %c0_1 = arith.constant 0 : index
    %c0_2 = arith.constant 0 : index
    %1 = vector.load %arg2[%c0_1, %c0_2] : memref<48x128xbf16, #tpu.memory_space<vmem>>, vector<48x128xbf16>
    %cst = arith.constant dense<0.000000e+00> : vector<512x128xf32>
    %2 = tpu.matmul %0, %1, %cst {dimension_numbers = #tpu.dot_dimension_numbers<[1], [0], [0], [1], [0, 0, 1, 1], [], []>} : vector<512x48xbf16>, vector<48x128xbf16>, vector<512x128xf32> -> vector<512x128xf32>
    %c0_3 = arith.constant 0 : index
    %c0_4 = arith.constant 0 : index
    %3 = vector.load %arg3[%c0_3, %c0_4] : memref<1x128xf32, #tpu.memory_space<vmem>>, vector<1x128xf32>
    %4 = vector.broadcast %3 : vector<1x128xf32> to vector<512x128xf32>
    %5 = arith.addf %2, %4 : vector<512x128xf32>
    %cst_5 = arith.constant 0.000000e+00 : f32
    %6 = vector.broadcast %cst_5 : f32 to vector<512x128xf32>
    %7 = arith.maximumf %5, %6 : vector<512x128xf32>
    %8 = arith.truncf %7 : vector<512x128xf32> to vector<512x128xbf16>
    %c0_6 = arith.constant 0 : index
    %c0_7 = arith.constant 0 : index
    %9 = vector.load %arg4[%c0_6, %c0_7] : memref<512x128xbf16, #tpu.memory_space<vmem>>, vector<512x128xbf16>
    tpu.vector_store %arg4[%c0_6, %c0_7], %8 {strides = array<i32>} : memref<512x128xbf16, #tpu.memory_space<vmem>>, vector<512x128xbf16>,
    return
  }
  func.func @transform_0(%arg0: i32) -> (i32, i32) {
    %c0_i32 = arith.constant 0 : i32
    %c0_i32_0 = arith.constant 0 : i32
    return %arg0, %c0_i32 : i32, i32
  }
  func.func @transform_1(%arg0: i32) -> (i32, i32) {
    %c0_i32 = arith.constant 0 : i32
    %c0_i32_0 = arith.constant 0 : i32
    %c0_i32_1 = arith.constant 0 : i32
    return %c0_i32, %c0_i32_0 : i32, i32
  }
  func.func @transform_2(%arg0: i32) -> (i32, i32) {
    %c0_i32 = arith.constant 0 : i32
    %c0_i32_0 = arith.constant 0 : i32
    %c0_i32_1 = arith.constant 0 : i32
    return %c0_i32, %c0_i32_0 : i32, i32
  }
  func.func @transform_3(%arg0: i32) -> (i32, i32) {
    %c0_i32 = arith.constant 0 : i32
    %c0_i32_0 = arith.constant 0 : i32
    return %arg0, %c0_i32 : i32, i32
  }
}

module attributes {stable_mosaic.version = 11 : i64} {
  func.func @_gemm_kernel(%arg0: i32, %arg1: memref<208x512xbf16, #tpu.memory_space<vmem>>, %arg2: memref<512x128xbf16, #tpu.memory_space<vmem>>, %arg3: memref<1x128xf32, #tpu.memory_space<vmem>>, %arg4: memref<208x128xbf16, #tpu.memory_space<vmem>>) attributes {dimension_semantics = [#tpu.dimension_semantics<parallel>], iteration_bounds = array<i64: 2>, scalar_prefetch = 0 : i64, scratch_operands = 0 : i64, tpu.core_type = #tpu.core_type<tc>, window_params = [{transform_indices = @transform_0, window_bounds = array<i64: 208, 512>}, {pipeline_mode = #tpu.pipeline_mode<synchronous>, transform_indices = @transform_1, window_bounds = array<i64: 512, 128>}, {pipeline_mode = #tpu.pipeline_mode<synchronous>, transform_indices = @transform_2, window_bounds = array<i64: 1, 128>}, {transform_indices = @transform_3, window_bounds = array<i64: 208, 128>}]} {
    %c0 = arith.constant 0 : index
    %c0_0 = arith.constant 0 : index
    %0 = vector.load %arg1[%c0, %c0_0] : memref<208x512xbf16, #tpu.memory_space<vmem>>, vector<208x512xbf16>
    %c0_1 = arith.constant 0 : index
    %c0_2 = arith.constant 0 : index
    %1 = vector.load %arg2[%c0_1, %c0_2] : memref<512x128xbf16, #tpu.memory_space<vmem>>, vector<512x128xbf16>
    %cst = arith.constant dense<0.000000e+00> : vector<208x128xf32>
    %2 = tpu.matmul %0, %1, %cst {dimension_numbers = #tpu.dot_dimension_numbers<[1], [0], [0], [1], [0, 0, 1, 1], [], []>} : vector<208x512xbf16>, vector<512x128xbf16>, vector<208x128xf32> -> vector<208x128xf32>
    %c0_3 = arith.constant 0 : index
    %c0_4 = arith.constant 0 : index
    %3 = vector.load %arg3[%c0_3, %c0_4] : memref<1x128xf32, #tpu.memory_space<vmem>>, vector<1x128xf32>
    %4 = vector.broadcast %3 : vector<1x128xf32> to vector<208x128xf32>
    %5 = arith.addf %2, %4 : vector<208x128xf32>
    %cst_5 = arith.constant 0.000000e+00 : f32
    %6 = vector.broadcast %cst_5 : f32 to vector<208x128xf32>
    %7 = arith.maximumf %5, %6 : vector<208x128xf32>
    %8 = arith.truncf %7 : vector<208x128xf32> to vector<208x128xbf16>
    %c0_6 = arith.constant 0 : index
    %c0_7 = arith.constant 0 : index
    %9 = vector.load %arg4[%c0_6, %c0_7] : memref<208x128xbf16, #tpu.memory_space<vmem>>, vector<208x128xbf16>
    tpu.vector_store %arg4[%c0_6, %c0_7], %8 {strides = array<i32>} : memref<208x128xbf16, #tpu.memory_space<vmem>>, vector<208x128xbf16>,
    return
  }
  func.func @transform_0(%arg0: i32) -> (i32, i32) {
    %c0_i32 = arith.constant 0 : i32
    %c0_i32_0 = arith.constant 0 : i32
    return %arg0, %c0_i32 : i32, i32
  }
  func.func @transform_1(%arg0: i32) -> (i32, i32) {
    %c0_i32 = arith.constant 0 : i32
    %c0_i32_0 = arith.constant 0 : i32
    %c0_i32_1 = arith.constant 0 : i32
    return %c0_i32, %c0_i32_0 : i32, i32
  }
  func.func @transform_2(%arg0: i32) -> (i32, i32) {
    %c0_i32 = arith.constant 0 : i32
    %c0_i32_0 = arith.constant 0 : i32
    %c0_i32_1 = arith.constant 0 : i32
    return %c0_i32, %c0_i32_0 : i32, i32
  }
  func.func @transform_3(%arg0: i32) -> (i32, i32) {
    %c0_i32 = arith.constant 0 : i32
    %c0_i32_0 = arith.constant 0 : i32
    return %arg0, %c0_i32 : i32, i32
  }
}

module attributes {stable_mosaic.version = 11 : i64} {
  func.func @_gemm_kernel(%arg0: i32, %arg1: memref<72x1024xbf16, #tpu.memory_space<vmem>>, %arg2: memref<1024x128xbf16, #tpu.memory_space<vmem>>, %arg3: memref<1x128xf32, #tpu.memory_space<vmem>>, %arg4: memref<72x128xbf16, #tpu.memory_space<vmem>>) attributes {dimension_semantics = [#tpu.dimension_semantics<parallel>], iteration_bounds = array<i64: 1>, scalar_prefetch = 0 : i64, scratch_operands = 0 : i64, tpu.core_type = #tpu.core_type<tc>, window_params = [{transform_indices = @transform_0, window_bounds = array<i64: 72, 1024>}, {pipeline_mode = #tpu.pipeline_mode<synchronous>, transform_indices = @transform_1, window_bounds = array<i64: 1024, 128>}, {pipeline_mode = #tpu.pipeline_mode<synchronous>, transform_indices = @transform_2, window_bounds = array<i64: 1, 128>}, {transform_indices = @transform_3, window_bounds = array<i64: 72, 128>}]} {
    %c0 = arith.constant 0 : index
    %c0_0 = arith.constant 0 : index
    %0 = vector.load %arg1[%c0, %c0_0] : memref<72x1024xbf16, #tpu.memory_space<vmem>>, vector<72x1024xbf16>
    %c0_1 = arith.constant 0 : index
    %c0_2 = arith.constant 0 : index
    %1 = vector.load %arg2[%c0_1, %c0_2] : memref<1024x128xbf16, #tpu.memory_space<vmem>>, vector<1024x128xbf16>
    %cst = arith.constant dense<0.000000e+00> : vector<72x128xf32>
    %2 = tpu.matmul %0, %1, %cst {dimension_numbers = #tpu.dot_dimension_numbers<[1], [0], [0], [1], [0, 0, 1, 1], [], []>} : vector<72x1024xbf16>, vector<1024x128xbf16>, vector<72x128xf32> -> vector<72x128xf32>
    %c0_3 = arith.constant 0 : index
    %c0_4 = arith.constant 0 : index
    %3 = vector.load %arg3[%c0_3, %c0_4] : memref<1x128xf32, #tpu.memory_space<vmem>>, vector<1x128xf32>
    %4 = vector.broadcast %3 : vector<1x128xf32> to vector<72x128xf32>
    %5 = arith.addf %2, %4 : vector<72x128xf32>
    %cst_5 = arith.constant 0.000000e+00 : f32
    %6 = vector.broadcast %cst_5 : f32 to vector<72x128xf32>
    %7 = arith.maximumf %5, %6 : vector<72x128xf32>
    %8 = arith.truncf %7 : vector<72x128xf32> to vector<72x128xbf16>
    %c0_6 = arith.constant 0 : index
    %c0_7 = arith.constant 0 : index
    %9 = vector.load %arg4[%c0_6, %c0_7] : memref<72x128xbf16, #tpu.memory_space<vmem>>, vector<72x128xbf16>
    tpu.vector_store %arg4[%c0_6, %c0_7], %8 {strides = array<i32>} : memref<72x128xbf16, #tpu.memory_space<vmem>>, vector<72x128xbf16>,
    return
  }
  func.func @transform_0(%arg0: i32) -> (i32, i32) {
    %c0_i32 = arith.constant 0 : i32
    %c0_i32_0 = arith.constant 0 : i32
    return %arg0, %c0_i32 : i32, i32
  }
  func.func @transform_1(%arg0: i32) -> (i32, i32) {
    %c0_i32 = arith.constant 0 : i32
    %c0_i32_0 = arith.constant 0 : i32
    %c0_i32_1 = arith.constant 0 : i32
    return %c0_i32, %c0_i32_0 : i32, i32
  }
  func.func @transform_2(%arg0: i32) -> (i32, i32) {
    %c0_i32 = arith.constant 0 : i32
    %c0_i32_0 = arith.constant 0 : i32
    %c0_i32_1 = arith.constant 0 : i32
    return %c0_i32, %c0_i32_0 : i32, i32
  }
  func.func @transform_3(%arg0: i32) -> (i32, i32) {
    %c0_i32 = arith.constant 0 : i32
    %c0_i32_0 = arith.constant 0 : i32
    return %arg0, %c0_i32 : i32, i32
  }
}

module attributes {stable_mosaic.version = 11 : i64} {
  func.func @_gemm_kernel(%arg0: i32, %arg1: memref<8x2048xbf16, #tpu.memory_space<vmem>>, %arg2: memref<2048x256xbf16, #tpu.memory_space<vmem>>, %arg3: memref<1x256xf32, #tpu.memory_space<vmem>>, %arg4: memref<8x256xbf16, #tpu.memory_space<vmem>>) attributes {dimension_semantics = [#tpu.dimension_semantics<parallel>], iteration_bounds = array<i64: 1>, scalar_prefetch = 0 : i64, scratch_operands = 0 : i64, tpu.core_type = #tpu.core_type<tc>, window_params = [{transform_indices = @transform_0, window_bounds = array<i64: 8, 2048>}, {pipeline_mode = #tpu.pipeline_mode<synchronous>, transform_indices = @transform_1, window_bounds = array<i64: 2048, 256>}, {pipeline_mode = #tpu.pipeline_mode<synchronous>, transform_indices = @transform_2, window_bounds = array<i64: 1, 256>}, {transform_indices = @transform_3, window_bounds = array<i64: 8, 256>}]} {
    %c0 = arith.constant 0 : index
    %c0_0 = arith.constant 0 : index
    %0 = vector.load %arg1[%c0, %c0_0] : memref<8x2048xbf16, #tpu.memory_space<vmem>>, vector<8x2048xbf16>
    %c0_1 = arith.constant 0 : index
    %c0_2 = arith.constant 0 : index
    %1 = vector.load %arg2[%c0_1, %c0_2] : memref<2048x256xbf16, #tpu.memory_space<vmem>>, vector<2048x256xbf16>
    %cst = arith.constant dense<0.000000e+00> : vector<8x256xf32>
    %2 = tpu.matmul %0, %1, %cst {dimension_numbers = #tpu.dot_dimension_numbers<[1], [0], [0], [1], [0, 0, 1, 1], [], []>} : vector<8x2048xbf16>, vector<2048x256xbf16>, vector<8x256xf32> -> vector<8x256xf32>
    %c0_3 = arith.constant 0 : index
    %c0_4 = arith.constant 0 : index
    %3 = vector.load %arg3[%c0_3, %c0_4] : memref<1x256xf32, #tpu.memory_space<vmem>>, vector<1x256xf32>
    %4 = vector.broadcast %3 : vector<1x256xf32> to vector<8x256xf32>
    %5 = arith.addf %2, %4 : vector<8x256xf32>
    %cst_5 = arith.constant 0.000000e+00 : f32
    %6 = vector.broadcast %cst_5 : f32 to vector<8x256xf32>
    %7 = arith.maximumf %5, %6 : vector<8x256xf32>
    %8 = arith.truncf %7 : vector<8x256xf32> to vector<8x256xbf16>
    %c0_6 = arith.constant 0 : index
    %c0_7 = arith.constant 0 : index
    %9 = vector.load %arg4[%c0_6, %c0_7] : memref<8x256xbf16, #tpu.memory_space<vmem>>, vector<8x256xbf16>
    tpu.vector_store %arg4[%c0_6, %c0_7], %8 {strides = array<i32>} : memref<8x256xbf16, #tpu.memory_space<vmem>>, vector<8x256xbf16>,
    return
  }
  func.func @transform_0(%arg0: i32) -> (i32, i32) {
    %c0_i32 = arith.constant 0 : i32
    %c0_i32_0 = arith.constant 0 : i32
    return %arg0, %c0_i32 : i32, i32
  }
  func.func @transform_1(%arg0: i32) -> (i32, i32) {
    %c0_i32 = arith.constant 0 : i32
    %c0_i32_0 = arith.constant 0 : i32
    %c0_i32_1 = arith.constant 0 : i32
    return %c0_i32, %c0_i32_0 : i32, i32
  }
  func.func @transform_2(%arg0: i32) -> (i32, i32) {
    %c0_i32 = arith.constant 0 : i32
    %c0_i32_0 = arith.constant 0 : i32
    %c0_i32_1 = arith.constant 0 : i32
    return %c0_i32, %c0_i32_0 : i32, i32
  }
  func.func @transform_3(%arg0: i32) -> (i32, i32) {
    %c0_i32 = arith.constant 0 : i32
    %c0_i32_0 = arith.constant 0 : i32
    return %arg0, %c0_i32 : i32, i32
  }
}

module attributes {stable_mosaic.version = 11 : i64} {
  func.func @_fc_reparam_kernel(%arg0: memref<2x1024xbf16, #tpu.memory_space<vmem>>, %arg1: memref<1024x128xbf16, #tpu.memory_space<vmem>>, %arg2: memref<1x128xf32, #tpu.memory_space<vmem>>, %arg3: memref<2x64xf32, #tpu.memory_space<vmem>>, %arg4: memref<2x64xf32, #tpu.memory_space<vmem>>, %arg5: memref<2x64xf32, #tpu.memory_space<vmem>>, %arg6: memref<2x64xf32, #tpu.memory_space<vmem>>) attributes {dimension_semantics = [], scalar_prefetch = 0 : i64, scratch_operands = 0 : i64, tpu.core_type = #tpu.core_type<tc>} {
    %c0 = arith.constant 0 : index
    %c0_0 = arith.constant 0 : index
    %0 = vector.load %arg0[%c0, %c0_0] : memref<2x1024xbf16, #tpu.memory_space<vmem>>, vector<2x1024xbf16>
    %c0_1 = arith.constant 0 : index
    %c0_2 = arith.constant 0 : index
    %1 = vector.load %arg1[%c0_1, %c0_2] : memref<1024x128xbf16, #tpu.memory_space<vmem>>, vector<1024x128xbf16>
    %cst = arith.constant dense<0.000000e+00> : vector<2x128xf32>
    %2 = tpu.matmul %0, %1, %cst {dimension_numbers = #tpu.dot_dimension_numbers<[1], [0], [0], [1], [0, 0, 1, 1], [], []>} : vector<2x1024xbf16>, vector<1024x128xbf16>, vector<2x128xf32> -> vector<2x128xf32>
    %c0_3 = arith.constant 0 : index
    %c0_4 = arith.constant 0 : index
    %3 = vector.load %arg2[%c0_3, %c0_4] : memref<1x128xf32, #tpu.memory_space<vmem>>, vector<1x128xf32>
    %4 = vector.broadcast %3 : vector<1x128xf32> to vector<2x128xf32>
    %5 = arith.addf %2, %4 : vector<2x128xf32>
    %6 = vector.extract_strided_slice %5 {offsets = [0, 0], sizes = [2, 64], strides = [1, 1]} : vector<2x128xf32> to vector<2x64xf32>
    %7 = vector.extract_strided_slice %5 {offsets = [0, 64], sizes = [2, 64], strides = [1, 1]} : vector<2x128xf32> to vector<2x64xf32>
    %c0_5 = arith.constant 0 : index
    %c0_6 = arith.constant 0 : index
    %8 = vector.load %arg4[%c0_5, %c0_6] : memref<2x64xf32, #tpu.memory_space<vmem>>, vector<2x64xf32>
    tpu.vector_store %arg4[%c0_5, %c0_6], %6 {strides = array<i32>} : memref<2x64xf32, #tpu.memory_space<vmem>>, vector<2x64xf32>,
    %c0_7 = arith.constant 0 : index
    %c0_8 = arith.constant 0 : index
    %9 = vector.load %arg5[%c0_7, %c0_8] : memref<2x64xf32, #tpu.memory_space<vmem>>, vector<2x64xf32>
    tpu.vector_store %arg5[%c0_7, %c0_8], %7 {strides = array<i32>} : memref<2x64xf32, #tpu.memory_space<vmem>>, vector<2x64xf32>,
    %cst_9 = arith.constant 5.000000e-01 : f32
    %10 = vector.broadcast %cst_9 : f32 to vector<2x64xf32>
    %11 = arith.mulf %10, %7 : vector<2x64xf32>
    %12 = math.exp %11 : vector<2x64xf32>
    %c0_10 = arith.constant 0 : index
    %c0_11 = arith.constant 0 : index
    %13 = vector.load %arg3[%c0_10, %c0_11] : memref<2x64xf32, #tpu.memory_space<vmem>>, vector<2x64xf32>
    %14 = arith.mulf %12, %13 : vector<2x64xf32>
    %15 = arith.addf %6, %14 : vector<2x64xf32>
    %c0_12 = arith.constant 0 : index
    %c0_13 = arith.constant 0 : index
    %16 = vector.load %arg6[%c0_12, %c0_13] : memref<2x64xf32, #tpu.memory_space<vmem>>, vector<2x64xf32>
    tpu.vector_store %arg6[%c0_12, %c0_13], %15 {strides = array<i32>} : memref<2x64xf32, #tpu.memory_space<vmem>>, vector<2x64xf32>,
    return
  }
}

module attributes {stable_mosaic.version = 11 : i64} {
  func.func @_gemm_kernel(%arg0: i32, %arg1: memref<2x64xbf16, #tpu.memory_space<vmem>>, %arg2: memref<64x1024xbf16, #tpu.memory_space<vmem>>, %arg3: memref<1x1024xf32, #tpu.memory_space<vmem>>, %arg4: memref<2x1024xbf16, #tpu.memory_space<vmem>>) attributes {dimension_semantics = [#tpu.dimension_semantics<parallel>], iteration_bounds = array<i64: 1>, scalar_prefetch = 0 : i64, scratch_operands = 0 : i64, tpu.core_type = #tpu.core_type<tc>, window_params = [{transform_indices = @transform_0, window_bounds = array<i64: 2, 64>}, {pipeline_mode = #tpu.pipeline_mode<synchronous>, transform_indices = @transform_1, window_bounds = array<i64: 64, 1024>}, {pipeline_mode = #tpu.pipeline_mode<synchronous>, transform_indices = @transform_2, window_bounds = array<i64: 1, 1024>}, {transform_indices = @transform_3, window_bounds = array<i64: 2, 1024>}]} {
    %c0 = arith.constant 0 : index
    %c0_0 = arith.constant 0 : index
    %0 = vector.load %arg1[%c0, %c0_0] : memref<2x64xbf16, #tpu.memory_space<vmem>>, vector<2x64xbf16>
    %c0_1 = arith.constant 0 : index
    %c0_2 = arith.constant 0 : index
    %1 = vector.load %arg2[%c0_1, %c0_2] : memref<64x1024xbf16, #tpu.memory_space<vmem>>, vector<64x1024xbf16>
    %cst = arith.constant dense<0.000000e+00> : vector<2x1024xf32>
    %2 = tpu.matmul %0, %1, %cst {dimension_numbers = #tpu.dot_dimension_numbers<[1], [0], [0], [1], [0, 0, 1, 1], [], []>} : vector<2x64xbf16>, vector<64x1024xbf16>, vector<2x1024xf32> -> vector<2x1024xf32>
    %c0_3 = arith.constant 0 : index
    %c0_4 = arith.constant 0 : index
    %3 = vector.load %arg3[%c0_3, %c0_4] : memref<1x1024xf32, #tpu.memory_space<vmem>>, vector<1x1024xf32>
    %4 = vector.broadcast %3 : vector<1x1024xf32> to vector<2x1024xf32>
    %5 = arith.addf %2, %4 : vector<2x1024xf32>
    %6 = arith.truncf %5 : vector<2x1024xf32> to vector<2x1024xbf16>
    %c0_5 = arith.constant 0 : index
    %c0_6 = arith.constant 0 : index
    %7 = vector.load %arg4[%c0_5, %c0_6] : memref<2x1024xbf16, #tpu.memory_space<vmem>>, vector<2x1024xbf16>
    tpu.vector_store %arg4[%c0_5, %c0_6], %6 {strides = array<i32>} : memref<2x1024xbf16, #tpu.memory_space<vmem>>, vector<2x1024xbf16>,
    return
  }
  func.func @transform_0(%arg0: i32) -> (i32, i32) {
    %c0_i32 = arith.constant 0 : i32
    %c0_i32_0 = arith.constant 0 : i32
    return %arg0, %c0_i32 : i32, i32
  }
  func.func @transform_1(%arg0: i32) -> (i32, i32) {
    %c0_i32 = arith.constant 0 : i32
    %c0_i32_0 = arith.constant 0 : i32
    %c0_i32_1 = arith.constant 0 : i32
    return %c0_i32, %c0_i32_0 : i32, i32
  }
  func.func @transform_2(%arg0: i32) -> (i32, i32) {
    %c0_i32 = arith.constant 0 : i32
    %c0_i32_0 = arith.constant 0 : i32
    %c0_i32_1 = arith.constant 0 : i32
    return %c0_i32, %c0_i32_0 : i32, i32
  }
  func.func @transform_3(%arg0: i32) -> (i32, i32) {
    %c0_i32 = arith.constant 0 : i32
    %c0_i32_0 = arith.constant 0 : i32
    return %arg0, %c0_i32 : i32, i32
  }
}

module attributes {stable_mosaic.version = 11 : i64} {
  func.func @_gemm_kernel(%arg0: i32, %arg1: memref<2x1024xbf16, #tpu.memory_space<vmem>>, %arg2: memref<1024x896xbf16, #tpu.memory_space<vmem>>, %arg3: memref<1x896xf32, #tpu.memory_space<vmem>>, %arg4: memref<2x896xbf16, #tpu.memory_space<vmem>>) attributes {dimension_semantics = [#tpu.dimension_semantics<parallel>], iteration_bounds = array<i64: 1>, scalar_prefetch = 0 : i64, scratch_operands = 0 : i64, tpu.core_type = #tpu.core_type<tc>, window_params = [{transform_indices = @transform_0, window_bounds = array<i64: 2, 1024>}, {pipeline_mode = #tpu.pipeline_mode<synchronous>, transform_indices = @transform_1, window_bounds = array<i64: 1024, 896>}, {pipeline_mode = #tpu.pipeline_mode<synchronous>, transform_indices = @transform_2, window_bounds = array<i64: 1, 896>}, {transform_indices = @transform_3, window_bounds = array<i64: 2, 896>}]} {
    %c0 = arith.constant 0 : index
    %c0_0 = arith.constant 0 : index
    %0 = vector.load %arg1[%c0, %c0_0] : memref<2x1024xbf16, #tpu.memory_space<vmem>>, vector<2x1024xbf16>
    %c0_1 = arith.constant 0 : index
    %c0_2 = arith.constant 0 : index
    %1 = vector.load %arg2[%c0_1, %c0_2] : memref<1024x896xbf16, #tpu.memory_space<vmem>>, vector<1024x896xbf16>
    %cst = arith.constant dense<0.000000e+00> : vector<2x896xf32>
    %2 = tpu.matmul %0, %1, %cst {dimension_numbers = #tpu.dot_dimension_numbers<[1], [0], [0], [1], [0, 0, 1, 1], [], []>} : vector<2x1024xbf16>, vector<1024x896xbf16>, vector<2x896xf32> -> vector<2x896xf32>
    %c0_3 = arith.constant 0 : index
    %c0_4 = arith.constant 0 : index
    %3 = vector.load %arg3[%c0_3, %c0_4] : memref<1x896xf32, #tpu.memory_space<vmem>>, vector<1x896xf32>
    %4 = vector.broadcast %3 : vector<1x896xf32> to vector<2x896xf32>
    %5 = arith.addf %2, %4 : vector<2x896xf32>
    %cst_5 = arith.constant 0.000000e+00 : f32
    %6 = vector.broadcast %cst_5 : f32 to vector<2x896xf32>
    %7 = arith.maximumf %5, %6 : vector<2x896xf32>
    %8 = arith.truncf %7 : vector<2x896xf32> to vector<2x896xbf16>
    %c0_6 = arith.constant 0 : index
    %c0_7 = arith.constant 0 : index
    %9 = vector.load %arg4[%c0_6, %c0_7] : memref<2x896xbf16, #tpu.memory_space<vmem>>, vector<2x896xbf16>
    tpu.vector_store %arg4[%c0_6, %c0_7], %8 {strides = array<i32>} : memref<2x896xbf16, #tpu.memory_space<vmem>>, vector<2x896xbf16>,
    return
  }
  func.func @transform_0(%arg0: i32) -> (i32, i32) {
    %c0_i32 = arith.constant 0 : i32
    %c0_i32_0 = arith.constant 0 : i32
    return %arg0, %c0_i32 : i32, i32
  }
  func.func @transform_1(%arg0: i32) -> (i32, i32) {
    %c0_i32 = arith.constant 0 : i32
    %c0_i32_0 = arith.constant 0 : i32
    %c0_i32_1 = arith.constant 0 : i32
    return %c0_i32, %c0_i32_0 : i32, i32
  }
  func.func @transform_2(%arg0: i32) -> (i32, i32) {
    %c0_i32 = arith.constant 0 : i32
    %c0_i32_0 = arith.constant 0 : i32
    %c0_i32_1 = arith.constant 0 : i32
    return %c0_i32, %c0_i32_0 : i32, i32
  }
  func.func @transform_3(%arg0: i32) -> (i32, i32) {
    %c0_i32 = arith.constant 0 : i32
    %c0_i32_0 = arith.constant 0 : i32
    return %arg0, %c0_i32 : i32, i32
  }
}

module attributes {stable_mosaic.version = 11 : i64} {
  func.func @_gemm_kernel(%arg0: i32, %arg1: memref<50x32xbf16, #tpu.memory_space<vmem>>, %arg2: memref<32x896xbf16, #tpu.memory_space<vmem>>, %arg3: memref<50x896xf32, #tpu.memory_space<vmem>>) attributes {dimension_semantics = [#tpu.dimension_semantics<parallel>], iteration_bounds = array<i64: 1>, scalar_prefetch = 0 : i64, scratch_operands = 0 : i64, tpu.core_type = #tpu.core_type<tc>, window_params = [{transform_indices = @transform_0, window_bounds = array<i64: 50, 32>}, {pipeline_mode = #tpu.pipeline_mode<synchronous>, transform_indices = @transform_1, window_bounds = array<i64: 32, 896>}, {transform_indices = @transform_2, window_bounds = array<i64: 50, 896>}]} {
    %c0 = arith.constant 0 : index
    %c0_0 = arith.constant 0 : index
    %0 = vector.load %arg1[%c0, %c0_0] : memref<50x32xbf16, #tpu.memory_space<vmem>>, vector<50x32xbf16>
    %c0_1 = arith.constant 0 : index
    %c0_2 = arith.constant 0 : index
    %1 = vector.load %arg2[%c0_1, %c0_2] : memref<32x896xbf16, #tpu.memory_space<vmem>>, vector<32x896xbf16>
    %cst = arith.constant dense<0.000000e+00> : vector<50x896xf32>
    %2 = tpu.matmul %0, %1, %cst {dimension_numbers = #tpu.dot_dimension_numbers<[1], [0], [0], [1], [0, 0, 1, 1], [], []>} : vector<50x32xbf16>, vector<32x896xbf16>, vector<50x896xf32> -> vector<50x896xf32>
    %c0_3 = arith.constant 0 : index
    %c0_4 = arith.constant 0 : index
    %3 = vector.load %arg3[%c0_3, %c0_4] : memref<50x896xf32, #tpu.memory_space<vmem>>, vector<50x896xf32>
    tpu.vector_store %arg3[%c0_3, %c0_4], %2 {strides = array<i32>} : memref<50x896xf32, #tpu.memory_space<vmem>>, vector<50x896xf32>,
    return
  }
  func.func @transform_0(%arg0: i32) -> (i32, i32) {
    %c0_i32 = arith.constant 0 : i32
    %c0_i32_0 = arith.constant 0 : i32
    return %arg0, %c0_i32 : i32, i32
  }
  func.func @transform_1(%arg0: i32) -> (i32, i32) {
    %c0_i32 = arith.constant 0 : i32
    %c0_i32_0 = arith.constant 0 : i32
    %c0_i32_1 = arith.constant 0 : i32
    return %c0_i32, %c0_i32_0 : i32, i32
  }
  func.func @transform_2(%arg0: i32) -> (i32, i32) {
    %c0_i32 = arith.constant 0 : i32
    %c0_i32_0 = arith.constant 0 : i32
    return %arg0, %c0_i32 : i32, i32
  }
}

module attributes {stable_mosaic.version = 11 : i64} {
  func.func @_gemm_kernel(%arg0: i32, %arg1: memref<176x32xbf16, #tpu.memory_space<vmem>>, %arg2: memref<32x640xbf16, #tpu.memory_space<vmem>>, %arg3: memref<176x640xf32, #tpu.memory_space<vmem>>) attributes {dimension_semantics = [#tpu.dimension_semantics<parallel>], iteration_bounds = array<i64: 2>, scalar_prefetch = 0 : i64, scratch_operands = 0 : i64, tpu.core_type = #tpu.core_type<tc>, window_params = [{transform_indices = @transform_0, window_bounds = array<i64: 176, 32>}, {pipeline_mode = #tpu.pipeline_mode<synchronous>, transform_indices = @transform_1, window_bounds = array<i64: 32, 640>}, {transform_indices = @transform_2, window_bounds = array<i64: 176, 640>}]} {
    %c0 = arith.constant 0 : index
    %c0_0 = arith.constant 0 : index
    %0 = vector.load %arg1[%c0, %c0_0] : memref<176x32xbf16, #tpu.memory_space<vmem>>, vector<176x32xbf16>
    %c0_1 = arith.constant 0 : index
    %c0_2 = arith.constant 0 : index
    %1 = vector.load %arg2[%c0_1, %c0_2] : memref<32x640xbf16, #tpu.memory_space<vmem>>, vector<32x640xbf16>
    %cst = arith.constant dense<0.000000e+00> : vector<176x640xf32>
    %2 = tpu.matmul %0, %1, %cst {dimension_numbers = #tpu.dot_dimension_numbers<[1], [0], [0], [1], [0, 0, 1, 1], [], []>} : vector<176x32xbf16>, vector<32x640xbf16>, vector<176x640xf32> -> vector<176x640xf32>
    %c0_3 = arith.constant 0 : index
    %c0_4 = arith.constant 0 : index
    %3 = vector.load %arg3[%c0_3, %c0_4] : memref<176x640xf32, #tpu.memory_space<vmem>>, vector<176x640xf32>
    tpu.vector_store %arg3[%c0_3, %c0_4], %2 {strides = array<i32>} : memref<176x640xf32, #tpu.memory_space<vmem>>, vector<176x640xf32>,
    return
  }
  func.func @transform_0(%arg0: i32) -> (i32, i32) {
    %c0_i32 = arith.constant 0 : i32
    %c0_i32_0 = arith.constant 0 : i32
    return %arg0, %c0_i32 : i32, i32
  }
  func.func @transform_1(%arg0: i32) -> (i32, i32) {
    %c0_i32 = arith.constant 0 : i32
    %c0_i32_0 = arith.constant 0 : i32
    %c0_i32_1 = arith.constant 0 : i32
    return %c0_i32, %c0_i32_0 : i32, i32
  }
  func.func @transform_2(%arg0: i32) -> (i32, i32) {
    %c0_i32 = arith.constant 0 : i32
    %c0_i32_0 = arith.constant 0 : i32
    return %arg0, %c0_i32 : i32, i32
  }
}

module attributes {stable_mosaic.version = 11 : i64} {
  func.func @_gemm_kernel(%arg0: i32, %arg1: memref<512x16xbf16, #tpu.memory_space<vmem>>, %arg2: memref<16x128xbf16, #tpu.memory_space<vmem>>, %arg3: memref<512x128xf32, #tpu.memory_space<vmem>>) attributes {dimension_semantics = [#tpu.dimension_semantics<parallel>], iteration_bounds = array<i64: 4>, scalar_prefetch = 0 : i64, scratch_operands = 0 : i64, tpu.core_type = #tpu.core_type<tc>, window_params = [{transform_indices = @transform_0, window_bounds = array<i64: 512, 16>}, {pipeline_mode = #tpu.pipeline_mode<synchronous>, transform_indices = @transform_1, window_bounds = array<i64: 16, 128>}, {transform_indices = @transform_2, window_bounds = array<i64: 512, 128>}]} {
    %c0 = arith.constant 0 : index
    %c0_0 = arith.constant 0 : index
    %0 = vector.load %arg1[%c0, %c0_0] : memref<512x16xbf16, #tpu.memory_space<vmem>>, vector<512x16xbf16>
    %c0_1 = arith.constant 0 : index
    %c0_2 = arith.constant 0 : index
    %1 = vector.load %arg2[%c0_1, %c0_2] : memref<16x128xbf16, #tpu.memory_space<vmem>>, vector<16x128xbf16>
    %cst = arith.constant dense<0.000000e+00> : vector<512x128xf32>
    %2 = tpu.matmul %0, %1, %cst {dimension_numbers = #tpu.dot_dimension_numbers<[1], [0], [0], [1], [0, 0, 1, 1], [], []>} : vector<512x16xbf16>, vector<16x128xbf16>, vector<512x128xf32> -> vector<512x128xf32>
    %c0_3 = arith.constant 0 : index
    %c0_4 = arith.constant 0 : index
    %3 = vector.load %arg3[%c0_3, %c0_4] : memref<512x128xf32, #tpu.memory_space<vmem>>, vector<512x128xf32>
    tpu.vector_store %arg3[%c0_3, %c0_4], %2 {strides = array<i32>} : memref<512x128xf32, #tpu.memory_space<vmem>>, vector<512x128xf32>,
    return
  }
  func.func @transform_0(%arg0: i32) -> (i32, i32) {
    %c0_i32 = arith.constant 0 : i32
    %c0_i32_0 = arith.constant 0 : i32
    return %arg0, %c0_i32 : i32, i32
  }
  func.func @transform_1(%arg0: i32) -> (i32, i32) {
    %c0_i32 = arith.constant 0 : i32
    %c0_i32_0 = arith.constant 0 : i32
    %c0_i32_1 = arith.constant 0 : i32
    return %c0_i32, %c0_i32_0 : i32, i32
  }
  func.func @transform_2(%arg0: i32) -> (i32, i32) {
    %c0_i32 = arith.constant 0 : i32
    %c0_i32_0 = arith.constant 0 : i32
    return %arg0, %c0_i32 : i32, i32
  }
}

</mosaic_0001>

<bundles_post_ra>
// kernel: vae_forward.10
= control target key start
LH: loop header
LB: loop body
LE: loop exit
PB: predicated region body
PF: predicated region fallthrough
CT: control target
= control target key end

     0   :  { %s2440_s12 = smov 0   ;;  %s2442_s13 = smov 0   ;;  %s2855_s0 = inlined_call_operand.vmem [shape: bf16[1922,48], index: 0, kind: input, shape index: {}]   ;;  %s2856_s1 = inlined_call_operand.vmem [shape: bf16[48,128], index: 1, kind: input, shape index: {}]   ;;  %s2857_s2 = inlined_call_operand.vmem [shape: f32[1,128], index: 2, kind: input, shape index: {}]   ;;  %s2858_s3 = inlined_call_operand.vmem [shape: bf16[1922,128], index: 3, kind: output, shape index: {}]  }
   0x1   :  { %s2444_s14 = smov 0  }
   0x2 LB: > { %s2453_s15 = sadd.s32 4294967295, %s2386_s14   ;;  %s2455_s16 = sadd.s32 1, %s2386_s14   ;;  %s2386_s14 = sphi %s2444_s14, %s2865_s14   ;;  %s2382_s13 = sphi %s2442_s13, %s2864_s13   ;;  %s2378_s12 = sphi %s2440_s12, %s2863_s12  }
   0x3   : > { %s85_s17 = ssub.s32 %s2386_s14, %s2455_s16  ;;  %s88_s18 = sadd.s32 1, %s2382_s13 }
   0x4   : > { %p86_p0 = scmp.eq.s32.totalorder %s85_s17, 0  ;;  %p98_p1 = scmp.ne.s32.totalorder %s2382_s13, %s2378_s12 }
   0x5   : > { %p99_p2 = scmp.eq.s32.totalorder %s2453_s15, 3  ;;  %p1687_p3 = scmp.ge.s32.totalorder %s2386_s14, 1 }
   0x6   : > { %s2463_s19 = scalar_select %p86_p0, %s2382_s13, %s88_s18  }
   0x7   : > { %p2465_p4 = por %p99_p2, %p98_p1  ;;  %p146_p5 = scmp.lt.s32.totalorder %s2386_s14, 5 }
   0x9   : > { %p147_p6 = pnand %p1687_p3, %p146_p5 }
   0xa   : > { %v2297_v0 = vld [vmem:[%s2856_s1] sm:$0xff] (!%p147_p6)   ;;  %s2473_s23 = sshll.u32 (!%p147_p6), %s2453_s15, 6  ;;  %v2298_v1 = vld [vmem:[%s2856_s1 + $0x8] sm:$0xff] (!%p147_p6)   ;;  %v2299_v2 = vld [vmem:[%s2856_s1 + $0x10] sm:$0xff] (!%p147_p6)   ;;  %vm448_vm0 = vcmask (!%p147_p6), 392192   ;;  %s170_s8 = sand.u32 (!%p147_p6), 1, %s2378_s12  }
   0xb   : > { %150 = sbr.rel (%p147_p6) target bundleno = 394 (0x18a), region = 32  ;;  %p178_p7 = scmp.lt.s32.totalorder (!%p147_p6), %s2473_s23, 240  ;;  %2133 = vmatprep.subr.bf16.mxu0 (!%p147_p6), %v2297_v0  ;;  %2203 = vmatprep.subr.bf16.mxu1 (!%p147_p6), %v2297_v0  ;;  %v2555_v35 = vld [vmem:[%s2857_s2] ss:$0 sm:$0xff] (!%p147_p6) }
   0xc   : > { %2134 = vmatpush3.bf16.msra.mxu0 (!%p147_p6), %v2297_v0  ;;  %2206 = vmatpush3.bf16.msra.mxu1 (!%p147_p6), %v2297_v0  ;;  %s1688_s9 = sshll.u32 (!%p147_p6), %s170_s8, 8 }
   0xd   : > { %2135 = vmatprep.subr.bf16.mxu0 (!%p147_p6), %v2298_v1  ;;  %2204 = vmatprep.subr.bf16.mxu1 (!%p147_p6), %v2298_v1  ;;  %s2566_s10 = scalar_lea.vmem (!%p147_p6), [#allocation2], %s1688_s9  }
  0x10   : > { %2136 = vmatpush3.bf16.msra.mxu0 (!%p147_p6), %v2298_v1  ;;  %2207 = vmatpush3.bf16.msra.mxu1 (!%p147_p6), %v2298_v1 }
  0x11   : > { %2137 = vmatprep.subr.bf16.mxu0 (!%p147_p6), %v2299_v2  ;;  %2205 = vmatprep.subr.bf16.mxu1 (!%p147_p6), %v2299_v2 }
  0x12   : > { %s179_s26 = scalar_select %p178_p7, %s2473_s23, 240 }
  0x13   : > { %s1226_s11 = ssub.s32 (%p2465_p4), 241, %s2473_s23  ;;  %s1904_s12 = sshll.u32 (%p2465_p4), %s2453_s15, 8 }
  0x14   : > { %s1690_s29 = sshll.u32 %s179_s26, 2  ;;  %2138 = vmatpush3.bf16.msra.mxu0 %v2299_v2  ;;  %2208 = vmatpush3.bf16.msra.mxu1 %v2299_v2  ;;  %p1227_p8 = scmp.lt.s32.totalorder (%p2465_p4), %s1226_s11, 64 }
  0x15   : > { %s2486_s5 = scalar_lea.vmem %s2855_s0, %s1690_s29  ;;  %s2663_s18 = scalar_lea.vmem (%p2465_p4), %s2858_s3, %s1904_s12  }
  0x16   : > { %v2300_v3 = vld [vmem:[%s2486_s5] sm:$0xff]   ;;  %v2302_v5 = vld [vmem:[%s2486_s5 + $0x8] sm:$0xff]   ;;  %v2304_v7 = vld [vmem:[%s2486_s5 + $0x10] sm:$0xff]  }
  0x17   : > { %v2301_v4 = vld [vmem:[%s2486_s5 + $0x80] sm:$0xff]   ;;  %2139 = vmatprep.mubr.msk.bf16.mxu0 %vm448_vm0, %v2300_v3  ;;  %v2303_v6 = vld [vmem:[%s2486_s5 + $0x88] sm:$0xff]   ;;  %v2305_v8 = vld [vmem:[%s2486_s5 + $0x90] sm:$0xff]  }
  0x18   : > { %2171 = vmatprep.mubr.msk.bf16.mxu1 %vm448_vm0, %v2301_v4  ;;  %2140 = vmatmul.mubr.msk.bf16.vlgmr.msra.gmra.mrb[0].mxu0 %vm448_vm0, %v2302_v5  ;;  %v2306_v9 = vld [vmem:[%s2486_s5 + $0x18] sm:$0xff]   ;;  %v2308_v11 = vld [vmem:[%s2486_s5 + $0x20] sm:$0xff]   ;;  %v2310_v13 = vld [vmem:[%s2486_s5 + $0x28] sm:$0xff]  }
  0x19   : > { %2172 = vmatmul.mubr.msk.bf16.vlgmr.msra.gmra.mrb[0].mxu1 %vm448_vm0, %v2303_v6  ;;  %2143 = vmatprep.mubr.msk.bf16.mxu0 %vm448_vm0, %v2304_v7  ;;  %v2307_v10 = vld [vmem:[%s2486_s5 + $0x98] sm:$0xff]   ;;  %v2309_v12 = vld [vmem:[%s2486_s5 + $0xa0] sm:$0xff]   ;;  %v2311_v14 = vld [vmem:[%s2486_s5 + $0xa8] sm:$0xff]  }
  0x1a   : > { %2175 = vmatprep.mubr.msk.bf16.mxu1 %vm448_vm0, %v2305_v8  ;;  %v2312_v15 = vld [vmem:[%s2486_s5 + $0x30] sm:$0xff]   ;;  %v2314_v17 = vld [vmem:[%s2486_s5 + $0x38] sm:$0xff]   ;;  %v2316_v19 = vld [vmem:[%s2486_s5 + $0x40] sm:$0xff]  }
  0x1b   : > { %v2313_v16 = vld [vmem:[%s2486_s5 + $0xb0] sm:$0xff]   ;;  %v2315_v18 = vld [vmem:[%s2486_s5 + $0xb8] sm:$0xff]   ;;  %v2317_v20 = vld [vmem:[%s2486_s5 + $0xc0] sm:$0xff]  }
  0x1c   : > { %v2318_v21 = vld [vmem:[%s2486_s5 + $0x48] sm:$0xff]   ;;  %v2320_v23 = vld [vmem:[%s2486_s5 + $0x50] sm:$0xff]   ;;  %v2322_v25 = vld [vmem:[%s2486_s5 + $0x58] sm:$0xff]  }
  0x1d   : > { %v2319_v22 = vld [vmem:[%s2486_s5 + $0xc8] sm:$0xff]   ;;  %v2321_v24 = vld [vmem:[%s2486_s5 + $0xd0] sm:$0xff]   ;;  %v2323_v26 = vld [vmem:[%s2486_s5 + $0xd8] sm:$0xff]  }
  0x1e   : > { %v2324_v27 = vld [vmem:[%s2486_s5 + $0x60] sm:$0xff]   ;;  %v2326_v29 = vld [vmem:[%s2486_s5 + $0x68] sm:$0xff]   ;;  %v2328_v31 = vld [vmem:[%s2486_s5 + $0x70] sm:$0xff]  }
  0x1f   : > { %v2325_v28 = vld [vmem:[%s2486_s5 + $0xe0] sm:$0xff]   ;;  %v2327_v30 = vld [vmem:[%s2486_s5 + $0xe8] sm:$0xff]   ;;  %v2329_v32 = vld [vmem:[%s2486_s5 + $0xf0] sm:$0xff]  }
  0x20   : > { %2144 = vmatmul.mubr.msk.bf16.gmra.mrb[4].mxu0 %vm448_vm0, %v2306_v9  ;;  %v2330_v33 = vld [vmem:[%s2486_s5 + $0x78] sm:$0xff]  }
  0x21   : > { %2176 = vmatmul.mubr.msk.bf16.gmra.mrb[4].mxu1 %vm448_vm0, %v2307_v10  ;;  %2147 = vmatprep.mubr.msk.bf16.mxu0 %vm448_vm0, %v2308_v11  ;;  %v2331_v34 = vld [vmem:[%s2486_s5 + $0xf8] sm:$0xff]  }
  0x22   : > { %2179 = vmatprep.mubr.msk.bf16.mxu1 %vm448_vm0, %v2309_v12 }
  0x28   : > { %2148 = vmatmul.mubr.msk.bf16.gmra.mrb[8].mxu0 %vm448_vm0, %v2310_v13 }
  0x29   : > { %2180 = vmatmul.mubr.msk.bf16.gmra.mrb[8].mxu1 %vm448_vm0, %v2311_v14  ;;  %2151 = vmatprep.mubr.msk.bf16.mxu0 %vm448_vm0, %v2312_v15 }
  0x2a   : > { %2183 = vmatprep.mubr.msk.bf16.mxu1 %vm448_vm0, %v2313_v16 }
  0x30   : > { %2152 = vmatmul.mubr.msk.bf16.gmra.mrb[12].mxu0 %vm448_vm0, %v2314_v17 }
  0x31   : > { %2184 = vmatmul.mubr.msk.bf16.gmra.mrb[12].mxu1 %vm448_vm0, %v2315_v18  ;;  %2155 = vmatprep.mubr.msk.bf16.mxu0 %vm448_vm0, %v2316_v19 }
  0x32   : > { %2187 = vmatprep.mubr.msk.bf16.mxu1 %vm448_vm0, %v2317_v20 }
  0x38   : > { %2156 = vmatmul.mubr.msk.bf16.gmra.mrb[16].mxu0 %vm448_vm0, %v2318_v21 }
  0x39   : > { %2188 = vmatmul.mubr.msk.bf16.gmra.mrb[16].mxu1 %vm448_vm0, %v2319_v22  ;;  %2159 = vmatprep.mubr.msk.bf16.mxu0 %vm448_vm0, %v2320_v23 }
  0x3a   : > { %2191 = vmatprep.mubr.msk.bf16.mxu1 %vm448_vm0, %v2321_v24 }
  0x40   : > { %2160 = vmatmul.mubr.msk.bf16.gmra.mrb[20].mxu0 %vm448_vm0, %v2322_v25 }
  0x41   : > { %2192 = vmatmul.mubr.msk.bf16.gmra.mrb[20].mxu1 %vm448_vm0, %v2323_v26  ;;  %2163 = vmatprep.mubr.msk.bf16.mxu0 %vm448_vm0, %v2324_v27 }
  0x42   : > { %2195 = vmatprep.mubr.msk.bf16.mxu1 %vm448_vm0, %v2325_v28 }
  0x48   : > { %2164 = vmatmul.mubr.msk.bf16.gmra.mrb[24].mxu0 %vm448_vm0, %v2326_v29 }
  0x49   : > { %2196 = vmatmul.mubr.msk.bf16.gmra.mrb[24].mxu1 %vm448_vm0, %v2327_v30  ;;  %2167 = vmatprep.mubr.msk.bf16.mxu0 %vm448_vm0, %v2328_v31 }
  0x4a   : > { %2199 = vmatprep.mubr.msk.bf16.mxu1 %vm448_vm0, %v2329_v32 }
  0x50   : > { %2168 = vmatmul.mubr.msk.bf16.gmra.mrb[28].mxu0 %vm448_vm0, %v2330_v33 }
  0x51   : > { %2200 = vmatmul.mubr.msk.bf16.gmra.mrb[28].mxu1 %vm448_vm0, %v2331_v34 }
  0xeb   : > { %v2141_v36 = vpop.f32.mrb[0].mxu0 }
  0xec   : > { %v2173_v37 = vpop.f32.mrb[0].mxu1  ;;  %v588_v38 = vadd.f32 %v2141_v36, %v2555_v35  ;;  %v579_v40 = vpop.f32.mrb[1].mxu0 }
  0xed   : > { %v716_v39 = vadd.f32 %v2173_v37, %v2555_v35  ;;  %v707_v41 = vpop.f32.mrb[1].mxu1  ;;  %v580_v42 = vadd.f32 %v2555_v35, %v579_v40  ;;  %v2142_v44 = vpop.f32.mrb[2].mxu0 }
  0xee   : > { %v708_v43 = vadd.f32 %v2555_v35, %v707_v41  ;;  %v2174_v45 = vpop.f32.mrb[2].mxu1  ;;  %v591_v46 = vadd.f32 %v2142_v44, %v2555_v35  ;;  %v582_v48 = vpop.f32.mrb[3].mxu0  ;;  %v836_v52 = vmax.f32 %v588_v38, 0.0 }
  0xef   : > { %v719_v47 = vadd.f32 %v2174_v45, %v2555_v35  ;;  %v710_v49 = vpop.f32.mrb[3].mxu1  ;;  %v583_v50 = vadd.f32 %v2555_v35, %v582_v48  ;;  %v868_v53 = vmax.f32 %v716_v39, 0.0  ;;  %v834_v56 = vmax.f32 %v580_v42, 0.0 }
  0xf0   : > { %v711_v51 = vadd.f32 %v2555_v35, %v710_v49  ;;  %v837_v54 = vmax.f32 %v591_v46, 0.0  ;;  %v866_v57 = vmax.f32 %v708_v43, 0.0 }
  0xf1   : > { %v869_v55 = vmax.f32 %v719_v47, 0.0  ;;  %v835_v58 = vmax.f32 %v583_v50, 0.0 }
  0xf2   : > { %v867_v59 = vmax.f32 %v711_v51, 0.0  ;;  %v1915_v60 = vpack.c.bf16 %v837_v54, %v836_v52 }
  0xf3   : > { %v1995_v61 = vpack.c.bf16 %v869_v55, %v868_v53  ;;  %v1910_v62 = vpack.c.bf16 %v835_v58, %v834_v56  ;;  %v2145_v0 = vpop.f32.mrb[4].mxu0 }
  0xf4   : > { %v1990_v63 = vpack.c.bf16 %v867_v59, %v866_v57  ;;  %v2177_v1 = vpop.f32.mrb[4].mxu1  ;;  %2067 = vst [vmem:[%s2566_s10 + $0x8] sm:$0xff] %v1915_v60   ;;  %v604_v2 = vadd.f32 %v2145_v0, %v2555_v35  ;;  %v595_v4 = vpop.f32.mrb[5].mxu0 }
  0xf5   : > { %2083 = vst [vmem:[%s2566_s10 + $0x88] sm:$0xff] %v1995_v61   ;;  %v732_v3 = vadd.f32 %v2177_v1, %v2555_v35  ;;  %v723_v5 = vpop.f32.mrb[5].mxu1  ;;  %1911 = vst [vmem:[%s2566_s10] sm:$0xff] %v1910_v62   ;;  %v596_v6 = vadd.f32 %v2555_v35, %v595_v4  ;;  %v2146_v8 = vpop.f32.mrb[6].mxu0 }
  0xf6   : > { %2082 = vst [vmem:[%s2566_s10 + $0x80] sm:$0xff] %v1990_v63   ;;  %v724_v7 = vadd.f32 %v2555_v35, %v723_v5  ;;  %v2178_v9 = vpop.f32.mrb[6].mxu1  ;;  %v607_v10 = vadd.f32 %v2146_v8, %v2555_v35  ;;  %v598_v12 = vpop.f32.mrb[7].mxu0  ;;  %v840_v16 = vmax.f32 %v604_v2, 0.0 }
  0xf7   : > { %v735_v11 = vadd.f32 %v2178_v9, %v2555_v35  ;;  %v726_v13 = vpop.f32.mrb[7].mxu1  ;;  %v599_v14 = vadd.f32 %v2555_v35, %v598_v12  ;;  %v872_v17 = vmax.f32 %v732_v3, 0.0  ;;  %v838_v20 = vmax.f32 %v596_v6, 0.0 }
  0xf8   : > { %v727_v15 = vadd.f32 %v2555_v35, %v726_v13  ;;  %v841_v18 = vmax.f32 %v607_v10, 0.0  ;;  %v870_v21 = vmax.f32 %v724_v7, 0.0 }
  0xf9   : > { %v873_v19 = vmax.f32 %v735_v11, 0.0  ;;  %v839_v22 = vmax.f32 %v599_v14, 0.0 }
  0xfa   : > { %v871_v23 = vmax.f32 %v727_v15, 0.0  ;;  %v1925_v24 = vpack.c.bf16 %v841_v18, %v840_v16 }
  0xfb   : > { %v2005_v25 = vpack.c.bf16 %v873_v19, %v872_v17  ;;  %v1920_v26 = vpack.c.bf16 %v839_v22, %v838_v20  ;;  %v2149_v28 = vpop.f32.mrb[8].mxu0 }
  0xfc   : > { %v2000_v27 = vpack.c.bf16 %v871_v23, %v870_v21  ;;  %v2181_v29 = vpop.f32.mrb[8].mxu1  ;;  %2069 = vst [vmem:[%s2566_s10 + $0x18] sm:$0xff] %v1925_v24   ;;  %v620_v30 = vadd.f32 %v2149_v28, %v2555_v35  ;;  %v611_v32 = vpop.f32.mrb[9].mxu0 }
  0xfd   : > { %2085 = vst [vmem:[%s2566_s10 + $0x98] sm:$0xff] %v2005_v25   ;;  %v748_v31 = vadd.f32 %v2181_v29, %v2555_v35  ;;  %v739_v33 = vpop.f32.mrb[9].mxu1  ;;  %2068 = vst [vmem:[%s2566_s10 + $0x10] sm:$0xff] %v1920_v26   ;;  %v612_v34 = vadd.f32 %v2555_v35, %v611_v32  ;;  %v2150_v37 = vpop.f32.mrb[10].mxu0 }
  0xfe   : > { %2084 = vst [vmem:[%s2566_s10 + $0x90] sm:$0xff] %v2000_v27   ;;  %v740_v36 = vadd.f32 %v2555_v35, %v739_v33  ;;  %v2182_v38 = vpop.f32.mrb[10].mxu1  ;;  %v623_v39 = vadd.f32 %v2150_v37, %v2555_v35  ;;  %v614_v41 = vpop.f32.mrb[11].mxu0  ;;  %v844_v45 = vmax.f32 %v620_v30, 0.0 }
  0xff   : > { %v751_v40 = vadd.f32 %v2182_v38, %v2555_v35  ;;  %v742_v42 = vpop.f32.mrb[11].mxu1  ;;  %v615_v43 = vadd.f32 %v2555_v35, %v614_v41  ;;  %v876_v46 = vmax.f32 %v748_v31, 0.0  ;;  %v842_v49 = vmax.f32 %v612_v34, 0.0 }
 0x100   : > { %v743_v44 = vadd.f32 %v2555_v35, %v742_v42  ;;  %v845_v47 = vmax.f32 %v623_v39, 0.0  ;;  %v874_v50 = vmax.f32 %v740_v36, 0.0 }
 0x101   : > { %v877_v48 = vmax.f32 %v751_v40, 0.0  ;;  %v843_v51 = vmax.f32 %v615_v43, 0.0 }
 0x102   : > { %v875_v52 = vmax.f32 %v743_v44, 0.0  ;;  %v1935_v53 = vpack.c.bf16 %v845_v47, %v844_v45 }
 0x103   : > { %v2015_v54 = vpack.c.bf16 %v877_v48, %v876_v46  ;;  %v1930_v55 = vpack.c.bf16 %v843_v51, %v842_v49  ;;  %v2153_v57 = vpop.f32.mrb[12].mxu0 }
 0x104   : > { %v2010_v56 = vpack.c.bf16 %v875_v52, %v874_v50  ;;  %v2185_v58 = vpop.f32.mrb[12].mxu1  ;;  %2071 = vst [vmem:[%s2566_s10 + $0x28] sm:$0xff] %v1935_v53   ;;  %v636_v59 = vadd.f32 %v2153_v57, %v2555_v35  ;;  %v627_v61 = vpop.f32.mrb[13].mxu0 }
 0x105   : > { %2087 = vst [vmem:[%s2566_s10 + $0xa8] sm:$0xff] %v2015_v54   ;;  %v764_v60 = vadd.f32 %v2185_v58, %v2555_v35  ;;  %v755_v62 = vpop.f32.mrb[13].mxu1  ;;  %2070 = vst [vmem:[%s2566_s10 + $0x20] sm:$0xff] %v1930_v55   ;;  %v628_v63 = vadd.f32 %v2555_v35, %v627_v61  ;;  %v2154_v1 = vpop.f32.mrb[14].mxu0 }
 0x106   : > { %2086 = vst [vmem:[%s2566_s10 + $0xa0] sm:$0xff] %v2010_v56   ;;  %v756_v0 = vadd.f32 %v2555_v35, %v755_v62  ;;  %v2186_v2 = vpop.f32.mrb[14].mxu1  ;;  %v639_v3 = vadd.f32 %v2154_v1, %v2555_v35  ;;  %v630_v5 = vpop.f32.mrb[15].mxu0  ;;  %v848_v9 = vmax.f32 %v636_v59, 0.0 }
 0x107   : > { %v767_v4 = vadd.f32 %v2186_v2, %v2555_v35  ;;  %v758_v6 = vpop.f32.mrb[15].mxu1  ;;  %v631_v7 = vadd.f32 %v2555_v35, %v630_v5  ;;  %v880_v10 = vmax.f32 %v764_v60, 0.0  ;;  %v846_v13 = vmax.f32 %v628_v63, 0.0 }
 0x108   : > { %v759_v8 = vadd.f32 %v2555_v35, %v758_v6  ;;  %v849_v11 = vmax.f32 %v639_v3, 0.0  ;;  %v878_v14 = vmax.f32 %v756_v0, 0.0 }
 0x109   : > { %v881_v12 = vmax.f32 %v767_v4, 0.0  ;;  %v847_v15 = vmax.f32 %v631_v7, 0.0 }
 0x10a   : > { %v879_v16 = vmax.f32 %v759_v8, 0.0  ;;  %v1945_v17 = vpack.c.bf16 %v849_v11, %v848_v9 }
 0x10b   : > { %v2025_v18 = vpack.c.bf16 %v881_v12, %v880_v10  ;;  %v1940_v19 = vpack.c.bf16 %v847_v15, %v846_v13  ;;  %v2157_v21 = vpop.f32.mrb[16].mxu0 }
 0x10c   : > { %v2020_v20 = vpack.c.bf16 %v879_v16, %v878_v14  ;;  %v2189_v22 = vpop.f32.mrb[16].mxu1  ;;  %2073 = vst [vmem:[%s2566_s10 + $0x38] sm:$0xff] %v1945_v17   ;;  %v652_v23 = vadd.f32 %v2157_v21, %v2555_v35  ;;  %v643_v25 = vpop.f32.mrb[17].mxu0 }
 0x10d   : > { %2089 = vst [vmem:[%s2566_s10 + $0xb8] sm:$0xff] %v2025_v18   ;;  %v780_v24 = vadd.f32 %v2189_v22, %v2555_v35  ;;  %v771_v26 = vpop.f32.mrb[17].mxu1  ;;  %2072 = vst [vmem:[%s2566_s10 + $0x30] sm:$0xff] %v1940_v19   ;;  %v644_v27 = vadd.f32 %v2555_v35, %v643_v25  ;;  %v2158_v29 = vpop.f32.mrb[18].mxu0 }
 0x10e   : > { %2088 = vst [vmem:[%s2566_s10 + $0xb0] sm:$0xff] %v2020_v20   ;;  %v772_v28 = vadd.f32 %v2555_v35, %v771_v26  ;;  %v2190_v30 = vpop.f32.mrb[18].mxu1  ;;  %v655_v31 = vadd.f32 %v2158_v29, %v2555_v35  ;;  %v646_v33 = vpop.f32.mrb[19].mxu0  ;;  %v852_v38 = vmax.f32 %v652_v23, 0.0 }
 0x10f   : > { %v783_v32 = vadd.f32 %v2190_v30, %v2555_v35  ;;  %v774_v34 = vpop.f32.mrb[19].mxu1  ;;  %v647_v36 = vadd.f32 %v2555_v35, %v646_v33  ;;  %v884_v39 = vmax.f32 %v780_v24, 0.0  ;;  %v850_v42 = vmax.f32 %v644_v27, 0.0 }
 0x110   : > { %v775_v37 = vadd.f32 %v2555_v35, %v774_v34  ;;  %v853_v40 = vmax.f32 %v655_v31, 0.0  ;;  %v882_v43 = vmax.f32 %v772_v28, 0.0 }
 0x111   : > { %v885_v41 = vmax.f32 %v783_v32, 0.0  ;;  %v851_v44 = vmax.f32 %v647_v36, 0.0 }
 0x112   : > { %v883_v45 = vmax.f32 %v775_v37, 0.0  ;;  %v1955_v46 = vpack.c.bf16 %v853_v40, %v852_v38 }
 0x113   : > { %v2035_v47 = vpack.c.bf16 %v885_v41, %v884_v39  ;;  %v1950_v48 = vpack.c.bf16 %v851_v44, %v850_v42  ;;  %v2161_v50 = vpop.f32.mrb[20].mxu0 }
 0x114   : > { %v2030_v49 = vpack.c.bf16 %v883_v45, %v882_v43  ;;  %v2193_v51 = vpop.f32.mrb[20].mxu1  ;;  %2075 = vst [vmem:[%s2566_s10 + $0x48] sm:$0xff] %v1955_v46   ;;  %v668_v52 = vadd.f32 %v2161_v50, %v2555_v35  ;;  %v659_v54 = vpop.f32.mrb[21].mxu0 }
 0x115   : > { %2091 = vst [vmem:[%s2566_s10 + $0xc8] sm:$0xff] %v2035_v47   ;;  %v796_v53 = vadd.f32 %v2193_v51, %v2555_v35  ;;  %v787_v55 = vpop.f32.mrb[21].mxu1  ;;  %2074 = vst [vmem:[%s2566_s10 + $0x40] sm:$0xff] %v1950_v48   ;;  %v660_v56 = vadd.f32 %v2555_v35, %v659_v54  ;;  %v2162_v58 = vpop.f32.mrb[22].mxu0 }
 0x116   : > { %2090 = vst [vmem:[%s2566_s10 + $0xc0] sm:$0xff] %v2030_v49   ;;  %v788_v57 = vadd.f32 %v2555_v35, %v787_v55  ;;  %v2194_v59 = vpop.f32.mrb[22].mxu1  ;;  %v671_v60 = vadd.f32 %v2162_v58, %v2555_v35  ;;  %v662_v62 = vpop.f32.mrb[23].mxu0  ;;  %v856_v2 = vmax.f32 %v668_v52, 0.0 }
 0x117   : > { %v799_v61 = vadd.f32 %v2194_v59, %v2555_v35  ;;  %v790_v63 = vpop.f32.mrb[23].mxu1  ;;  %v663_v0 = vadd.f32 %v2555_v35, %v662_v62  ;;  %v888_v3 = vmax.f32 %v796_v53, 0.0  ;;  %v854_v6 = vmax.f32 %v660_v56, 0.0 }
 0x118   : > { %v791_v1 = vadd.f32 %v2555_v35, %v790_v63  ;;  %v857_v4 = vmax.f32 %v671_v60, 0.0  ;;  %v886_v7 = vmax.f32 %v788_v57, 0.0 }
 0x119   : > { %v889_v5 = vmax.f32 %v799_v61, 0.0  ;;  %v855_v8 = vmax.f32 %v663_v0, 0.0 }
 0x11a   : > { %v887_v9 = vmax.f32 %v791_v1, 0.0  ;;  %v1965_v10 = vpack.c.bf16 %v857_v4, %v856_v2 }
 0x11b   : > { %v2045_v11 = vpack.c.bf16 %v889_v5, %v888_v3  ;;  %v1960_v12 = vpack.c.bf16 %v855_v8, %v854_v6  ;;  %v2165_v14 = vpop.f32.mrb[24].mxu0 }
 0x11c   : > { %v2040_v13 = vpack.c.bf16 %v887_v9, %v886_v7  ;;  %v2197_v15 = vpop.f32.mrb[24].mxu1  ;;  %2077 = vst [vmem:[%s2566_s10 + $0x58] sm:$0xff] %v1965_v10   ;;  %v684_v16 = vadd.f32 %v2165_v14, %v2555_v35  ;;  %v675_v18 = vpop.f32.mrb[25].mxu0 }
 0x11d   : > { %2093 = vst [vmem:[%s2566_s10 + $0xd8] sm:$0xff] %v2045_v11   ;;  %v812_v17 = vadd.f32 %v2197_v15, %v2555_v35  ;;  %v803_v19 = vpop.f32.mrb[25].mxu1  ;;  %2076 = vst [vmem:[%s2566_s10 + $0x50] sm:$0xff] %v1960_v12   ;;  %v676_v20 = vadd.f32 %v2555_v35, %v675_v18  ;;  %v2166_v22 = vpop.f32.mrb[26].mxu0 }
 0x11e   : > { %2092 = vst [vmem:[%s2566_s10 + $0xd0] sm:$0xff] %v2040_v13   ;;  %v804_v21 = vadd.f32 %v2555_v35, %v803_v19  ;;  %v2198_v23 = vpop.f32.mrb[26].mxu1  ;;  %v687_v24 = vadd.f32 %v2166_v22, %v2555_v35  ;;  %v678_v26 = vpop.f32.mrb[27].mxu0  ;;  %v860_v30 = vmax.f32 %v684_v16, 0.0 }
 0x11f   : > { %v815_v25 = vadd.f32 %v2198_v23, %v2555_v35  ;;  %v806_v27 = vpop.f32.mrb[27].mxu1  ;;  %v679_v28 = vadd.f32 %v2555_v35, %v678_v26  ;;  %v892_v31 = vmax.f32 %v812_v17, 0.0  ;;  %v858_v34 = vmax.f32 %v676_v20, 0.0 }
 0x120   : > { %v807_v29 = vadd.f32 %v2555_v35, %v806_v27  ;;  %v861_v32 = vmax.f32 %v687_v24, 0.0  ;;  %v890_v36 = vmax.f32 %v804_v21, 0.0 }
 0x121   : > { %v893_v33 = vmax.f32 %v815_v25, 0.0  ;;  %v859_v37 = vmax.f32 %v679_v28, 0.0 }
 0x122   : > { %v891_v38 = vmax.f32 %v807_v29, 0.0  ;;  %v1975_v39 = vpack.c.bf16 %v861_v32, %v860_v30 }
 0x123   : > { %v2055_v40 = vpack.c.bf16 %v893_v33, %v892_v31  ;;  %v1970_v41 = vpack.c.bf16 %v859_v37, %v858_v34  ;;  %v2169_v43 = vpop.f32.mrb[28].mxu0 }
 0x124   : > { %v2050_v42 = vpack.c.bf16 %v891_v38, %v890_v36  ;;  %v2201_v44 = vpop.f32.mrb[28].mxu1  ;;  %2079 = vst [vmem:[%s2566_s10 + $0x68] sm:$0xff] %v1975_v39   ;;  %v700_v45 = vadd.f32 %v2169_v43, %v2555_v35  ;;  %v691_v47 = vpop.f32.mrb[29].mxu0 }
 0x125   : > { %2095 = vst [vmem:[%s2566_s10 + $0xe8] sm:$0xff] %v2055_v40   ;;  %v828_v46 = vadd.f32 %v2201_v44, %v2555_v35  ;;  %v819_v48 = vpop.f32.mrb[29].mxu1  ;;  %2078 = vst [vmem:[%s2566_s10 + $0x60] sm:$0xff] %v1970_v41   ;;  %v692_v49 = vadd.f32 %v2555_v35, %v691_v47  ;;  %v2170_v51 = vpop.f32.mrb[30].mxu0 }
 0x126   : > { %2094 = vst [vmem:[%s2566_s10 + $0xe0] sm:$0xff] %v2050_v42   ;;  %v820_v50 = vadd.f32 %v2555_v35, %v819_v48  ;;  %v2202_v52 = vpop.f32.mrb[30].mxu1  ;;  %v703_v53 = vadd.f32 %v2170_v51, %v2555_v35  ;;  %v694_v55 = vpop.f32.mrb[31].mxu0  ;;  %v864_v59 = vmax.f32 %v700_v45, 0.0 }
 0x127   : > { %v831_v54 = vadd.f32 %v2202_v52, %v2555_v35  ;;  %v822_v56 = vpop.f32.mrb[31].mxu1  ;;  %v695_v57 = vadd.f32 %v2555_v35, %v694_v55  ;;  %v896_v60 = vmax.f32 %v828_v46, 0.0  ;;  %v862_v63 = vmax.f32 %v692_v49, 0.0 }
 0x128   : > { %v823_v58 = vadd.f32 %v2555_v35, %v822_v56  ;;  %v865_v61 = vmax.f32 %v703_v53, 0.0  ;;  %v894_v0 = vmax.f32 %v820_v50, 0.0  ;;  %1224 = sbr.rel (!%p2465_p4) target bundleno = 394 (0x18a), region = 36 }
 0x129   : > { %v897_v62 = vmax.f32 %v831_v54, 0.0  ;;  %v863_v1 = vmax.f32 %v695_v57, 0.0 }
 0x12a   : > { %v895_v2 = vmax.f32 %v823_v58, 0.0  ;;  %v1985_v3 = vpack.c.bf16 %v865_v61, %v864_v59 }
 0x12b   : > { %v2065_v4 = vpack.c.bf16 %v897_v62, %v896_v60  ;;  %v1980_v5 = vpack.c.bf16 %v863_v1, %v862_v63 }
 0x12c   : > { %v2060_v6 = vpack.c.bf16 %v895_v2, %v894_v0  ;;  %2081 = vst [vmem:[%s2566_s10 + $0x78] sm:$0xff] %v1985_v3  }
 0x12d   : > { %2097 = vst [vmem:[%s2566_s10 + $0xf8] sm:$0xff] %v2065_v4   ;;  %2080 = vst [vmem:[%s2566_s10 + $0x70] sm:$0xff] %v1980_v5  }
 0x12e   : > { %2096 = vst [vmem:[%s2566_s10 + $0xf0] sm:$0xff] %v2060_v6  }
 0x12f   : > { %s2867_s11 = smov (!%p1227_p8, %s1226_s11), 64 }
 0x130   : > { %s1825_s21 = sshll.u32 %s2867_s11, 6 }
 0x131   : > { %p1828_p9 = scmp.eq.s32.totalorder %s1825_s21, 0 }
 0x132   : > { %s2669_s22 = sshrl.u32 (!%p1828_p9), %s2867_s11, 6 }
 0x133   : > { %1235 = sbr.rel (%p1828_p9) target bundleno = 394 (0x18a), region = 40  ;;  %p1829_p10 = scmp.le.s32.totalorder (!%p1828_p9), %s2669_s22, 0 }
 0x13a   : > { %1640 = sbr.rel (%p1829_p10) target bundleno = 373 (0x175), region = 112  ;;  %s2860_s15 = smov (!%p1829_p10), %s2663_s18 }
 0x13b   : > { %s2861_s20 = smov (!%p1829_p10), %s2566_s10  ;;  %s2678_s23 = smov (!%p1829_p10), 0  }
 0x13c   : > { %s2680_s24 = smov (!%p1829_p10), 0  }
 0x141 LB: >> { %v1251_v35 = vld [vmem:[%s2394_s20] sm:$0xf]  ;;  %v1253_v7 = vld [vmem:[%s2394_s20 + $0x4] sm:$0xf]  ;;  %v1255_v8 = vld [vmem:[%s2394_s20 + $0x8] sm:$0xf]  ;;  %s2402_s24 = sphi %s2680_s24, %s1245_s24   ;;  %s2398_s23 = sphi %s2678_s23, %s2862_s23   ;;  %s2394_s20 = sphi %s2861_s20, %s1384_s20   ;;  %s2390_s15 = sphi %s2860_s15, %s1385_s15  }
 0x142   : >> { %1252 = vst [vmem:[%s2390_s15] sm:$0xf] %v1251_v35  ;;  %1254 = vst [vmem:[%s2390_s15 + $0x4] sm:$0xf] %v1253_v7  ;;  %v1257_v9 = vld [vmem:[%s2394_s20 + $0xc] sm:$0xf]  ;;  %s1379_s25 = sadd.s32 1, %s2398_s23 }
 0x143   : >> { %1256 = vst [vmem:[%s2390_s15 + $0x8] sm:$0xf] %v1255_v8  ;;  %v1259_v10 = vld [vmem:[%s2394_s20 + $0x10] sm:$0xf]  ;;  %v1261_v11 = vld [vmem:[%s2394_s20 + $0x14] sm:$0xf]  ;;  %p1380_p11 = scmp.ge.s32.totalorder %s1379_s25, %s2669_s22 }
 0x144   : >> { %1258 = vst [vmem:[%s2390_s15 + $0xc] sm:$0xf] %v1257_v9  ;;  %1260 = vst [vmem:[%s2390_s15 + $0x10] sm:$0xf] %v1259_v10  ;;  %v1263_v12 = vld [vmem:[%s2394_s20 + $0x18] sm:$0xf] }
 0x145   : >> { %1262 = vst [vmem:[%s2390_s15 + $0x14] sm:$0xf] %v1261_v11  ;;  %v1265_v13 = vld [vmem:[%s2394_s20 + $0x1c] sm:$0xf]  ;;  %v1267_v14 = vld [vmem:[%s2394_s20 + $0x20] sm:$0xf] }
 0x146   : >> { %1264 = vst [vmem:[%s2390_s15 + $0x18] sm:$0xf] %v1263_v12  ;;  %1266 = vst [vmem:[%s2390_s15 + $0x1c] sm:$0xf] %v1265_v13  ;;  %v1269_v15 = vld [vmem:[%s2394_s20 + $0x24] sm:$0xf] }
 0x147   : >> { %1268 = vst [vmem:[%s2390_s15 + $0x20] sm:$0xf] %v1267_v14  ;;  %v1271_v16 = vld [vmem:[%s2394_s20 + $0x28] sm:$0xf]  ;;  %v1273_v17 = vld [vmem:[%s2394_s20 + $0x2c] sm:$0xf] }
 0x148   : >> { %1270 = vst [vmem:[%s2390_s15 + $0x24] sm:$0xf] %v1269_v15  ;;  %1272 = vst [vmem:[%s2390_s15 + $0x28] sm:$0xf] %v1271_v16  ;;  %v1275_v18 = vld [vmem:[%s2394_s20 + $0x30] sm:$0xf] }
 0x149   : >> { %1274 = vst [vmem:[%s2390_s15 + $0x2c] sm:$0xf] %v1273_v17  ;;  %v1277_v19 = vld [vmem:[%s2394_s20 + $0x34] sm:$0xf]  ;;  %v1279_v20 = vld [vmem:[%s2394_s20 + $0x38] sm:$0xf] }
 0x14a   : >> { %1276 = vst [vmem:[%s2390_s15 + $0x30] sm:$0xf] %v1275_v18  ;;  %1278 = vst [vmem:[%s2390_s15 + $0x34] sm:$0xf] %v1277_v19  ;;  %v1281_v21 = vld [vmem:[%s2394_s20 + $0x3c] sm:$0xf] }
 0x14b   : >> { %1280 = vst [vmem:[%s2390_s15 + $0x38] sm:$0xf] %v1279_v20  ;;  %v1283_v22 = vld [vmem:[%s2394_s20 + $0x40] sm:$0xf]  ;;  %v1285_v23 = vld [vmem:[%s2394_s20 + $0x44] sm:$0xf] }
 0x14c   : >> { %1282 = vst [vmem:[%s2390_s15 + $0x3c] sm:$0xf] %v1281_v21  ;;  %1284 = vst [vmem:[%s2390_s15 + $0x40] sm:$0xf] %v1283_v22  ;;  %v1287_v24 = vld [vmem:[%s2394_s20 + $0x48] sm:$0xf] }
 0x14d   : >> { %1286 = vst [vmem:[%s2390_s15 + $0x44] sm:$0xf] %v1285_v23  ;;  %v1289_v25 = vld [vmem:[%s2394_s20 + $0x4c] sm:$0xf]  ;;  %v1291_v26 = vld [vmem:[%s2394_s20 + $0x50] sm:$0xf] }
 0x14e   : >> { %1288 = vst [vmem:[%s2390_s15 + $0x48] sm:$0xf] %v1287_v24  ;;  %1290 = vst [vmem:[%s2390_s15 + $0x4c] sm:$0xf] %v1289_v25  ;;  %v1293_v27 = vld [vmem:[%s2394_s20 + $0x54] sm:$0xf] }
 0x14f   : >> { %1292 = vst [vmem:[%s2390_s15 + $0x50] sm:$0xf] %v1291_v26  ;;  %v1295_v28 = vld [vmem:[%s2394_s20 + $0x58] sm:$0xf]  ;;  %v1297_v29 = vld [vmem:[%s2394_s20 + $0x5c] sm:$0xf] }
 0x150   : >> { %1294 = vst [vmem:[%s2390_s15 + $0x54] sm:$0xf] %v1293_v27  ;;  %1296 = vst [vmem:[%s2390_s15 + $0x58] sm:$0xf] %v1295_v28  ;;  %v1299_v30 = vld [vmem:[%s2394_s20 + $0x60] sm:$0xf] }
 0x151   : >> { %1298 = vst [vmem:[%s2390_s15 + $0x5c] sm:$0xf] %v1297_v29  ;;  %v1301_v31 = vld [vmem:[%s2394_s20 + $0x64] sm:$0xf]  ;;  %v1303_v32 = vld [vmem:[%s2394_s20 + $0x68] sm:$0xf] }
 0x152   : >> { %1300 = vst [vmem:[%s2390_s15 + $0x60] sm:$0xf] %v1299_v30  ;;  %1302 = vst [vmem:[%s2390_s15 + $0x64] sm:$0xf] %v1301_v31  ;;  %v1305_v33 = vld [vmem:[%s2394_s20 + $0x6c] sm:$0xf] }
 0x153   : >> { %1304 = vst [vmem:[%s2390_s15 + $0x68] sm:$0xf] %v1303_v32  ;;  %v1307_v34 = vld [vmem:[%s2394_s20 + $0x70] sm:$0xf]  ;;  %v1309_v36 = vld [vmem:[%s2394_s20 + $0x74] sm:$0xf] }
 0x154   : >> { %1306 = vst [vmem:[%s2390_s15 + $0x6c] sm:$0xf] %v1305_v33  ;;  %1308 = vst [vmem:[%s2390_s15 + $0x70] sm:$0xf] %v1307_v34  ;;  %v1311_v37 = vld [vmem:[%s2394_s20 + $0x78] sm:$0xf] }
 0x155   : >> { %1310 = vst [vmem:[%s2390_s15 + $0x74] sm:$0xf] %v1309_v36  ;;  %v1313_v38 = vld [vmem:[%s2394_s20 + $0x7c] sm:$0xf]  ;;  %v1315_v39 = vld [vmem:[%s2394_s20 + $0x80] sm:$0xf] }
 0x156   : >> { %1312 = vst [vmem:[%s2390_s15 + $0x78] sm:$0xf] %v1311_v37  ;;  %1314 = vst [vmem:[%s2390_s15 + $0x7c] sm:$0xf] %v1313_v38  ;;  %v1317_v40 = vld [vmem:[%s2394_s20 + $0x84] sm:$0xf] }
 0x157   : >> { %1316 = vst [vmem:[%s2390_s15 + $0x80] sm:$0xf] %v1315_v39  ;;  %v1319_v41 = vld [vmem:[%s2394_s20 + $0x88] sm:$0xf]  ;;  %v1321_v42 = vld [vmem:[%s2394_s20 + $0x8c] sm:$0xf] }
 0x158   : >> { %1318 = vst [vmem:[%s2390_s15 + $0x84] sm:$0xf] %v1317_v40  ;;  %1320 = vst [vmem:[%s2390_s15 + $0x88] sm:$0xf] %v1319_v41  ;;  %v1323_v43 = vld [vmem:[%s2394_s20 + $0x90] sm:$0xf] }
 0x159   : >> { %1322 = vst [vmem:[%s2390_s15 + $0x8c] sm:$0xf] %v1321_v42  ;;  %v1325_v44 = vld [vmem:[%s2394_s20 + $0x94] sm:$0xf]  ;;  %v1327_v45 = vld [vmem:[%s2394_s20 + $0x98] sm:$0xf] }
 0x15a   : >> { %1324 = vst [vmem:[%s2390_s15 + $0x90] sm:$0xf] %v1323_v43  ;;  %1326 = vst [vmem:[%s2390_s15 + $0x94] sm:$0xf] %v1325_v44  ;;  %v1329_v46 = vld [vmem:[%s2394_s20 + $0x9c] sm:$0xf] }
 0x15b   : >> { %1328 = vst [vmem:[%s2390_s15 + $0x98] sm:$0xf] %v1327_v45  ;;  %v1331_v47 = vld [vmem:[%s2394_s20 + $0xa0] sm:$0xf]  ;;  %v1333_v48 = vld [vmem:[%s2394_s20 + $0xa4] sm:$0xf] }
 0x15c   : >> { %1330 = vst [vmem:[%s2390_s15 + $0x9c] sm:$0xf] %v1329_v46  ;;  %1332 = vst [vmem:[%s2390_s15 + $0xa0] sm:$0xf] %v1331_v47  ;;  %v1335_v49 = vld [vmem:[%s2394_s20 + $0xa8] sm:$0xf] }
 0x15d   : >> { %1334 = vst [vmem:[%s2390_s15 + $0xa4] sm:$0xf] %v1333_v48  ;;  %v1337_v50 = vld [vmem:[%s2394_s20 + $0xac] sm:$0xf]  ;;  %v1339_v51 = vld [vmem:[%s2394_s20 + $0xb0] sm:$0xf] }
 0x15e   : >> { %1336 = vst [vmem:[%s2390_s15 + $0xa8] sm:$0xf] %v1335_v49  ;;  %1338 = vst [vmem:[%s2390_s15 + $0xac] sm:$0xf] %v1337_v50  ;;  %v1341_v52 = vld [vmem:[%s2394_s20 + $0xb4] sm:$0xf] }
 0x15f   : >> { %1340 = vst [vmem:[%s2390_s15 + $0xb0] sm:$0xf] %v1339_v51  ;;  %v1343_v53 = vld [vmem:[%s2394_s20 + $0xb8] sm:$0xf]  ;;  %v1345_v54 = vld [vmem:[%s2394_s20 + $0xbc] sm:$0xf] }
 0x160   : >> { %1342 = vst [vmem:[%s2390_s15 + $0xb4] sm:$0xf] %v1341_v52  ;;  %1344 = vst [vmem:[%s2390_s15 + $0xb8] sm:$0xf] %v1343_v53  ;;  %v1347_v55 = vld [vmem:[%s2394_s20 + $0xc0] sm:$0xf] }
 0x161   : >> { %1346 = vst [vmem:[%s2390_s15 + $0xbc] sm:$0xf] %v1345_v54  ;;  %v1349_v56 = vld [vmem:[%s2394_s20 + $0xc4] sm:$0xf]  ;;  %v1351_v57 = vld [vmem:[%s2394_s20 + $0xc8] sm:$0xf] }
 0x162   : >> { %1348 = vst [vmem:[%s2390_s15 + $0xc0] sm:$0xf] %v1347_v55  ;;  %1350 = vst [vmem:[%s2390_s15 + $0xc4] sm:$0xf] %v1349_v56  ;;  %v1353_v58 = vld [vmem:[%s2394_s20 + $0xcc] sm:$0xf] }
 0x163   : >> { %1352 = vst [vmem:[%s2390_s15 + $0xc8] sm:$0xf] %v1351_v57  ;;  %v1355_v59 = vld [vmem:[%s2394_s20 + $0xd0] sm:$0xf]  ;;  %v1357_v60 = vld [vmem:[%s2394_s20 + $0xd4] sm:$0xf] }
 0x164   : >> { %1354 = vst [vmem:[%s2390_s15 + $0xcc] sm:$0xf] %v1353_v58  ;;  %1356 = vst [vmem:[%s2390_s15 + $0xd0] sm:$0xf] %v1355_v59  ;;  %v1359_v61 = vld [vmem:[%s2394_s20 + $0xd8] sm:$0xf] }
 0x165   : >> { %1358 = vst [vmem:[%s2390_s15 + $0xd4] sm:$0xf] %v1357_v60  ;;  %v1361_v62 = vld [vmem:[%s2394_s20 + $0xdc] sm:$0xf]  ;;  %v1363_v63 = vld [vmem:[%s2394_s20 + $0xe0] sm:$0xf] }
 0x166   : >> { %1360 = vst [vmem:[%s2390_s15 + $0xd8] sm:$0xf] %v1359_v61  ;;  %1362 = vst [vmem:[%s2390_s15 + $0xdc] sm:$0xf] %v1361_v62  ;;  %v1365_v0 = vld [vmem:[%s2394_s20 + $0xe4] sm:$0xf] }
 0x167   : >> { %1364 = vst [vmem:[%s2390_s15 + $0xe0] sm:$0xf] %v1363_v63  ;;  %v1367_v1 = vld [vmem:[%s2394_s20 + $0xe8] sm:$0xf]  ;;  %v1369_v2 = vld [vmem:[%s2394_s20 + $0xec] sm:$0xf] }
 0x168   : >> { %1366 = vst [vmem:[%s2390_s15 + $0xe4] sm:$0xf] %v1365_v0  ;;  %1368 = vst [vmem:[%s2390_s15 + $0xe8] sm:$0xf] %v1367_v1  ;;  %v1371_v3 = vld [vmem:[%s2394_s20 + $0xf0] sm:$0xf] }
 0x169   : >> { %1370 = vst [vmem:[%s2390_s15 + $0xec] sm:$0xf] %v1369_v2  ;;  %v1373_v4 = vld [vmem:[%s2394_s20 + $0xf4] sm:$0xf]  ;;  %v1375_v5 = vld [vmem:[%s2394_s20 + $0xf8] sm:$0xf] }
 0x16a   : >> { %1372 = vst [vmem:[%s2390_s15 + $0xf0] sm:$0xf] %v1371_v3  ;;  %1374 = vst [vmem:[%s2390_s15 + $0xf4] sm:$0xf] %v1373_v4  ;;  %v1377_v6 = vld [vmem:[%s2394_s20 + $0xfc] sm:$0xf] }
 0x16b   : >> { %1376 = vst [vmem:[%s2390_s15 + $0xf8] sm:$0xf] %v1375_v5  ;;  %1378 = vst [vmem:[%s2390_s15 + $0xfc] sm:$0xf] %v1377_v6  ;;  %s2869_s25 = smov (%p1380_p11, %s1379_s25), 0  ;;  %s1245_s24 = sadd.s32 1, %s2402_s24  }
 0x16c   : >> { %s1830_s26 = sshll.u32 %s2869_s25, 8  ;;  %p1244_p12 = scmp.ge.s32.totalorder %s1245_s24, %s2669_s22 }
 0x16d   : >> { %s1384_s20 = scalar_lea.vmem %s2566_s10, %s1830_s26 [#allocation2]   ;;  %s1385_s15 = scalar_lea.vmem %s2663_s18, %s1830_s26  }
 0x16e   : >> { %s2862_s23 = smov %s2869_s25  ;;  %1247 = sbr.rel (!%p1244_p12) target bundleno = 321 (0x141), region = 118 }
 0x175 PF: > { %s2837_s27 = sand.u32 63, %s2867_s11   ;;  %s1905_s28 = sshll.u32 %s2669_s22, 8 }
 0x176   : > { %s1390_s29 = scalar_lea.vmem %s2566_s10, %s1905_s28 [#allocation2]   ;;  %s1392_s30 = scalar_lea.vmem %s2663_s18, %s1905_s28  }
 0x177   : > { %p1835_p13 = scmp.le.s32.totalorder %s2837_s27, 0 }
 0x178   : > { %s2404_s4 = smov (!%p1835_p13), %s1392_s30   ;;  %s2408_s5 = smov (!%p1835_p13), %s1390_s29  }
 0x179   : > { %1654 = sbr.rel (%p1835_p13) target bundleno = 394 (0x18a), region = 123  ;;  %s2412_s6 = smov (!%p1835_p13), 0  }
 0x17a   : > { %s2416_s7 = smov (!%p1835_p13), 0  }
 0x180 LB: >> { %v1402_v35 = vld [vmem:[%s2410_s5] sm:$0xf]  ;;  %s1404_s8 = sadd.s32 1, %s2414_s6  ;;  %s1396_s7 = sadd.s32 1, %s2418_s7   ;;  %s2418_s7 = sphi %s2416_s7, %s1396_s7   ;;  %s2414_s6 = sphi %s2412_s6, %s2413_s6   ;;  %s2410_s5 = sphi %s2408_s5, %s1409_s5   ;;  %s2406_s4 = sphi %s2404_s4, %s1410_s4  }
 0x181   : >> { %1403 = vst [vmem:[%s2406_s4] sm:$0xf] %v1402_v35  ;;  %p1405_p0 = scmp.ge.s32.totalorder %s1404_s8, %s2837_s27  ;;  %p1395_p1 = scmp.ge.s32.totalorder %s1396_s7, %s2837_s27 }
 0x183   : >> { %s2871_s8 = smov (%p1405_p0, %s1404_s8), 0  ;;  %1398 = sbr.rel (!%p1395_p1) target bundleno = 384 (0x180), region = 129 }
 0x184   : >> { %s1836_s9 = sshll.u32 %s2871_s8, 2  ;;  %s2413_s6 = smov %s2871_s8  }
 0x185   : >> { %s1409_s5 = scalar_lea.vmem %s1390_s29, %s1836_s9 [#allocation2]   ;;  %s1410_s4 = scalar_lea.vmem %s1392_s30, %s1836_s9  }
 0x18a PF: > { %p10_p2 = scmp.ge.s32.totalorder %s2455_s16, 6   ;;  %s2863_s12 = smov %s2382_s13 }
 0x18b   : > { %s2864_s13 = smov %s2463_s19  ;;  %s2865_s14 = smov %s2455_s16 }
 0x18c   :  { %12 = sbr.rel (!%p10_p2) target bundleno = 2 (0x2), region = 140 }

// kernel: vae_forward.11
= control target key start
LH: loop header
LB: loop body
LE: loop exit
PB: predicated region body
PF: predicated region fallthrough
CT: control target
= control target key end

     0   :  { %s2256_s12 = smov 0   ;;  %s2258_s13 = smov 0   ;;  %s2608_s0 = inlined_call_operand.vmem [shape: bf16[392,512], index: 0, kind: input, shape index: {}]   ;;  %s2609_s1 = inlined_call_operand.vmem [shape: bf16[512,128], index: 1, kind: input, shape index: {}]   ;;  %s2610_s2 = inlined_call_operand.vmem [shape: f32[1,128], index: 2, kind: input, shape index: {}]   ;;  %s2611_s3 = inlined_call_operand.vmem [shape: bf16[392,128], index: 3, kind: output, shape index: {}]  }
   0x1   :  { %s2260_s14 = smov 0  }
   0x2 LB: > { %s2269_s15 = sadd.s32 4294967295, %s2202_s14   ;;  %s2271_s16 = sadd.s32 1, %s2202_s14   ;;  %s2202_s14 = sphi %s2260_s14, %s2618_s14   ;;  %s2198_s13 = sphi %s2258_s13, %s2617_s13   ;;  %s2194_s12 = sphi %s2256_s12, %s2616_s12  }
   0x3   : > { %s85_s17 = ssub.s32 %s2202_s14, %s2271_s16  ;;  %s88_s18 = sadd.s32 1, %s2198_s13 }
   0x4   : > { %p86_p0 = scmp.eq.s32.totalorder %s85_s17, 0  ;;  %p98_p1 = scmp.ne.s32.totalorder %s2198_s13, %s2194_s12 }
   0x5   : > { %p99_p2 = scmp.eq.s32.totalorder %s2269_s15, 1  ;;  %p1525_p3 = scmp.ge.s32.totalorder %s2202_s14, 1 }
   0x6   : > { %s2279_s19 = scalar_select %p86_p0, %s2198_s13, %s88_s18  }
   0x7   : > { %p2281_p4 = por %p99_p2, %p98_p1  ;;  %p149_p5 = scmp.lt.s32.totalorder %s2202_s14, 3 }
   0x9   : > { %p150_p6 = pnand %p1525_p3, %p149_p5 }
   0xa   : > { %v2034_v0 = vld [vmem:[%s2609_s1 + $0x40] sm:$0xff] (!%p150_p6)   ;;  %v2038_v4 = vld [vmem:[%s2609_s1 + $0x48] sm:$0xff] (!%p150_p6)   ;;  %v2042_v8 = vld [vmem:[%s2609_s1 + $0x50] sm:$0xff] (!%p150_p6)   ;;  %s2331_s30 = smul.u32 (!%p150_p6), 26, %s2269_s15  ;;  %s175_s5 = sand.u32 (!%p150_p6), 1, %s2194_s12  }
   0xb   : > { %153 = sbr.rel (%p150_p6) target bundleno = 445 (0x1bd), region = 32  ;;  %v2035_v1 = vld [vmem:[%s2609_s1 + $0xc0] sm:$0xff] (!%p150_p6)   ;;  %1756 = vmatprep.subr.bf16.mxu0 (!%p150_p6), %v2034_v0  ;;  %v2039_v5 = vld [vmem:[%s2609_s1 + $0xc8] sm:$0xff] (!%p150_p6)   ;;  %v2043_v9 = vld [vmem:[%s2609_s1 + $0xd0] sm:$0xff] (!%p150_p6)  }
   0xc   : > { %v2036_v2 = vld [vmem:[%s2609_s1] sm:$0xff] (!%p150_p6)   ;;  %1850 = vmatprep.subr.bf16.mxu1 (!%p150_p6), %v2035_v1  ;;  %v2040_v6 = vld [vmem:[%s2609_s1 + $0x8] sm:$0xff] (!%p150_p6)   ;;  %v2044_v10 = vld [vmem:[%s2609_s1 + $0x10] sm:$0xff] (!%p150_p6)   ;;  %p184_p7 = scmp.lt.s32.totalorder (!%p150_p6), %s2331_s30, 48  ;;  %s1944_s6 = smul.u32 (!%p150_p6), 104, %s175_s5 }
   0xd   : > { %v2037_v3 = vld [vmem:[%s2609_s1 + $0x80] sm:$0xff] (!%p150_p6)   ;;  %1757 = vmatpush3.bf16.msra.mxu0 (!%p150_p6), %v2036_v2  ;;  %v2041_v7 = vld [vmem:[%s2609_s1 + $0x88] sm:$0xff] (!%p150_p6)   ;;  %v2045_v11 = vld [vmem:[%s2609_s1 + $0x90] sm:$0xff] (!%p150_p6)  }
   0xe   : > { %1851 = vmatpush3.bf16.msra.mxu1 (!%p150_p6), %v2037_v3  ;;  %1758 = vmatprep.subr.bf16.mxu0 (!%p150_p6), %v2038_v4  ;;  %v2046_v12 = vld [vmem:[%s2609_s1 + $0x58] sm:$0xff] (!%p150_p6)   ;;  %v2050_v16 = vld [vmem:[%s2609_s1 + $0x60] sm:$0xff] (!%p150_p6)   ;;  %v2054_v20 = vld [vmem:[%s2609_s1 + $0x68] sm:$0xff] (!%p150_p6)   ;;  %s2452_s12 = scalar_lea.vmem (!%p150_p6), [#allocation2], %s1944_s6  }
   0xf   : > { %1852 = vmatprep.subr.bf16.mxu1 (!%p150_p6), %v2039_v5  ;;  %v2047_v13 = vld [vmem:[%s2609_s1 + $0xd8] sm:$0xff] (!%p150_p6)   ;;  %v2051_v17 = vld [vmem:[%s2609_s1 + $0xe0] sm:$0xff] (!%p150_p6)   ;;  %v2055_v21 = vld [vmem:[%s2609_s1 + $0xe8] sm:$0xff] (!%p150_p6)  }
  0x10   : > { %v2048_v14 = vld [vmem:[%s2609_s1 + $0x18] sm:$0xff] (!%p150_p6)   ;;  %v2052_v18 = vld [vmem:[%s2609_s1 + $0x20] sm:$0xff] (!%p150_p6)   ;;  %v2056_v22 = vld [vmem:[%s2609_s1 + $0x28] sm:$0xff] (!%p150_p6)  }
  0x11   : > { %1759 = vmatpush3.bf16.msra.mxu0 (!%p150_p6), %v2040_v6  ;;  %v2049_v15 = vld [vmem:[%s2609_s1 + $0x98] sm:$0xff] (!%p150_p6)   ;;  %v2053_v19 = vld [vmem:[%s2609_s1 + $0xa0] sm:$0xff] (!%p150_p6)   ;;  %v2057_v23 = vld [vmem:[%s2609_s1 + $0xa8] sm:$0xff] (!%p150_p6)  }
  0x12   : > { %1853 = vmatpush3.bf16.msra.mxu1 %v2041_v7  ;;  %1760 = vmatprep.subr.bf16.mxu0 %v2042_v8  ;;  %s185_s26 = scalar_select %p184_p7, %s2331_s30, 48  ;;  %v2058_v24 = vld [vmem:[%s2609_s1 + $0x70] sm:$0xff]   ;;  %v2062_v28 = vld [vmem:[%s2609_s1 + $0x78] sm:$0xff]  }
  0x13   : > { %1854 = vmatprep.subr.bf16.mxu1 %v2043_v9  ;;  %v2059_v25 = vld [vmem:[%s2609_s1 + $0xf0] sm:$0xff]   ;;  %v2063_v29 = vld [vmem:[%s2609_s1 + $0xf8] sm:$0xff]   ;;  %s1214_s7 = ssub.s32 (%p2281_p4), 49, %s2331_s30  ;;  %s1678_s8 = smul.u32 (%p2281_p4), 104, %s2269_s15 }
  0x14   : > { %v2060_v26 = vld [vmem:[%s2609_s1 + $0x30] sm:$0xff]   ;;  %s1651_s9 = sshll.u32 %s185_s26, 4  ;;  %v2064_v30 = vld [vmem:[%s2609_s1 + $0x38] sm:$0xff]   ;;  %p1215_p8 = scmp.lt.s32.totalorder (%p2281_p4), %s1214_s7, 26 }
  0x15   : > { %1761 = vmatpush3.bf16.msra.mxu0 %v2044_v10  ;;  %v2061_v27 = vld [vmem:[%s2609_s1 + $0xb0] sm:$0xff]   ;;  %s2383_s24 = scalar_lea.vmem %s2608_s0, %s1651_s9  ;;  %v2065_v31 = vld [vmem:[%s2609_s1 + $0xb8] sm:$0xff]   ;;  %s2497_s11 = scalar_lea.vmem (%p2281_p4), %s2611_s3, %s1678_s8  }
  0x16   : > { %1855 = vmatpush3.bf16.msra.mxu1 %v2045_v11  ;;  %1762 = vmatprep.subr.bf16.mxu0 %v2046_v12  ;;  %v2066_v32 = vld [vmem:[%s2383_s24] ss:$16 sps:$4 sm:$0xff]   ;;  %v2068_v33 = vld [vmem:[%s2383_s24 + $0x4] ss:$16 sps:$4 sm:$0xff]   ;;  %v2069_v34 = vld [vmem:[%s2383_s24 + $0x8] ss:$16 sps:$4 sm:$0xff]  }
  0x17   : > { %1856 = vmatprep.subr.bf16.mxu1 %v2047_v13  ;;  %v2071_v35 = vld [vmem:[%s2383_s24 + $0xc] ss:$16 sps:$4 sm:$0xff]   ;;  %808 = vmatprep.mubr.bf16.mxu0 %v2068_v33  ;;  %v2072_v36 = vld [vmem:[%s2383_s24 + $0x24] ss:$16 sps:$4 sm:$0xff]   ;;  %v2076_v38 = vld [vmem:[%s2383_s24 + $0x20] ss:$16 sps:$4 sm:$0xff]  }
  0x18   : > { %945 = vmatprep.mubr.bf16.mxu1 %v2071_v35  ;;  %v2074_v37 = vld [vmem:[%s2383_s24 + $0x2c] ss:$16 sps:$4 sm:$0xff]   ;;  %v2077_v39 = vld [vmem:[%s2383_s24 + $0x28] ss:$16 sps:$4 sm:$0xff]   ;;  %v2078_v40 = vld [vmem:[%s2383_s24 + $0x44] ss:$16 sps:$4 sm:$0xff]  }
  0x19   : > { %1763 = vmatpush3.bf16.msra.mxu0 %v2048_v14  ;;  %v2080_v41 = vld [vmem:[%s2383_s24 + $0x4c] ss:$16 sps:$4 sm:$0xff]   ;;  %v2082_v42 = vld [vmem:[%s2383_s24 + $0x40] ss:$16 sps:$4 sm:$0xff]   ;;  %v2083_v43 = vld [vmem:[%s2383_s24 + $0x48] ss:$16 sps:$4 sm:$0xff]  }
  0x1a   : > { %1857 = vmatpush3.bf16.msra.mxu1 %v2049_v15  ;;  %1764 = vmatprep.subr.bf16.mxu0 %v2050_v16  ;;  %v2084_v44 = vld [vmem:[%s2383_s24 + $0x64] ss:$16 sps:$4 sm:$0xff]   ;;  %v2086_v45 = vld [vmem:[%s2383_s24 + $0x6c] ss:$16 sps:$4 sm:$0xff]   ;;  %v2088_v46 = vld [vmem:[%s2383_s24 + $0x60] ss:$16 sps:$4 sm:$0xff]  }
  0x1b   : > { %1858 = vmatprep.subr.bf16.mxu1 %v2051_v17  ;;  %v2089_v47 = vld [vmem:[%s2383_s24 + $0x68] ss:$16 sps:$4 sm:$0xff]   ;;  %v2090_v48 = vld [vmem:[%s2383_s24 + $0x84] ss:$16 sps:$4 sm:$0xff]   ;;  %v2092_v49 = vld [vmem:[%s2383_s24 + $0x8c] ss:$16 sps:$4 sm:$0xff]  }
  0x1c   : > { %v2094_v50 = vld [vmem:[%s2383_s24 + $0x80] ss:$16 sps:$4 sm:$0xff]   ;;  %v2095_v51 = vld [vmem:[%s2383_s24 + $0x88] ss:$16 sps:$4 sm:$0xff]   ;;  %v2096_v52 = vld [vmem:[%s2383_s24 + $0xa4] ss:$16 sps:$4 sm:$0xff]  }
  0x1d   : > { %1765 = vmatpush3.bf16.msra.mxu0 %v2052_v18  ;;  %v2098_v53 = vld [vmem:[%s2383_s24 + $0xac] ss:$16 sps:$4 sm:$0xff]   ;;  %v2100_v54 = vld [vmem:[%s2383_s24 + $0xa0] ss:$16 sps:$4 sm:$0xff]   ;;  %v2101_v55 = vld [vmem:[%s2383_s24 + $0xa8] ss:$16 sps:$4 sm:$0xff]  }
  0x1e   : > { %1859 = vmatpush3.bf16.msra.mxu1 %v2053_v19  ;;  %1766 = vmatprep.subr.bf16.mxu0 %v2054_v20  ;;  %v2102_v56 = vld [vmem:[%s2383_s24 + $0xc4] ss:$16 sps:$4 sm:$0xff]   ;;  %v2104_v57 = vld [vmem:[%s2383_s24 + $0xcc] ss:$16 sps:$4 sm:$0xff]   ;;  %v2106_v58 = vld [vmem:[%s2383_s24 + $0xc0] ss:$16 sps:$4 sm:$0xff]  }
  0x1f   : > { %1860 = vmatprep.subr.bf16.mxu1 %v2055_v21  ;;  %v2107_v59 = vld [vmem:[%s2383_s24 + $0xc8] ss:$16 sps:$4 sm:$0xff]   ;;  %v2108_v60 = vld [vmem:[%s2383_s24 + $0xe4] ss:$16 sps:$4 sm:$0xff]   ;;  %v2110_v61 = vld [vmem:[%s2383_s24 + $0xec] ss:$16 sps:$4 sm:$0xff]  }
  0x20   : > { %v2112_v62 = vld [vmem:[%s2383_s24 + $0xe0] ss:$16 sps:$4 sm:$0xff]   ;;  %v2113_v63 = vld [vmem:[%s2383_s24 + $0xe8] ss:$16 sps:$4 sm:$0xff]   ;;  %v2114_v0 = vld [vmem:[%s2383_s24 + $0x104] ss:$16 sps:$4 sm:$0xff]  }
  0x21   : > { %1767 = vmatpush3.bf16.msra.mxu0 %v2056_v22  ;;  %v2116_v1 = vld [vmem:[%s2383_s24 + $0x10c] ss:$16 sps:$4 sm:$0xff]   ;;  %v2118_v2 = vld [vmem:[%s2383_s24 + $0x100] ss:$16 sps:$4 sm:$0xff]   ;;  %v2119_v3 = vld [vmem:[%s2383_s24 + $0x108] ss:$16 sps:$4 sm:$0xff]  }
  0x22   : > { %1861 = vmatpush3.bf16.msra.mxu1 %v2057_v23  ;;  %1768 = vmatprep.subr.bf16.mxu0 %v2058_v24  ;;  %v2120_v4 = vld [vmem:[%s2383_s24 + $0x124] ss:$16 sps:$4 sm:$0xff]   ;;  %v2122_v5 = vld [vmem:[%s2383_s24 + $0x12c] ss:$16 sps:$4 sm:$0xff]   ;;  %v2124_v6 = vld [vmem:[%s2383_s24 + $0x120] ss:$16 sps:$4 sm:$0xff]  }
  0x23   : > { %1862 = vmatprep.subr.bf16.mxu1 %v2059_v25  ;;  %v2125_v7 = vld [vmem:[%s2383_s24 + $0x128] ss:$16 sps:$4 sm:$0xff]   ;;  %v2126_v8 = vld [vmem:[%s2383_s24 + $0x144] ss:$16 sps:$4 sm:$0xff]   ;;  %v2128_v9 = vld [vmem:[%s2383_s24 + $0x14c] ss:$16 sps:$4 sm:$0xff]  }
  0x24   : > { %v2130_v10 = vld [vmem:[%s2383_s24 + $0x140] ss:$16 sps:$4 sm:$0xff]   ;;  %v2131_v11 = vld [vmem:[%s2383_s24 + $0x148] ss:$16 sps:$4 sm:$0xff]   ;;  %v2132_v12 = vld [vmem:[%s2383_s24 + $0x164] ss:$16 sps:$4 sm:$0xff]  }
  0x25   : > { %1769 = vmatpush3.bf16.msra.mxu0 %v2060_v26  ;;  %v2134_v13 = vld [vmem:[%s2383_s24 + $0x16c] ss:$16 sps:$4 sm:$0xff]   ;;  %v2136_v14 = vld [vmem:[%s2383_s24 + $0x160] ss:$16 sps:$4 sm:$0xff]   ;;  %v2137_v15 = vld [vmem:[%s2383_s24 + $0x168] ss:$16 sps:$4 sm:$0xff]  }
  0x26   : > { %1863 = vmatpush3.bf16.msra.mxu1 %v2061_v27  ;;  %1770 = vmatprep.subr.bf16.mxu0 %v2062_v28  ;;  %v2138_v16 = vld [vmem:[%s2383_s24 + $0x184] ss:$16 sps:$4 sm:$0xff]   ;;  %v2140_v17 = vld [vmem:[%s2383_s24 + $0x18c] ss:$16 sps:$4 sm:$0xff]   ;;  %v2142_v18 = vld [vmem:[%s2383_s24 + $0x180] ss:$16 sps:$4 sm:$0xff]  }
  0x27   : > { %1864 = vmatprep.subr.bf16.mxu1 %v2063_v29  ;;  %v2143_v19 = vld [vmem:[%s2383_s24 + $0x188] ss:$16 sps:$4 sm:$0xff]   ;;  %v2446_v22 = vld [vmem:[%s2610_s2] ss:$0 sm:$0xff] }
  0x29   : > { %1771 = vmatpush3.bf16.msra.mxu0 %v2064_v30 }
  0x2a   : > { %1865 = vmatpush3.bf16.msra.mxu1 %v2065_v31 }
  0x2c   : > { %809 = vmatmul.mubr.bf16.vlgmr.msra.gmra.mrb[0].mxu0 %v2066_v32 }
  0x2d   : > { %946 = vmatmul.mubr.bf16.vlgmr.msra.gmra.mrb[0].mxu1 %v2069_v34  ;;  %816 = vmatprep.mubr.bf16.mxu0 %v2072_v36 }
  0x2e   : > { %953 = vmatprep.mubr.bf16.mxu1 %v2074_v37 }
  0x34   : > { %817 = vmatmul.mubr.bf16.gmra.mrb[4].mxu0 %v2076_v38 }
  0x35   : > { %954 = vmatmul.mubr.bf16.gmra.mrb[4].mxu1 %v2077_v39  ;;  %824 = vmatprep.mubr.bf16.mxu0 %v2078_v40 }
  0x36   : > { %961 = vmatprep.mubr.bf16.mxu1 %v2080_v41 }
  0x3c   : > { %825 = vmatmul.mubr.bf16.gmra.mrb[8].mxu0 %v2082_v42 }
  0x3d   : > { %962 = vmatmul.mubr.bf16.gmra.mrb[8].mxu1 %v2083_v43  ;;  %832 = vmatprep.mubr.bf16.mxu0 %v2084_v44 }
  0x3e   : > { %969 = vmatprep.mubr.bf16.mxu1 %v2086_v45 }
  0x44   : > { %833 = vmatmul.mubr.bf16.gmra.mrb[12].mxu0 %v2088_v46 }
  0x45   : > { %970 = vmatmul.mubr.bf16.gmra.mrb[12].mxu1 %v2089_v47  ;;  %840 = vmatprep.mubr.bf16.mxu0 %v2090_v48 }
  0x46   : > { %977 = vmatprep.mubr.bf16.mxu1 %v2092_v49 }
  0x4c   : > { %841 = vmatmul.mubr.bf16.gmra.mrb[16].mxu0 %v2094_v50 }
  0x4d   : > { %978 = vmatmul.mubr.bf16.gmra.mrb[16].mxu1 %v2095_v51  ;;  %848 = vmatprep.mubr.bf16.mxu0 %v2096_v52 }
  0x4e   : > { %985 = vmatprep.mubr.bf16.mxu1 %v2098_v53 }
  0x54   : > { %849 = vmatmul.mubr.bf16.gmra.mrb[20].mxu0 %v2100_v54 }
  0x55   : > { %986 = vmatmul.mubr.bf16.gmra.mrb[20].mxu1 %v2101_v55  ;;  %856 = vmatprep.mubr.bf16.mxu0 %v2102_v56 }
  0x56   : > { %993 = vmatprep.mubr.bf16.mxu1 %v2104_v57 }
  0x5c   : > { %857 = vmatmul.mubr.bf16.gmra.mrb[24].mxu0 %v2106_v58 }
  0x5d   : > { %994 = vmatmul.mubr.bf16.gmra.mrb[24].mxu1 %v2107_v59  ;;  %864 = vmatprep.mubr.bf16.mxu0 %v2108_v60 }
  0x5e   : > { %1001 = vmatprep.mubr.bf16.mxu1 %v2110_v61 }
  0x64   : > { %865 = vmatmul.mubr.bf16.gmra.mrb[28].mxu0 %v2112_v62 }
  0x65   : > { %1002 = vmatmul.mubr.bf16.gmra.mrb[28].mxu1 %v2113_v63  ;;  %872 = vmatprep.mubr.bf16.mxu0 %v2114_v0 }
  0x66   : > { %1009 = vmatprep.mubr.bf16.mxu1 %v2116_v1 }
  0x6c   : > { %873 = vmatmul.mubr.bf16.gmra.mrb[32].mxu0 %v2118_v2 }
  0x6d   : > { %1010 = vmatmul.mubr.bf16.gmra.mrb[32].mxu1 %v2119_v3  ;;  %880 = vmatprep.mubr.bf16.mxu0 %v2120_v4 }
  0x6e   : > { %1017 = vmatprep.mubr.bf16.mxu1 %v2122_v5 }
  0x74   : > { %881 = vmatmul.mubr.bf16.gmra.mrb[36].mxu0 %v2124_v6 }
  0x75   : > { %1018 = vmatmul.mubr.bf16.gmra.mrb[36].mxu1 %v2125_v7  ;;  %888 = vmatprep.mubr.bf16.mxu0 %v2126_v8 }
  0x76   : > { %1025 = vmatprep.mubr.bf16.mxu1 %v2128_v9 }
  0x7c   : > { %889 = vmatmul.mubr.bf16.gmra.mrb[40].mxu0 %v2130_v10 }
  0x7d   : > { %1026 = vmatmul.mubr.bf16.gmra.mrb[40].mxu1 %v2131_v11  ;;  %896 = vmatprep.mubr.bf16.mxu0 %v2132_v12 }
  0x7e   : > { %1033 = vmatprep.mubr.bf16.mxu1 %v2134_v13 }
  0x84   : > { %897 = vmatmul.mubr.bf16.gmra.mrb[44].mxu0 %v2136_v14 }
  0x85   : > { %1034 = vmatmul.mubr.bf16.gmra.mrb[44].mxu1 %v2137_v15  ;;  %904 = vmatprep.mubr.bf16.mxu0 %v2138_v16 }
  0x86   : > { %1041 = vmatprep.mubr.bf16.mxu1 %v2140_v17 }
  0x8c   : > { %905 = vmatmul.mubr.bf16.gmra.mrb[48].mxu0 %v2142_v18 }
  0x8d   : > { %1042 = vmatmul.mubr.bf16.gmra.mrb[48].mxu1 %v2143_v19 }
  0xff   : > { %v1772_v20 = vpop.f32.mrb[0].mxu0 }
 0x100   : > { %v1866_v21 = vpop.f32.mrb[0].mxu1  ;;  %v1773_v23 = vpop.f32.mrb[1].mxu0 }
 0x101   : > { %v1774_v24 = vadd.f32 %v1773_v23, %v1772_v20  ;;  %v1867_v25 = vpop.f32.mrb[1].mxu1  ;;  %v1775_v26 = vpop.f32.mrb[2].mxu0 }
 0x102   : > { %v1868_v27 = vadd.f32 %v1867_v25, %v1866_v21  ;;  %v1869_v28 = vpop.f32.mrb[2].mxu1  ;;  %v1776_v29 = vpop.f32.mrb[3].mxu0 }
 0x103   : > { %v811_v30 = vadd.f32 %v1774_v24, %v2446_v22  ;;  %v1777_v31 = vadd.f32 %v1776_v29, %v1775_v26  ;;  %v1870_v32 = vpop.f32.mrb[3].mxu1 }
 0x104   : > { %v1871_v33 = vadd.f32 %v1870_v32, %v1869_v28 }
 0x105   : > { %v948_v34 = vadd.f32 %v1868_v27, %v811_v30  ;;  %v814_v35 = vadd.f32 %v1777_v31, %v2446_v22 }
 0x107   : > { %v951_v36 = vadd.f32 %v1871_v33, %v814_v35  ;;  %v1778_v37 = vpop.f32.mrb[4].mxu0  ;;  %v1050_v40 = vmax.f32 %v948_v34, 0.0 }
 0x108   : > { %v1872_v38 = vpop.f32.mrb[4].mxu1  ;;  %v1779_v39 = vpop.f32.mrb[5].mxu0 }
 0x109   : > { %v1051_v41 = vmax.f32 %v951_v36, 0.0  ;;  %v1780_v42 = vadd.f32 %v1779_v39, %v1778_v37  ;;  %v1873_v43 = vpop.f32.mrb[5].mxu1  ;;  %v1781_v44 = vpop.f32.mrb[6].mxu0 }
 0x10a   : > { %v1874_v45 = vadd.f32 %v1873_v43, %v1872_v38  ;;  %v1875_v46 = vpop.f32.mrb[6].mxu1  ;;  %v1782_v47 = vpop.f32.mrb[7].mxu0 }
 0x10b   : > { %v1682_v48 = vpack.c.bf16 %v1051_v41, %v1050_v40  ;;  %v819_v49 = vadd.f32 %v1780_v42, %v2446_v22  ;;  %v1783_v50 = vadd.f32 %v1782_v47, %v1781_v44  ;;  %v1876_v51 = vpop.f32.mrb[7].mxu1 }
 0x10c   : > { %v1877_v52 = vadd.f32 %v1876_v51, %v1875_v46 }
 0x10d   : > { %1683 = vst [vmem:[%s2452_s12] sm:$0xff] %v1682_v48   ;;  %v956_v53 = vadd.f32 %v1874_v45, %v819_v49  ;;  %v822_v54 = vadd.f32 %v1783_v50, %v2446_v22 }
 0x10f   : > { %v959_v55 = vadd.f32 %v1877_v52, %v822_v54  ;;  %v1784_v56 = vpop.f32.mrb[8].mxu0  ;;  %v1052_v59 = vmax.f32 %v956_v53, 0.0 }
 0x110   : > { %v1878_v57 = vpop.f32.mrb[8].mxu1  ;;  %v1785_v58 = vpop.f32.mrb[9].mxu0 }
 0x111   : > { %v1053_v60 = vmax.f32 %v959_v55, 0.0  ;;  %v1786_v61 = vadd.f32 %v1785_v58, %v1784_v56  ;;  %v1879_v62 = vpop.f32.mrb[9].mxu1  ;;  %v1787_v63 = vpop.f32.mrb[10].mxu0 }
 0x112   : > { %v1880_v0 = vadd.f32 %v1879_v62, %v1878_v57  ;;  %v1881_v1 = vpop.f32.mrb[10].mxu1  ;;  %v1788_v2 = vpop.f32.mrb[11].mxu0 }
 0x113   : > { %v1687_v3 = vpack.c.bf16 %v1053_v60, %v1052_v59  ;;  %v827_v4 = vadd.f32 %v1786_v61, %v2446_v22  ;;  %v1789_v5 = vadd.f32 %v1788_v2, %v1787_v63  ;;  %v1882_v6 = vpop.f32.mrb[11].mxu1 }
 0x114   : > { %v1883_v7 = vadd.f32 %v1882_v6, %v1881_v1 }
 0x115   : > { %1744 = vst [vmem:[%s2452_s12 + $0x8] sm:$0xff] %v1687_v3   ;;  %v964_v8 = vadd.f32 %v1880_v0, %v827_v4  ;;  %v830_v9 = vadd.f32 %v1789_v5, %v2446_v22 }
 0x117   : > { %v967_v10 = vadd.f32 %v1883_v7, %v830_v9  ;;  %v1790_v11 = vpop.f32.mrb[12].mxu0  ;;  %v1054_v14 = vmax.f32 %v964_v8, 0.0 }
 0x118   : > { %v1884_v12 = vpop.f32.mrb[12].mxu1  ;;  %v1791_v13 = vpop.f32.mrb[13].mxu0 }
 0x119   : > { %v1055_v15 = vmax.f32 %v967_v10, 0.0  ;;  %v1792_v16 = vadd.f32 %v1791_v13, %v1790_v11  ;;  %v1885_v17 = vpop.f32.mrb[13].mxu1  ;;  %v1793_v18 = vpop.f32.mrb[14].mxu0 }
 0x11a   : > { %v1886_v19 = vadd.f32 %v1885_v17, %v1884_v12  ;;  %v1887_v20 = vpop.f32.mrb[14].mxu1  ;;  %v1794_v21 = vpop.f32.mrb[15].mxu0 }
 0x11b   : > { %v1692_v23 = vpack.c.bf16 %v1055_v15, %v1054_v14  ;;  %v835_v24 = vadd.f32 %v1792_v16, %v2446_v22  ;;  %v1795_v25 = vadd.f32 %v1794_v21, %v1793_v18  ;;  %v1888_v26 = vpop.f32.mrb[15].mxu1 }
 0x11c   : > { %v1889_v27 = vadd.f32 %v1888_v26, %v1887_v20 }
 0x11d   : > { %1745 = vst [vmem:[%s2452_s12 + $0x10] sm:$0xff] %v1692_v23   ;;  %v972_v28 = vadd.f32 %v1886_v19, %v835_v24  ;;  %v838_v29 = vadd.f32 %v1795_v25, %v2446_v22 }
 0x11f   : > { %v975_v30 = vadd.f32 %v1889_v27, %v838_v29  ;;  %v1796_v31 = vpop.f32.mrb[16].mxu0  ;;  %v1056_v34 = vmax.f32 %v972_v28, 0.0 }
 0x120   : > { %v1890_v32 = vpop.f32.mrb[16].mxu1  ;;  %v1797_v33 = vpop.f32.mrb[17].mxu0 }
 0x121   : > { %v1057_v35 = vmax.f32 %v975_v30, 0.0  ;;  %v1798_v36 = vadd.f32 %v1797_v33, %v1796_v31  ;;  %v1891_v37 = vpop.f32.mrb[17].mxu1  ;;  %v1799_v38 = vpop.f32.mrb[18].mxu0 }
 0x122   : > { %v1892_v39 = vadd.f32 %v1891_v37, %v1890_v32  ;;  %v1893_v40 = vpop.f32.mrb[18].mxu1  ;;  %v1800_v41 = vpop.f32.mrb[19].mxu0 }
 0x123   : > { %v1697_v42 = vpack.c.bf16 %v1057_v35, %v1056_v34  ;;  %v843_v43 = vadd.f32 %v1798_v36, %v2446_v22  ;;  %v1801_v44 = vadd.f32 %v1800_v41, %v1799_v38  ;;  %v1894_v45 = vpop.f32.mrb[19].mxu1 }
 0x124   : > { %v1895_v46 = vadd.f32 %v1894_v45, %v1893_v40 }
 0x125   : > { %1746 = vst [vmem:[%s2452_s12 + $0x18] sm:$0xff] %v1697_v42   ;;  %v980_v47 = vadd.f32 %v1892_v39, %v843_v43  ;;  %v846_v48 = vadd.f32 %v1801_v44, %v2446_v22 }
 0x127   : > { %v983_v49 = vadd.f32 %v1895_v46, %v846_v48  ;;  %v1802_v50 = vpop.f32.mrb[20].mxu0  ;;  %v1058_v53 = vmax.f32 %v980_v47, 0.0 }
 0x128   : > { %v1896_v51 = vpop.f32.mrb[20].mxu1  ;;  %v1803_v52 = vpop.f32.mrb[21].mxu0 }
 0x129   : > { %v1059_v54 = vmax.f32 %v983_v49, 0.0  ;;  %v1804_v55 = vadd.f32 %v1803_v52, %v1802_v50  ;;  %v1897_v56 = vpop.f32.mrb[21].mxu1  ;;  %v1805_v57 = vpop.f32.mrb[22].mxu0 }
 0x12a   : > { %v1898_v58 = vadd.f32 %v1897_v56, %v1896_v51  ;;  %v1899_v59 = vpop.f32.mrb[22].mxu1  ;;  %v1806_v60 = vpop.f32.mrb[23].mxu0 }
 0x12b   : > { %v1702_v61 = vpack.c.bf16 %v1059_v54, %v1058_v53  ;;  %v851_v62 = vadd.f32 %v1804_v55, %v2446_v22  ;;  %v1807_v63 = vadd.f32 %v1806_v60, %v1805_v57  ;;  %v1900_v0 = vpop.f32.mrb[23].mxu1 }
 0x12c   : > { %v1901_v1 = vadd.f32 %v1900_v0, %v1899_v59 }
 0x12d   : > { %1747 = vst [vmem:[%s2452_s12 + $0x20] sm:$0xff] %v1702_v61   ;;  %v988_v2 = vadd.f32 %v1898_v58, %v851_v62  ;;  %v854_v3 = vadd.f32 %v1807_v63, %v2446_v22 }
 0x12f   : > { %v991_v4 = vadd.f32 %v1901_v1, %v854_v3  ;;  %v1808_v5 = vpop.f32.mrb[24].mxu0  ;;  %v1060_v8 = vmax.f32 %v988_v2, 0.0 }
 0x130   : > { %v1902_v6 = vpop.f32.mrb[24].mxu1  ;;  %v1809_v7 = vpop.f32.mrb[25].mxu0 }
 0x131   : > { %v1061_v9 = vmax.f32 %v991_v4, 0.0  ;;  %v1810_v10 = vadd.f32 %v1809_v7, %v1808_v5  ;;  %v1903_v11 = vpop.f32.mrb[25].mxu1  ;;  %v1811_v12 = vpop.f32.mrb[26].mxu0 }
 0x132   : > { %v1904_v13 = vadd.f32 %v1903_v11, %v1902_v6  ;;  %v1905_v14 = vpop.f32.mrb[26].mxu1  ;;  %v1812_v15 = vpop.f32.mrb[27].mxu0 }
 0x133   : > { %v1707_v16 = vpack.c.bf16 %v1061_v9, %v1060_v8  ;;  %v859_v17 = vadd.f32 %v1810_v10, %v2446_v22  ;;  %v1813_v18 = vadd.f32 %v1812_v15, %v1811_v12  ;;  %v1906_v19 = vpop.f32.mrb[27].mxu1 }
 0x134   : > { %v1907_v20 = vadd.f32 %v1906_v19, %v1905_v14 }
 0x135   : > { %1748 = vst [vmem:[%s2452_s12 + $0x28] sm:$0xff] %v1707_v16   ;;  %v996_v21 = vadd.f32 %v1904_v13, %v859_v17  ;;  %v862_v23 = vadd.f32 %v1813_v18, %v2446_v22 }
 0x137   : > { %v999_v24 = vadd.f32 %v1907_v20, %v862_v23  ;;  %v1814_v25 = vpop.f32.mrb[28].mxu0  ;;  %v1062_v28 = vmax.f32 %v996_v21, 0.0 }
 0x138   : > { %v1908_v26 = vpop.f32.mrb[28].mxu1  ;;  %v1815_v27 = vpop.f32.mrb[29].mxu0 }
 0x139   : > { %v1063_v29 = vmax.f32 %v999_v24, 0.0  ;;  %v1816_v30 = vadd.f32 %v1815_v27, %v1814_v25  ;;  %v1909_v31 = vpop.f32.mrb[29].mxu1  ;;  %v1817_v32 = vpop.f32.mrb[30].mxu0 }
 0x13a   : > { %v1910_v33 = vadd.f32 %v1909_v31, %v1908_v26  ;;  %v1911_v34 = vpop.f32.mrb[30].mxu1  ;;  %v1818_v35 = vpop.f32.mrb[31].mxu0 }
 0x13b   : > { %v1712_v36 = vpack.c.bf16 %v1063_v29, %v1062_v28  ;;  %v867_v37 = vadd.f32 %v1816_v30, %v2446_v22  ;;  %v1819_v38 = vadd.f32 %v1818_v35, %v1817_v32  ;;  %v1912_v39 = vpop.f32.mrb[31].mxu1 }
 0x13c   : > { %v1913_v40 = vadd.f32 %v1912_v39, %v1911_v34 }
 0x13d   : > { %1749 = vst [vmem:[%s2452_s12 + $0x30] sm:$0xff] %v1712_v36   ;;  %v1004_v41 = vadd.f32 %v1910_v33, %v867_v37  ;;  %v870_v42 = vadd.f32 %v1819_v38, %v2446_v22 }
 0x13f   : > { %v1007_v43 = vadd.f32 %v1913_v40, %v870_v42  ;;  %v1820_v44 = vpop.f32.mrb[32].mxu0  ;;  %v1064_v47 = vmax.f32 %v1004_v41, 0.0 }
 0x140   : > { %v1914_v45 = vpop.f32.mrb[32].mxu1  ;;  %v1821_v46 = vpop.f32.mrb[33].mxu0 }
 0x141   : > { %v1065_v48 = vmax.f32 %v1007_v43, 0.0  ;;  %v1822_v49 = vadd.f32 %v1821_v46, %v1820_v44  ;;  %v1915_v50 = vpop.f32.mrb[33].mxu1  ;;  %v1823_v51 = vpop.f32.mrb[34].mxu0 }
 0x142   : > { %v1916_v52 = vadd.f32 %v1915_v50, %v1914_v45  ;;  %v1917_v53 = vpop.f32.mrb[34].mxu1  ;;  %v1824_v54 = vpop.f32.mrb[35].mxu0 }
 0x143   : > { %v1717_v55 = vpack.c.bf16 %v1065_v48, %v1064_v47  ;;  %v875_v56 = vadd.f32 %v1822_v49, %v2446_v22  ;;  %v1825_v57 = vadd.f32 %v1824_v54, %v1823_v51  ;;  %v1918_v58 = vpop.f32.mrb[35].mxu1 }
 0x144   : > { %v1919_v59 = vadd.f32 %v1918_v58, %v1917_v53 }
 0x145   : > { %1750 = vst [vmem:[%s2452_s12 + $0x38] sm:$0xff] %v1717_v55   ;;  %v1012_v60 = vadd.f32 %v1916_v52, %v875_v56  ;;  %v878_v61 = vadd.f32 %v1825_v57, %v2446_v22 }
 0x147   : > { %v1015_v62 = vadd.f32 %v1919_v59, %v878_v61  ;;  %v1826_v63 = vpop.f32.mrb[36].mxu0  ;;  %v1066_v2 = vmax.f32 %v1012_v60, 0.0 }
 0x148   : > { %v1920_v0 = vpop.f32.mrb[36].mxu1  ;;  %v1827_v1 = vpop.f32.mrb[37].mxu0 }
 0x149   : > { %v1067_v3 = vmax.f32 %v1015_v62, 0.0  ;;  %v1828_v4 = vadd.f32 %v1827_v1, %v1826_v63  ;;  %v1921_v5 = vpop.f32.mrb[37].mxu1  ;;  %v1829_v6 = vpop.f32.mrb[38].mxu0 }
 0x14a   : > { %v1922_v7 = vadd.f32 %v1921_v5, %v1920_v0  ;;  %v1923_v8 = vpop.f32.mrb[38].mxu1  ;;  %v1830_v9 = vpop.f32.mrb[39].mxu0 }
 0x14b   : > { %v1722_v10 = vpack.c.bf16 %v1067_v3, %v1066_v2  ;;  %v883_v11 = vadd.f32 %v1828_v4, %v2446_v22  ;;  %v1831_v12 = vadd.f32 %v1830_v9, %v1829_v6  ;;  %v1924_v13 = vpop.f32.mrb[39].mxu1 }
 0x14c   : > { %v1925_v14 = vadd.f32 %v1924_v13, %v1923_v8 }
 0x14d   : > { %1751 = vst [vmem:[%s2452_s12 + $0x40] sm:$0xff] %v1722_v10   ;;  %v1020_v15 = vadd.f32 %v1922_v7, %v883_v11  ;;  %v886_v16 = vadd.f32 %v1831_v12, %v2446_v22 }
 0x14f   : > { %v1023_v17 = vadd.f32 %v1925_v14, %v886_v16  ;;  %v1832_v18 = vpop.f32.mrb[40].mxu0  ;;  %v1068_v21 = vmax.f32 %v1020_v15, 0.0 }
 0x150   : > { %v1926_v19 = vpop.f32.mrb[40].mxu1  ;;  %v1833_v20 = vpop.f32.mrb[41].mxu0 }
 0x151   : > { %v1069_v23 = vmax.f32 %v1023_v17, 0.0  ;;  %v1834_v24 = vadd.f32 %v1833_v20, %v1832_v18  ;;  %v1927_v25 = vpop.f32.mrb[41].mxu1  ;;  %v1835_v26 = vpop.f32.mrb[42].mxu0 }
 0x152   : > { %v1928_v27 = vadd.f32 %v1927_v25, %v1926_v19  ;;  %v1929_v28 = vpop.f32.mrb[42].mxu1  ;;  %v1836_v29 = vpop.f32.mrb[43].mxu0 }
 0x153   : > { %v1727_v30 = vpack.c.bf16 %v1069_v23, %v1068_v21  ;;  %v891_v31 = vadd.f32 %v1834_v24, %v2446_v22  ;;  %v1837_v32 = vadd.f32 %v1836_v29, %v1835_v26  ;;  %v1930_v33 = vpop.f32.mrb[43].mxu1 }
 0x154   : > { %v1931_v34 = vadd.f32 %v1930_v33, %v1929_v28 }
 0x155   : > { %1752 = vst [vmem:[%s2452_s12 + $0x48] sm:$0xff] %v1727_v30   ;;  %v1028_v35 = vadd.f32 %v1928_v27, %v891_v31  ;;  %v894_v36 = vadd.f32 %v1837_v32, %v2446_v22 }
 0x157   : > { %v1031_v37 = vadd.f32 %v1931_v34, %v894_v36  ;;  %v1838_v38 = vpop.f32.mrb[44].mxu0  ;;  %v1070_v41 = vmax.f32 %v1028_v35, 0.0 }
 0x158   : > { %v1932_v39 = vpop.f32.mrb[44].mxu1  ;;  %v1839_v40 = vpop.f32.mrb[45].mxu0 }
 0x159   : > { %v1071_v42 = vmax.f32 %v1031_v37, 0.0  ;;  %v1840_v43 = vadd.f32 %v1839_v40, %v1838_v38  ;;  %v1933_v44 = vpop.f32.mrb[45].mxu1  ;;  %v1841_v45 = vpop.f32.mrb[46].mxu0 }
 0x15a   : > { %v1934_v46 = vadd.f32 %v1933_v44, %v1932_v39  ;;  %v1935_v47 = vpop.f32.mrb[46].mxu1  ;;  %v1842_v48 = vpop.f32.mrb[47].mxu0 }
 0x15b   : > { %v1732_v49 = vpack.c.bf16 %v1071_v42, %v1070_v41  ;;  %v899_v50 = vadd.f32 %v1840_v43, %v2446_v22  ;;  %v1843_v51 = vadd.f32 %v1842_v48, %v1841_v45  ;;  %v1936_v52 = vpop.f32.mrb[47].mxu1 }
 0x15c   : > { %v1937_v53 = vadd.f32 %v1936_v52, %v1935_v47 }
 0x15d   : > { %1753 = vst [vmem:[%s2452_s12 + $0x50] sm:$0xff] %v1732_v49   ;;  %v1036_v54 = vadd.f32 %v1934_v46, %v899_v50  ;;  %v902_v55 = vadd.f32 %v1843_v51, %v2446_v22 }
 0x15f   : > { %v1039_v56 = vadd.f32 %v1937_v53, %v902_v55  ;;  %v1844_v57 = vpop.f32.mrb[48].mxu0  ;;  %v1072_v60 = vmax.f32 %v1036_v54, 0.0 }
 0x160   : > { %v1938_v58 = vpop.f32.mrb[48].mxu1  ;;  %v1845_v59 = vpop.f32.mrb[49].mxu0 }
 0x161   : > { %v1073_v61 = vmax.f32 %v1039_v56, 0.0  ;;  %v1846_v62 = vadd.f32 %v1845_v59, %v1844_v57  ;;  %v1939_v63 = vpop.f32.mrb[49].mxu1  ;;  %v1847_v0 = vpop.f32.mrb[50].mxu0 }
 0x162   : > { %v1940_v1 = vadd.f32 %v1939_v63, %v1938_v58  ;;  %v1941_v2 = vpop.f32.mrb[50].mxu1  ;;  %v1848_v3 = vpop.f32.mrb[51].mxu0 }
 0x163   : > { %v1737_v4 = vpack.c.bf16 %v1073_v61, %v1072_v60  ;;  %v907_v5 = vadd.f32 %v1846_v62, %v2446_v22  ;;  %v1849_v6 = vadd.f32 %v1848_v3, %v1847_v0  ;;  %v1942_v7 = vpop.f32.mrb[51].mxu1 }
 0x164   : > { %v1943_v8 = vadd.f32 %v1942_v7, %v1941_v2 }
 0x165   : > { %1754 = vst [vmem:[%s2452_s12 + $0x58] sm:$0xff] %v1737_v4   ;;  %v1044_v9 = vadd.f32 %v1940_v1, %v907_v5  ;;  %v910_v10 = vadd.f32 %v1849_v6, %v2446_v22 }
 0x167   : > { %v1047_v11 = vadd.f32 %v1943_v8, %v910_v10  ;;  %v1074_v12 = vmax.f32 %v1044_v9, 0.0  ;;  %1212 = sbr.rel (!%p2281_p4) target bundleno = 445 (0x1bd), region = 36 }
 0x169   : > { %v1075_v13 = vmax.f32 %v1047_v11, 0.0 }
 0x16b   : > { %v1742_v14 = vpack.c.bf16 %v1075_v13, %v1074_v12 }
 0x16d   : > { %1755 = vst [vmem:[%s2452_s12 + $0x60] sm:$0xff] %v1742_v14  }
 0x16e   : > { %s2620_s7 = smov (!%p1215_p8, %s1214_s7), 26 }
 0x16f   : > { %s1639_s14 = sshll.u32 %s2620_s7, 6 }
 0x170   : > { %p1642_p9 = scmp.eq.s32.totalorder %s1639_s14, 0 }
 0x171   : > { %2144 = sdivrem.u32 (!%p1642_p9), %s2620_s7, 26 }
 0x172   : > { %1223 = sbr.rel (%p1642_p9) target bundleno = 445 (0x1bd), region = 40 }
 0x17a   : > { %s2503_s20 = spop.drf %2144 }
 0x17b   : > { %p1643_p10 = scmp.le.s32.totalorder %s2503_s20, 0 }
 0x17c   : > { %s2613_s15 = smov (!%p1643_p10), %s2497_s11  ;;  %s2614_s30 = smov (!%p1643_p10), %s2452_s12 }
 0x17d   : > { %1478 = sbr.rel (%p1643_p10) target bundleno = 416 (0x1a0), region = 112  ;;  %s2512_s17 = smov (!%p1643_p10), 0  }
 0x17e   : > { %s2514_s18 = smov (!%p1643_p10), 0  }
 0x184 LB: >> { %v1240_v22 = vld [vmem:[%s2210_s30] sm:$0xf]  ;;  %v1242_v15 = vld [vmem:[%s2210_s30 + $0x4] sm:$0xf]  ;;  %v1244_v16 = vld [vmem:[%s2210_s30 + $0x8] sm:$0xf]  ;;  %s2218_s18 = sphi %s2514_s18, %s1234_s18   ;;  %s2214_s17 = sphi %s2512_s17, %s2615_s17   ;;  %s2210_s30 = sphi %s2614_s30, %s1297_s30   ;;  %s2206_s15 = sphi %s2613_s15, %s1298_s15  }
 0x185   : >> { %1241 = vst [vmem:[%s2206_s15] sm:$0xf] %v1240_v22  ;;  %1243 = vst [vmem:[%s2206_s15 + $0x4] sm:$0xf] %v1242_v15  ;;  %v1246_v17 = vld [vmem:[%s2210_s30 + $0xc] sm:$0xf]  ;;  %s1292_s21 = sadd.s32 1, %s2214_s17 }
 0x186   : >> { %1245 = vst [vmem:[%s2206_s15 + $0x8] sm:$0xf] %v1244_v16  ;;  %v1248_v18 = vld [vmem:[%s2210_s30 + $0x10] sm:$0xf]  ;;  %v1250_v19 = vld [vmem:[%s2210_s30 + $0x14] sm:$0xf]  ;;  %p1293_p11 = scmp.ge.s32.totalorder %s1292_s21, %s2503_s20 }
 0x187   : >> { %1247 = vst [vmem:[%s2206_s15 + $0xc] sm:$0xf] %v1246_v17  ;;  %1249 = vst [vmem:[%s2206_s15 + $0x10] sm:$0xf] %v1248_v18  ;;  %v1252_v20 = vld [vmem:[%s2210_s30 + $0x18] sm:$0xf] }
 0x188   : >> { %1251 = vst [vmem:[%s2206_s15 + $0x14] sm:$0xf] %v1250_v19  ;;  %v1254_v21 = vld [vmem:[%s2210_s30 + $0x1c] sm:$0xf]  ;;  %v1256_v23 = vld [vmem:[%s2210_s30 + $0x20] sm:$0xf] }
 0x189   : >> { %1253 = vst [vmem:[%s2206_s15 + $0x18] sm:$0xf] %v1252_v20  ;;  %1255 = vst [vmem:[%s2206_s15 + $0x1c] sm:$0xf] %v1254_v21  ;;  %v1258_v24 = vld [vmem:[%s2210_s30 + $0x24] sm:$0xf] }
 0x18a   : >> { %1257 = vst [vmem:[%s2206_s15 + $0x20] sm:$0xf] %v1256_v23  ;;  %v1260_v25 = vld [vmem:[%s2210_s30 + $0x28] sm:$0xf]  ;;  %v1262_v26 = vld [vmem:[%s2210_s30 + $0x2c] sm:$0xf] }
 0x18b   : >> { %1259 = vst [vmem:[%s2206_s15 + $0x24] sm:$0xf] %v1258_v24  ;;  %1261 = vst [vmem:[%s2206_s15 + $0x28] sm:$0xf] %v1260_v25  ;;  %v1264_v27 = vld [vmem:[%s2210_s30 + $0x30] sm:$0xf] }
 0x18c   : >> { %1263 = vst [vmem:[%s2206_s15 + $0x2c] sm:$0xf] %v1262_v26  ;;  %v1266_v28 = vld [vmem:[%s2210_s30 + $0x34] sm:$0xf]  ;;  %v1268_v29 = vld [vmem:[%s2210_s30 + $0x38] sm:$0xf] }
 0x18d   : >> { %1265 = vst [vmem:[%s2206_s15 + $0x30] sm:$0xf] %v1264_v27  ;;  %1267 = vst [vmem:[%s2206_s15 + $0x34] sm:$0xf] %v1266_v28  ;;  %v1270_v30 = vld [vmem:[%s2210_s30 + $0x3c] sm:$0xf] }
 0x18e   : >> { %1269 = vst [vmem:[%s2206_s15 + $0x38] sm:$0xf] %v1268_v29  ;;  %v1272_v31 = vld [vmem:[%s2210_s30 + $0x40] sm:$0xf]  ;;  %v1274_v32 = vld [vmem:[%s2210_s30 + $0x44] sm:$0xf] }
 0x18f   : >> { %1271 = vst [vmem:[%s2206_s15 + $0x3c] sm:$0xf] %v1270_v30  ;;  %1273 = vst [vmem:[%s2206_s15 + $0x40] sm:$0xf] %v1272_v31  ;;  %v1276_v33 = vld [vmem:[%s2210_s30 + $0x48] sm:$0xf] }
 0x190   : >> { %1275 = vst [vmem:[%s2206_s15 + $0x44] sm:$0xf] %v1274_v32  ;;  %v1278_v34 = vld [vmem:[%s2210_s30 + $0x4c] sm:$0xf]  ;;  %v1280_v35 = vld [vmem:[%s2210_s30 + $0x50] sm:$0xf] }
 0x191   : >> { %1277 = vst [vmem:[%s2206_s15 + $0x48] sm:$0xf] %v1276_v33  ;;  %1279 = vst [vmem:[%s2206_s15 + $0x4c] sm:$0xf] %v1278_v34  ;;  %v1282_v36 = vld [vmem:[%s2210_s30 + $0x54] sm:$0xf] }
 0x192   : >> { %1281 = vst [vmem:[%s2206_s15 + $0x50] sm:$0xf] %v1280_v35  ;;  %v1284_v37 = vld [vmem:[%s2210_s30 + $0x58] sm:$0xf]  ;;  %v1286_v38 = vld [vmem:[%s2210_s30 + $0x5c] sm:$0xf] }
 0x193   : >> { %1283 = vst [vmem:[%s2206_s15 + $0x54] sm:$0xf] %v1282_v36  ;;  %1285 = vst [vmem:[%s2206_s15 + $0x58] sm:$0xf] %v1284_v37  ;;  %v1288_v39 = vld [vmem:[%s2210_s30 + $0x60] sm:$0xf] }
 0x194   : >> { %1287 = vst [vmem:[%s2206_s15 + $0x5c] sm:$0xf] %v1286_v38  ;;  %v1290_v40 = vld [vmem:[%s2210_s30 + $0x64] sm:$0xf]  ;;  %1289 = vst [vmem:[%s2206_s15 + $0x60] sm:$0xf] %v1288_v39 }
 0x195   : >> { %1291 = vst [vmem:[%s2206_s15 + $0x64] sm:$0xf] %v1290_v40  ;;  %s2622_s21 = smov (%p1293_p11, %s1292_s21), 0  ;;  %s1234_s18 = sadd.s32 1, %s2218_s18  }
 0x196   : >> { %s1295_s22 = smul.u32 104, %s2622_s21  ;;  %p1233_p12 = scmp.ge.s32.totalorder %s1234_s18, %s2503_s20 }
 0x197   : >> { %s2615_s17 = smov %s2622_s21 }
 0x198   : >> { %s1297_s30 = scalar_lea.vmem %s2452_s12, %s1295_s22 [#allocation2]   ;;  %s1298_s15 = scalar_lea.vmem %s2497_s11, %s1295_s22  }
 0x199   : > { %1236 = sbr.rel (!%p1233_p12) target bundleno = 388 (0x184), region = 118 }
 0x1a0 PF: > { %2146 = sdivrem.u32 %s2620_s7, 26 }
 0x1a1   : > { %s1644_s23 = smul.u32 104, %s2503_s20 }
 0x1a3   : > { %s1303_s24 = scalar_lea.vmem %s2452_s12, %s1644_s23 [#allocation2]   ;;  %s1305_s25 = scalar_lea.vmem %s2497_s11, %s1644_s23  }
 0x1a9   : > { %s2147_s26 = spop.drf %2146 }
 0x1aa   : > { %p1646_p13 = scmp.le.s32.totalorder %s2147_s26, 0 }
 0x1ab   : > { %s2220_s27 = smov (!%p1646_p13), %s1305_s25   ;;  %s2224_s28 = smov (!%p1646_p13), %s1303_s24  }
 0x1ac   : > { %1492 = sbr.rel (%p1646_p13) target bundleno = 445 (0x1bd), region = 123  ;;  %s2228_s29 = smov (!%p1646_p13), 0  }
 0x1ad   : > { %s2232_s4 = smov (!%p1646_p13), 0  }
 0x1b3 LB: >> { %v1315_v41 = vld [vmem:[%s2226_s28] sm:$0xf]  ;;  %s1317_s5 = sadd.s32 1, %s2230_s29  ;;  %s1309_s4 = sadd.s32 1, %s2234_s4   ;;  %s2234_s4 = sphi %s2232_s4, %s1309_s4   ;;  %s2230_s29 = sphi %s2228_s29, %s2229_s29   ;;  %s2226_s28 = sphi %s2224_s28, %s1322_s28   ;;  %s2222_s27 = sphi %s2220_s27, %s1323_s27  }
 0x1b4   : >> { %1316 = vst [vmem:[%s2222_s27] sm:$0xf] %v1315_v41  ;;  %p1318_p0 = scmp.ge.s32.totalorder %s1317_s5, %s2147_s26  ;;  %p1308_p1 = scmp.ge.s32.totalorder %s1309_s4, %s2147_s26 }
 0x1b6   : >> { %s2624_s5 = smov (%p1318_p0, %s1317_s5), 0  ;;  %1311 = sbr.rel (!%p1308_p1) target bundleno = 435 (0x1b3), region = 129 }
 0x1b7   : >> { %s1647_s6 = sshll.u32 %s2624_s5, 2  ;;  %s2229_s29 = smov %s2624_s5  }
 0x1b8   : >> { %s1322_s28 = scalar_lea.vmem %s1303_s24, %s1647_s6 [#allocation2]   ;;  %s1323_s27 = scalar_lea.vmem %s1305_s25, %s1647_s6  }
 0x1bd PF: > { %p10_p2 = scmp.ge.s32.totalorder %s2271_s16, 4   ;;  %s2616_s12 = smov %s2198_s13 }
 0x1be   : > { %s2617_s13 = smov %s2279_s19  ;;  %s2618_s14 = smov %s2271_s16 }
 0x1bf   :  { %12 = sbr.rel (!%p10_p2) target bundleno = 2 (0x2), region = 140 }

// kernel: vae_forward.12
= control target key start
LH: loop header
LB: loop body
LE: loop exit
PB: predicated region body
PF: predicated region fallthrough
CT: control target
= control target key end

     0   :  { %s1883_s1 = inlined_call_operand.vmem [shape: bf16[1024,128], index: 1, kind: input, shape index: {}]   ;;  %s1884_s0 = inlined_call_operand.vmem [shape: bf16[72,1024], index: 0, kind: input, shape index: {}]   ;;  %s1885_s2 = inlined_call_operand.vmem [shape: f32[1,128], index: 2, kind: input, shape index: {}]   ;;  %s1886_s3 = inlined_call_operand.vmem [shape: bf16[72,128], index: 3, kind: output, shape index: {}]  }
   0x1   :  { %v1435_v0 = vld [vmem:[%s1883_s1 + $0x40] sm:$0xff]   ;;  %v1439_v4 = vld [vmem:[%s1883_s1 + $0x48] sm:$0xff]   ;;  %v1443_v8 = vld [vmem:[%s1883_s1 + $0x50] sm:$0xff]  }
   0x2   :  { %v1436_v1 = vld [vmem:[%s1883_s1 + $0xc0] sm:$0xff]   ;;  %1251 = vmatprep.subr.bf16.mxu0 %v1435_v0  ;;  %v1440_v5 = vld [vmem:[%s1883_s1 + $0xc8] sm:$0xff]   ;;  %v1444_v9 = vld [vmem:[%s1883_s1 + $0xd0] sm:$0xff]  }
   0x3   :  { %v1437_v2 = vld [vmem:[%s1883_s1] sm:$0xff]   ;;  %1297 = vmatprep.subr.bf16.mxu1 %v1436_v1  ;;  %v1441_v6 = vld [vmem:[%s1883_s1 + $0x8] sm:$0xff]   ;;  %v1445_v10 = vld [vmem:[%s1883_s1 + $0x10] sm:$0xff]  }
   0x4   :  { %v1438_v3 = vld [vmem:[%s1883_s1 + $0x80] sm:$0xff]   ;;  %1252 = vmatpush3.bf16.msra.mxu0 %v1437_v2  ;;  %v1442_v7 = vld [vmem:[%s1883_s1 + $0x88] sm:$0xff]   ;;  %v1446_v11 = vld [vmem:[%s1883_s1 + $0x90] sm:$0xff]  }
   0x5   :  { %1298 = vmatpush3.bf16.msra.mxu1 %v1438_v3  ;;  %1253 = vmatprep.subr.bf16.mxu0 %v1439_v4  ;;  %v1447_v12 = vld [vmem:[%s1883_s1 + $0x58] sm:$0xff]   ;;  %v1451_v16 = vld [vmem:[%s1883_s1 + $0x60] sm:$0xff]   ;;  %v1455_v20 = vld [vmem:[%s1883_s1 + $0x68] sm:$0xff]  }
   0x6   :  { %1299 = vmatprep.subr.bf16.mxu1 %v1440_v5  ;;  %v1448_v13 = vld [vmem:[%s1883_s1 + $0xd8] sm:$0xff]   ;;  %v1452_v17 = vld [vmem:[%s1883_s1 + $0xe0] sm:$0xff]   ;;  %v1456_v21 = vld [vmem:[%s1883_s1 + $0xe8] sm:$0xff]  }
   0x7   :  { %v1449_v14 = vld [vmem:[%s1883_s1 + $0x18] sm:$0xff]   ;;  %v1453_v18 = vld [vmem:[%s1883_s1 + $0x20] sm:$0xff]   ;;  %v1457_v22 = vld [vmem:[%s1883_s1 + $0x28] sm:$0xff]  }
   0x8   :  { %1254 = vmatpush3.bf16.msra.mxu0 %v1441_v6  ;;  %v1450_v15 = vld [vmem:[%s1883_s1 + $0x98] sm:$0xff]   ;;  %v1454_v19 = vld [vmem:[%s1883_s1 + $0xa0] sm:$0xff]   ;;  %v1458_v23 = vld [vmem:[%s1883_s1 + $0xa8] sm:$0xff]  }
   0x9   :  { %1300 = vmatpush3.bf16.msra.mxu1 %v1442_v7  ;;  %1255 = vmatprep.subr.bf16.mxu0 %v1443_v8  ;;  %v1459_v24 = vld [vmem:[%s1883_s1 + $0x70] sm:$0xff]   ;;  %v1463_v28 = vld [vmem:[%s1883_s1 + $0x78] sm:$0xff]   ;;  %v15_v32 = vld [vmem:[%s1884_s0] sm:$0xff] }
   0xa   :  { %1301 = vmatprep.subr.bf16.mxu1 %v1444_v9  ;;  %v1460_v25 = vld [vmem:[%s1883_s1 + $0xf0] sm:$0xff]   ;;  %v1464_v29 = vld [vmem:[%s1883_s1 + $0xf8] sm:$0xff]   ;;  %v19_v33 = vld [vmem:[%s1884_s0 + $0x20] sm:$0xff] }
   0xb   :  { %v1461_v26 = vld [vmem:[%s1883_s1 + $0x30] sm:$0xff]   ;;  %v1465_v30 = vld [vmem:[%s1883_s1 + $0x38] sm:$0xff]   ;;  %v16_v34 = vld [vmem:[%s1884_s0 + $0x8] sm:$0xff]  ;;  %v1106_v35 = vcombine.low %v15_v32, %v19_v33  ;;  %v1107_v36 = vcombine.high %v15_v32, %v19_v33 }
   0xc   :  { %1256 = vmatpush3.bf16.msra.mxu0 %v1445_v10  ;;  %v1462_v27 = vld [vmem:[%s1883_s1 + $0xb0] sm:$0xff]   ;;  %v1466_v31 = vld [vmem:[%s1883_s1 + $0xb8] sm:$0xff]   ;;  %v20_v37 = vld [vmem:[%s1884_s0 + $0x28] sm:$0xff] }
   0xd   :  { %1302 = vmatpush3.bf16.msra.mxu1 %v1446_v11  ;;  %1257 = vmatprep.subr.bf16.mxu0 %v1447_v12  ;;  %v1108_v38 = vcombine.low %v16_v34, %v20_v37  ;;  %v1109_v39 = vcombine.high %v16_v34, %v20_v37  ;;  %v1467_v40 = vld [vmem:[%s1883_s1 + $0x140] sm:$0xff]   ;;  %v1471_v44 = vld [vmem:[%s1883_s1 + $0x148] sm:$0xff]   ;;  %v1475_v56 = vld [vmem:[%s1883_s1 + $0x150] sm:$0xff]  }
   0xe   :  { %1303 = vmatprep.subr.bf16.mxu1 %v1448_v13  ;;  %790 = vmatprep.mubr.bf16.mxu0 %v1107_v36  ;;  %v1468_v41 = vld [vmem:[%s1883_s1 + $0x100] sm:$0xff]   ;;  %v1472_v45 = vld [vmem:[%s1883_s1 + $0x108] sm:$0xff]   ;;  %v1476_v57 = vld [vmem:[%s1883_s1 + $0x110] sm:$0xff]  }
   0xf   :  { %862 = vmatprep.mubr.bf16.mxu1 %v1109_v39  ;;  %v1469_v42 = vld [vmem:[%s1883_s1 + $0x1c0] sm:$0xff]   ;;  %v24_v49 = vld [vmem:[%s1884_s0 + $0x48] sm:$0xff]  ;;  %v1477_v58 = vld [vmem:[%s1883_s1 + $0x1d0] sm:$0xff]  }
  0x10   :  { %1258 = vmatpush3.bf16.msra.mxu0 %v1449_v14  ;;  %v1470_v43 = vld [vmem:[%s1883_s1 + $0x180] sm:$0xff]   ;;  %v28_v50 = vld [vmem:[%s1884_s0 + $0x68] sm:$0xff]  ;;  %v1478_v59 = vld [vmem:[%s1883_s1 + $0x190] sm:$0xff]  }
  0x11   :  { %1304 = vmatpush3.bf16.msra.mxu1 %v1450_v15  ;;  %1259 = vmatprep.subr.bf16.mxu0 %v1451_v16  ;;  %v23_v46 = vld [vmem:[%s1884_s0 + $0x40] sm:$0xff]  ;;  %v1117_v52 = vcombine.high %v24_v49, %v28_v50  ;;  %v1473_v53 = vld [vmem:[%s1883_s1 + $0x1c8] sm:$0xff]   ;;  %v1116_v54 = vcombine.low %v24_v49, %v28_v50  ;;  %v1479_v2 = vld [vmem:[%s1883_s1 + $0x158] sm:$0xff]  }
  0x12   :  { %1305 = vmatprep.subr.bf16.mxu1 %v1452_v17  ;;  %v27_v47 = vld [vmem:[%s1884_s0 + $0x60] sm:$0xff]  ;;  %v1474_v55 = vld [vmem:[%s1883_s1 + $0x188] sm:$0xff]   ;;  %v1480_v5 = vld [vmem:[%s1883_s1 + $0x118] sm:$0xff]  }
  0x13   :  { %v1115_v48 = vcombine.high %v23_v46, %v27_v47  ;;  %v1114_v51 = vcombine.low %v23_v46, %v27_v47  ;;  %v31_v60 = vld [vmem:[%s1884_s0 + $0x80] sm:$0xff]  ;;  %v32_v62 = vld [vmem:[%s1884_s0 + $0x88] sm:$0xff]  ;;  %v1481_v6 = vld [vmem:[%s1883_s1 + $0x1d8] sm:$0xff]  }
  0x14   :  { %1260 = vmatpush3.bf16.msra.mxu0 %v1453_v18  ;;  %v35_v61 = vld [vmem:[%s1884_s0 + $0xa0] sm:$0xff]  ;;  %v36_v63 = vld [vmem:[%s1884_s0 + $0xa8] sm:$0xff]  ;;  %v1482_v7 = vld [vmem:[%s1883_s1 + $0x198] sm:$0xff]  }
  0x15   :  { %1306 = vmatpush3.bf16.msra.mxu1 %v1454_v19  ;;  %1261 = vmatprep.subr.bf16.mxu0 %v1455_v20  ;;  %v1123_v0 = vcombine.high %v31_v60, %v35_v61  ;;  %v1125_v1 = vcombine.high %v32_v62, %v36_v63  ;;  %v1122_v3 = vcombine.low %v31_v60, %v35_v61  ;;  %v1483_v8 = vld [vmem:[%s1883_s1 + $0x160] sm:$0xff]   ;;  %v40_v13 = vld [vmem:[%s1884_s0 + $0xc8] sm:$0xff]  ;;  %v1498_v33 = vld [vmem:[%s1883_s1 + $0x1b0] sm:$0xff]  }
  0x16   :  { %1307 = vmatprep.subr.bf16.mxu1 %v1456_v21  ;;  %v1124_v4 = vcombine.low %v32_v62, %v36_v63  ;;  %v1484_v9 = vld [vmem:[%s1883_s1 + $0x120] sm:$0xff]   ;;  %v44_v15 = vld [vmem:[%s1884_s0 + $0xe8] sm:$0xff]  ;;  %v1499_v34 = vld [vmem:[%s1883_s1 + $0x178] sm:$0xff]  }
  0x17   :  { %v1485_v10 = vld [vmem:[%s1883_s1 + $0x1e0] sm:$0xff]   ;;  %v1133_v17 = vcombine.high %v40_v13, %v44_v15  ;;  %v1132_v19 = vcombine.low %v40_v13, %v44_v15  ;;  %v1487_v20 = vld [vmem:[%s1883_s1 + $0x168] sm:$0xff]   ;;  %v1501_v36 = vld [vmem:[%s1883_s1 + $0x1f8] sm:$0xff]  }
  0x18   :  { %1262 = vmatpush3.bf16.msra.mxu0 %v1457_v22  ;;  %v39_v11 = vld [vmem:[%s1884_s0 + $0xc0] sm:$0xff]  ;;  %v1488_v21 = vld [vmem:[%s1883_s1 + $0x128] sm:$0xff]   ;;  %v1502_v37 = vld [vmem:[%s1883_s1 + $0x1b8] sm:$0xff]  }
  0x19   :  { %1308 = vmatpush3.bf16.msra.mxu1 %v1458_v23  ;;  %1263 = vmatprep.subr.bf16.mxu0 %v1459_v24  ;;  %v43_v12 = vld [vmem:[%s1884_s0 + $0xe0] sm:$0xff]  ;;  %v1489_v22 = vld [vmem:[%s1883_s1 + $0x1e8] sm:$0xff]   ;;  %v1491_v24 = vld [vmem:[%s1883_s1 + $0x170] sm:$0xff]  }
  0x1a   :  { %1309 = vmatprep.subr.bf16.mxu1 %v1460_v25  ;;  %v1131_v14 = vcombine.high %v39_v11, %v43_v12  ;;  %v1130_v16 = vcombine.low %v39_v11, %v43_v12  ;;  %v1486_v18 = vld [vmem:[%s1883_s1 + $0x1a0] sm:$0xff]   ;;  %v1490_v23 = vld [vmem:[%s1883_s1 + $0x1a8] sm:$0xff]   ;;  %v21_v39 = vld [vmem:[%s1884_s0 + $0x30] sm:$0xff] }
  0x1b   :  { %v47_v25 = vld [vmem:[%s1884_s0 + $0x100] sm:$0xff]  ;;  %v26_v47 = vld [vmem:[%s1884_s0 + $0x58] sm:$0xff]  ;;  %v41_v60 = vld [vmem:[%s1884_s0 + $0xd0] sm:$0xff] }
  0x1c   :  { %1264 = vmatpush3.bf16.msra.mxu0 %v1461_v26  ;;  %v48_v26 = vld [vmem:[%s1884_s0 + $0x108] sm:$0xff]  ;;  %v45_v61 = vld [vmem:[%s1884_s0 + $0xf0] sm:$0xff]  ;;  %v42_v62 = vld [vmem:[%s1884_s0 + $0xd8] sm:$0xff] }
  0x1d   :  { %1310 = vmatpush3.bf16.msra.mxu1 %v1462_v27  ;;  %1265 = vmatprep.subr.bf16.mxu0 %v1463_v28  ;;  %v1139_v27 = vcombine.high %v47_v25, %v47_v25  ;;  %v1141_v28 = vcombine.high %v48_v26, %v48_v26  ;;  %v1140_v32 = vcombine.low %v48_v26, %v48_v26  ;;  %v46_v63 = vld [vmem:[%s1884_s0 + $0xf8] sm:$0xff] }
  0x1e   :  { %1311 = vmatprep.subr.bf16.mxu1 %v1464_v29  ;;  %v1494_v29 = vld [vmem:[%s1883_s1 + $0x130] sm:$0xff]  }
  0x20   :  { %1266 = vmatpush3.bf16.msra.mxu0 %v1465_v30  ;;  %v1138_v30 = vcombine.low %v47_v25, %v47_v25 }
  0x21   :  { %1312 = vmatpush3.bf16.msra.mxu1 %v1466_v31  ;;  %1343 = vmatprep.subr.bf16.mxu0 %v1467_v40  ;;  %v1497_v31 = vld [vmem:[%s1883_s1 + $0x1f0] sm:$0xff]   ;;  %v18_v40 = vld [vmem:[%s1884_s0 + $0x18] sm:$0xff] }
  0x22   :  { %1389 = vmatprep.subr.bf16.mxu1 %v1469_v42  ;;  %v22_v42 = vld [vmem:[%s1884_s0 + $0x38] sm:$0xff] }
  0x23   :  { %791 = vmatmul.mubr.bf16.vlgmr.msra.gmra.mrb[0].mxu0 %v1106_v35  ;;  %v1500_v35 = vld [vmem:[%s1883_s1 + $0x138] sm:$0xff]   ;;  %v1113_v46 = vcombine.high %v18_v40, %v22_v42  ;;  %v1112_v49 = vcombine.low %v18_v40, %v22_v42 }
  0x24   :  { %863 = vmatmul.mubr.bf16.vlgmr.msra.gmra.mrb[0].mxu1 %v1108_v38  ;;  %1344 = vmatpush3.bf16.msra.mxu0 %v1468_v41  ;;  %v17_v38 = vld [vmem:[%s1884_s0 + $0x10] sm:$0xff] }
  0x25   :  { %1390 = vmatpush3.bf16.msra.mxu1 %v1470_v43  ;;  %1345 = vmatprep.subr.bf16.mxu0 %v1471_v44  ;;  %v1111_v41 = vcombine.high %v17_v38, %v21_v39  ;;  %v25_v43 = vld [vmem:[%s1884_s0 + $0x50] sm:$0xff] }
  0x26   :  { %798 = vmatprep.mubr.bf16.mxu0 %v1115_v48  ;;  %870 = vmatprep.mubr.bf16.mxu1 %v1117_v52  ;;  %v29_v44 = vld [vmem:[%s1884_s0 + $0x70] sm:$0xff]  ;;  %v30_v48 = vld [vmem:[%s1884_s0 + $0x78] sm:$0xff] }
  0x27   :  { %1391 = vmatprep.subr.bf16.mxu1 %v1473_v53  ;;  %v1119_v50 = vcombine.high %v25_v43, %v29_v44  ;;  %v33_v52 = vld [vmem:[%s1884_s0 + $0x90] sm:$0xff] }
  0x28   :  { %1346 = vmatpush3.bf16.msra.mxu0 %v1472_v45  ;;  %v1110_v45 = vcombine.low %v17_v38, %v21_v39  ;;  %v37_v53 = vld [vmem:[%s1884_s0 + $0xb0] sm:$0xff] }
  0x29   :  { %1392 = vmatpush3.bf16.msra.mxu1 %v1474_v55  ;;  %1347 = vmatprep.subr.bf16.mxu0 %v1475_v56  ;;  %v38_v55 = vld [vmem:[%s1884_s0 + $0xb8] sm:$0xff]  ;;  %v1118_v56 = vcombine.low %v25_v43, %v29_v44 }
  0x2a   :  { %1393 = vmatprep.subr.bf16.mxu1 %v1477_v58  ;;  %v1127_v58 = vcombine.high %v33_v52, %v37_v53 }
  0x2b   :  { %799 = vmatmul.mubr.bf16.gmra.mrb[4].mxu0 %v1114_v51  ;;  %v1121_v51 = vcombine.high %v26_v47, %v30_v48 }
  0x2c   :  { %871 = vmatmul.mubr.bf16.gmra.mrb[4].mxu1 %v1116_v54  ;;  %1348 = vmatpush3.bf16.msra.mxu0 %v1476_v57  ;;  %v34_v54 = vld [vmem:[%s1884_s0 + $0x98] sm:$0xff]  ;;  %v1120_v57 = vcombine.low %v26_v47, %v30_v48 }
  0x2d   :  { %1394 = vmatpush3.bf16.msra.mxu1 %v1478_v59  ;;  %806 = vmatprep.mubr.bf16.mxu0 %v1123_v0  ;;  %v1129_v59 = vcombine.high %v34_v54, %v38_v55  ;;  %v1126_v0 = vcombine.low %v33_v52, %v37_v53 }
  0x2e   :  { %878 = vmatprep.mubr.bf16.mxu1 %v1125_v1  ;;  %1349 = vmatprep.subr.bf16.mxu0 %v1479_v2  ;;  %v1128_v1 = vcombine.low %v34_v54, %v38_v55  ;;  %v1135_v2 = vcombine.high %v41_v60, %v45_v61 }
  0x2f   :  { %1395 = vmatprep.subr.bf16.mxu1 %v1481_v6  ;;  %v1134_v6 = vcombine.low %v41_v60, %v45_v61 }
  0x30   :  { %1350 = vmatpush3.bf16.msra.mxu0 %v1480_v5  ;;  %v50_v5 = vld [vmem:[%s1884_s0 + $0x118] sm:$0xff] }
  0x31   :  { %1396 = vmatpush3.bf16.msra.mxu1 %v1482_v7  ;;  %1351 = vmatprep.subr.bf16.mxu0 %v1483_v8  ;;  %v1136_v7 = vcombine.low %v42_v62, %v46_v63  ;;  %v1144_v11 = vcombine.low %v50_v5, %v50_v5 }
  0x32   :  { %1397 = vmatprep.subr.bf16.mxu1 %v1485_v10 }
  0x33   :  { %807 = vmatmul.mubr.bf16.gmra.mrb[8].mxu0 %v1122_v3  ;;  %v1137_v3 = vcombine.high %v42_v62, %v46_v63 }
  0x34   :  { %879 = vmatmul.mubr.bf16.gmra.mrb[8].mxu1 %v1124_v4  ;;  %1352 = vmatpush3.bf16.msra.mxu0 %v1484_v9  ;;  %v49_v4 = vld [vmem:[%s1884_s0 + $0x110] sm:$0xff]  ;;  %v1145_v9 = vcombine.high %v50_v5, %v50_v5 }
  0x35   :  { %814 = vmatprep.mubr.bf16.mxu0 %v1131_v14  ;;  %886 = vmatprep.mubr.bf16.mxu1 %v1133_v17  ;;  %v1143_v8 = vcombine.high %v49_v4, %v49_v4  ;;  %v1142_v10 = vcombine.low %v49_v4, %v49_v4  ;;  %v1830_v14 = vld [vmem:[%s1885_s2] ss:$0 sm:$0xff] }
  0x36   :  { %1398 = vmatpush3.bf16.msra.mxu1 %v1486_v18  ;;  %1353 = vmatprep.subr.bf16.mxu0 %v1487_v20 }
  0x37   :  { %1399 = vmatprep.subr.bf16.mxu1 %v1489_v22 }
  0x38   :  { %1354 = vmatpush3.bf16.msra.mxu0 %v1488_v21 }
  0x39   :  { %1355 = vmatprep.subr.bf16.mxu0 %v1491_v24 }
  0x3a   :  { %1400 = vmatpush3.bf16.msra.mxu1 %v1490_v23 }
  0x3b   :  { %815 = vmatmul.mubr.bf16.gmra.mrb[12].mxu0 %v1130_v16  ;;  %1401 = vmatprep.subr.bf16.mxu1 %v1497_v31 }
  0x3c   :  { %887 = vmatmul.mubr.bf16.gmra.mrb[12].mxu1 %v1132_v19  ;;  %822 = vmatprep.mubr.bf16.mxu0 %v1139_v27 }
  0x3d   :  { %894 = vmatprep.mubr.bf16.mxu1 %v1141_v28  ;;  %1356 = vmatpush3.bf16.msra.mxu0 %v1494_v29 }
  0x3e   :  { %1402 = vmatpush3.bf16.msra.mxu1 %v1498_v33  ;;  %1357 = vmatprep.subr.bf16.mxu0 %v1499_v34 }
  0x3f   :  { %1403 = vmatprep.subr.bf16.mxu1 %v1501_v36 }
  0x41   :  { %1358 = vmatpush3.bf16.msra.mxu0 %v1500_v35 }
  0x42   :  { %1404 = vmatpush3.bf16.msra.mxu1 %v1502_v37 }
  0x43   :  { %823 = vmatmul.mubr.bf16.gmra.mrb[16].mxu0 %v1138_v30 }
  0x44   :  { %895 = vmatmul.mubr.bf16.gmra.mrb[16].mxu1 %v1140_v32  ;;  %934 = vmatprep.mubr.bf16.mxu0 %v1111_v41 }
  0x45   :  { %1006 = vmatprep.mubr.bf16.mxu1 %v1113_v46 }
  0x4b   :  { %935 = vmatmul.mubr.bf16.vlgmr.msra.gmra.mrb[20].mxu0 %v1110_v45 }
  0x4c   :  { %1007 = vmatmul.mubr.bf16.vlgmr.msra.gmra.mrb[20].mxu1 %v1112_v49  ;;  %942 = vmatprep.mubr.bf16.mxu0 %v1119_v50 }
  0x4d   :  { %1014 = vmatprep.mubr.bf16.mxu1 %v1121_v51 }
  0x53   :  { %943 = vmatmul.mubr.bf16.gmra.mrb[24].mxu0 %v1118_v56 }
  0x54   :  { %1015 = vmatmul.mubr.bf16.gmra.mrb[24].mxu1 %v1120_v57  ;;  %950 = vmatprep.mubr.bf16.mxu0 %v1127_v58 }
  0x55   :  { %1022 = vmatprep.mubr.bf16.mxu1 %v1129_v59 }
  0x5b   :  { %951 = vmatmul.mubr.bf16.gmra.mrb[28].mxu0 %v1126_v0 }
  0x5c   :  { %1023 = vmatmul.mubr.bf16.gmra.mrb[28].mxu1 %v1128_v1  ;;  %958 = vmatprep.mubr.bf16.mxu0 %v1135_v2 }
  0x5d   :  { %1030 = vmatprep.mubr.bf16.mxu1 %v1137_v3 }
  0x63   :  { %959 = vmatmul.mubr.bf16.gmra.mrb[32].mxu0 %v1134_v6 }
  0x64   :  { %1031 = vmatmul.mubr.bf16.gmra.mrb[32].mxu1 %v1136_v7  ;;  %966 = vmatprep.mubr.bf16.mxu0 %v1143_v8 }
  0x65   :  { %1038 = vmatprep.mubr.bf16.mxu1 %v1145_v9 }
  0x6b   :  { %967 = vmatmul.mubr.bf16.gmra.mrb[36].mxu0 %v1142_v10 }
  0x6c   :  { %1039 = vmatmul.mubr.bf16.gmra.mrb[36].mxu1 %v1144_v11 }
  0xf6   :  { %v1267_v12 = vpop.f32.mrb[0].mxu0 }
  0xf7   :  { %v1313_v13 = vpop.f32.mrb[0].mxu1  ;;  %v1268_v15 = vpop.f32.mrb[1].mxu0 }
  0xf8   :  { %v1269_v16 = vadd.f32 %v1268_v15, %v1267_v12  ;;  %v1314_v17 = vpop.f32.mrb[1].mxu1  ;;  %v1270_v18 = vpop.f32.mrb[2].mxu0 }
  0xf9   :  { %v1315_v19 = vadd.f32 %v1314_v17, %v1313_v13  ;;  %v1316_v20 = vpop.f32.mrb[2].mxu1  ;;  %v1271_v21 = vpop.f32.mrb[3].mxu0 }
  0xfa   :  { %v793_v22 = vadd.f32 %v1269_v16, %v1830_v14  ;;  %v1272_v23 = vadd.f32 %v1271_v21, %v1270_v18  ;;  %v1317_v24 = vpop.f32.mrb[3].mxu1 }
  0xfb   :  { %v1318_v25 = vadd.f32 %v1317_v24, %v1316_v20 }
  0xfc   :  { %v1833_v26 = vadd.f32 %v1315_v19, %v793_v22  ;;  %v796_v27 = vadd.f32 %v1272_v23, %v1830_v14 }
  0xfe   :  { %v1836_v28 = vadd.f32 %v1318_v25, %v796_v27  ;;  %v1273_v29 = vpop.f32.mrb[4].mxu0 }
  0xff   :  { %v1319_v30 = vpop.f32.mrb[4].mxu1  ;;  %v1274_v31 = vpop.f32.mrb[5].mxu0 }
 0x100   :  { %v1275_v32 = vadd.f32 %v1274_v31, %v1273_v29  ;;  %v1320_v33 = vpop.f32.mrb[5].mxu1  ;;  %v1276_v34 = vpop.f32.mrb[6].mxu0 }
 0x101   :  { %v1321_v35 = vadd.f32 %v1320_v33, %v1319_v30  ;;  %v1322_v36 = vpop.f32.mrb[6].mxu1  ;;  %v1277_v37 = vpop.f32.mrb[7].mxu0 }
 0x102   :  { %v801_v38 = vadd.f32 %v1275_v32, %v1830_v14  ;;  %v1278_v39 = vadd.f32 %v1277_v37, %v1276_v34  ;;  %v1323_v40 = vpop.f32.mrb[7].mxu1 }
 0x103   :  { %v1324_v41 = vadd.f32 %v1323_v40, %v1322_v36 }
 0x104   :  { %v1839_v42 = vadd.f32 %v1321_v35, %v801_v38  ;;  %v804_v43 = vadd.f32 %v1278_v39, %v1830_v14 }
 0x106   :  { %v1842_v44 = vadd.f32 %v1324_v41, %v804_v43  ;;  %v1279_v45 = vpop.f32.mrb[8].mxu0 }
 0x107   :  { %v1325_v46 = vpop.f32.mrb[8].mxu1  ;;  %v1280_v47 = vpop.f32.mrb[9].mxu0 }
 0x108   :  { %v1281_v48 = vadd.f32 %v1280_v47, %v1279_v45  ;;  %v1326_v49 = vpop.f32.mrb[9].mxu1  ;;  %v1282_v50 = vpop.f32.mrb[10].mxu0 }
 0x109   :  { %v1327_v51 = vadd.f32 %v1326_v49, %v1325_v46  ;;  %v1328_v52 = vpop.f32.mrb[10].mxu1  ;;  %v1283_v53 = vpop.f32.mrb[11].mxu0 }
 0x10a   :  { %v809_v54 = vadd.f32 %v1281_v48, %v1830_v14  ;;  %v1284_v55 = vadd.f32 %v1283_v53, %v1282_v50  ;;  %v1329_v56 = vpop.f32.mrb[11].mxu1 }
 0x10b   :  { %v1330_v57 = vadd.f32 %v1329_v56, %v1328_v52 }
 0x10c   :  { %v1845_v58 = vadd.f32 %v1327_v51, %v809_v54  ;;  %v812_v59 = vadd.f32 %v1284_v55, %v1830_v14 }
 0x10e   :  { %v1848_v60 = vadd.f32 %v1330_v57, %v812_v59  ;;  %v1285_v61 = vpop.f32.mrb[12].mxu0 }
 0x10f   :  { %v1331_v62 = vpop.f32.mrb[12].mxu1  ;;  %v1286_v63 = vpop.f32.mrb[13].mxu0 }
 0x110   :  { %v1287_v0 = vadd.f32 %v1286_v63, %v1285_v61  ;;  %v1332_v1 = vpop.f32.mrb[13].mxu1  ;;  %v1288_v2 = vpop.f32.mrb[14].mxu0 }
 0x111   :  { %v1333_v3 = vadd.f32 %v1332_v1, %v1331_v62  ;;  %v1334_v4 = vpop.f32.mrb[14].mxu1  ;;  %v1289_v5 = vpop.f32.mrb[15].mxu0 }
 0x112   :  { %v817_v6 = vadd.f32 %v1287_v0, %v1830_v14  ;;  %v1290_v7 = vadd.f32 %v1289_v5, %v1288_v2  ;;  %v1335_v8 = vpop.f32.mrb[15].mxu1 }
 0x113   :  { %v1336_v9 = vadd.f32 %v1335_v8, %v1334_v4 }
 0x114   :  { %v1851_v10 = vadd.f32 %v1333_v3, %v817_v6  ;;  %v820_v11 = vadd.f32 %v1290_v7, %v1830_v14 }
 0x116   :  { %v1854_v12 = vadd.f32 %v1336_v9, %v820_v11  ;;  %v1291_v13 = vpop.f32.mrb[16].mxu0 }
 0x117   :  { %v1337_v15 = vpop.f32.mrb[16].mxu1  ;;  %v1292_v16 = vpop.f32.mrb[17].mxu0 }
 0x118   :  { %v1293_v17 = vadd.f32 %v1292_v16, %v1291_v13  ;;  %v1338_v18 = vpop.f32.mrb[17].mxu1  ;;  %v1294_v19 = vpop.f32.mrb[18].mxu0 }
 0x119   :  { %v1339_v20 = vadd.f32 %v1338_v18, %v1337_v15  ;;  %v1340_v21 = vpop.f32.mrb[18].mxu1  ;;  %v1295_v22 = vpop.f32.mrb[19].mxu0 }
 0x11a   :  { %v825_v23 = vadd.f32 %v1293_v17, %v1830_v14  ;;  %v1341_v24 = vpop.f32.mrb[19].mxu1 }
 0x11c   :  { %v1857_v25 = vadd.f32 %v1339_v20, %v825_v23 }
 0x11e   :  { %v1359_v27 = vpop.f32.mrb[20].mxu0 }
 0x11f   :  { %v1405_v29 = vpop.f32.mrb[20].mxu1  ;;  %v1360_v30 = vpop.f32.mrb[21].mxu0 }
 0x120   :  { %v1361_v31 = vadd.f32 %v1360_v30, %v1359_v27  ;;  %v1406_v32 = vpop.f32.mrb[21].mxu1  ;;  %v1362_v33 = vpop.f32.mrb[22].mxu0 }
 0x121   :  { %v1407_v34 = vadd.f32 %v1406_v32, %v1405_v29  ;;  %v1408_v35 = vpop.f32.mrb[22].mxu1  ;;  %v1363_v36 = vpop.f32.mrb[23].mxu0 }
 0x122   :  { %v937_v37 = vadd.f32 %v1361_v31, %v1833_v26  ;;  %v1364_v38 = vadd.f32 %v1363_v36, %v1362_v33  ;;  %v1409_v39 = vpop.f32.mrb[23].mxu1 }
 0x123   :  { %v1410_v40 = vadd.f32 %v1409_v39, %v1408_v35 }
 0x124   :  { %v1009_v41 = vadd.f32 %v1407_v34, %v937_v37  ;;  %v940_v14 = vadd.f32 %v1364_v38, %v1836_v28 }
 0x126   :  { %v1012_v43 = vadd.f32 %v1410_v40, %v940_v14  ;;  %v1365_v45 = vpop.f32.mrb[24].mxu0  ;;  %v1046_v48 = vmax.f32 %v1009_v41, 0.0 }
 0x127   :  { %v1411_v46 = vpop.f32.mrb[24].mxu1  ;;  %v1366_v47 = vpop.f32.mrb[25].mxu0 }
 0x128   :  { %v1047_v49 = vmax.f32 %v1012_v43, 0.0  ;;  %v1367_v50 = vadd.f32 %v1366_v47, %v1365_v45  ;;  %v1412_v51 = vpop.f32.mrb[25].mxu1  ;;  %v1368_v52 = vpop.f32.mrb[26].mxu0 }
 0x129   :  { %v1413_v53 = vadd.f32 %v1412_v51, %v1411_v46  ;;  %v1414_v54 = vpop.f32.mrb[26].mxu1  ;;  %v1369_v55 = vpop.f32.mrb[27].mxu0 }
 0x12a   :  { %v1231_v56 = vpack.c.bf16 %v1047_v49, %v1046_v48  ;;  %v945_v26 = vadd.f32 %v1367_v50, %v1839_v42  ;;  %v1370_v57 = vadd.f32 %v1369_v55, %v1368_v52  ;;  %v1415_v59 = vpop.f32.mrb[27].mxu1 }
 0x12b   :  { %v1416_v61 = vadd.f32 %v1415_v59, %v1414_v54 }
 0x12c   :  { %1232 = vst [vmem:[%s1886_s3] sm:$0xff] %v1231_v56   ;;  %v1017_v28 = vadd.f32 %v1413_v53, %v945_v26  ;;  %v948_v62 = vadd.f32 %v1370_v57, %v1842_v44 }
 0x12e   :  { %v1020_v63 = vadd.f32 %v1416_v61, %v948_v62  ;;  %v1371_v0 = vpop.f32.mrb[28].mxu0  ;;  %v1048_v3 = vmax.f32 %v1017_v28, 0.0 }
 0x12f   :  { %v1417_v1 = vpop.f32.mrb[28].mxu1  ;;  %v1372_v2 = vpop.f32.mrb[29].mxu0 }
 0x130   :  { %v1049_v4 = vmax.f32 %v1020_v63, 0.0  ;;  %v1373_v5 = vadd.f32 %v1372_v2, %v1371_v0  ;;  %v1418_v6 = vpop.f32.mrb[29].mxu1  ;;  %v1374_v7 = vpop.f32.mrb[30].mxu0 }
 0x131   :  { %v1419_v42 = vadd.f32 %v1418_v6, %v1417_v1  ;;  %v1420_v8 = vpop.f32.mrb[30].mxu1  ;;  %v1375_v9 = vpop.f32.mrb[31].mxu0 }
 0x132   :  { %v1236_v11 = vpack.c.bf16 %v1049_v4, %v1048_v3  ;;  %v953_v13 = vadd.f32 %v1373_v5, %v1845_v58  ;;  %v1376_v15 = vadd.f32 %v1375_v9, %v1374_v7  ;;  %v1421_v16 = vpop.f32.mrb[31].mxu1 }
 0x133   :  { %v1422_v17 = vadd.f32 %v1421_v16, %v1420_v8 }
 0x134   :  { %1248 = vst [vmem:[%s1886_s3 + $0x8] sm:$0xff] %v1236_v11   ;;  %v1025_v44 = vadd.f32 %v1419_v42, %v953_v13  ;;  %v956_v18 = vadd.f32 %v1376_v15, %v1848_v60 }
 0x136   :  { %v1028_v19 = vadd.f32 %v1422_v17, %v956_v18  ;;  %v1377_v20 = vpop.f32.mrb[32].mxu0  ;;  %v1050_v23 = vmax.f32 %v1025_v44, 0.0 }
 0x137   :  { %v1423_v21 = vpop.f32.mrb[32].mxu1  ;;  %v1378_v22 = vpop.f32.mrb[33].mxu0 }
 0x138   :  { %v1051_v24 = vmax.f32 %v1028_v19, 0.0  ;;  %v1379_v27 = vadd.f32 %v1378_v22, %v1377_v20  ;;  %v1424_v29 = vpop.f32.mrb[33].mxu1  ;;  %v1380_v30 = vpop.f32.mrb[34].mxu0 }
 0x139   :  { %v1425_v58 = vadd.f32 %v1424_v29, %v1423_v21  ;;  %v1426_v31 = vpop.f32.mrb[34].mxu1  ;;  %v1381_v32 = vpop.f32.mrb[35].mxu0 }
 0x13a   :  { %v1241_v33 = vpack.c.bf16 %v1051_v24, %v1050_v23  ;;  %v961_v34 = vadd.f32 %v1379_v27, %v1851_v10  ;;  %v1382_v35 = vadd.f32 %v1381_v32, %v1380_v30  ;;  %v1427_v36 = vpop.f32.mrb[35].mxu1 }
 0x13b   :  { %v1428_v37 = vadd.f32 %v1427_v36, %v1426_v31 }
 0x13c   :  { %1249 = vst [vmem:[%s1886_s3 + $0x10] sm:$0xff] %v1241_v33   ;;  %v1033_v60 = vadd.f32 %v1425_v58, %v961_v34  ;;  %v964_v38 = vadd.f32 %v1382_v35, %v1854_v12 }
 0x13e   :  { %v1036_v39 = vadd.f32 %v1428_v37, %v964_v38  ;;  %v1383_v40 = vpop.f32.mrb[36].mxu0  ;;  %v1052_v43 = vmax.f32 %v1033_v60, 0.0 }
 0x13f   :  { %v1429_v41 = vpop.f32.mrb[36].mxu1  ;;  %v1384_v14 = vpop.f32.mrb[37].mxu0 }
 0x140   :  { %v1053_v45 = vmax.f32 %v1036_v39, 0.0  ;;  %v1385_v46 = vadd.f32 %v1384_v14, %v1383_v40  ;;  %v1430_v47 = vpop.f32.mrb[37].mxu1  ;;  %v1386_v48 = vpop.f32.mrb[38].mxu0 }
 0x141   :  { %v1431_v10 = vadd.f32 %v1430_v47, %v1429_v41  ;;  %v1432_v49 = vpop.f32.mrb[38].mxu1  ;;  %v1387_v50 = vpop.f32.mrb[39].mxu0 }
 0x142   :  { %v1246_v51 = vpack.c.bf16 %v1053_v45, %v1052_v43  ;;  %v969_v52 = vadd.f32 %v1385_v46, %v1857_v25  ;;  %v1433_v53 = vpop.f32.mrb[39].mxu1 }
 0x144   :  { %1250 = vst [vmem:[%s1886_s3 + $0x18] sm:$0xff] %v1246_v51   ;;  %v1041_v12 = vadd.f32 %v1431_v10, %v969_v52 }
 0x146   :  { %v1054_v54 = vmax.f32 %v1041_v12, 0.0 }
 0x148   :  { %v1227_v55 = vpack.c.bf16 %v1054_v54, %v1054_v54 }
 0x14a   :  { %1100 = vst [vmem:[%s1886_s3 + $0x20] sm:$0xf] %v1227_v55 }

// kernel: vae_forward.13
= control target key start
LH: loop header
LB: loop body
LE: loop exit
PB: predicated region body
PF: predicated region fallthrough
CT: control target
= control target key end

     0   :  { %s3525_s1 = inlined_call_operand.vmem [shape: bf16[2048,256], index: 1, kind: input, shape index: {}]   ;;  %s3526_s0 = inlined_call_operand.vmem [shape: bf16[8,2048], index: 0, kind: input, shape index: {}]   ;;  %s3527_s2 = inlined_call_operand.vmem [shape: f32[1,256], index: 2, kind: input, shape index: {}]   ;;  %s3528_s3 = inlined_call_operand.vmem [shape: bf16[8,256], index: 3, kind: output, shape index: {}]  }
   0x1   :  { %v2271_v0 = vld [vmem:[%s3525_s1 + $0x4] ss:$8 sps:$4 sm:$0xff]   ;;  %v2275_v2 = vld [vmem:[%s3525_s1] ss:$8 sps:$4 sm:$0xff]   ;;  %v2277_v4 = vld [vmem:[%s3525_s1 + $0x14] ss:$8 sps:$4 sm:$0xff]  }
   0x2   :  { %v2273_v1 = vld [vmem:[%s3525_s1 + $0x404] ss:$8 sps:$4 sm:$0xff]   ;;  %1626 = vmatprep.subr.bf16.mxu1 %v2271_v0  ;;  %v2276_v3 = vld [vmem:[%s3525_s1 + $0x400] ss:$8 sps:$4 sm:$0xff]   ;;  %v2279_v5 = vld [vmem:[%s3525_s1 + $0x414] ss:$8 sps:$4 sm:$0xff]  }
   0x3   :  { %1790 = vmatprep.subr.bf16.mxu0 %v2273_v1  ;;  %1627 = vmatpush1.bf16.msra.mxu1 %v2275_v2  ;;  %v2281_v6 = vld [vmem:[%s3525_s1 + $0x10] ss:$8 sps:$4 sm:$0xff]   ;;  %v2283_v8 = vld [vmem:[%s3525_s1 + $0x24] ss:$8 sps:$4 sm:$0xff]   ;;  %v2287_v10 = vld [vmem:[%s3525_s1 + $0x20] ss:$8 sps:$4 sm:$0xff]  }
   0x4   :  { %1791 = vmatpush1.bf16.msra.mxu0 %v2276_v3  ;;  %1628 = vmatprep.subr.bf16.mxu1 %v2277_v4  ;;  %v2282_v7 = vld [vmem:[%s3525_s1 + $0x410] ss:$8 sps:$4 sm:$0xff]   ;;  %v2285_v9 = vld [vmem:[%s3525_s1 + $0x424] ss:$8 sps:$4 sm:$0xff]   ;;  %v2288_v11 = vld [vmem:[%s3525_s1 + $0x420] ss:$8 sps:$4 sm:$0xff]  }
   0x5   :  { %1792 = vmatprep.subr.bf16.mxu0 %v2279_v5  ;;  %v2289_v12 = vld [vmem:[%s3525_s1 + $0x34] ss:$8 sps:$4 sm:$0xff]   ;;  %v2293_v14 = vld [vmem:[%s3525_s1 + $0x30] ss:$8 sps:$4 sm:$0xff]   ;;  %v2295_v16 = vld [vmem:[%s3525_s1 + $0x44] ss:$8 sps:$4 sm:$0xff]  }
   0x6   :  { %v2291_v13 = vld [vmem:[%s3525_s1 + $0x434] ss:$8 sps:$4 sm:$0xff]   ;;  %v2294_v15 = vld [vmem:[%s3525_s1 + $0x430] ss:$8 sps:$4 sm:$0xff]   ;;  %v2297_v17 = vld [vmem:[%s3525_s1 + $0x444] ss:$8 sps:$4 sm:$0xff]  }
   0x7   :  { %1629 = vmatpush1.bf16.msra.mxu1 %v2281_v6  ;;  %v2299_v18 = vld [vmem:[%s3525_s1 + $0x40] ss:$8 sps:$4 sm:$0xff]   ;;  %v2301_v20 = vld [vmem:[%s3525_s1 + $0x54] ss:$8 sps:$4 sm:$0xff]   ;;  %v2305_v22 = vld [vmem:[%s3525_s1 + $0x50] ss:$8 sps:$4 sm:$0xff]  }
   0x8   :  { %1793 = vmatpush1.bf16.msra.mxu0 %v2282_v7  ;;  %1630 = vmatprep.subr.bf16.mxu1 %v2283_v8  ;;  %v2300_v19 = vld [vmem:[%s3525_s1 + $0x440] ss:$8 sps:$4 sm:$0xff]   ;;  %v2303_v21 = vld [vmem:[%s3525_s1 + $0x454] ss:$8 sps:$4 sm:$0xff]   ;;  %v2306_v23 = vld [vmem:[%s3525_s1 + $0x450] ss:$8 sps:$4 sm:$0xff]  }
   0x9   :  { %1794 = vmatprep.subr.bf16.mxu0 %v2285_v9  ;;  %v2307_v24 = vld [vmem:[%s3525_s1 + $0x64] ss:$8 sps:$4 sm:$0xff]   ;;  %v2311_v26 = vld [vmem:[%s3525_s1 + $0x60] ss:$8 sps:$4 sm:$0xff]   ;;  %v2313_v28 = vld [vmem:[%s3525_s1 + $0x74] ss:$8 sps:$4 sm:$0xff]  }
   0xa   :  { %v2309_v25 = vld [vmem:[%s3525_s1 + $0x464] ss:$8 sps:$4 sm:$0xff]   ;;  %v2312_v27 = vld [vmem:[%s3525_s1 + $0x460] ss:$8 sps:$4 sm:$0xff]   ;;  %v2315_v29 = vld [vmem:[%s3525_s1 + $0x474] ss:$8 sps:$4 sm:$0xff]  }
   0xb   :  { %1631 = vmatpush1.bf16.msra.mxu1 %v2287_v10  ;;  %v2317_v30 = vld [vmem:[%s3525_s1 + $0x70] ss:$8 sps:$4 sm:$0xff]   ;;  %v2319_v32 = vld [vmem:[%s3525_s1 + $0x84] ss:$8 sps:$4 sm:$0xff]   ;;  %v2323_v34 = vld [vmem:[%s3525_s1 + $0x80] ss:$8 sps:$4 sm:$0xff]  }
   0xc   :  { %1795 = vmatpush1.bf16.msra.mxu0 %v2288_v11  ;;  %1632 = vmatprep.subr.bf16.mxu1 %v2289_v12  ;;  %v2318_v31 = vld [vmem:[%s3525_s1 + $0x470] ss:$8 sps:$4 sm:$0xff]   ;;  %v2321_v33 = vld [vmem:[%s3525_s1 + $0x484] ss:$8 sps:$4 sm:$0xff]   ;;  %v2324_v35 = vld [vmem:[%s3525_s1 + $0x480] ss:$8 sps:$4 sm:$0xff]  }
   0xd   :  { %1796 = vmatprep.subr.bf16.mxu0 %v2291_v13  ;;  %v2325_v36 = vld [vmem:[%s3525_s1 + $0x94] ss:$8 sps:$4 sm:$0xff]   ;;  %v2329_v38 = vld [vmem:[%s3525_s1 + $0x90] ss:$8 sps:$4 sm:$0xff]   ;;  %v2331_v40 = vld [vmem:[%s3525_s1 + $0xa4] ss:$8 sps:$4 sm:$0xff]  }
   0xe   :  { %v2327_v37 = vld [vmem:[%s3525_s1 + $0x494] ss:$8 sps:$4 sm:$0xff]   ;;  %v2330_v39 = vld [vmem:[%s3525_s1 + $0x490] ss:$8 sps:$4 sm:$0xff]   ;;  %v2333_v41 = vld [vmem:[%s3525_s1 + $0x4a4] ss:$8 sps:$4 sm:$0xff]  }
   0xf   :  { %1633 = vmatpush1.bf16.msra.mxu1 %v2293_v14  ;;  %v2335_v42 = vld [vmem:[%s3525_s1 + $0xa0] ss:$8 sps:$4 sm:$0xff]   ;;  %v2337_v44 = vld [vmem:[%s3525_s1 + $0xb4] ss:$8 sps:$4 sm:$0xff]   ;;  %v2341_v47 = vld [vmem:[%s3525_s1 + $0xb0] ss:$8 sps:$4 sm:$0xff]  }
  0x10   :  { %1797 = vmatpush1.bf16.msra.mxu0 %v2294_v15  ;;  %1634 = vmatprep.subr.bf16.mxu1 %v2295_v16  ;;  %v2336_v43 = vld [vmem:[%s3525_s1 + $0x4a0] ss:$8 sps:$4 sm:$0xff]   ;;  %v2339_v45 = vld [vmem:[%s3525_s1 + $0x4b4] ss:$8 sps:$4 sm:$0xff]   ;;  %v2342_v49 = vld [vmem:[%s3525_s1 + $0x4b0] ss:$8 sps:$4 sm:$0xff]  }
  0x11   :  { %1798 = vmatprep.subr.bf16.mxu0 %v2297_v17  ;;  %v14_v46 = vld [vmem:[%s3526_s0] sm:$0xff]  ;;  %v2349_v56 = vld [vmem:[%s3525_s1 + $0xd4] ss:$8 sps:$4 sm:$0xff]   ;;  %v2353_v58 = vld [vmem:[%s3525_s1 + $0xd0] ss:$8 sps:$4 sm:$0xff]  }
  0x12   :  { %v1970_v48 = vcombine.high %v14_v46, %v14_v46  ;;  %v18_v50 = vld [vmem:[%s3526_s0 + $0x20] sm:$0xff]  ;;  %v2351_v57 = vld [vmem:[%s3525_s1 + $0x4d4] ss:$8 sps:$4 sm:$0xff]   ;;  %v2354_v59 = vld [vmem:[%s3525_s1 + $0x4d0] ss:$8 sps:$4 sm:$0xff]   ;;  %v1969_v6 = vcombine.low %v14_v46, %v14_v46 }
  0x13   :  { %1635 = vmatpush1.bf16.msra.mxu1 %v2299_v18  ;;  %v2343_v51 = vld [vmem:[%s3525_s1 + $0xc4] ss:$8 sps:$4 sm:$0xff]   ;;  %v1978_v53 = vcombine.high %v18_v50, %v18_v50  ;;  %v2347_v54 = vld [vmem:[%s3525_s1 + $0xc0] ss:$8 sps:$4 sm:$0xff]   ;;  %v2361_v0 = vld [vmem:[%s3525_s1 + $0xf4] ss:$8 sps:$4 sm:$0xff]   ;;  %v1977_v7 = vcombine.low %v18_v50, %v18_v50 }
  0x14   :  { %1799 = vmatpush1.bf16.msra.mxu0 %v2300_v19  ;;  %1636 = vmatprep.subr.bf16.mxu1 %v2301_v20  ;;  %v2345_v52 = vld [vmem:[%s3525_s1 + $0x4c4] ss:$8 sps:$4 sm:$0xff]   ;;  %v2348_v55 = vld [vmem:[%s3525_s1 + $0x4c0] ss:$8 sps:$4 sm:$0xff]   ;;  %v2363_v1 = vld [vmem:[%s3525_s1 + $0x4f4] ss:$8 sps:$4 sm:$0xff]  }
  0x15   :  { %1800 = vmatprep.subr.bf16.mxu0 %v2303_v21  ;;  %1658 = vmatprep.mubr.bf16.mxu1 %v1970_v48  ;;  %v2355_v60 = vld [vmem:[%s3525_s1 + $0xe4] ss:$8 sps:$4 sm:$0xff]   ;;  %v2359_v62 = vld [vmem:[%s3525_s1 + $0xe0] ss:$8 sps:$4 sm:$0xff]   ;;  %v2365_v2 = vld [vmem:[%s3525_s1 + $0xf0] ss:$8 sps:$4 sm:$0xff]  }
  0x16   :  { %1822 = vmatprep.mubr.bf16.mxu0 %v1978_v53  ;;  %v2357_v61 = vld [vmem:[%s3525_s1 + $0x4e4] ss:$8 sps:$4 sm:$0xff]   ;;  %v2360_v63 = vld [vmem:[%s3525_s1 + $0x4e0] ss:$8 sps:$4 sm:$0xff]   ;;  %v2366_v3 = vld [vmem:[%s3525_s1 + $0x4f0] ss:$8 sps:$4 sm:$0xff]  }
  0x17   :  { %1637 = vmatpush1.bf16.msra.mxu1 %v2305_v22  ;;  %v2371_v4 = vld [vmem:[%s3525_s1 + $0x104] ss:$8 sps:$4 sm:$0xff]   ;;  %v2369_v8 = vld [vmem:[%s3525_s1 + $0x100] ss:$8 sps:$4 sm:$0xff]   ;;  %v2379_v10 = vld [vmem:[%s3525_s1 + $0x114] ss:$8 sps:$4 sm:$0xff]  }
  0x18   :  { %1801 = vmatpush1.bf16.msra.mxu0 %v2306_v23  ;;  %1638 = vmatprep.subr.bf16.mxu1 %v2307_v24  ;;  %v2376_v5 = vld [vmem:[%s3525_s1 + $0x504] ss:$8 sps:$4 sm:$0xff]   ;;  %v2374_v9 = vld [vmem:[%s3525_s1 + $0x500] ss:$8 sps:$4 sm:$0xff]   ;;  %v2382_v11 = vld [vmem:[%s3525_s1 + $0x514] ss:$8 sps:$4 sm:$0xff]  }
  0x19   :  { %1802 = vmatprep.subr.bf16.mxu0 %v2309_v25  ;;  %v2377_v12 = vld [vmem:[%s3525_s1 + $0x110] ss:$8 sps:$4 sm:$0xff]   ;;  %v2385_v14 = vld [vmem:[%s3525_s1 + $0x124] ss:$8 sps:$4 sm:$0xff]   ;;  %v2383_v16 = vld [vmem:[%s3525_s1 + $0x120] ss:$8 sps:$4 sm:$0xff]  }
  0x1a   :  { %v2380_v13 = vld [vmem:[%s3525_s1 + $0x510] ss:$8 sps:$4 sm:$0xff]   ;;  %v2388_v15 = vld [vmem:[%s3525_s1 + $0x524] ss:$8 sps:$4 sm:$0xff]   ;;  %v2386_v17 = vld [vmem:[%s3525_s1 + $0x520] ss:$8 sps:$4 sm:$0xff]  }
  0x1b   :  { %1639 = vmatpush1.bf16.msra.mxu1 %v2311_v26  ;;  %v2391_v18 = vld [vmem:[%s3525_s1 + $0x134] ss:$8 sps:$4 sm:$0xff]   ;;  %v2389_v20 = vld [vmem:[%s3525_s1 + $0x130] ss:$8 sps:$4 sm:$0xff]   ;;  %v2397_v22 = vld [vmem:[%s3525_s1 + $0x144] ss:$8 sps:$4 sm:$0xff]  }
  0x1c   :  { %1803 = vmatpush1.bf16.msra.mxu0 %v2312_v27  ;;  %1640 = vmatprep.subr.bf16.mxu1 %v2313_v28  ;;  %v2394_v19 = vld [vmem:[%s3525_s1 + $0x534] ss:$8 sps:$4 sm:$0xff]   ;;  %v2392_v21 = vld [vmem:[%s3525_s1 + $0x530] ss:$8 sps:$4 sm:$0xff]   ;;  %v2400_v23 = vld [vmem:[%s3525_s1 + $0x544] ss:$8 sps:$4 sm:$0xff]  }
  0x1d   :  { %1804 = vmatprep.subr.bf16.mxu0 %v2315_v29  ;;  %v2395_v24 = vld [vmem:[%s3525_s1 + $0x140] ss:$8 sps:$4 sm:$0xff]   ;;  %v2403_v26 = vld [vmem:[%s3525_s1 + $0x154] ss:$8 sps:$4 sm:$0xff]   ;;  %v2401_v28 = vld [vmem:[%s3525_s1 + $0x150] ss:$8 sps:$4 sm:$0xff]  }
  0x1e   :  { %v2398_v25 = vld [vmem:[%s3525_s1 + $0x540] ss:$8 sps:$4 sm:$0xff]   ;;  %v2406_v27 = vld [vmem:[%s3525_s1 + $0x554] ss:$8 sps:$4 sm:$0xff]   ;;  %v2404_v29 = vld [vmem:[%s3525_s1 + $0x550] ss:$8 sps:$4 sm:$0xff]  }
  0x1f   :  { %1641 = vmatpush1.bf16.msra.mxu1 %v2317_v30  ;;  %v2409_v30 = vld [vmem:[%s3525_s1 + $0x164] ss:$8 sps:$4 sm:$0xff]   ;;  %v2427_v46 = vld [vmem:[%s3525_s1 + $0x194] ss:$8 sps:$4 sm:$0xff]   ;;  %v2425_v48 = vld [vmem:[%s3525_s1 + $0x190] ss:$8 sps:$4 sm:$0xff]  }
  0x20   :  { %1805 = vmatpush1.bf16.msra.mxu0 %v2318_v31  ;;  %1642 = vmatprep.subr.bf16.mxu1 %v2319_v32  ;;  %v2412_v31 = vld [vmem:[%s3525_s1 + $0x564] ss:$8 sps:$4 sm:$0xff]   ;;  %v2434_v53 = vld [vmem:[%s3525_s1 + $0x5a0] ss:$8 sps:$4 sm:$0xff]  }
  0x21   :  { %1806 = vmatprep.subr.bf16.mxu0 %v2321_v33  ;;  %v2970_v32 = vld [vmem:[%s3526_s0 + $0x8] sm:$0xff] }
  0x22   :  { %v2407_v33 = vld [vmem:[%s3525_s1 + $0x160] ss:$8 sps:$4 sm:$0xff]   ;;  %v2433_v50 = vld [vmem:[%s3525_s1 + $0x1a4] ss:$8 sps:$4 sm:$0xff]  }
  0x23   :  { %1643 = vmatpush1.bf16.msra.mxu1 %v2323_v34  ;;  %v2410_v34 = vld [vmem:[%s3525_s1 + $0x560] ss:$8 sps:$4 sm:$0xff]  }
  0x24   :  { %1807 = vmatpush1.bf16.msra.mxu0 %v2324_v35  ;;  %1644 = vmatprep.subr.bf16.mxu1 %v2325_v36  ;;  %v1972_v35 = vcombine.high %v2970_v32, %v2970_v32  ;;  %v2983_v36 = vld [vmem:[%s3526_s0 + $0x28] sm:$0xff] }
  0x25   :  { %1808 = vmatprep.subr.bf16.mxu0 %v2327_v37  ;;  %v2415_v37 = vld [vmem:[%s3525_s1 + $0x174] ss:$8 sps:$4 sm:$0xff]  }
  0x27   :  { %1645 = vmatpush1.bf16.msra.mxu1 %v2329_v38  ;;  %v1980_v38 = vcombine.high %v2983_v36, %v2983_v36 }
  0x28   :  { %1809 = vmatpush1.bf16.msra.mxu0 %v2330_v39  ;;  %1646 = vmatprep.subr.bf16.mxu1 %v2331_v40  ;;  %v2418_v39 = vld [vmem:[%s3525_s1 + $0x574] ss:$8 sps:$4 sm:$0xff]   ;;  %v2413_v40 = vld [vmem:[%s3525_s1 + $0x170] ss:$8 sps:$4 sm:$0xff]  }
  0x29   :  { %1810 = vmatprep.subr.bf16.mxu0 %v2333_v41  ;;  %v2416_v41 = vld [vmem:[%s3525_s1 + $0x570] ss:$8 sps:$4 sm:$0xff]  }
  0x2b   :  { %1647 = vmatpush1.bf16.msra.mxu1 %v2335_v42  ;;  %v2421_v42 = vld [vmem:[%s3525_s1 + $0x184] ss:$8 sps:$4 sm:$0xff]  }
  0x2c   :  { %1811 = vmatpush1.bf16.msra.mxu0 %v2336_v43  ;;  %1648 = vmatprep.subr.bf16.mxu1 %v2337_v44  ;;  %v2424_v43 = vld [vmem:[%s3525_s1 + $0x584] ss:$8 sps:$4 sm:$0xff]   ;;  %v2419_v44 = vld [vmem:[%s3525_s1 + $0x180] ss:$8 sps:$4 sm:$0xff]  }
  0x2d   :  { %1812 = vmatprep.subr.bf16.mxu0 %v2339_v45  ;;  %v2422_v45 = vld [vmem:[%s3525_s1 + $0x580] ss:$8 sps:$4 sm:$0xff]  }
  0x2f   :  { %1649 = vmatpush1.bf16.msra.mxu1 %v2341_v47  ;;  %v2430_v47 = vld [vmem:[%s3525_s1 + $0x594] ss:$8 sps:$4 sm:$0xff]  }
  0x30   :  { %1813 = vmatpush1.bf16.msra.mxu0 %v2342_v49  ;;  %1650 = vmatprep.subr.bf16.mxu1 %v2343_v51  ;;  %v2428_v49 = vld [vmem:[%s3525_s1 + $0x590] ss:$8 sps:$4 sm:$0xff]   ;;  %v2436_v51 = vld [vmem:[%s3525_s1 + $0x5a4] ss:$8 sps:$4 sm:$0xff]  }
  0x31   :  { %1814 = vmatprep.subr.bf16.mxu0 %v2345_v52  ;;  %v2431_v52 = vld [vmem:[%s3525_s1 + $0x1a0] ss:$8 sps:$4 sm:$0xff]  }
  0x33   :  { %1651 = vmatpush1.bf16.msra.mxu1 %v2347_v54  ;;  %v2439_v54 = vld [vmem:[%s3525_s1 + $0x1b4] ss:$8 sps:$4 sm:$0xff]  }
  0x34   :  { %1815 = vmatpush1.bf16.msra.mxu0 %v2348_v55  ;;  %1652 = vmatprep.subr.bf16.mxu1 %v2349_v56  ;;  %v2442_v55 = vld [vmem:[%s3525_s1 + $0x5b4] ss:$8 sps:$4 sm:$0xff]   ;;  %v2437_v56 = vld [vmem:[%s3525_s1 + $0x1b0] ss:$8 sps:$4 sm:$0xff]  }
  0x35   :  { %1816 = vmatprep.subr.bf16.mxu0 %v2351_v57  ;;  %v2440_v57 = vld [vmem:[%s3525_s1 + $0x5b0] ss:$8 sps:$4 sm:$0xff]  }
  0x37   :  { %1653 = vmatpush1.bf16.msra.mxu1 %v2353_v58  ;;  %v2445_v58 = vld [vmem:[%s3525_s1 + $0x1c4] ss:$8 sps:$4 sm:$0xff]  }
  0x38   :  { %1817 = vmatpush1.bf16.msra.mxu0 %v2354_v59  ;;  %1654 = vmatprep.subr.bf16.mxu1 %v2355_v60  ;;  %v2448_v59 = vld [vmem:[%s3525_s1 + $0x5c4] ss:$8 sps:$4 sm:$0xff]   ;;  %v2443_v60 = vld [vmem:[%s3525_s1 + $0x1c0] ss:$8 sps:$4 sm:$0xff]  }
  0x39   :  { %1818 = vmatprep.subr.bf16.mxu0 %v2357_v61  ;;  %v2446_v61 = vld [vmem:[%s3525_s1 + $0x5c0] ss:$8 sps:$4 sm:$0xff]  }
  0x3b   :  { %1655 = vmatpush1.bf16.msra.mxu1 %v2359_v62  ;;  %v2451_v62 = vld [vmem:[%s3525_s1 + $0x1d4] ss:$8 sps:$4 sm:$0xff]  }
  0x3c   :  { %1819 = vmatpush1.bf16.msra.mxu0 %v2360_v63  ;;  %1656 = vmatprep.subr.bf16.mxu1 %v2361_v0  ;;  %v2454_v63 = vld [vmem:[%s3525_s1 + $0x5d4] ss:$8 sps:$4 sm:$0xff]   ;;  %v2449_v0 = vld [vmem:[%s3525_s1 + $0x1d0] ss:$8 sps:$4 sm:$0xff]  }
  0x3d   :  { %1820 = vmatprep.subr.bf16.mxu0 %v2363_v1  ;;  %v2452_v1 = vld [vmem:[%s3525_s1 + $0x5d0] ss:$8 sps:$4 sm:$0xff]  }
  0x3f   :  { %1657 = vmatpush1.bf16.msra.mxu1 %v2365_v2  ;;  %v2457_v2 = vld [vmem:[%s3525_s1 + $0x1e4] ss:$8 sps:$4 sm:$0xff]  }
  0x40   :  { %1821 = vmatpush1.bf16.msra.mxu0 %v2366_v3  ;;  %1667 = vmatprep.subr.bf16.mxu1 %v2371_v4  ;;  %v2460_v3 = vld [vmem:[%s3525_s1 + $0x5e4] ss:$8 sps:$4 sm:$0xff]   ;;  %v2455_v4 = vld [vmem:[%s3525_s1 + $0x1e0] ss:$8 sps:$4 sm:$0xff]  }
  0x41   :  { %1831 = vmatprep.subr.bf16.mxu0 %v2376_v5  ;;  %v2458_v5 = vld [vmem:[%s3525_s1 + $0x5e0] ss:$8 sps:$4 sm:$0xff]  }
  0x42   :  { %1659 = vmatmul.mubr.bf16.vlgmr.msra.gmra.mrb[0].mxu1 %v1969_v6  ;;  %v2463_v6 = vld [vmem:[%s3525_s1 + $0x1f4] ss:$8 sps:$4 sm:$0xff]  }
  0x43   :  { %1823 = vmatmul.mubr.bf16.vlgmr.msra.gmra.mrb[0].mxu0 %v1977_v7  ;;  %1668 = vmatpush1.bf16.msra.mxu1 %v2369_v8  ;;  %v2466_v7 = vld [vmem:[%s3525_s1 + $0x5f4] ss:$8 sps:$4 sm:$0xff]   ;;  %v2461_v8 = vld [vmem:[%s3525_s1 + $0x1f0] ss:$8 sps:$4 sm:$0xff]  }
  0x44   :  { %1832 = vmatpush1.bf16.msra.mxu0 %v2374_v9  ;;  %1669 = vmatprep.subr.bf16.mxu1 %v2379_v10  ;;  %v2464_v9 = vld [vmem:[%s3525_s1 + $0x5f0] ss:$8 sps:$4 sm:$0xff]   ;;  %v2471_v10 = vld [vmem:[%s3525_s1 + $0x204] ss:$8 sps:$4 sm:$0xff]  }
  0x45   :  { %1833 = vmatprep.subr.bf16.mxu0 %v2382_v11  ;;  %1699 = vmatprep.mubr.bf16.mxu1 %v1972_v35  ;;  %v2476_v11 = vld [vmem:[%s3525_s1 + $0x604] ss:$8 sps:$4 sm:$0xff]   ;;  %v2498_v35 = vld [vmem:[%s3525_s1 + $0x640] ss:$8 sps:$4 sm:$0xff]  }
  0x46   :  { %1863 = vmatprep.mubr.bf16.mxu0 %v1980_v38  ;;  %v2501_v38 = vld [vmem:[%s3525_s1 + $0x250] ss:$8 sps:$4 sm:$0xff]  }
  0x47   :  { %1670 = vmatpush1.bf16.msra.mxu1 %v2377_v12  ;;  %v1971_v12 = vcombine.low %v2970_v32, %v2970_v32  ;;  %v2497_v32 = vld [vmem:[%s3525_s1 + $0x244] ss:$8 sps:$4 sm:$0xff]  }
  0x48   :  { %1834 = vmatpush1.bf16.msra.mxu0 %v2380_v13  ;;  %1671 = vmatprep.subr.bf16.mxu1 %v2385_v14  ;;  %v2469_v13 = vld [vmem:[%s3525_s1 + $0x200] ss:$8 sps:$4 sm:$0xff]   ;;  %v1979_v14 = vcombine.low %v2983_v36, %v2983_v36  ;;  %v2503_v36 = vld [vmem:[%s3525_s1 + $0x254] ss:$8 sps:$4 sm:$0xff]  }
  0x49   :  { %1835 = vmatprep.subr.bf16.mxu0 %v2388_v15  ;;  %v2474_v15 = vld [vmem:[%s3525_s1 + $0x600] ss:$8 sps:$4 sm:$0xff]  }
  0x4b   :  { %1672 = vmatpush1.bf16.msra.mxu1 %v2383_v16  ;;  %v2479_v16 = vld [vmem:[%s3525_s1 + $0x214] ss:$8 sps:$4 sm:$0xff]  }
  0x4c   :  { %1836 = vmatpush1.bf16.msra.mxu0 %v2386_v17  ;;  %1673 = vmatprep.subr.bf16.mxu1 %v2391_v18  ;;  %v2482_v17 = vld [vmem:[%s3525_s1 + $0x614] ss:$8 sps:$4 sm:$0xff]  }
  0x4d   :  { %1837 = vmatprep.subr.bf16.mxu0 %v2394_v19  ;;  %v3120_v18 = vld [vmem:[%s3526_s0 + $0x10] sm:$0xff] }
  0x4e   :  { %v1974_v19 = vcombine.high %v3120_v18, %v3120_v18 }
  0x4f   :  { %1674 = vmatpush1.bf16.msra.mxu1 %v2389_v20  ;;  %v3127_v20 = vld [vmem:[%s3526_s0 + $0x30] sm:$0xff] }
  0x50   :  { %1838 = vmatpush1.bf16.msra.mxu0 %v2392_v21  ;;  %1675 = vmatprep.subr.bf16.mxu1 %v2397_v22  ;;  %v2477_v21 = vld [vmem:[%s3525_s1 + $0x210] ss:$8 sps:$4 sm:$0xff]  }
  0x51   :  { %1839 = vmatprep.subr.bf16.mxu0 %v2400_v23  ;;  %v2480_v22 = vld [vmem:[%s3525_s1 + $0x610] ss:$8 sps:$4 sm:$0xff]   ;;  %v1982_v23 = vcombine.high %v3127_v20, %v3127_v20 }
  0x53   :  { %1676 = vmatpush1.bf16.msra.mxu1 %v2395_v24  ;;  %v2485_v24 = vld [vmem:[%s3525_s1 + $0x224] ss:$8 sps:$4 sm:$0xff]  }
  0x54   :  { %1840 = vmatpush1.bf16.msra.mxu0 %v2398_v25  ;;  %1677 = vmatprep.subr.bf16.mxu1 %v2403_v26  ;;  %v2488_v25 = vld [vmem:[%s3525_s1 + $0x624] ss:$8 sps:$4 sm:$0xff]   ;;  %v2483_v26 = vld [vmem:[%s3525_s1 + $0x220] ss:$8 sps:$4 sm:$0xff]  }
  0x55   :  { %1841 = vmatprep.subr.bf16.mxu0 %v2406_v27  ;;  %v2486_v27 = vld [vmem:[%s3525_s1 + $0x620] ss:$8 sps:$4 sm:$0xff]  }
  0x57   :  { %1678 = vmatpush1.bf16.msra.mxu1 %v2401_v28  ;;  %v2491_v28 = vld [vmem:[%s3525_s1 + $0x234] ss:$8 sps:$4 sm:$0xff]  }
  0x58   :  { %1842 = vmatpush1.bf16.msra.mxu0 %v2404_v29  ;;  %1679 = vmatprep.subr.bf16.mxu1 %v2409_v30  ;;  %v2494_v29 = vld [vmem:[%s3525_s1 + $0x634] ss:$8 sps:$4 sm:$0xff]   ;;  %v2489_v30 = vld [vmem:[%s3525_s1 + $0x230] ss:$8 sps:$4 sm:$0xff]  }
  0x59   :  { %1843 = vmatprep.subr.bf16.mxu0 %v2412_v31  ;;  %v2492_v31 = vld [vmem:[%s3525_s1 + $0x630] ss:$8 sps:$4 sm:$0xff]  }
  0x5b   :  { %1680 = vmatpush1.bf16.msra.mxu1 %v2407_v33  ;;  %v2500_v33 = vld [vmem:[%s3525_s1 + $0x644] ss:$8 sps:$4 sm:$0xff]  }
  0x5c   :  { %1844 = vmatpush1.bf16.msra.mxu0 %v2410_v34  ;;  %1681 = vmatprep.subr.bf16.mxu1 %v2415_v37  ;;  %v2495_v34 = vld [vmem:[%s3525_s1 + $0x240] ss:$8 sps:$4 sm:$0xff]   ;;  %v2506_v37 = vld [vmem:[%s3525_s1 + $0x654] ss:$8 sps:$4 sm:$0xff]  }
  0x5d   :  { %1845 = vmatprep.subr.bf16.mxu0 %v2418_v39  ;;  %v2504_v39 = vld [vmem:[%s3525_s1 + $0x650] ss:$8 sps:$4 sm:$0xff]  }
  0x5f   :  { %1682 = vmatpush1.bf16.msra.mxu1 %v2413_v40  ;;  %v2509_v40 = vld [vmem:[%s3525_s1 + $0x264] ss:$8 sps:$4 sm:$0xff]  }
  0x60   :  { %1846 = vmatpush1.bf16.msra.mxu0 %v2416_v41  ;;  %1683 = vmatprep.subr.bf16.mxu1 %v2421_v42  ;;  %v2512_v41 = vld [vmem:[%s3525_s1 + $0x664] ss:$8 sps:$4 sm:$0xff]   ;;  %v2507_v42 = vld [vmem:[%s3525_s1 + $0x260] ss:$8 sps:$4 sm:$0xff]  }
  0x61   :  { %1847 = vmatprep.subr.bf16.mxu0 %v2424_v43  ;;  %v2510_v43 = vld [vmem:[%s3525_s1 + $0x660] ss:$8 sps:$4 sm:$0xff]  }
  0x63   :  { %1684 = vmatpush1.bf16.msra.mxu1 %v2419_v44  ;;  %v2515_v44 = vld [vmem:[%s3525_s1 + $0x274] ss:$8 sps:$4 sm:$0xff]  }
  0x64   :  { %1848 = vmatpush1.bf16.msra.mxu0 %v2422_v45  ;;  %1685 = vmatprep.subr.bf16.mxu1 %v2427_v46  ;;  %v2518_v45 = vld [vmem:[%s3525_s1 + $0x674] ss:$8 sps:$4 sm:$0xff]   ;;  %v2513_v46 = vld [vmem:[%s3525_s1 + $0x270] ss:$8 sps:$4 sm:$0xff]  }
  0x65   :  { %1849 = vmatprep.subr.bf16.mxu0 %v2430_v47  ;;  %v2516_v47 = vld [vmem:[%s3525_s1 + $0x670] ss:$8 sps:$4 sm:$0xff]  }
  0x67   :  { %1686 = vmatpush1.bf16.msra.mxu1 %v2425_v48  ;;  %v2521_v48 = vld [vmem:[%s3525_s1 + $0x284] ss:$8 sps:$4 sm:$0xff]  }
  0x68   :  { %1850 = vmatpush1.bf16.msra.mxu0 %v2428_v49  ;;  %1687 = vmatprep.subr.bf16.mxu1 %v2433_v50  ;;  %v2524_v49 = vld [vmem:[%s3525_s1 + $0x684] ss:$8 sps:$4 sm:$0xff]   ;;  %v2519_v50 = vld [vmem:[%s3525_s1 + $0x280] ss:$8 sps:$4 sm:$0xff]  }
  0x69   :  { %1851 = vmatprep.subr.bf16.mxu0 %v2436_v51  ;;  %v2522_v51 = vld [vmem:[%s3525_s1 + $0x680] ss:$8 sps:$4 sm:$0xff]  }
  0x6b   :  { %1688 = vmatpush1.bf16.msra.mxu1 %v2431_v52  ;;  %v2527_v52 = vld [vmem:[%s3525_s1 + $0x294] ss:$8 sps:$4 sm:$0xff]  }
  0x6c   :  { %1852 = vmatpush1.bf16.msra.mxu0 %v2434_v53  ;;  %1689 = vmatprep.subr.bf16.mxu1 %v2439_v54  ;;  %v2530_v53 = vld [vmem:[%s3525_s1 + $0x694] ss:$8 sps:$4 sm:$0xff]   ;;  %v2525_v54 = vld [vmem:[%s3525_s1 + $0x290] ss:$8 sps:$4 sm:$0xff]  }
  0x6d   :  { %1853 = vmatprep.subr.bf16.mxu0 %v2442_v55  ;;  %v2528_v55 = vld [vmem:[%s3525_s1 + $0x690] ss:$8 sps:$4 sm:$0xff]  }
  0x6f   :  { %1690 = vmatpush1.bf16.msra.mxu1 %v2437_v56  ;;  %v2533_v56 = vld [vmem:[%s3525_s1 + $0x2a4] ss:$8 sps:$4 sm:$0xff]  }
  0x70   :  { %1854 = vmatpush1.bf16.msra.mxu0 %v2440_v57  ;;  %1691 = vmatprep.subr.bf16.mxu1 %v2445_v58  ;;  %v2536_v57 = vld [vmem:[%s3525_s1 + $0x6a4] ss:$8 sps:$4 sm:$0xff]   ;;  %v2531_v58 = vld [vmem:[%s3525_s1 + $0x2a0] ss:$8 sps:$4 sm:$0xff]  }
  0x71   :  { %1855 = vmatprep.subr.bf16.mxu0 %v2448_v59  ;;  %v2534_v59 = vld [vmem:[%s3525_s1 + $0x6a0] ss:$8 sps:$4 sm:$0xff]  }
  0x73   :  { %1692 = vmatpush1.bf16.msra.mxu1 %v2443_v60  ;;  %v2539_v60 = vld [vmem:[%s3525_s1 + $0x2b4] ss:$8 sps:$4 sm:$0xff]  }
  0x74   :  { %1856 = vmatpush1.bf16.msra.mxu0 %v2446_v61  ;;  %1693 = vmatprep.subr.bf16.mxu1 %v2451_v62  ;;  %v2542_v61 = vld [vmem:[%s3525_s1 + $0x6b4] ss:$8 sps:$4 sm:$0xff]   ;;  %v2537_v62 = vld [vmem:[%s3525_s1 + $0x2b0] ss:$8 sps:$4 sm:$0xff]  }
  0x75   :  { %1857 = vmatprep.subr.bf16.mxu0 %v2454_v63  ;;  %v2540_v63 = vld [vmem:[%s3525_s1 + $0x6b0] ss:$8 sps:$4 sm:$0xff]  }
  0x77   :  { %1694 = vmatpush1.bf16.msra.mxu1 %v2449_v0  ;;  %v2545_v0 = vld [vmem:[%s3525_s1 + $0x2c4] ss:$8 sps:$4 sm:$0xff]  }
  0x78   :  { %1858 = vmatpush1.bf16.msra.mxu0 %v2452_v1  ;;  %1695 = vmatprep.subr.bf16.mxu1 %v2457_v2  ;;  %v2548_v1 = vld [vmem:[%s3525_s1 + $0x6c4] ss:$8 sps:$4 sm:$0xff]   ;;  %v2543_v2 = vld [vmem:[%s3525_s1 + $0x2c0] ss:$8 sps:$4 sm:$0xff]  }
  0x79   :  { %1859 = vmatprep.subr.bf16.mxu0 %v2460_v3  ;;  %v2546_v3 = vld [vmem:[%s3525_s1 + $0x6c0] ss:$8 sps:$4 sm:$0xff]  }
  0x7b   :  { %1696 = vmatpush1.bf16.msra.mxu1 %v2455_v4  ;;  %v2551_v4 = vld [vmem:[%s3525_s1 + $0x2d4] ss:$8 sps:$4 sm:$0xff]  }
  0x7c   :  { %1860 = vmatpush1.bf16.msra.mxu0 %v2458_v5  ;;  %1697 = vmatprep.subr.bf16.mxu1 %v2463_v6  ;;  %v2554_v5 = vld [vmem:[%s3525_s1 + $0x6d4] ss:$8 sps:$4 sm:$0xff]   ;;  %v2549_v6 = vld [vmem:[%s3525_s1 + $0x2d0] ss:$8 sps:$4 sm:$0xff]  }
  0x7d   :  { %1861 = vmatprep.subr.bf16.mxu0 %v2466_v7  ;;  %v2552_v7 = vld [vmem:[%s3525_s1 + $0x6d0] ss:$8 sps:$4 sm:$0xff]  }
  0x7f   :  { %1698 = vmatpush1.bf16.msra.mxu1 %v2461_v8  ;;  %v2557_v8 = vld [vmem:[%s3525_s1 + $0x2e4] ss:$8 sps:$4 sm:$0xff]  }
  0x80   :  { %1862 = vmatpush1.bf16.msra.mxu0 %v2464_v9  ;;  %1708 = vmatprep.subr.bf16.mxu1 %v2471_v10  ;;  %v2560_v9 = vld [vmem:[%s3525_s1 + $0x6e4] ss:$8 sps:$4 sm:$0xff]   ;;  %v2555_v10 = vld [vmem:[%s3525_s1 + $0x2e0] ss:$8 sps:$4 sm:$0xff]  }
  0x81   :  { %1872 = vmatprep.subr.bf16.mxu0 %v2476_v11  ;;  %v2558_v11 = vld [vmem:[%s3525_s1 + $0x6e0] ss:$8 sps:$4 sm:$0xff]  }
  0x82   :  { %1700 = vmatmul.mubr.bf16.vlgmr.msra.gmra.mrb[0].mxu1 %v1971_v12  ;;  %v2563_v12 = vld [vmem:[%s3525_s1 + $0x2f4] ss:$8 sps:$4 sm:$0xff]  }
  0x83   :  { %1864 = vmatmul.mubr.bf16.vlgmr.msra.gmra.mrb[0].mxu0 %v1979_v14  ;;  %1709 = vmatpush1.bf16.msra.mxu1 %v2469_v13  ;;  %v2566_v13 = vld [vmem:[%s3525_s1 + $0x6f4] ss:$8 sps:$4 sm:$0xff]   ;;  %v2561_v14 = vld [vmem:[%s3525_s1 + $0x2f0] ss:$8 sps:$4 sm:$0xff]  }
  0x84   :  { %1873 = vmatpush1.bf16.msra.mxu0 %v2474_v15  ;;  %1710 = vmatprep.subr.bf16.mxu1 %v2479_v16  ;;  %v2564_v15 = vld [vmem:[%s3525_s1 + $0x6f0] ss:$8 sps:$4 sm:$0xff]   ;;  %v2571_v16 = vld [vmem:[%s3525_s1 + $0x304] ss:$8 sps:$4 sm:$0xff]  }
  0x85   :  { %1874 = vmatprep.subr.bf16.mxu0 %v2482_v17  ;;  %1740 = vmatprep.mubr.bf16.mxu1 %v1974_v19  ;;  %v2576_v17 = vld [vmem:[%s3525_s1 + $0x704] ss:$8 sps:$4 sm:$0xff]   ;;  %v1973_v19 = vcombine.low %v3120_v18, %v3120_v18  ;;  %v2574_v18 = vld [vmem:[%s3525_s1 + $0x700] ss:$8 sps:$4 sm:$0xff]  }
  0x86   :  { %1904 = vmatprep.mubr.bf16.mxu0 %v1982_v23  ;;  %v3323_v23 = vld [vmem:[%s3526_s0 + $0x38] sm:$0xff] }
  0x87   :  { %1711 = vmatpush1.bf16.msra.mxu1 %v2477_v21  ;;  %v1981_v21 = vcombine.low %v3127_v20, %v3127_v20  ;;  %v2579_v20 = vld [vmem:[%s3525_s1 + $0x314] ss:$8 sps:$4 sm:$0xff]  }
  0x88   :  { %1875 = vmatpush1.bf16.msra.mxu0 %v2480_v22  ;;  %1712 = vmatprep.subr.bf16.mxu1 %v2485_v24  ;;  %v3318_v22 = vld [vmem:[%s3526_s0 + $0x18] sm:$0xff]  ;;  %v2569_v24 = vld [vmem:[%s3525_s1 + $0x300] ss:$8 sps:$4 sm:$0xff]  }
  0x89   :  { %1876 = vmatprep.subr.bf16.mxu0 %v2488_v25  ;;  %v2582_v25 = vld [vmem:[%s3525_s1 + $0x714] ss:$8 sps:$4 sm:$0xff]  }
  0x8b   :  { %1713 = vmatpush1.bf16.msra.mxu1 %v2483_v26  ;;  %v1976_v26 = vcombine.high %v3318_v22, %v3318_v22 }
  0x8c   :  { %1877 = vmatpush1.bf16.msra.mxu0 %v2486_v27  ;;  %1714 = vmatprep.subr.bf16.mxu1 %v2491_v28  ;;  %v1984_v27 = vcombine.high %v3323_v23, %v3323_v23  ;;  %v2577_v28 = vld [vmem:[%s3525_s1 + $0x310] ss:$8 sps:$4 sm:$0xff]  }
  0x8d   :  { %1878 = vmatprep.subr.bf16.mxu0 %v2494_v29  ;;  %v2580_v29 = vld [vmem:[%s3525_s1 + $0x710] ss:$8 sps:$4 sm:$0xff]  }
  0x8f   :  { %1715 = vmatpush1.bf16.msra.mxu1 %v2489_v30  ;;  %v2585_v30 = vld [vmem:[%s3525_s1 + $0x324] ss:$8 sps:$4 sm:$0xff]  }
  0x90   :  { %1879 = vmatpush1.bf16.msra.mxu0 %v2492_v31  ;;  %1716 = vmatprep.subr.bf16.mxu1 %v2497_v32  ;;  %v2588_v31 = vld [vmem:[%s3525_s1 + $0x724] ss:$8 sps:$4 sm:$0xff]   ;;  %v2583_v32 = vld [vmem:[%s3525_s1 + $0x320] ss:$8 sps:$4 sm:$0xff]  }
  0x91   :  { %1880 = vmatprep.subr.bf16.mxu0 %v2500_v33  ;;  %v2586_v33 = vld [vmem:[%s3525_s1 + $0x720] ss:$8 sps:$4 sm:$0xff]  }
  0x93   :  { %1717 = vmatpush1.bf16.msra.mxu1 %v2495_v34  ;;  %v2591_v34 = vld [vmem:[%s3525_s1 + $0x334] ss:$8 sps:$4 sm:$0xff]  }
  0x94   :  { %1881 = vmatpush1.bf16.msra.mxu0 %v2498_v35  ;;  %1718 = vmatprep.subr.bf16.mxu1 %v2503_v36  ;;  %v2594_v35 = vld [vmem:[%s3525_s1 + $0x734] ss:$8 sps:$4 sm:$0xff]   ;;  %v2589_v36 = vld [vmem:[%s3525_s1 + $0x330] ss:$8 sps:$4 sm:$0xff]  }
  0x95   :  { %1882 = vmatprep.subr.bf16.mxu0 %v2506_v37  ;;  %v2592_v37 = vld [vmem:[%s3525_s1 + $0x730] ss:$8 sps:$4 sm:$0xff]  }
  0x97   :  { %1719 = vmatpush1.bf16.msra.mxu1 %v2501_v38  ;;  %v2597_v38 = vld [vmem:[%s3525_s1 + $0x344] ss:$8 sps:$4 sm:$0xff]  }
  0x98   :  { %1883 = vmatpush1.bf16.msra.mxu0 %v2504_v39  ;;  %1720 = vmatprep.subr.bf16.mxu1 %v2509_v40  ;;  %v2600_v39 = vld [vmem:[%s3525_s1 + $0x744] ss:$8 sps:$4 sm:$0xff]   ;;  %v2595_v40 = vld [vmem:[%s3525_s1 + $0x340] ss:$8 sps:$4 sm:$0xff]  }
  0x99   :  { %1884 = vmatprep.subr.bf16.mxu0 %v2512_v41  ;;  %v2598_v41 = vld [vmem:[%s3525_s1 + $0x740] ss:$8 sps:$4 sm:$0xff]  }
  0x9b   :  { %1721 = vmatpush1.bf16.msra.mxu1 %v2507_v42  ;;  %v2603_v42 = vld [vmem:[%s3525_s1 + $0x354] ss:$8 sps:$4 sm:$0xff]  }
  0x9c   :  { %1885 = vmatpush1.bf16.msra.mxu0 %v2510_v43  ;;  %1722 = vmatprep.subr.bf16.mxu1 %v2515_v44  ;;  %v2606_v43 = vld [vmem:[%s3525_s1 + $0x754] ss:$8 sps:$4 sm:$0xff]   ;;  %v2601_v44 = vld [vmem:[%s3525_s1 + $0x350] ss:$8 sps:$4 sm:$0xff]  }
  0x9d   :  { %1886 = vmatprep.subr.bf16.mxu0 %v2518_v45  ;;  %v2604_v45 = vld [vmem:[%s3525_s1 + $0x750] ss:$8 sps:$4 sm:$0xff]  }
  0x9f   :  { %1723 = vmatpush1.bf16.msra.mxu1 %v2513_v46  ;;  %v2609_v46 = vld [vmem:[%s3525_s1 + $0x364] ss:$8 sps:$4 sm:$0xff]  }
  0xa0   :  { %1887 = vmatpush1.bf16.msra.mxu0 %v2516_v47  ;;  %1724 = vmatprep.subr.bf16.mxu1 %v2521_v48  ;;  %v2612_v47 = vld [vmem:[%s3525_s1 + $0x764] ss:$8 sps:$4 sm:$0xff]   ;;  %v2607_v48 = vld [vmem:[%s3525_s1 + $0x360] ss:$8 sps:$4 sm:$0xff]  }
  0xa1   :  { %1888 = vmatprep.subr.bf16.mxu0 %v2524_v49  ;;  %v2610_v49 = vld [vmem:[%s3525_s1 + $0x760] ss:$8 sps:$4 sm:$0xff]  }
  0xa3   :  { %1725 = vmatpush1.bf16.msra.mxu1 %v2519_v50  ;;  %v2615_v50 = vld [vmem:[%s3525_s1 + $0x374] ss:$8 sps:$4 sm:$0xff]  }
  0xa4   :  { %1889 = vmatpush1.bf16.msra.mxu0 %v2522_v51  ;;  %1726 = vmatprep.subr.bf16.mxu1 %v2527_v52  ;;  %v2618_v51 = vld [vmem:[%s3525_s1 + $0x774] ss:$8 sps:$4 sm:$0xff]   ;;  %v2613_v52 = vld [vmem:[%s3525_s1 + $0x370] ss:$8 sps:$4 sm:$0xff]  }
  0xa5   :  { %1890 = vmatprep.subr.bf16.mxu0 %v2530_v53  ;;  %v2616_v53 = vld [vmem:[%s3525_s1 + $0x770] ss:$8 sps:$4 sm:$0xff]  }
  0xa7   :  { %1727 = vmatpush1.bf16.msra.mxu1 %v2525_v54  ;;  %v2621_v54 = vld [vmem:[%s3525_s1 + $0x384] ss:$8 sps:$4 sm:$0xff]  }
  0xa8   :  { %1891 = vmatpush1.bf16.msra.mxu0 %v2528_v55  ;;  %1728 = vmatprep.subr.bf16.mxu1 %v2533_v56  ;;  %v2624_v55 = vld [vmem:[%s3525_s1 + $0x784] ss:$8 sps:$4 sm:$0xff]   ;;  %v2619_v56 = vld [vmem:[%s3525_s1 + $0x380] ss:$8 sps:$4 sm:$0xff]  }
  0xa9   :  { %1892 = vmatprep.subr.bf16.mxu0 %v2536_v57  ;;  %v2622_v57 = vld [vmem:[%s3525_s1 + $0x780] ss:$8 sps:$4 sm:$0xff]  }
  0xab   :  { %1729 = vmatpush1.bf16.msra.mxu1 %v2531_v58  ;;  %v2627_v58 = vld [vmem:[%s3525_s1 + $0x394] ss:$8 sps:$4 sm:$0xff]  }
  0xac   :  { %1893 = vmatpush1.bf16.msra.mxu0 %v2534_v59  ;;  %1730 = vmatprep.subr.bf16.mxu1 %v2539_v60  ;;  %v2630_v59 = vld [vmem:[%s3525_s1 + $0x794] ss:$8 sps:$4 sm:$0xff]   ;;  %v2625_v60 = vld [vmem:[%s3525_s1 + $0x390] ss:$8 sps:$4 sm:$0xff]  }
  0xad   :  { %1894 = vmatprep.subr.bf16.mxu0 %v2542_v61  ;;  %v2628_v61 = vld [vmem:[%s3525_s1 + $0x790] ss:$8 sps:$4 sm:$0xff]  }
  0xaf   :  { %1731 = vmatpush1.bf16.msra.mxu1 %v2537_v62  ;;  %v2633_v62 = vld [vmem:[%s3525_s1 + $0x3a4] ss:$8 sps:$4 sm:$0xff]  }
  0xb0   :  { %1895 = vmatpush1.bf16.msra.mxu0 %v2540_v63  ;;  %1732 = vmatprep.subr.bf16.mxu1 %v2545_v0  ;;  %v2636_v63 = vld [vmem:[%s3525_s1 + $0x7a4] ss:$8 sps:$4 sm:$0xff]   ;;  %v2631_v0 = vld [vmem:[%s3525_s1 + $0x3a0] ss:$8 sps:$4 sm:$0xff]  }
  0xb1   :  { %1896 = vmatprep.subr.bf16.mxu0 %v2548_v1  ;;  %v2634_v1 = vld [vmem:[%s3525_s1 + $0x7a0] ss:$8 sps:$4 sm:$0xff]  }
  0xb3   :  { %1733 = vmatpush1.bf16.msra.mxu1 %v2543_v2  ;;  %v2639_v2 = vld [vmem:[%s3525_s1 + $0x3b4] ss:$8 sps:$4 sm:$0xff]  }
  0xb4   :  { %1897 = vmatpush1.bf16.msra.mxu0 %v2546_v3  ;;  %1734 = vmatprep.subr.bf16.mxu1 %v2551_v4  ;;  %v2642_v3 = vld [vmem:[%s3525_s1 + $0x7b4] ss:$8 sps:$4 sm:$0xff]   ;;  %v2637_v4 = vld [vmem:[%s3525_s1 + $0x3b0] ss:$8 sps:$4 sm:$0xff]  }
  0xb5   :  { %1898 = vmatprep.subr.bf16.mxu0 %v2554_v5  ;;  %v2640_v5 = vld [vmem:[%s3525_s1 + $0x7b0] ss:$8 sps:$4 sm:$0xff]  }
  0xb7   :  { %1735 = vmatpush1.bf16.msra.mxu1 %v2549_v6  ;;  %v2645_v6 = vld [vmem:[%s3525_s1 + $0x3c4] ss:$8 sps:$4 sm:$0xff]  }
  0xb8   :  { %1899 = vmatpush1.bf16.msra.mxu0 %v2552_v7  ;;  %1736 = vmatprep.subr.bf16.mxu1 %v2557_v8  ;;  %v2648_v7 = vld [vmem:[%s3525_s1 + $0x7c4] ss:$8 sps:$4 sm:$0xff]   ;;  %v2643_v8 = vld [vmem:[%s3525_s1 + $0x3c0] ss:$8 sps:$4 sm:$0xff]  }
  0xb9   :  { %1900 = vmatprep.subr.bf16.mxu0 %v2560_v9  ;;  %v2646_v9 = vld [vmem:[%s3525_s1 + $0x7c0] ss:$8 sps:$4 sm:$0xff]  }
  0xbb   :  { %1737 = vmatpush1.bf16.msra.mxu1 %v2555_v10  ;;  %v2651_v10 = vld [vmem:[%s3525_s1 + $0x3d4] ss:$8 sps:$4 sm:$0xff]  }
  0xbc   :  { %1901 = vmatpush1.bf16.msra.mxu0 %v2558_v11  ;;  %1738 = vmatprep.subr.bf16.mxu1 %v2563_v12  ;;  %v2654_v11 = vld [vmem:[%s3525_s1 + $0x7d4] ss:$8 sps:$4 sm:$0xff]   ;;  %v2649_v12 = vld [vmem:[%s3525_s1 + $0x3d0] ss:$8 sps:$4 sm:$0xff]  }
  0xbd   :  { %1902 = vmatprep.subr.bf16.mxu0 %v2566_v13  ;;  %v2652_v13 = vld [vmem:[%s3525_s1 + $0x7d0] ss:$8 sps:$4 sm:$0xff]  }
  0xbf   :  { %1739 = vmatpush1.bf16.msra.mxu1 %v2561_v14  ;;  %v2657_v14 = vld [vmem:[%s3525_s1 + $0x3e4] ss:$8 sps:$4 sm:$0xff]  }
  0xc0   :  { %1903 = vmatpush1.bf16.msra.mxu0 %v2564_v15  ;;  %1749 = vmatprep.subr.bf16.mxu1 %v2571_v16  ;;  %v2660_v15 = vld [vmem:[%s3525_s1 + $0x7e4] ss:$8 sps:$4 sm:$0xff]   ;;  %v2655_v16 = vld [vmem:[%s3525_s1 + $0x3e0] ss:$8 sps:$4 sm:$0xff]  }
  0xc1   :  { %1913 = vmatprep.subr.bf16.mxu0 %v2576_v17  ;;  %v2658_v17 = vld [vmem:[%s3525_s1 + $0x7e0] ss:$8 sps:$4 sm:$0xff]  }
  0xc2   :  { %1741 = vmatmul.mubr.bf16.vlgmr.msra.gmra.mrb[0].mxu1 %v1973_v19  ;;  %v2663_v19 = vld [vmem:[%s3525_s1 + $0x3f4] ss:$8 sps:$4 sm:$0xff]  }
  0xc3   :  { %1905 = vmatmul.mubr.bf16.vlgmr.msra.gmra.mrb[0].mxu0 %v1981_v21  ;;  %1750 = vmatpush1.bf16.msra.mxu1 %v2569_v24  ;;  %v2666_v21 = vld [vmem:[%s3525_s1 + $0x7f4] ss:$8 sps:$4 sm:$0xff]   ;;  %v2661_v24 = vld [vmem:[%s3525_s1 + $0x3f0] ss:$8 sps:$4 sm:$0xff]  }
  0xc4   :  { %1914 = vmatpush1.bf16.msra.mxu0 %v2574_v18  ;;  %1751 = vmatprep.subr.bf16.mxu1 %v2579_v20  ;;  %v2664_v18 = vld [vmem:[%s3525_s1 + $0x7f0] ss:$8 sps:$4 sm:$0xff]   ;;  %v1975_v20 = vcombine.low %v3318_v22, %v3318_v22 }
  0xc5   :  { %1915 = vmatprep.subr.bf16.mxu0 %v2582_v25  ;;  %1781 = vmatprep.mubr.bf16.mxu1 %v1976_v26  ;;  %v1983_v25 = vcombine.low %v3323_v23, %v3323_v23  ;;  %v280_v26 = vlaneseq }
  0xc6   :  { %1945 = vmatprep.mubr.bf16.mxu0 %v1984_v27 }
  0xc7   :  { %1752 = vmatpush1.bf16.msra.mxu1 %v2577_v28  ;;  %v281_v27 = vshrl.u32 %v280_v26, 7 }
  0xc8   :  { %1916 = vmatpush1.bf16.msra.mxu0 %v2580_v29  ;;  %1753 = vmatprep.subr.bf16.mxu1 %v2585_v30  ;;  %v278_v29 = vld [vmem:[%s3527_s2] sm:$0x3] }
  0xc9   :  { %1917 = vmatprep.subr.bf16.mxu0 %v2588_v31  ;;  %v282_v28 = vsub.s32 0, %v281_v27  ;;  %v286_v30 = vsub.s32 1, %v281_v27 }
  0xcb   :  { %1754 = vmatpush1.bf16.msra.mxu1 %v2583_v32  ;;  %v283_v31 = vrot.slane %v278_v29, %v282_v28  ;;  %v287_v32 = vrot.slane %v278_v29, %v286_v30 }
  0xcc   :  { %1918 = vmatpush1.bf16.msra.mxu0 %v2586_v33  ;;  %1755 = vmatprep.subr.bf16.mxu1 %v2591_v34 }
  0xcd   :  { %1919 = vmatprep.subr.bf16.mxu0 %v2594_v35 }
  0xcf   :  { %1756 = vmatpush1.bf16.msra.mxu1 %v2589_v36 }
  0xd0   :  { %1920 = vmatpush1.bf16.msra.mxu0 %v2592_v37  ;;  %1757 = vmatprep.subr.bf16.mxu1 %v2597_v38 }
  0xd1   :  { %1921 = vmatprep.subr.bf16.mxu0 %v2600_v39 }
  0xd3   :  { %1758 = vmatpush1.bf16.msra.mxu1 %v2595_v40 }
  0xd4   :  { %1922 = vmatpush1.bf16.msra.mxu0 %v2598_v41  ;;  %1759 = vmatprep.subr.bf16.mxu1 %v2603_v42 }
  0xd5   :  { %1923 = vmatprep.subr.bf16.mxu0 %v2606_v43 }
  0xd7   :  { %1760 = vmatpush1.bf16.msra.mxu1 %v2601_v44 }
  0xd8   :  { %1924 = vmatpush1.bf16.msra.mxu0 %v2604_v45  ;;  %1761 = vmatprep.subr.bf16.mxu1 %v2609_v46 }
  0xd9   :  { %1925 = vmatprep.subr.bf16.mxu0 %v2612_v47 }
  0xdb   :  { %1762 = vmatpush1.bf16.msra.mxu1 %v2607_v48 }
  0xdc   :  { %1926 = vmatpush1.bf16.msra.mxu0 %v2610_v49  ;;  %1763 = vmatprep.subr.bf16.mxu1 %v2615_v50 }
  0xdd   :  { %1927 = vmatprep.subr.bf16.mxu0 %v2618_v51 }
  0xdf   :  { %1764 = vmatpush1.bf16.msra.mxu1 %v2613_v52 }
  0xe0   :  { %1928 = vmatpush1.bf16.msra.mxu0 %v2616_v53  ;;  %1765 = vmatprep.subr.bf16.mxu1 %v2621_v54 }
  0xe1   :  { %1929 = vmatprep.subr.bf16.mxu0 %v2624_v55 }
  0xe3   :  { %1766 = vmatpush1.bf16.msra.mxu1 %v2619_v56 }
  0xe4   :  { %1930 = vmatpush1.bf16.msra.mxu0 %v2622_v57  ;;  %1767 = vmatprep.subr.bf16.mxu1 %v2627_v58 }
  0xe5   :  { %1931 = vmatprep.subr.bf16.mxu0 %v2630_v59 }
  0xe7   :  { %1768 = vmatpush1.bf16.msra.mxu1 %v2625_v60 }
  0xe8   :  { %1932 = vmatpush1.bf16.msra.mxu0 %v2628_v61  ;;  %1769 = vmatprep.subr.bf16.mxu1 %v2633_v62 }
  0xe9   :  { %1933 = vmatprep.subr.bf16.mxu0 %v2636_v63 }
  0xeb   :  { %1770 = vmatpush1.bf16.msra.mxu1 %v2631_v0 }
  0xec   :  { %1934 = vmatpush1.bf16.msra.mxu0 %v2634_v1  ;;  %1771 = vmatprep.subr.bf16.mxu1 %v2639_v2 }
  0xed   :  { %1935 = vmatprep.subr.bf16.mxu0 %v2642_v3 }
  0xef   :  { %1772 = vmatpush1.bf16.msra.mxu1 %v2637_v4 }
  0xf0   :  { %1936 = vmatpush1.bf16.msra.mxu0 %v2640_v5  ;;  %1773 = vmatprep.subr.bf16.mxu1 %v2645_v6 }
  0xf1   :  { %1937 = vmatprep.subr.bf16.mxu0 %v2648_v7 }
  0xf3   :  { %1774 = vmatpush1.bf16.msra.mxu1 %v2643_v8 }
  0xf4   :  { %1938 = vmatpush1.bf16.msra.mxu0 %v2646_v9  ;;  %1775 = vmatprep.subr.bf16.mxu1 %v2651_v10 }
  0xf5   :  { %1939 = vmatprep.subr.bf16.mxu0 %v2654_v11 }
  0xf7   :  { %1776 = vmatpush1.bf16.msra.mxu1 %v2649_v12 }
  0xf8   :  { %1940 = vmatpush1.bf16.msra.mxu0 %v2652_v13  ;;  %1777 = vmatprep.subr.bf16.mxu1 %v2657_v14 }
  0xf9   :  { %1941 = vmatprep.subr.bf16.mxu0 %v2660_v15 }
  0xfb   :  { %1778 = vmatpush1.bf16.msra.mxu1 %v2655_v16 }
  0xfc   :  { %1942 = vmatpush1.bf16.msra.mxu0 %v2658_v17  ;;  %1779 = vmatprep.subr.bf16.mxu1 %v2663_v19 }
  0xfd   :  { %1943 = vmatprep.subr.bf16.mxu0 %v2666_v21 }
  0xff   :  { %1780 = vmatpush1.bf16.msra.mxu1 %v2661_v24 }
 0x100   :  { %1944 = vmatpush1.bf16.msra.mxu0 %v2664_v18 }
 0x102   :  { %1782 = vmatmul.mubr.bf16.vlgmr.msra.gmra.mrb[0].mxu1 %v1975_v20 }
 0x103   :  { %1946 = vmatmul.mubr.bf16.vlgmr.msra.gmra.mrb[0].mxu0 %v1983_v25 }
 0x1d5   :  { %v1783_v33 = vpop.f32.mrb[0].mxu1 }
 0x1d6   :  { %v1947_v34 = vpop.f32.mrb[0].mxu0  ;;  %v2243_v22 = vadd.f32 %v1783_v33, %v283_v31  ;;  %v1785_v35 = vpop.f32.mrb[1].mxu1 }
 0x1d7   :  { %v1949_v36 = vpop.f32.mrb[1].mxu0  ;;  %v2245_v23 = vadd.f32 %v1785_v35, %v287_v32  ;;  %v1787_v37 = vpop.f32.mrb[2].mxu1 }
 0x1d8   :  { %v1951_v38 = vpop.f32.mrb[2].mxu0  ;;  %v2244_v39 = vadd.f32 %v2243_v22, %v1947_v34  ;;  %v1788_v40 = vpop.f32.mrb[3].mxu1 }
 0x1d9   :  { %v1952_v41 = vpop.f32.mrb[3].mxu0  ;;  %v2246_v42 = vadd.f32 %v2245_v23, %v1949_v36 }
 0x1da   :  { %v1954_v43 = vmax.f32 %v2244_v39, 0.0 }
 0x1db   :  { %v1955_v44 = vmax.f32 %v2246_v42, 0.0 }
 0x1dd   :  { %v2242_v45 = vpack.c.bf16 %v1955_v44, %v1954_v43 }
 0x1df   :  { %1964 = vst [vmem:[%s3528_s3] sm:$0xff] %v2242_v45 }

// kernel: vae_forward.14
= control target key start
LH: loop header
LB: loop body
LE: loop exit
PB: predicated region body
PF: predicated region fallthrough
CT: control target
= control target key end

     0   :  { %12 = vsyncpa [#allocation3], 0  ;;  %v164_v28 = vlaneseq  ;;  %v1087_v36 = vmov 1966171168   ;;  %s1373_s0 = inlined_call_operand.vmem [shape: bf16[2,1024], index: 0, kind: input, shape index: {}]   ;;  %s1374_s1 = inlined_call_operand.vmem [shape: bf16[1024,128], index: 1, kind: input, shape index: {}]   ;;  %s1375_s2 = inlined_call_operand.vmem [shape: f32[1,128], index: 2, kind: input, shape index: {}]   ;;  %s1376_s3 = inlined_call_operand.vmem [shape: f32[2,64], index: 3, kind: input, shape index: {}]   ;;  %s1377_s4 = inlined_call_operand.hbm [shape: f32[2,64], index: 4, kind: output, shape index: {0}]   ;;  %s1378_s5 = inlined_call_operand.hbm [shape: f32[2,64], index: 5, kind: output, shape index: {1}]   ;;  %s1379_s6 = inlined_call_operand.vmem [shape: f32[2,64], index: 6, kind: output, shape index: {2}]  }
   0x1   :  { %v972_v0 = vld [vmem:[%s1374_s1 + $0x40] sm:$0xff]   ;;  %v976_v4 = vld [vmem:[%s1374_s1 + $0x48] sm:$0xff]   ;;  %v980_v8 = vld [vmem:[%s1374_s1 + $0x50] sm:$0xff]   ;;  %v162_v37 = vunpack.c.l.s4 %v1087_v36 }
   0x2   :  { %v973_v1 = vld [vmem:[%s1374_s1 + $0xc0] sm:$0xff]   ;;  %880 = vmatprep.subr.bf16.mxu0 %v972_v0  ;;  %v977_v5 = vld [vmem:[%s1374_s1 + $0xc8] sm:$0xff]   ;;  %v981_v9 = vld [vmem:[%s1374_s1 + $0xd0] sm:$0xff]   ;;  %v165_v33 = vshrl.u32 %v164_v28, 7 }
   0x3   :  { %v974_v2 = vld [vmem:[%s1374_s1] sm:$0xff]   ;;  %902 = vmatprep.subr.bf16.mxu1 %v973_v1  ;;  %v978_v6 = vld [vmem:[%s1374_s1 + $0x8] sm:$0xff]   ;;  %v982_v10 = vld [vmem:[%s1374_s1 + $0x10] sm:$0xff]   ;;  %v163_v40 = vunpack.c.0.s8 %v162_v37 }
   0x4   :  { %v975_v3 = vld [vmem:[%s1374_s1 + $0x80] sm:$0xff]   ;;  %881 = vmatpush3.bf16.msra.mxu0 %v974_v2  ;;  %v979_v7 = vld [vmem:[%s1374_s1 + $0x88] sm:$0xff]   ;;  %v983_v11 = vld [vmem:[%s1374_s1 + $0x90] sm:$0xff]  }
   0x5   :  { %903 = vmatpush3.bf16.msra.mxu1 %v975_v3  ;;  %882 = vmatprep.subr.bf16.mxu0 %v976_v4  ;;  %v984_v12 = vld [vmem:[%s1374_s1 + $0x58] sm:$0xff]   ;;  %v988_v16 = vld [vmem:[%s1374_s1 + $0x60] sm:$0xff]   ;;  %v992_v20 = vld [vmem:[%s1374_s1 + $0x68] sm:$0xff]   ;;  %v1231_v41 = vsub.s32 %v163_v40, %v165_v33 }
   0x6   :  { %904 = vmatprep.subr.bf16.mxu1 %v977_v5  ;;  %v985_v13 = vld [vmem:[%s1374_s1 + $0xd8] sm:$0xff]   ;;  %v989_v17 = vld [vmem:[%s1374_s1 + $0xe0] sm:$0xff]   ;;  %v993_v21 = vld [vmem:[%s1374_s1 + $0xe8] sm:$0xff]  }
   0x7   :  { %v986_v14 = vld [vmem:[%s1374_s1 + $0x18] sm:$0xff]   ;;  %v990_v18 = vld [vmem:[%s1374_s1 + $0x20] sm:$0xff]   ;;  %v994_v22 = vld [vmem:[%s1374_s1 + $0x28] sm:$0xff]  }
   0x8   :  { %883 = vmatpush3.bf16.msra.mxu0 %v978_v6  ;;  %v987_v15 = vld [vmem:[%s1374_s1 + $0x98] sm:$0xff]   ;;  %v991_v19 = vld [vmem:[%s1374_s1 + $0xa0] sm:$0xff]   ;;  %v995_v23 = vld [vmem:[%s1374_s1 + $0xa8] sm:$0xff]  }
   0x9   :  { %905 = vmatpush3.bf16.msra.mxu1 %v979_v7  ;;  %884 = vmatprep.subr.bf16.mxu0 %v980_v8  ;;  %v996_v24 = vld [vmem:[%s1374_s1 + $0x70] sm:$0xff]   ;;  %v1000_v29 = vld [vmem:[%s1374_s1 + $0x78] sm:$0xff]   ;;  %v23_v34 = vld [vmem:[%s1373_s0] sm:$0xff] }
   0xa   :  { %906 = vmatprep.subr.bf16.mxu1 %v981_v9  ;;  %v997_v25 = vld [vmem:[%s1374_s1 + $0xf0] sm:$0xff]   ;;  %v1001_v30 = vld [vmem:[%s1374_s1 + $0xf8] sm:$0xff]   ;;  %v1005_v35 = vld [vmem:[%s1374_s1 + $0x140] sm:$0xff]   ;;  %v160_v39 = vcombine.high %v23_v34, %v23_v34  ;;  %v167_v42 = vrot.slane %v23_v34, %v1231_v41 }
   0xb   :  { %v998_v26 = vld [vmem:[%s1374_s1 + $0x30] sm:$0xff]   ;;  %v1002_v31 = vld [vmem:[%s1374_s1 + $0x38] sm:$0xff]   ;;  %v1006_v38 = vld [vmem:[%s1374_s1 + $0x1c0] sm:$0xff]  }
   0xc   :  { %885 = vmatpush3.bf16.msra.mxu0 %v982_v10  ;;  %v999_v27 = vld [vmem:[%s1374_s1 + $0xb0] sm:$0xff]   ;;  %v1003_v32 = vld [vmem:[%s1374_s1 + $0xb8] sm:$0xff]   ;;  %v1235_v43 = vrot.slane %v160_v39, %v1231_v41  ;;  %v175_v44 = vcombine.high %v167_v42, %v167_v42  ;;  %v183_v45 = vrot.slane %v167_v42, %v1231_v41  ;;  %v1007_v48 = vld [vmem:[%s1374_s1 + $0x100] sm:$0xff]  }
   0xd   :  { %907 = vmatpush3.bf16.msra.mxu1 %v983_v11  ;;  %886 = vmatprep.subr.bf16.mxu0 %v984_v12  ;;  %v1009_v51 = vld [vmem:[%s1374_s1 + $0x148] sm:$0xff]   ;;  %v1008_v53 = vld [vmem:[%s1374_s1 + $0x180] sm:$0xff]   ;;  %v1013_v57 = vld [vmem:[%s1374_s1 + $0x150] sm:$0xff]  }
   0xe   :  { %908 = vmatprep.subr.bf16.mxu1 %v985_v13  ;;  %v176_v46 = vcombine.high %v1235_v43, %v1235_v43  ;;  %v197_v47 = vrot.slane %v175_v44, %v1231_v41  ;;  %v205_v50 = vcombine.high %v183_v45, %v183_v45  ;;  %v1010_v54 = vld [vmem:[%s1374_s1 + $0x1c8] sm:$0xff]   ;;  %v1014_v59 = vld [vmem:[%s1374_s1 + $0x1d0] sm:$0xff]   ;;  %v1017_v61 = vld [vmem:[%s1374_s1 + $0x158] sm:$0xff]  }
   0xf   :  { %v1011_v56 = vld [vmem:[%s1374_s1 + $0x108] sm:$0xff]   ;;  %v1015_v60 = vld [vmem:[%s1374_s1 + $0x110] sm:$0xff]   ;;  %v1018_v63 = vld [vmem:[%s1374_s1 + $0x1d8] sm:$0xff]  }
  0x10   :  { %887 = vmatpush3.bf16.msra.mxu0 %v986_v14  ;;  %v204_v49 = vrot.slane %v176_v46, %v1231_v41  ;;  %633 = vmatprep.mubr.bf16.mxu0 %v197_v47  ;;  %v207_v52 = vcombine.high %v197_v47, %v197_v47  ;;  %v1012_v58 = vld [vmem:[%s1374_s1 + $0x188] sm:$0xff]   ;;  %v1016_v62 = vld [vmem:[%s1374_s1 + $0x190] sm:$0xff]   ;;  %v1019_v0 = vld [vmem:[%s1374_s1 + $0x118] sm:$0xff]  }
  0x11   :  { %909 = vmatpush3.bf16.msra.mxu1 %v987_v15  ;;  %888 = vmatprep.subr.bf16.mxu0 %v988_v16  ;;  %v1021_v1 = vld [vmem:[%s1374_s1 + $0x160] sm:$0xff]   ;;  %v1020_v2 = vld [vmem:[%s1374_s1 + $0x198] sm:$0xff]   ;;  %v1025_v5 = vld [vmem:[%s1374_s1 + $0x168] sm:$0xff]  }
  0x12   :  { %910 = vmatprep.subr.bf16.mxu1 %v989_v17  ;;  %v208_v55 = vcombine.high %v204_v49, %v204_v49  ;;  %673 = vmatprep.mubr.bf16.mxu1 %v207_v52  ;;  %v1022_v3 = vld [vmem:[%s1374_s1 + $0x1e0] sm:$0xff]   ;;  %v1026_v7 = vld [vmem:[%s1374_s1 + $0x1e8] sm:$0xff]   ;;  %v1029_v9 = vld [vmem:[%s1374_s1 + $0x170] sm:$0xff]  }
  0x13   :  { %v1023_v4 = vld [vmem:[%s1374_s1 + $0x120] sm:$0xff]   ;;  %v1027_v8 = vld [vmem:[%s1374_s1 + $0x128] sm:$0xff]  }
  0x14   :  { %889 = vmatpush3.bf16.msra.mxu0 %v990_v18  ;;  %v1024_v6 = vld [vmem:[%s1374_s1 + $0x1a0] sm:$0xff]  }
  0x15   :  { %911 = vmatpush3.bf16.msra.mxu1 %v991_v19  ;;  %890 = vmatprep.subr.bf16.mxu0 %v992_v20  ;;  %v771_v10 = vld [vmem:[%s1376_s3] sm:$0x3] }
  0x16   :  { %912 = vmatprep.subr.bf16.mxu1 %v993_v21 }
  0x18   :  { %891 = vmatpush3.bf16.msra.mxu0 %v994_v22 }
  0x19   :  { %913 = vmatpush3.bf16.msra.mxu1 %v995_v23  ;;  %892 = vmatprep.subr.bf16.mxu0 %v996_v24 }
  0x1a   :  { %914 = vmatprep.subr.bf16.mxu1 %v997_v25 }
  0x1c   :  { %893 = vmatpush3.bf16.msra.mxu0 %v998_v26 }
  0x1d   :  { %915 = vmatpush3.bf16.msra.mxu1 %v999_v27  ;;  %894 = vmatprep.subr.bf16.mxu0 %v1000_v29 }
  0x1e   :  { %916 = vmatprep.subr.bf16.mxu1 %v1001_v30 }
  0x20   :  { %895 = vmatpush3.bf16.msra.mxu0 %v1002_v31 }
  0x21   :  { %917 = vmatpush3.bf16.msra.mxu1 %v1003_v32  ;;  %924 = vmatprep.subr.bf16.mxu0 %v1005_v35 }
  0x22   :  { %946 = vmatprep.subr.bf16.mxu1 %v1006_v38 }
  0x23   :  { %634 = vmatmul.mubr.bf16.vlgmr.msra.gmra.mrb[0].mxu0 %v183_v45 }
  0x24   :  { %925 = vmatpush3.bf16.msra.mxu0 %v1007_v48  ;;  %674 = vmatmul.mubr.bf16.vlgmr.msra.gmra.mrb[0].mxu1 %v205_v50 }
  0x25   :  { %926 = vmatprep.subr.bf16.mxu0 %v1009_v51  ;;  %947 = vmatpush3.bf16.msra.mxu1 %v1008_v53 }
  0x26   :  { %713 = vmatprep.mubr.bf16.mxu0 %v204_v49  ;;  %948 = vmatprep.subr.bf16.mxu1 %v1010_v54 }
  0x27   :  { %753 = vmatprep.mubr.bf16.mxu1 %v208_v55 }
  0x28   :  { %927 = vmatpush3.bf16.msra.mxu0 %v1011_v56 }
  0x29   :  { %928 = vmatprep.subr.bf16.mxu0 %v1013_v57  ;;  %949 = vmatpush3.bf16.msra.mxu1 %v1012_v58 }
  0x2a   :  { %950 = vmatprep.subr.bf16.mxu1 %v1014_v59 }
  0x2c   :  { %929 = vmatpush3.bf16.msra.mxu0 %v1015_v60 }
  0x2d   :  { %930 = vmatprep.subr.bf16.mxu0 %v1017_v61  ;;  %951 = vmatpush3.bf16.msra.mxu1 %v1016_v62 }
  0x2e   :  { %952 = vmatprep.subr.bf16.mxu1 %v1018_v63 }
  0x30   :  { %931 = vmatpush3.bf16.msra.mxu0 %v1019_v0 }
  0x31   :  { %932 = vmatprep.subr.bf16.mxu0 %v1021_v1  ;;  %953 = vmatpush3.bf16.msra.mxu1 %v1020_v2 }
  0x32   :  { %954 = vmatprep.subr.bf16.mxu1 %v1022_v3 }
  0x34   :  { %933 = vmatpush3.bf16.msra.mxu0 %v1023_v4 }
  0x35   :  { %934 = vmatprep.subr.bf16.mxu0 %v1025_v5 }
  0x36   :  { %13 = vsyncpa [#allocation5], 0  ;;  %955 = vmatpush3.bf16.msra.mxu1 %v1024_v6  ;;  %v1028_v11 = vld [vmem:[%s1374_s1 + $0x1a8] sm:$0xff]   ;;  %s1088_s17 = smov 64   ;;  %v1030_v12 = vld [vmem:[%s1374_s1 + $0x1f0] sm:$0xff]   ;;  %v190_v18 = vrot.slane %v1235_v43, %v1231_v41  ;;  %vm761_vm0 = vcmask 517120  }
  0x37   :  { %773 = vrot.lane.b32.xlu0 %v771_v10, %s1088_s17  ;;  %956 = vmatprep.subr.bf16.mxu1 %v1026_v7  ;;  %v1031_v13 = vld [vmem:[%s1374_s1 + $0x130] sm:$0xff]   ;;  %v1033_v14 = vld [vmem:[%s1374_s1 + $0x178] sm:$0xff]   ;;  %v815_v22 = vld [vmem:[%s1375_s2] ss:$0 sm:$0xff] }
  0x38   :  { %935 = vmatpush3.bf16.msra.mxu0 %v1027_v8  ;;  %v1032_v15 = vld [vmem:[%s1374_s1 + $0x1b0] sm:$0xff]   ;;  %v1034_v16 = vld [vmem:[%s1374_s1 + $0x1f8] sm:$0xff]   ;;  %v206_v20 = vcombine.high %v190_v18, %v190_v18 }
  0x39   :  { %936 = vmatprep.subr.bf16.mxu0 %v1029_v9  ;;  %v1035_v17 = vld [vmem:[%s1374_s1 + $0x138] sm:$0xff]  }
  0x3a   :  { %957 = vmatpush3.bf16.msra.mxu1 %v1028_v11  ;;  %v1036_v19 = vld [vmem:[%s1374_s1 + $0x1b8] sm:$0xff]   ;;  %s1089_s1 = smov [#allocation2]  }
  0x3b   :  { %958 = vmatprep.subr.bf16.mxu1 %v1030_v12  ;;  %s789_s2 = sshll.u32 %s1089_s1, 4  ;;  %s790_s2 = int_to_ptr.vmem [resolvable:$true] %s789_s2 }
  0x3c   :  { %937 = vmatpush3.bf16.msra.mxu0 %v1031_v13  ;;  %s1039_s8 = scalar_lea.vmem %s790_s2, 32  ;;  %p1044_p1 = scmp.lt.s32.totalorder %s790_s2, %s790_s2 }
  0x3d   :  { %938 = vmatprep.subr.bf16.mxu0 %v1033_v14  ;;  %p1040_p0 = scmp.ne.s32.totalorder %s790_s2, %s1039_s8  ;;  %p1045_p2 = scmp.lt.s32.totalorder %s1039_s8, %s1039_s8 }
  0x3e   :  { %959 = vmatpush3.bf16.msra.mxu1 %v1032_v15 }
  0x3f   :  { %960 = vmatprep.subr.bf16.mxu1 %v1034_v16  ;;  %p1046_p3 = por %p1045_p2, %p1044_p1 }
  0x40   :  { %939 = vmatpush3.bf16.msra.mxu0 %v1035_v17 }
  0x41   :  { %p1047_p4 = pnand %p1046_p3, %p1040_p0 }
  0x42   :  { %961 = vmatpush3.bf16.msra.mxu1 %v1036_v19 }
  0x43   :  { %714 = vmatmul.mubr.bf16.vlgmr.msra.gmra.mrb[4].mxu0 %v190_v18 }
  0x45   :  { %754 = vmatmul.mubr.bf16.vlgmr.msra.gmra.mrb[4].mxu1 %v206_v20 }
  0xf6   :  { %v896_v21 = vpop.f32.mrb[0].mxu0 }
  0xf7   :  { %v897_v23 = vpop.f32.mrb[1].mxu0  ;;  %v918_v24 = vpop.f32.mrb[0].mxu1 }
  0xf8   :  { %v898_v25 = vadd.f32 %v897_v23, %v896_v21  ;;  %v899_v26 = vpop.f32.mrb[2].mxu0  ;;  %v919_v27 = vpop.f32.mrb[1].mxu1 }
  0xf9   :  { %v900_v28 = vpop.f32.mrb[3].mxu0  ;;  %v920_v30 = vadd.f32 %v919_v27, %v918_v24  ;;  %v921_v31 = vpop.f32.mrb[2].mxu1 }
  0xfa   :  { %v636_v29 = vadd.f32 %v898_v25, %v815_v22  ;;  %v922_v32 = vpop.f32.mrb[3].mxu1 }
  0xfc   :  { %v676_v33 = vadd.f32 %v920_v30, %v636_v29 }
 0x116   :  { %v940_v34 = vpop.f32.mrb[4].mxu0 }
 0x117   :  { %v941_v35 = vpop.f32.mrb[5].mxu0 }
 0x118   :  { %v962_v36 = vpop.f32.mrb[4].mxu1  ;;  %v942_v37 = vadd.f32 %v941_v35, %v940_v34  ;;  %v943_v38 = vpop.f32.mrb[6].mxu0 }
 0x119   :  { %v963_v39 = vpop.f32.mrb[5].mxu1  ;;  %v944_v40 = vpop.f32.mrb[7].mxu0 }
 0x11a   :  { %v716_v41 = vadd.f32 %v942_v37, %v676_v33  ;;  %v964_v42 = vadd.f32 %v963_v39, %v962_v36  ;;  %v965_v43 = vpop.f32.mrb[6].mxu1 }
 0x11b   :  { %v966_v44 = vpop.f32.mrb[7].mxu1 }
 0x11c   :  { %v756_v45 = vadd.f32 %v964_v42, %v716_v41 }
 0x11e   :  { %v768_v46 = vmul.f32 0.5, %v756_v45  ;;  %764 = vrot.lane.b32.xlu1 %v756_v45, %s1088_s17  ;;  %762 = vst.msk [vmem:[#allocation2] sm:$0x3] %vm761_vm0, %v756_v45 }
 0x120   :  { %v769_v47 = vmul.f32 1.442695, %v768_v46 }
 0x122   :  { %1037 = vpow2.f32 %v769_v47 }
 0x123   :  { %1050 = shalt.err (!%p1047_p4)
}
 0x124   :  { %s1051_s11 = scalar_lea.hbm %s1377_s4, 32 }
 0x125   :  { %p1052_p5 = scmp.ne.s32.totalorder %s1377_s4, %s1051_s11  ;;  %p1055_p6 = scmp.lt.u32.totalorder %s1051_s11, %s1377_s4 }
 0x127   :  { %p1057_p7 = pnand %p1055_p6, %p1052_p5 }
 0x129   :  { %1060 = shalt.err (!%p1057_p7)
}
 0x12a   :  { %792 = dma.vmem_to_hbm [thread:$0]  %s790_s2, 32, %s1377_s4, [#allocation3]   ;;  %v774_v48 = vpop.permute.xlu0 %773 }
 0x12b   :  { %s1090_s0 = smov [#allocation4]  }
 0x12c   :  { %v1038_v49 = vpop.eup %1037  ;;  %s799_s19 = sshll.u32 %s1090_s0, 4  ;;  %s800_s19 = int_to_ptr.vmem [resolvable:$true] %s799_s19 }
 0x12d   :  { %v776_v50 = vmul.f32 %v1038_v49, %v774_v48  ;;  %s1061_s20 = scalar_lea.vmem %s800_s19, 32  ;;  %p1066_p9 = scmp.lt.s32.totalorder %s800_s19, %s800_s19 }
 0x12e   :  { %p1062_p8 = scmp.ne.s32.totalorder %s800_s19, %s1061_s20  ;;  %p1067_p10 = scmp.lt.s32.totalorder %s1061_s20, %s1061_s20 }
 0x12f   :  { %778 = vrot.lane.b32.xlu0 %v776_v50, %s1088_s17 }
 0x130   :  { %p1068_p11 = por %p1067_p10, %p1066_p9 }
 0x132   :  { %p1069_p12 = pnand %p1068_p11, %p1062_p8 }
 0x190   :  { %v765_v51 = vpop.permute.xlu1 %764 }
 0x191   :  { %767 = vst.msk [vmem:[#allocation4] sm:$0x3] %vm761_vm0, %v765_v51 }
 0x192   :  { %1072 = shalt.err (!%p1069_p12)
}
 0x193   :  { %s1073_s21 = scalar_lea.hbm %s1378_s5, 32 }
 0x194   :  { %p1074_p13 = scmp.ne.s32.totalorder %s1378_s5, %s1073_s21  ;;  %p1077_p0 = scmp.lt.u32.totalorder %s1073_s21, %s1378_s5 }
 0x196   :  { %p1079_p1 = pnand %p1077_p0, %p1074_p13 }
 0x198   :  { %1082 = shalt.err (!%p1079_p1)
}
 0x199   :  { %802 = dma.vmem_to_hbm [thread:$0]  %s800_s19, 32, %s1378_s5, [#allocation5]  }
 0x1a1   :  { %v779_v52 = vpop.permute.xlu0 %778 }
 0x1a2   :  { %v781_v53 = vadd.f32 %v779_v52, %v756_v45 }
 0x1a4   :  { %782 = vst.msk [vmem:[%s1379_s6] sm:$0x3] %vm761_vm0, %v781_v53 }
 0x1a5   :  { %1083 = dma.done.wait [#allocation3], 32  }
 0x1a6   :  { %1084 = vsyncadd [#allocation3], 4294967264 }
 0x1a7   :  { %1085 = dma.done.wait [#allocation5], 32  }
 0x1a8   :  { %1086 = vsyncadd [#allocation5], 4294967264 }
 0x1a9   :  { %813 = vsyncpa [#allocation3], 1 }
 0x1aa   :  { %814 = vsyncpa [#allocation5], 1 }

// kernel: vae_forward.15
= control target key start
LH: loop header
LB: loop body
LE: loop exit
PB: predicated region body
PF: predicated region fallthrough
CT: control target
= control target key end

     0   :  { %v531_v3 = vmov 0   ;;  %vm250_vm0 = vcmask 523264   ;;  %s666_s1 = inlined_call_operand.vmem [shape: bf16[64,1024], index: 1, kind: input, shape index: {}]   ;;  %s667_s0 = inlined_call_operand.vmem [shape: bf16[2,64], index: 0, kind: input, shape index: {}]   ;;  %s668_s2 = inlined_call_operand.vmem [shape: f32[1,1024], index: 2, kind: input, shape index: {}]   ;;  %s669_s3 = inlined_call_operand.vmem [shape: bf16[2,1024], index: 3, kind: output, shape index: {}]  }
   0x1   :  { %v16_v0 = vld [vmem:[%s666_s1] sm:$0xff]  ;;  %v17_v2 = vld [vmem:[%s666_s1 + $0x8] sm:$0xff]  ;;  %286 = vmatprep.mubr.bf16.mxu0 %v531_v3  ;;  %327 = vmatprep.mubr.bf16.mxu1 %v531_v3  ;;  %v18_v31 = vld [vmem:[%s666_s1 + $0x10] sm:$0xff] }
   0x2   :  { %v20_v1 = vld [vmem:[%s666_s1 + $0x20] sm:$0xff]  ;;  %v21_v5 = vld [vmem:[%s666_s1 + $0x28] sm:$0xff]  ;;  %v22_v32 = vld [vmem:[%s666_s1 + $0x30] sm:$0xff] }
   0x3   :  { %v490_v4 = vcombine.high %v16_v0, %v20_v1  ;;  %v489_v6 = vcombine.low %v16_v0, %v20_v1  ;;  %v24_v7 = vld [vmem:[%s666_s1 + $0x40] sm:$0xff]  ;;  %v492_v9 = vcombine.high %v17_v2, %v21_v5  ;;  %v491_v10 = vcombine.low %v17_v2, %v21_v5  ;;  %v25_v12 = vld [vmem:[%s666_s1 + $0x48] sm:$0xff]  ;;  %v19_v33 = vld [vmem:[%s666_s1 + $0x18] sm:$0xff] }
   0x4   :  { %v28_v8 = vld [vmem:[%s666_s1 + $0x60] sm:$0xff]  ;;  %v29_v13 = vld [vmem:[%s666_s1 + $0x68] sm:$0xff]  ;;  %v23_v34 = vld [vmem:[%s666_s1 + $0x38] sm:$0xff]  ;;  %v494_v37 = vcombine.high %v18_v31, %v22_v32  ;;  %v493_v44 = vcombine.low %v18_v31, %v22_v32  ;;  %v50_v2 = vlaneseq }
   0x5   :  { %v498_v11 = vcombine.high %v24_v7, %v28_v8  ;;  %v32_v14 = vld [vmem:[%s666_s1 + $0x80] sm:$0xff]  ;;  %254 = vmatprep.subr.bf16.mxu0 %v490_v4  ;;  %v500_v15 = vcombine.high %v25_v12, %v29_v13  ;;  %v33_v17 = vld [vmem:[%s666_s1 + $0x88] sm:$0xff]  ;;  %295 = vmatprep.subr.bf16.mxu1 %v492_v9  ;;  %v497_v19 = vcombine.low %v24_v7, %v28_v8  ;;  %v26_v39 = vld [vmem:[%s666_s1 + $0x50] sm:$0xff]  ;;  %v532_v8 = vmov 1966171168  }
   0x6   :  { %v36_v16 = vld [vmem:[%s666_s1 + $0xa0] sm:$0xff]  ;;  %v37_v18 = vld [vmem:[%s666_s1 + $0xa8] sm:$0xff]  ;;  %255 = vmatpush1.bf16.msra.mxu0 %v489_v6  ;;  %296 = vmatpush1.bf16.msra.mxu1 %v491_v10  ;;  %v499_v20 = vcombine.low %v25_v12, %v29_v13  ;;  %v496_v38 = vcombine.high %v19_v33, %v23_v34  ;;  %v30_v40 = vld [vmem:[%s666_s1 + $0x70] sm:$0xff]  ;;  %v495_v45 = vcombine.low %v19_v33, %v23_v34  ;;  %v439_v9 = vunpack.c.l.s4 %v532_v8 }
   0x7   :  { %256 = vmatprep.subr.bf16.mxu0 %v498_v11  ;;  %v506_v21 = vcombine.high %v32_v14, %v36_v16  ;;  %297 = vmatprep.subr.bf16.mxu1 %v500_v15  ;;  %v508_v22 = vcombine.high %v33_v17, %v37_v18  ;;  %v40_v23 = vld [vmem:[%s666_s1 + $0xc0] sm:$0xff]  ;;  %v41_v25 = vld [vmem:[%s666_s1 + $0xc8] sm:$0xff]  ;;  %v505_v27 = vcombine.low %v32_v14, %v36_v16  ;;  %v27_v41 = vld [vmem:[%s666_s1 + $0x58] sm:$0xff] }
   0x8   :  { %v44_v24 = vld [vmem:[%s666_s1 + $0xe0] sm:$0xff]  ;;  %v45_v26 = vld [vmem:[%s666_s1 + $0xe8] sm:$0xff]  ;;  %v507_v28 = vcombine.low %v33_v17, %v37_v18  ;;  %v31_v42 = vld [vmem:[%s666_s1 + $0x78] sm:$0xff]  ;;  %v502_v46 = vcombine.high %v26_v39, %v30_v40  ;;  %v501_v52 = vcombine.low %v26_v39, %v30_v40  ;;  %v440_v14 = vunpack.c.0.s8 %v439_v9 }
   0x9   :  { %v514_v29 = vcombine.high %v40_v23, %v44_v24  ;;  %v516_v30 = vcombine.high %v41_v25, %v45_v26  ;;  %v513_v35 = vcombine.low %v40_v23, %v44_v24  ;;  %v515_v36 = vcombine.low %v41_v25, %v45_v26  ;;  %v15_v43 = vld [vmem:[%s667_s0] sm:$0x1]  ;;  %v34_v48 = vld [vmem:[%s666_s1 + $0x90] sm:$0xff]  ;;  %v35_v50 = vld [vmem:[%s666_s1 + $0x98] sm:$0xff] }
   0xa   :  { %257 = vmatpush1.bf16.msra.mxu0 %v497_v19  ;;  %298 = vmatpush1.bf16.msra.mxu1 %v499_v20  ;;  %v504_v47 = vcombine.high %v27_v41, %v31_v42  ;;  %v38_v49 = vld [vmem:[%s666_s1 + $0xb0] sm:$0xff]  ;;  %v39_v51 = vld [vmem:[%s666_s1 + $0xb8] sm:$0xff]  ;;  %v503_v53 = vcombine.low %v27_v41, %v31_v42  ;;  %v48_v5 = vld [vmem:[%s668_s2] sm:$0xff] }
   0xb   :  { %258 = vmatprep.subr.bf16.mxu0 %v506_v21  ;;  %299 = vmatprep.subr.bf16.mxu1 %v508_v22  ;;  %v510_v54 = vcombine.high %v34_v48, %v38_v49  ;;  %v512_v55 = vcombine.high %v35_v50, %v39_v51  ;;  %v42_v56 = vld [vmem:[%s666_s1 + $0xd0] sm:$0xff]  ;;  %v43_v58 = vld [vmem:[%s666_s1 + $0xd8] sm:$0xff]  ;;  %v509_v60 = vcombine.low %v34_v48, %v38_v49 }
   0xc   :  { %v46_v57 = vld [vmem:[%s666_s1 + $0xf0] sm:$0xff]  ;;  %v47_v59 = vld [vmem:[%s666_s1 + $0xf8] sm:$0xff]  ;;  %v511_v61 = vcombine.low %v35_v50, %v39_v51 }
   0xd   :  { %v518_v62 = vcombine.high %v42_v56, %v46_v57  ;;  %v520_v63 = vcombine.high %v43_v58, %v47_v59  ;;  %v517_v0 = vcombine.low %v42_v56, %v46_v57  ;;  %v519_v1 = vcombine.low %v43_v58, %v47_v59 }
   0xe   :  { %259 = vmatpush1.bf16.msra.mxu0 %v505_v27  ;;  %300 = vmatpush1.bf16.msra.mxu1 %v507_v28 }
   0xf   :  { %260 = vmatprep.subr.bf16.mxu0 %v514_v29  ;;  %301 = vmatprep.subr.bf16.mxu1 %v516_v30 }
  0x12   :  { %261 = vmatpush1.bf16.msra.mxu0 %v513_v35  ;;  %302 = vmatpush1.bf16.msra.mxu1 %v515_v36 }
  0x13   :  { %336 = vmatprep.subr.bf16.mxu0 %v494_v37  ;;  %377 = vmatprep.subr.bf16.mxu1 %v496_v38 }
  0x15   :  { %521 = vmatmul.mubr.msk.bf16.vlgmr.msra.gmra.mrb[0].mxu0 %vm250_vm0, %v15_v43  ;;  %522 = vmatmul.mubr.msk.bf16.vlgmr.msra.gmra.mrb[0].mxu1 %vm250_vm0, %v15_v43 }
  0x16   :  { %337 = vmatpush1.bf16.msra.mxu0 %v493_v44  ;;  %378 = vmatpush1.bf16.msra.mxu1 %v495_v45 }
  0x17   :  { %338 = vmatprep.subr.bf16.mxu0 %v502_v46  ;;  %379 = vmatprep.subr.bf16.mxu1 %v504_v47 }
  0x18   :  { %368 = vmatprep.mubr.bf16.mxu0 %v531_v3  ;;  %409 = vmatprep.mubr.bf16.mxu1 %v531_v3  ;;  %v51_v3 = vshrl.u32 %v50_v2, 7 }
  0x1a   :  { %339 = vmatpush1.bf16.msra.mxu0 %v501_v52  ;;  %380 = vmatpush1.bf16.msra.mxu1 %v503_v53  ;;  %v52_v4 = vsub.s32 0, %v51_v3  ;;  %v60_v6 = vsub.s32 2, %v51_v3  ;;  %v56_v7 = vsub.s32 1, %v51_v3  ;;  %v64_v10 = vsub.s32 3, %v51_v3 }
  0x1b   :  { %340 = vmatprep.subr.bf16.mxu0 %v510_v54  ;;  %381 = vmatprep.subr.bf16.mxu1 %v512_v55  ;;  %v443_v22 = vsub.s32 %v440_v14, %v51_v3  ;;  %v68_v34 = vsub.s32 4, %v51_v3  ;;  %v76_v35 = vsub.s32 6, %v51_v3  ;;  %v72_v36 = vsub.s32 5, %v51_v3 }
  0x1c   :  { %v53_v11 = vrot.slane %v48_v5, %v52_v4  ;;  %v61_v12 = vrot.slane %v48_v5, %v60_v6  ;;  %v57_v13 = vrot.slane %v48_v5, %v56_v7  ;;  %v65_v15 = vrot.slane %v48_v5, %v64_v10 }
  0x1d   :  { %v80_v37 = vsub.s32 7, %v51_v3  ;;  %v69_v38 = vrot.slane %v48_v5, %v68_v34  ;;  %v77_v39 = vrot.slane %v48_v5, %v76_v35  ;;  %v73_v40 = vrot.slane %v48_v5, %v72_v36 }
  0x1e   :  { %341 = vmatpush1.bf16.msra.mxu0 %v509_v60  ;;  %382 = vmatpush1.bf16.msra.mxu1 %v511_v61 }
  0x1f   :  { %342 = vmatprep.subr.bf16.mxu0 %v518_v62  ;;  %383 = vmatprep.subr.bf16.mxu1 %v520_v63  ;;  %v81_v41 = vrot.slane %v48_v5, %v80_v37 }
  0x22   :  { %343 = vmatpush1.bf16.msra.mxu0 %v517_v0  ;;  %384 = vmatpush1.bf16.msra.mxu1 %v519_v1 }
  0x25   :  { %523 = vmatmul.mubr.msk.bf16.vlgmr.msra.gmra.mrb[4].mxu0 %vm250_vm0, %v15_v43  ;;  %524 = vmatmul.mubr.msk.bf16.vlgmr.msra.gmra.mrb[4].mxu1 %vm250_vm0, %v15_v43 }
  0xe8   :  { %v288_v16 = vpop.f32.mrb[0].mxu0  ;;  %v329_v18 = vpop.f32.mrb[0].mxu1 }
  0xe9   :  { %v289_v17 = vadd.f32 %v288_v16, %v53_v11  ;;  %v290_v19 = vpop.f32.mrb[1].mxu0  ;;  %v330_v20 = vadd.f32 %v329_v18, %v61_v12  ;;  %v331_v23 = vpop.f32.mrb[1].mxu1 }
  0xea   :  { %v291_v21 = vadd.f32 %v290_v19, %v57_v13  ;;  %v292_v24 = vpop.f32.mrb[2].mxu0  ;;  %v332_v25 = vadd.f32 %v331_v23, %v65_v15  ;;  %v333_v26 = vpop.f32.mrb[2].mxu1 }
  0xeb   :  { %v293_v27 = vpop.f32.mrb[3].mxu0  ;;  %v334_v29 = vpop.f32.mrb[3].mxu1 }
  0xec   :  { %v525_v28 = vpack.c.bf16 %v291_v21, %v289_v17  ;;  %v526_v30 = vpack.c.bf16 %v332_v25, %v330_v20 }
  0xee   :  { %v444_v31 = vrot.slane %v525_v28, %v443_v22  ;;  %v451_v32 = vrot.slane %v526_v30, %v443_v22 }
  0xf0   :  { %v466_v33 = vcombine.low %v444_v31, %v451_v32 }
  0xf2   :  { %v474_v59 = vrot.slane %v466_v33, %v443_v22 }
  0xf8   :  { %v370_v42 = vpop.f32.mrb[4].mxu0  ;;  %v411_v44 = vpop.f32.mrb[4].mxu1 }
  0xf9   :  { %v371_v43 = vadd.f32 %v370_v42, %v69_v38  ;;  %v372_v45 = vpop.f32.mrb[5].mxu0  ;;  %v412_v46 = vadd.f32 %v411_v44, %v77_v39  ;;  %v413_v48 = vpop.f32.mrb[5].mxu1 }
  0xfa   :  { %v373_v47 = vadd.f32 %v372_v45, %v73_v40  ;;  %v374_v49 = vpop.f32.mrb[6].mxu0  ;;  %v414_v50 = vadd.f32 %v413_v48, %v81_v41  ;;  %v415_v51 = vpop.f32.mrb[6].mxu1 }
  0xfb   :  { %v375_v52 = vpop.f32.mrb[7].mxu0  ;;  %v416_v54 = vpop.f32.mrb[7].mxu1 }
  0xfc   :  { %v527_v53 = vpack.c.bf16 %v373_v47, %v371_v43  ;;  %v528_v55 = vpack.c.bf16 %v414_v50, %v412_v46 }
  0xfe   :  { %v458_v56 = vrot.slane %v527_v53, %v443_v22  ;;  %v465_v57 = vrot.slane %v528_v55, %v443_v22 }
 0x100   :  { %v467_v58 = vcombine.low %v458_v56, %v465_v57 }
 0x102   :  { %v481_v60 = vrot.slane %v467_v58, %v443_v22 }
 0x104   :  { %v482_v61 = vcombine.low %v474_v59, %v481_v60 }
 0x106   :  { %484 = vst [vmem:[%s669_s3] sm:$0xff] %v482_v61 }

// kernel: vae_forward.17
= control target key start
LH: loop header
LB: loop body
LE: loop exit
PB: predicated region body
PF: predicated region fallthrough
CT: control target
= control target key end

     0   :  { %v549_v1 = vmov 0   ;;  %vm125_vm0 = vcmask 261120   ;;  %s794_s1 = inlined_call_operand.vmem [shape: bf16[32,896], index: 1, kind: input, shape index: {}]   ;;  %s795_s0 = inlined_call_operand.vmem [shape: bf16[50,32], index: 0, kind: input, shape index: {}]   ;;  %s796_s2 = inlined_call_operand.vmem [shape: f32[50,896], index: 2, kind: output, shape index: {}]  }
   0x1   :  { %v525_v0 = vld [vmem:[%s794_s1 + $0x4] ss:$28 sps:$4 sm:$0xff]   ;;  %170 = vmatprep.mubr.bf16.mxu0 %v549_v1  ;;  %200 = vmatprep.mubr.bf16.mxu1 %v549_v1  ;;  %v528_v3 = vld [vmem:[%s794_s1 + $0x3c] ss:$28 sps:$4 sm:$0xff]   ;;  %v535_v7 = vld [vmem:[%s794_s1 + $0xc] ss:$28 sps:$4 sm:$0xff]  }
   0x2   :  { %v527_v2 = vld [vmem:[%s794_s1] ss:$28 sps:$4 sm:$0xff]   ;;  %138 = vmatprep.subr.bf16.mxu0 %v525_v0  ;;  %520 = vmatprep.subr.bf16.mxu1 %v525_v0  ;;  %v530_v4 = vld [vmem:[%s794_s1 + $0x38] ss:$28 sps:$4 sm:$0xff]   ;;  %v533_v8 = vld [vmem:[%s794_s1 + $0x8] ss:$28 sps:$4 sm:$0xff]  }
   0x3   :  { %139 = vmatpush1.bf16.msra.mxu0 %v527_v2  ;;  %522 = vmatpush1.bf16.msra.mxu1 %v527_v2  ;;  %v531_v5 = vld [vmem:[%s795_s0] sm:$0xff]   ;;  %v532_v6 = vld [vmem:[%s795_s0 + $0x18] ss:$0 sps:$4 sm:$0x11]   ;;  %v538_v9 = vld [vmem:[%s794_s1 + $0x14] ss:$28 sps:$4 sm:$0xff]  }
   0x4   :  { %140 = vmatprep.subr.bf16.mxu0 %v528_v3  ;;  %521 = vmatprep.subr.bf16.mxu1 %v528_v3  ;;  %v536_v10 = vld [vmem:[%s794_s1 + $0x10] ss:$28 sps:$4 sm:$0xff]   ;;  %v541_v11 = vld [vmem:[%s794_s1 + $0x44] ss:$28 sps:$4 sm:$0xff]   ;;  %v543_v15 = vld [vmem:[%s794_s1 + $0x18] ss:$28 sps:$4 sm:$0xff]  }
   0x5   :  { %v539_v12 = vld [vmem:[%s794_s1 + $0x40] ss:$28 sps:$4 sm:$0xff]   ;;  %v544_v13 = vld [vmem:[%s794_s1 + $0x48] ss:$28 sps:$4 sm:$0xff]   ;;  %v548_v17 = vld [vmem:[%s794_s1 + $0x50] ss:$28 sps:$4 sm:$0xff]  }
   0x6   :  { %v546_v14 = vld [vmem:[%s794_s1 + $0x4c] ss:$28 sps:$4 sm:$0xff]   ;;  %v547_v18 = vld [vmem:[%s795_s0 + $0x10] sm:$0xff]  }
   0x7   :  { %141 = vmatpush1.bf16.msra.mxu0 %v530_v4  ;;  %523 = vmatpush1.bf16.msra.mxu1 %v530_v4  ;;  %v542_v16 = vld [vmem:[%s795_s0 + $0x8] sm:$0xff]  }
   0x8   :  { %209 = vmatprep.subr.bf16.mxu1 %v535_v7  ;;  %280 = vmatprep.subr.bf16.mxu0 %v538_v9 }
   0xa   :  { %486 = vmatmul.mubr.msk.bf16.vlgmr.msra.gmra.mrb[0].mxu0 %vm125_vm0, %v531_v5  ;;  %489 = vmatmul.mubr.msk.bf16.vlgmr.msra.gmra.mrb[0].mxu1 %vm125_vm0, %v532_v6 }
   0xb   :  { %210 = vmatpush1.bf16.msra.mxu1 %v533_v8  ;;  %281 = vmatpush1.bf16.msra.mxu0 %v536_v10 }
   0xc   :  { %211 = vmatprep.subr.bf16.mxu1 %v541_v11  ;;  %180 = vmatprep.mubr.bf16.mxu0 %v549_v1 }
   0xd   :  { %241 = vmatprep.mubr.bf16.mxu1 %v549_v1  ;;  %282 = vmatprep.subr.bf16.mxu0 %v546_v14 }
   0xf   :  { %212 = vmatpush1.bf16.msra.mxu1 %v539_v12  ;;  %283 = vmatpush1.bf16.msra.mxu0 %v544_v13 }
  0x10   :  { %508 = vmatprep.subr.bf16.mxu1 %v543_v15 }
  0x12   :  { %487 = vmatmul.mubr.msk.bf16.gmra.mrb[4].mxu0 %vm125_vm0, %v542_v16  ;;  %490 = vmatmul.mubr.msk.bf16.vlgmr.msra.gmra.mrb[4].mxu1 %vm125_vm0, %v531_v5 }
  0x13   :  { %509 = vmatpush3.bf16.msra.mxu1 %v543_v15  ;;  %190 = vmatprep.mubr.bf16.mxu0 %v549_v1 }
  0x14   :  { %251 = vmatprep.mubr.bf16.mxu1 %v549_v1  ;;  %510 = vmatprep.subr.bf16.mxu1 %v548_v17 }
  0x17   :  { %511 = vmatpush3.bf16.msra.mxu1 %v548_v17 }
  0x1a   :  { %488 = vmatmul.mubr.msk.bf16.gmra.mrb[8].mxu0 %vm125_vm0, %v547_v18  ;;  %491 = vmatmul.mubr.msk.bf16.gmra.mrb[8].mxu1 %vm125_vm0, %v542_v16 }
  0x1b   :  { %261 = vmatprep.mubr.bf16.mxu1 %v549_v1  ;;  %312 = vmatprep.mubr.bf16.mxu0 %v549_v1 }
  0x22   :  { %492 = vmatmul.mubr.msk.bf16.gmra.mrb[12].mxu1 %vm125_vm0, %v547_v18  ;;  %494 = vmatmul.mubr.msk.bf16.vlgmr.msra.gmra.mrb[12].mxu0 %vm125_vm0, %v531_v5 }
  0x23   :  { %271 = vmatprep.mubr.bf16.mxu1 %v549_v1  ;;  %322 = vmatprep.mubr.bf16.mxu0 %v549_v1 }
  0x2a   :  { %493 = vmatmul.mubr.msk.bf16.gmra.mrb[16].mxu1 %vm125_vm0, %v532_v6  ;;  %495 = vmatmul.mubr.msk.bf16.gmra.mrb[16].mxu0 %vm125_vm0, %v542_v16 }
  0x2b   :  { %332 = vmatprep.mubr.bf16.mxu0 %v549_v1  ;;  %512 = vmatprep.mubr.msk.bf16.mxu1 %vm125_vm0, %v531_v5 }
  0x32   :  { %496 = vmatmul.mubr.msk.bf16.gmra.mrb[20].mxu0 %vm125_vm0, %v547_v18  ;;  %513 = vmatmul.mubr.msk.bf16.vlgmr.msra.gmra.mrb[20].mxu1 %vm125_vm0, %v542_v16 }
  0x33   :  { %342 = vmatprep.mubr.bf16.mxu0 %v549_v1  ;;  %516 = vmatprep.mubr.msk.bf16.mxu1 %vm125_vm0, %v547_v18 }
  0x3a   :  { %497 = vmatmul.mubr.msk.bf16.gmra.mrb[24].mxu0 %vm125_vm0, %v532_v6  ;;  %517 = vmatmul.mubr.msk.bf16.gmra.mrb[24].mxu1 %vm125_vm0, %v532_v6 }
  0xdd   :  { %v172_v19 = vpop.f32.mrb[0].mxu0  ;;  %v202_v20 = vpop.f32.mrb[0].mxu1 }
  0xde   :  { %415 = vst [vmem:[%s796_s2] sm:$0xff] %v172_v19  ;;  %457 = vst [vmem:[%s796_s2 + $0x150] sm:$0x3] %v202_v20  ;;  %v174_v21 = vpop.f32.mrb[1].mxu0  ;;  %v204_v22 = vpop.f32.mrb[1].mxu1 }
  0xdf   :  { %416 = vst [vmem:[%s796_s2 + $0x8] sm:$0xff] %v174_v21  ;;  %458 = vst [vmem:[%s796_s2 + $0x158] sm:$0x3] %v204_v22  ;;  %v176_v23 = vpop.f32.mrb[2].mxu0  ;;  %v206_v24 = vpop.f32.mrb[2].mxu1 }
  0xe0   :  { %422 = vst [vmem:[%s796_s2 + $0x38] sm:$0xff] %v176_v23  ;;  %v178_v25 = vpop.f32.mrb[3].mxu0  ;;  %v207_v26 = vpop.f32.mrb[3].mxu1 }
  0xe1   :  { %423 = vst [vmem:[%s796_s2 + $0x40] sm:$0xff] %v178_v25 }
  0xe5   :  { %v182_v27 = vpop.f32.mrb[4].mxu0  ;;  %v243_v28 = vpop.f32.mrb[4].mxu1 }
  0xe6   :  { %429 = vst [vmem:[%s796_s2 + $0x70] sm:$0xff] %v182_v27  ;;  %417 = vst [vmem:[%s796_s2 + $0x10] sm:$0xff] %v243_v28  ;;  %v184_v29 = vpop.f32.mrb[5].mxu0  ;;  %v245_v30 = vpop.f32.mrb[5].mxu1 }
  0xe7   :  { %430 = vst [vmem:[%s796_s2 + $0x78] sm:$0xff] %v184_v29  ;;  %418 = vst [vmem:[%s796_s2 + $0x18] sm:$0xff] %v245_v30  ;;  %v186_v31 = vpop.f32.mrb[6].mxu0  ;;  %v247_v32 = vpop.f32.mrb[6].mxu1 }
  0xe8   :  { %436 = vst [vmem:[%s796_s2 + $0xa8] sm:$0xff] %v186_v31  ;;  %424 = vst [vmem:[%s796_s2 + $0x48] sm:$0xff] %v247_v32  ;;  %v188_v33 = vpop.f32.mrb[7].mxu0  ;;  %v249_v34 = vpop.f32.mrb[7].mxu1 }
  0xe9   :  { %437 = vst [vmem:[%s796_s2 + $0xb0] sm:$0xff] %v188_v33  ;;  %425 = vst [vmem:[%s796_s2 + $0x50] sm:$0xff] %v249_v34 }
  0xed   :  { %v192_v35 = vpop.f32.mrb[8].mxu0  ;;  %v253_v36 = vpop.f32.mrb[8].mxu1 }
  0xee   :  { %443 = vst [vmem:[%s796_s2 + $0xe0] sm:$0xff] %v192_v35  ;;  %431 = vst [vmem:[%s796_s2 + $0x80] sm:$0xff] %v253_v36  ;;  %v194_v37 = vpop.f32.mrb[9].mxu0  ;;  %v255_v38 = vpop.f32.mrb[9].mxu1 }
  0xef   :  { %444 = vst [vmem:[%s796_s2 + $0xe8] sm:$0xff] %v194_v37  ;;  %432 = vst [vmem:[%s796_s2 + $0x88] sm:$0xff] %v255_v38  ;;  %v196_v39 = vpop.f32.mrb[10].mxu0  ;;  %v257_v40 = vpop.f32.mrb[10].mxu1 }
  0xf0   :  { %450 = vst [vmem:[%s796_s2 + $0x118] sm:$0xff] %v196_v39  ;;  %438 = vst [vmem:[%s796_s2 + $0xb8] sm:$0xff] %v257_v40  ;;  %v198_v41 = vpop.f32.mrb[11].mxu0  ;;  %v259_v42 = vpop.f32.mrb[11].mxu1 }
  0xf1   :  { %451 = vst [vmem:[%s796_s2 + $0x120] sm:$0xff] %v198_v41  ;;  %439 = vst [vmem:[%s796_s2 + $0xc0] sm:$0xff] %v259_v42 }
  0xf5   :  { %v263_v43 = vpop.f32.mrb[12].mxu1  ;;  %v314_v44 = vpop.f32.mrb[12].mxu0 }
  0xf6   :  { %445 = vst [vmem:[%s796_s2 + $0xf0] sm:$0xff] %v263_v43  ;;  %419 = vst [vmem:[%s796_s2 + $0x20] sm:$0xff] %v314_v44  ;;  %v265_v45 = vpop.f32.mrb[13].mxu1  ;;  %v316_v46 = vpop.f32.mrb[13].mxu0 }
  0xf7   :  { %446 = vst [vmem:[%s796_s2 + $0xf8] sm:$0xff] %v265_v45  ;;  %420 = vst [vmem:[%s796_s2 + $0x28] sm:$0xff] %v316_v46  ;;  %v267_v47 = vpop.f32.mrb[14].mxu1  ;;  %v318_v48 = vpop.f32.mrb[14].mxu0 }
  0xf8   :  { %452 = vst [vmem:[%s796_s2 + $0x128] sm:$0xff] %v267_v47  ;;  %426 = vst [vmem:[%s796_s2 + $0x58] sm:$0xff] %v318_v48  ;;  %v269_v49 = vpop.f32.mrb[15].mxu1  ;;  %v320_v50 = vpop.f32.mrb[15].mxu0 }
  0xf9   :  { %453 = vst [vmem:[%s796_s2 + $0x130] sm:$0xff] %v269_v49  ;;  %427 = vst [vmem:[%s796_s2 + $0x60] sm:$0xff] %v320_v50 }
  0xfd   :  { %v273_v51 = vpop.f32.mrb[16].mxu1  ;;  %v324_v52 = vpop.f32.mrb[16].mxu0 }
  0xfe   :  { %459 = vst [vmem:[%s796_s2 + $0x160] sm:$0x3] %v273_v51  ;;  %433 = vst [vmem:[%s796_s2 + $0x90] sm:$0xff] %v324_v52  ;;  %v275_v53 = vpop.f32.mrb[17].mxu1  ;;  %v326_v54 = vpop.f32.mrb[17].mxu0 }
  0xff   :  { %460 = vst [vmem:[%s796_s2 + $0x168] sm:$0x3] %v275_v53  ;;  %434 = vst [vmem:[%s796_s2 + $0x98] sm:$0xff] %v326_v54  ;;  %v277_v55 = vpop.f32.mrb[18].mxu1  ;;  %v328_v56 = vpop.f32.mrb[18].mxu0 }
 0x100   :  { %440 = vst [vmem:[%s796_s2 + $0xc8] sm:$0xff] %v328_v56  ;;  %v278_v57 = vpop.f32.mrb[19].mxu1  ;;  %v330_v58 = vpop.f32.mrb[19].mxu0 }
 0x101   :  { %441 = vst [vmem:[%s796_s2 + $0xd0] sm:$0xff] %v330_v58 }
 0x105   :  { %v334_v59 = vpop.f32.mrb[20].mxu0  ;;  %v514_v60 = vpop.f32.mrb[20].mxu1 }
 0x106   :  { %447 = vst [vmem:[%s796_s2 + $0x100] sm:$0xff] %v334_v59  ;;  %435 = vst [vmem:[%s796_s2 + $0xa0] sm:$0xff] %v514_v60  ;;  %v336_v61 = vpop.f32.mrb[21].mxu0  ;;  %v385_v62 = vpop.f32.mrb[21].mxu1 }
 0x107   :  { %448 = vst [vmem:[%s796_s2 + $0x108] sm:$0xff] %v336_v61  ;;  %421 = vst [vmem:[%s796_s2 + $0x30] sm:$0xff] %v385_v62  ;;  %v338_v63 = vpop.f32.mrb[22].mxu0  ;;  %v515_v0 = vpop.f32.mrb[22].mxu1 }
 0x108   :  { %454 = vst [vmem:[%s796_s2 + $0x138] sm:$0xff] %v338_v63  ;;  %442 = vst [vmem:[%s796_s2 + $0xd8] sm:$0xff] %v515_v0  ;;  %v340_v1 = vpop.f32.mrb[23].mxu0  ;;  %v388_v2 = vpop.f32.mrb[23].mxu1 }
 0x109   :  { %455 = vst [vmem:[%s796_s2 + $0x140] sm:$0xff] %v340_v1  ;;  %428 = vst [vmem:[%s796_s2 + $0x68] sm:$0xff] %v388_v2 }
 0x10d   :  { %v344_v3 = vpop.f32.mrb[24].mxu0  ;;  %v518_v4 = vpop.f32.mrb[24].mxu1 }
 0x10e   :  { %461 = vst [vmem:[%s796_s2 + $0x170] sm:$0x3] %v344_v3  ;;  %463 = vst [vmem:[%s796_s2 + $0x180] sm:$0x3] %v518_v4  ;;  %v346_v5 = vpop.f32.mrb[25].mxu0  ;;  %v401_v6 = vpop.f32.mrb[25].mxu1 }
 0x10f   :  { %462 = vst [vmem:[%s796_s2 + $0x178] sm:$0x3] %v346_v5  ;;  %449 = vst [vmem:[%s796_s2 + $0x110] sm:$0xff] %v401_v6  ;;  %v348_v7 = vpop.f32.mrb[26].mxu0  ;;  %v519_v8 = vpop.f32.mrb[26].mxu1 }
 0x110   :  { %v349_v9 = vpop.f32.mrb[27].mxu0  ;;  %v404_v10 = vpop.f32.mrb[27].mxu1 }
 0x111   :  { %456 = vst [vmem:[%s796_s2 + $0x148] sm:$0xff] %v404_v10 }

// kernel: vae_forward.16
= control target key start
LH: loop header
LB: loop body
LE: loop exit
PB: predicated region body
PF: predicated region fallthrough
CT: control target
= control target key end

     0   :  { %v530_v36 = vlaneseq  ;;  %v4875_v37 = vmov 1966171168   ;;  %s6352_s1 = inlined_call_operand.vmem [shape: bf16[1024,896], index: 1, kind: input, shape index: {}]   ;;  %s6353_s0 = inlined_call_operand.vmem [shape: bf16[2,1024], index: 0, kind: input, shape index: {}]   ;;  %s6354_s2 = inlined_call_operand.vmem [shape: f32[1,896], index: 2, kind: input, shape index: {}]   ;;  %s6355_s3 = inlined_call_operand.vmem [shape: bf16[2,896], index: 3, kind: output, shape index: {}]  }
   0x1   :  { %v4234_v0 = vld [vmem:[%s6352_s1 + $0x4] ss:$28 sps:$4 sm:$0xff]   ;;  %v4240_v4 = vld [vmem:[%s6352_s1 + $0x3c] ss:$28 sps:$4 sm:$0xff]   ;;  %v4246_v8 = vld [vmem:[%s6352_s1 + $0x74] ss:$28 sps:$4 sm:$0xff]   ;;  %v568_v38 = vunpack.c.l.s4 %v4875_v37 }
   0x2   :  { %v4236_v1 = vld [vmem:[%s6352_s1 + $0x384] ss:$28 sps:$4 sm:$0xff]   ;;  %2927 = vmatprep.subr.bf16.mxu1 %v4234_v0  ;;  %v4242_v5 = vld [vmem:[%s6352_s1 + $0x3bc] ss:$28 sps:$4 sm:$0xff]   ;;  %v4248_v9 = vld [vmem:[%s6352_s1 + $0x3f4] ss:$28 sps:$4 sm:$0xff]  }
   0x3   :  { %v4238_v2 = vld [vmem:[%s6352_s1] ss:$28 sps:$4 sm:$0xff]   ;;  %2968 = vmatprep.subr.bf16.mxu0 %v4236_v1  ;;  %v4244_v6 = vld [vmem:[%s6352_s1 + $0x38] ss:$28 sps:$4 sm:$0xff]   ;;  %v4250_v10 = vld [vmem:[%s6352_s1 + $0x70] ss:$28 sps:$4 sm:$0xff]   ;;  %v569_v43 = vunpack.c.0.s8 %v568_v38 }
   0x4   :  { %v4239_v3 = vld [vmem:[%s6352_s1 + $0x380] ss:$28 sps:$4 sm:$0xff]   ;;  %2928 = vmatpush1.bf16.msra.mxu1 %v4238_v2  ;;  %v4245_v7 = vld [vmem:[%s6352_s1 + $0x3b8] ss:$28 sps:$4 sm:$0xff]   ;;  %v4251_v11 = vld [vmem:[%s6352_s1 + $0x3f0] ss:$28 sps:$4 sm:$0xff]  }
   0x5   :  { %2969 = vmatpush1.bf16.msra.mxu0 %v4239_v3  ;;  %2929 = vmatprep.subr.bf16.mxu1 %v4240_v4  ;;  %v4252_v12 = vld [vmem:[%s6352_s1 + $0xac] ss:$28 sps:$4 sm:$0xff]   ;;  %v4258_v16 = vld [vmem:[%s6352_s1 + $0xe4] ss:$28 sps:$4 sm:$0xff]   ;;  %v4264_v20 = vld [vmem:[%s6352_s1 + $0x11c] ss:$28 sps:$4 sm:$0xff]  }
   0x6   :  { %2970 = vmatprep.subr.bf16.mxu0 %v4242_v5  ;;  %v4254_v13 = vld [vmem:[%s6352_s1 + $0x42c] ss:$28 sps:$4 sm:$0xff]   ;;  %v4260_v17 = vld [vmem:[%s6352_s1 + $0x464] ss:$28 sps:$4 sm:$0xff]   ;;  %v4266_v21 = vld [vmem:[%s6352_s1 + $0x49c] ss:$28 sps:$4 sm:$0xff]  }
   0x7   :  { %v4256_v14 = vld [vmem:[%s6352_s1 + $0xa8] ss:$28 sps:$4 sm:$0xff]   ;;  %v4262_v18 = vld [vmem:[%s6352_s1 + $0xe0] ss:$28 sps:$4 sm:$0xff]   ;;  %v4268_v22 = vld [vmem:[%s6352_s1 + $0x118] ss:$28 sps:$4 sm:$0xff]  }
   0x8   :  { %2930 = vmatpush1.bf16.msra.mxu1 %v4244_v6  ;;  %v4257_v15 = vld [vmem:[%s6352_s1 + $0x428] ss:$28 sps:$4 sm:$0xff]   ;;  %v4263_v19 = vld [vmem:[%s6352_s1 + $0x460] ss:$28 sps:$4 sm:$0xff]   ;;  %v4269_v23 = vld [vmem:[%s6352_s1 + $0x498] ss:$28 sps:$4 sm:$0xff]  }
   0x9   :  { %2971 = vmatpush1.bf16.msra.mxu0 %v4245_v7  ;;  %2931 = vmatprep.subr.bf16.mxu1 %v4246_v8  ;;  %v4270_v24 = vld [vmem:[%s6352_s1 + $0x154] ss:$28 sps:$4 sm:$0xff]   ;;  %v4276_v28 = vld [vmem:[%s6352_s1 + $0x18c] ss:$28 sps:$4 sm:$0xff]   ;;  %v4282_v32 = vld [vmem:[%s6352_s1 + $0x1c4] ss:$28 sps:$4 sm:$0xff]  }
   0xa   :  { %2972 = vmatprep.subr.bf16.mxu0 %v4248_v9  ;;  %v4272_v25 = vld [vmem:[%s6352_s1 + $0x4d4] ss:$28 sps:$4 sm:$0xff]   ;;  %v4278_v29 = vld [vmem:[%s6352_s1 + $0x50c] ss:$28 sps:$4 sm:$0xff]   ;;  %v4284_v33 = vld [vmem:[%s6352_s1 + $0x544] ss:$28 sps:$4 sm:$0xff]  }
   0xb   :  { %v4274_v26 = vld [vmem:[%s6352_s1 + $0x150] ss:$28 sps:$4 sm:$0xff]   ;;  %v4280_v30 = vld [vmem:[%s6352_s1 + $0x188] ss:$28 sps:$4 sm:$0xff]   ;;  %v4286_v34 = vld [vmem:[%s6352_s1 + $0x1c0] ss:$28 sps:$4 sm:$0xff]  }
   0xc   :  { %2932 = vmatpush1.bf16.msra.mxu1 %v4250_v10  ;;  %v4275_v27 = vld [vmem:[%s6352_s1 + $0x4d0] ss:$28 sps:$4 sm:$0xff]   ;;  %v4281_v31 = vld [vmem:[%s6352_s1 + $0x508] ss:$28 sps:$4 sm:$0xff]   ;;  %v4287_v35 = vld [vmem:[%s6352_s1 + $0x540] ss:$28 sps:$4 sm:$0xff]  }
   0xd   :  { %2973 = vmatpush1.bf16.msra.mxu0 %v4251_v11  ;;  %2933 = vmatprep.subr.bf16.mxu1 %v4252_v12  ;;  %v4288_v39 = vld [vmem:[%s6352_s1 + $0x1fc] ss:$28 sps:$4 sm:$0xff]   ;;  %v5013_v42 = vshrl.u32 %v530_v36, 7  ;;  %v4294_v45 = vld [vmem:[%s6352_s1 + $0x234] ss:$28 sps:$4 sm:$0xff]   ;;  %v15_v52 = vld [vmem:[%s6353_s0] sm:$0xff] }
   0xe   :  { %2974 = vmatprep.subr.bf16.mxu0 %v4254_v13  ;;  %v4290_v40 = vld [vmem:[%s6352_s1 + $0x57c] ss:$28 sps:$4 sm:$0xff]   ;;  %v4296_v46 = vld [vmem:[%s6352_s1 + $0x5b4] ss:$28 sps:$4 sm:$0xff]   ;;  %v4300_v50 = vld [vmem:[%s6352_s1 + $0x26c] ss:$28 sps:$4 sm:$0xff]   ;;  %v566_v5 = vcombine.high %v15_v52, %v15_v52 }
   0xf   :  { %v4292_v41 = vld [vmem:[%s6352_s1 + $0x1f8] ss:$28 sps:$4 sm:$0xff]   ;;  %v4298_v47 = vld [vmem:[%s6352_s1 + $0x230] ss:$28 sps:$4 sm:$0xff]   ;;  %v5031_v49 = vsub.s32 %v569_v43, %v5013_v42  ;;  %v4304_v53 = vld [vmem:[%s6352_s1 + $0x268] ss:$28 sps:$4 sm:$0xff]  }
  0x10   :  { %2934 = vmatpush1.bf16.msra.mxu1 %v4256_v14  ;;  %v4293_v44 = vld [vmem:[%s6352_s1 + $0x578] ss:$28 sps:$4 sm:$0xff]   ;;  %v4299_v48 = vld [vmem:[%s6352_s1 + $0x5b0] ss:$28 sps:$4 sm:$0xff]   ;;  %v4305_v55 = vld [vmem:[%s6352_s1 + $0x5e8] ss:$28 sps:$4 sm:$0xff]  }
  0x11   :  { %2975 = vmatpush1.bf16.msra.mxu0 %v4257_v15  ;;  %2935 = vmatprep.subr.bf16.mxu1 %v4258_v16  ;;  %v4302_v51 = vld [vmem:[%s6352_s1 + $0x5ec] ss:$28 sps:$4 sm:$0xff]   ;;  %v573_v54 = vrot.slane %v15_v52, %v5031_v49  ;;  %v4306_v56 = vld [vmem:[%s6352_s1 + $0x2a4] ss:$28 sps:$4 sm:$0xff]   ;;  %v4312_v62 = vld [vmem:[%s6352_s1 + $0x2dc] ss:$28 sps:$4 sm:$0xff]   ;;  %v5101_v10 = vrot.slane %v566_v5, %v5031_v49 }
  0x12   :  { %2976 = vmatprep.subr.bf16.mxu0 %v4260_v17  ;;  %v4308_v57 = vld [vmem:[%s6352_s1 + $0x624] ss:$28 sps:$4 sm:$0xff]   ;;  %v4314_v63 = vld [vmem:[%s6352_s1 + $0x65c] ss:$28 sps:$4 sm:$0xff]   ;;  %v4318_v3 = vld [vmem:[%s6352_s1 + $0x314] ss:$28 sps:$4 sm:$0xff]  }
  0x13   :  { %v581_v58 = vcombine.high %v573_v54, %v573_v54  ;;  %v4310_v59 = vld [vmem:[%s6352_s1 + $0x2a0] ss:$28 sps:$4 sm:$0xff]   ;;  %v4316_v1 = vld [vmem:[%s6352_s1 + $0x2d8] ss:$28 sps:$4 sm:$0xff]   ;;  %v4322_v6 = vld [vmem:[%s6352_s1 + $0x310] ss:$28 sps:$4 sm:$0xff]   ;;  %v5107_v12 = vrot.slane %v573_v54, %v5031_v49  ;;  %v582_v16 = vcombine.high %v5101_v10, %v5101_v10 }
  0x14   :  { %2936 = vmatpush1.bf16.msra.mxu1 %v4262_v18  ;;  %v4311_v61 = vld [vmem:[%s6352_s1 + $0x620] ss:$28 sps:$4 sm:$0xff]   ;;  %v4317_v2 = vld [vmem:[%s6352_s1 + $0x658] ss:$28 sps:$4 sm:$0xff]   ;;  %v4323_v7 = vld [vmem:[%s6352_s1 + $0x690] ss:$28 sps:$4 sm:$0xff]  }
  0x15   :  { %2977 = vmatpush1.bf16.msra.mxu0 %v4263_v19  ;;  %2937 = vmatprep.subr.bf16.mxu1 %v4264_v20  ;;  %v5059_v60 = vrot.slane %v581_v58, %v5031_v49  ;;  %v4320_v4 = vld [vmem:[%s6352_s1 + $0x694] ss:$28 sps:$4 sm:$0xff]   ;;  %v4324_v8 = vld [vmem:[%s6352_s1 + $0x34c] ss:$28 sps:$4 sm:$0xff]   ;;  %v4332_v14 = vld [vmem:[%s6352_s1 + $0x704] ss:$28 sps:$4 sm:$0xff]   ;;  %v5125_v18 = vcombine.high %v5107_v12, %v5107_v12 }
  0x16   :  { %2978 = vmatprep.subr.bf16.mxu0 %v4266_v21  ;;  %v4326_v9 = vld [vmem:[%s6352_s1 + $0x6cc] ss:$28 sps:$4 sm:$0xff]   ;;  %v4330_v17 = vld [vmem:[%s6352_s1 + $0x700] ss:$28 sps:$4 sm:$0xff]  }
  0x17   :  { %v5072_v0 = vcombine.high %v5059_v60, %v5059_v60  ;;  %2959 = vmatprep.mubr.bf16.mxu1 %v5059_v60  ;;  %v4328_v11 = vld [vmem:[%s6352_s1 + $0x348] ss:$28 sps:$4 sm:$0xff]   ;;  %v4338_v20 = vld [vmem:[%s6352_s1 + $0x73c] ss:$28 sps:$4 sm:$0xff]  }
  0x18   :  { %2938 = vmatpush1.bf16.msra.mxu1 %v4268_v22  ;;  %v4329_v13 = vld [vmem:[%s6352_s1 + $0x6c8] ss:$28 sps:$4 sm:$0xff]   ;;  %v5137_v22 = vrot.slane %v582_v16, %v5031_v49  ;;  %v4362_v37 = vld [vmem:[%s6352_s1 + $0x81c] ss:$28 sps:$4 sm:$0xff]  }
  0x19   :  { %2979 = vmatpush1.bf16.msra.mxu0 %v4269_v23  ;;  %2939 = vmatprep.subr.bf16.mxu1 %v4270_v24  ;;  %v4335_v15 = vld [vmem:[%s6352_s1 + $0xc] ss:$28 sps:$4 sm:$0xff]   ;;  %v4341_v21 = vld [vmem:[%s6352_s1 + $0x44] ss:$28 sps:$4 sm:$0xff]   ;;  %v4336_v23 = vld [vmem:[%s6352_s1 + $0x738] ss:$28 sps:$4 sm:$0xff]  }
  0x1a   :  { %2980 = vmatprep.subr.bf16.mxu0 %v4272_v25  ;;  %3000 = vmatprep.mubr.bf16.mxu0 %v5072_v0  ;;  %v4333_v19 = vld [vmem:[%s6352_s1 + $0x8] ss:$28 sps:$4 sm:$0xff]   ;;  %v4339_v24 = vld [vmem:[%s6352_s1 + $0x40] ss:$28 sps:$4 sm:$0xff]   ;;  %v4344_v25 = vld [vmem:[%s6352_s1 + $0x774] ss:$28 sps:$4 sm:$0xff]  }
  0x1b   :  { %v4357_v36 = vld [vmem:[%s6352_s1 + $0xe8] ss:$28 sps:$4 sm:$0xff]   ;;  %v4371_v43 = vld [vmem:[%s6352_s1 + $0x15c] ss:$28 sps:$4 sm:$0xff]  }
  0x1c   :  { %2940 = vmatpush1.bf16.msra.mxu1 %v4274_v26  ;;  %v4347_v26 = vld [vmem:[%s6352_s1 + $0x7c] ss:$28 sps:$4 sm:$0xff]   ;;  %v4365_v38 = vld [vmem:[%s6352_s1 + $0x124] ss:$28 sps:$4 sm:$0xff]   ;;  %v4383_v52 = vld [vmem:[%s6352_s1 + $0x1cc] ss:$28 sps:$4 sm:$0xff]  }
  0x1d   :  { %2981 = vmatpush1.bf16.msra.mxu0 %v4275_v27  ;;  %2941 = vmatprep.subr.bf16.mxu1 %v4276_v28  ;;  %v4342_v27 = vld [vmem:[%s6352_s1 + $0x770] ss:$28 sps:$4 sm:$0xff]   ;;  %v4345_v28 = vld [vmem:[%s6352_s1 + $0x78] ss:$28 sps:$4 sm:$0xff]   ;;  %v4381_v54 = vld [vmem:[%s6352_s1 + $0x1c8] ss:$28 sps:$4 sm:$0xff]  }
  0x1e   :  { %2982 = vmatprep.subr.bf16.mxu0 %v4278_v29  ;;  %v4350_v29 = vld [vmem:[%s6352_s1 + $0x7ac] ss:$28 sps:$4 sm:$0xff]   ;;  %v4387_v58 = vld [vmem:[%s6352_s1 + $0x200] ss:$28 sps:$4 sm:$0xff]  }
  0x1f   :  { %v4404_v5 = vld [vmem:[%s6352_s1 + $0x9a4] ss:$28 sps:$4 sm:$0xff]   ;;  %v4419_v16 = vld [vmem:[%s6352_s1 + $0x31c] ss:$28 sps:$4 sm:$0xff]  }
  0x20   :  { %2942 = vmatpush1.bf16.msra.mxu1 %v4280_v30  ;;  %v4353_v30 = vld [vmem:[%s6352_s1 + $0xb4] ss:$28 sps:$4 sm:$0xff]  }
  0x21   :  { %2983 = vmatpush1.bf16.msra.mxu0 %v4281_v31  ;;  %2943 = vmatprep.subr.bf16.mxu1 %v4282_v32  ;;  %v4348_v31 = vld [vmem:[%s6352_s1 + $0x7a8] ss:$28 sps:$4 sm:$0xff]   ;;  %v4351_v32 = vld [vmem:[%s6352_s1 + $0xb0] ss:$28 sps:$4 sm:$0xff]  }
  0x22   :  { %2984 = vmatprep.subr.bf16.mxu0 %v4284_v33  ;;  %v4356_v33 = vld [vmem:[%s6352_s1 + $0x7e4] ss:$28 sps:$4 sm:$0xff]  }
  0x24   :  { %2944 = vmatpush1.bf16.msra.mxu1 %v4286_v34  ;;  %v4359_v34 = vld [vmem:[%s6352_s1 + $0xec] ss:$28 sps:$4 sm:$0xff]  }
  0x25   :  { %2985 = vmatpush1.bf16.msra.mxu0 %v4287_v35  ;;  %2945 = vmatprep.subr.bf16.mxu1 %v4288_v39  ;;  %v4354_v35 = vld [vmem:[%s6352_s1 + $0x7e0] ss:$28 sps:$4 sm:$0xff]   ;;  %v4360_v39 = vld [vmem:[%s6352_s1 + $0x818] ss:$28 sps:$4 sm:$0xff]  }
  0x26   :  { %2986 = vmatprep.subr.bf16.mxu0 %v4290_v40  ;;  %v4363_v40 = vld [vmem:[%s6352_s1 + $0x120] ss:$28 sps:$4 sm:$0xff]  }
  0x28   :  { %2946 = vmatpush1.bf16.msra.mxu1 %v4292_v41  ;;  %v4368_v41 = vld [vmem:[%s6352_s1 + $0x854] ss:$28 sps:$4 sm:$0xff]  }
  0x29   :  { %2987 = vmatpush1.bf16.msra.mxu0 %v4293_v44  ;;  %2947 = vmatprep.subr.bf16.mxu1 %v4294_v45  ;;  %v4366_v44 = vld [vmem:[%s6352_s1 + $0x850] ss:$28 sps:$4 sm:$0xff]   ;;  %v4369_v45 = vld [vmem:[%s6352_s1 + $0x158] ss:$28 sps:$4 sm:$0xff]  }
  0x2a   :  { %2988 = vmatprep.subr.bf16.mxu0 %v4296_v46  ;;  %v4374_v46 = vld [vmem:[%s6352_s1 + $0x88c] ss:$28 sps:$4 sm:$0xff]  }
  0x2c   :  { %2948 = vmatpush1.bf16.msra.mxu1 %v4298_v47  ;;  %v4377_v47 = vld [vmem:[%s6352_s1 + $0x194] ss:$28 sps:$4 sm:$0xff]  }
  0x2d   :  { %2989 = vmatpush1.bf16.msra.mxu0 %v4299_v48  ;;  %2949 = vmatprep.subr.bf16.mxu1 %v4300_v50  ;;  %v4372_v48 = vld [vmem:[%s6352_s1 + $0x888] ss:$28 sps:$4 sm:$0xff]   ;;  %v4375_v50 = vld [vmem:[%s6352_s1 + $0x190] ss:$28 sps:$4 sm:$0xff]  }
  0x2e   :  { %2990 = vmatprep.subr.bf16.mxu0 %v4302_v51  ;;  %v4380_v51 = vld [vmem:[%s6352_s1 + $0x8c4] ss:$28 sps:$4 sm:$0xff]  }
  0x30   :  { %2950 = vmatpush1.bf16.msra.mxu1 %v4304_v53  ;;  %v4378_v53 = vld [vmem:[%s6352_s1 + $0x8c0] ss:$28 sps:$4 sm:$0xff]  }
  0x31   :  { %2991 = vmatpush1.bf16.msra.mxu0 %v4305_v55  ;;  %2951 = vmatprep.subr.bf16.mxu1 %v4306_v56  ;;  %v4386_v55 = vld [vmem:[%s6352_s1 + $0x8fc] ss:$28 sps:$4 sm:$0xff]   ;;  %v4389_v56 = vld [vmem:[%s6352_s1 + $0x204] ss:$28 sps:$4 sm:$0xff]  }
  0x32   :  { %2992 = vmatprep.subr.bf16.mxu0 %v4308_v57  ;;  %v4384_v57 = vld [vmem:[%s6352_s1 + $0x8f8] ss:$28 sps:$4 sm:$0xff]  }
  0x34   :  { %2952 = vmatpush1.bf16.msra.mxu1 %v4310_v59  ;;  %v4392_v59 = vld [vmem:[%s6352_s1 + $0x934] ss:$28 sps:$4 sm:$0xff]  }
  0x35   :  { %2993 = vmatpush1.bf16.msra.mxu0 %v4311_v61  ;;  %2953 = vmatprep.subr.bf16.mxu1 %v4312_v62  ;;  %v4395_v61 = vld [vmem:[%s6352_s1 + $0x23c] ss:$28 sps:$4 sm:$0xff]   ;;  %v4390_v62 = vld [vmem:[%s6352_s1 + $0x930] ss:$28 sps:$4 sm:$0xff]  }
  0x36   :  { %2994 = vmatprep.subr.bf16.mxu0 %v4314_v63  ;;  %v4393_v63 = vld [vmem:[%s6352_s1 + $0x238] ss:$28 sps:$4 sm:$0xff]  }
  0x38   :  { %2954 = vmatpush1.bf16.msra.mxu1 %v4316_v1  ;;  %v4398_v1 = vld [vmem:[%s6352_s1 + $0x96c] ss:$28 sps:$4 sm:$0xff]  }
  0x39   :  { %2995 = vmatpush1.bf16.msra.mxu0 %v4317_v2  ;;  %2955 = vmatprep.subr.bf16.mxu1 %v4318_v3  ;;  %v4401_v2 = vld [vmem:[%s6352_s1 + $0x274] ss:$28 sps:$4 sm:$0xff]   ;;  %v4396_v3 = vld [vmem:[%s6352_s1 + $0x968] ss:$28 sps:$4 sm:$0xff]  }
  0x3a   :  { %2996 = vmatprep.subr.bf16.mxu0 %v4320_v4  ;;  %v4399_v4 = vld [vmem:[%s6352_s1 + $0x270] ss:$28 sps:$4 sm:$0xff]  }
  0x3c   :  { %2956 = vmatpush1.bf16.msra.mxu1 %v4322_v6  ;;  %v4407_v6 = vld [vmem:[%s6352_s1 + $0x2ac] ss:$28 sps:$4 sm:$0xff]  }
  0x3d   :  { %2997 = vmatpush1.bf16.msra.mxu0 %v4323_v7  ;;  %2957 = vmatprep.subr.bf16.mxu1 %v4324_v8  ;;  %v4402_v7 = vld [vmem:[%s6352_s1 + $0x9a0] ss:$28 sps:$4 sm:$0xff]   ;;  %v4405_v8 = vld [vmem:[%s6352_s1 + $0x2a8] ss:$28 sps:$4 sm:$0xff]  }
  0x3e   :  { %2998 = vmatprep.subr.bf16.mxu0 %v4326_v9  ;;  %v4410_v9 = vld [vmem:[%s6352_s1 + $0x9dc] ss:$28 sps:$4 sm:$0xff]  }
  0x40   :  { %2958 = vmatpush1.bf16.msra.mxu1 %v4328_v11  ;;  %v4413_v11 = vld [vmem:[%s6352_s1 + $0x2e4] ss:$28 sps:$4 sm:$0xff]  }
  0x41   :  { %2999 = vmatpush1.bf16.msra.mxu0 %v4329_v13  ;;  %3091 = vmatprep.subr.bf16.mxu1 %v4335_v15  ;;  %v4408_v13 = vld [vmem:[%s6352_s1 + $0x9d8] ss:$28 sps:$4 sm:$0xff]  }
  0x42   :  { %3009 = vmatprep.subr.bf16.mxu0 %v4332_v14  ;;  %v4411_v14 = vld [vmem:[%s6352_s1 + $0x2e0] ss:$28 sps:$4 sm:$0xff]   ;;  %v4416_v15 = vld [vmem:[%s6352_s1 + $0xa14] ss:$28 sps:$4 sm:$0xff]  }
  0x43   :  { %2960 = vmatmul.mubr.bf16.vlgmr.msra.gmra.mrb[0].mxu1 %v5107_v12 }
  0x44   :  { %3001 = vmatmul.mubr.bf16.vlgmr.msra.gmra.mrb[0].mxu0 %v5125_v18  ;;  %3092 = vmatpush1.bf16.msra.mxu1 %v4333_v19  ;;  %v4417_v19 = vld [vmem:[%s6352_s1 + $0x318] ss:$28 sps:$4 sm:$0xff]  }
  0x45   :  { %3010 = vmatpush1.bf16.msra.mxu0 %v4330_v17  ;;  %3093 = vmatprep.subr.bf16.mxu1 %v4341_v21  ;;  %v4414_v17 = vld [vmem:[%s6352_s1 + $0xa10] ss:$28 sps:$4 sm:$0xff]  }
  0x46   :  { %3011 = vmatprep.subr.bf16.mxu0 %v4338_v20  ;;  %3041 = vmatprep.mubr.bf16.mxu0 %v5137_v22  ;;  %v4422_v20 = vld [vmem:[%s6352_s1 + $0xa4c] ss:$28 sps:$4 sm:$0xff]   ;;  %v4425_v21 = vld [vmem:[%s6352_s1 + $0x354] ss:$28 sps:$4 sm:$0xff]  }
  0x47   :  { %3123 = vmatprep.mubr.bf16.mxu1 %v5059_v60 }
  0x48   :  { %3094 = vmatpush1.bf16.msra.mxu1 %v4339_v24  ;;  %v4423_v24 = vld [vmem:[%s6352_s1 + $0x350] ss:$28 sps:$4 sm:$0xff]  }
  0x49   :  { %3012 = vmatpush1.bf16.msra.mxu0 %v4336_v23  ;;  %3095 = vmatprep.subr.bf16.mxu1 %v4347_v26  ;;  %v4420_v23 = vld [vmem:[%s6352_s1 + $0xa48] ss:$28 sps:$4 sm:$0xff]  }
  0x4a   :  { %3013 = vmatprep.subr.bf16.mxu0 %v4344_v25  ;;  %v4429_v25 = vld [vmem:[%s6352_s1 + $0xa84] ss:$28 sps:$4 sm:$0xff]   ;;  %v4432_v26 = vld [vmem:[%s6352_s1 + $0x38c] ss:$28 sps:$4 sm:$0xff]  }
  0x4c   :  { %3096 = vmatpush1.bf16.msra.mxu1 %v4345_v28  ;;  %v5328_v28 = vrot.slane %v5101_v10, %v5031_v49  ;;  %v5341_v10 = vcombine.high %v5137_v22, %v5137_v22 }
  0x4d   :  { %3014 = vmatpush1.bf16.msra.mxu0 %v4342_v27  ;;  %3097 = vmatprep.subr.bf16.mxu1 %v4353_v30  ;;  %v4427_v27 = vld [vmem:[%s6352_s1 + $0xa80] ss:$28 sps:$4 sm:$0xff]  }
  0x4e   :  { %3015 = vmatprep.subr.bf16.mxu0 %v4350_v29  ;;  %v4430_v29 = vld [vmem:[%s6352_s1 + $0x388] ss:$28 sps:$4 sm:$0xff]   ;;  %v4435_v30 = vld [vmem:[%s6352_s1 + $0xabc] ss:$28 sps:$4 sm:$0xff]  }
  0x50   :  { %3098 = vmatpush1.bf16.msra.mxu1 %v4351_v32  ;;  %v4433_v32 = vld [vmem:[%s6352_s1 + $0xab8] ss:$28 sps:$4 sm:$0xff]  }
  0x51   :  { %3016 = vmatpush1.bf16.msra.mxu0 %v4348_v31  ;;  %3099 = vmatprep.subr.bf16.mxu1 %v4359_v34  ;;  %v4438_v31 = vld [vmem:[%s6352_s1 + $0x3c4] ss:$28 sps:$4 sm:$0xff]   ;;  %v4441_v34 = vld [vmem:[%s6352_s1 + $0xaf4] ss:$28 sps:$4 sm:$0xff]  }
  0x52   :  { %3017 = vmatprep.subr.bf16.mxu0 %v4356_v33  ;;  %v4436_v33 = vld [vmem:[%s6352_s1 + $0x3c0] ss:$28 sps:$4 sm:$0xff]  }
  0x54   :  { %3100 = vmatpush1.bf16.msra.mxu1 %v4357_v36  ;;  %v4439_v36 = vld [vmem:[%s6352_s1 + $0xaf0] ss:$28 sps:$4 sm:$0xff]  }
  0x55   :  { %3018 = vmatpush1.bf16.msra.mxu0 %v4354_v35  ;;  %3101 = vmatprep.subr.bf16.mxu1 %v4365_v38  ;;  %v4444_v35 = vld [vmem:[%s6352_s1 + $0x3fc] ss:$28 sps:$4 sm:$0xff]   ;;  %v4447_v38 = vld [vmem:[%s6352_s1 + $0xb2c] ss:$28 sps:$4 sm:$0xff]  }
  0x56   :  { %3019 = vmatprep.subr.bf16.mxu0 %v4362_v37  ;;  %v4442_v37 = vld [vmem:[%s6352_s1 + $0x3f8] ss:$28 sps:$4 sm:$0xff]  }
  0x58   :  { %3102 = vmatpush1.bf16.msra.mxu1 %v4363_v40  ;;  %v4445_v40 = vld [vmem:[%s6352_s1 + $0xb28] ss:$28 sps:$4 sm:$0xff]  }
  0x59   :  { %3020 = vmatpush1.bf16.msra.mxu0 %v4360_v39  ;;  %3103 = vmatprep.subr.bf16.mxu1 %v4371_v43  ;;  %v4450_v39 = vld [vmem:[%s6352_s1 + $0x434] ss:$28 sps:$4 sm:$0xff]   ;;  %v4453_v43 = vld [vmem:[%s6352_s1 + $0xb64] ss:$28 sps:$4 sm:$0xff]  }
  0x5a   :  { %3021 = vmatprep.subr.bf16.mxu0 %v4368_v41  ;;  %v4448_v41 = vld [vmem:[%s6352_s1 + $0x430] ss:$28 sps:$4 sm:$0xff]  }
  0x5c   :  { %3104 = vmatpush1.bf16.msra.mxu1 %v4369_v45  ;;  %v4451_v45 = vld [vmem:[%s6352_s1 + $0xb60] ss:$28 sps:$4 sm:$0xff]  }
  0x5d   :  { %3022 = vmatpush1.bf16.msra.mxu0 %v4366_v44  ;;  %3105 = vmatprep.subr.bf16.mxu1 %v4377_v47  ;;  %v4456_v44 = vld [vmem:[%s6352_s1 + $0x46c] ss:$28 sps:$4 sm:$0xff]   ;;  %v4459_v47 = vld [vmem:[%s6352_s1 + $0xb9c] ss:$28 sps:$4 sm:$0xff]  }
  0x5e   :  { %3023 = vmatprep.subr.bf16.mxu0 %v4374_v46  ;;  %v4454_v46 = vld [vmem:[%s6352_s1 + $0x468] ss:$28 sps:$4 sm:$0xff]  }
  0x60   :  { %3106 = vmatpush1.bf16.msra.mxu1 %v4375_v50  ;;  %v4457_v50 = vld [vmem:[%s6352_s1 + $0xb98] ss:$28 sps:$4 sm:$0xff]  }
  0x61   :  { %3024 = vmatpush1.bf16.msra.mxu0 %v4372_v48  ;;  %3107 = vmatprep.subr.bf16.mxu1 %v4383_v52  ;;  %v4462_v48 = vld [vmem:[%s6352_s1 + $0x4a4] ss:$28 sps:$4 sm:$0xff]   ;;  %v4465_v52 = vld [vmem:[%s6352_s1 + $0xbd4] ss:$28 sps:$4 sm:$0xff]  }
  0x62   :  { %3025 = vmatprep.subr.bf16.mxu0 %v4380_v51  ;;  %v4460_v51 = vld [vmem:[%s6352_s1 + $0x4a0] ss:$28 sps:$4 sm:$0xff]  }
  0x64   :  { %3108 = vmatpush1.bf16.msra.mxu1 %v4381_v54  ;;  %v4463_v54 = vld [vmem:[%s6352_s1 + $0xbd0] ss:$28 sps:$4 sm:$0xff]  }
  0x65   :  { %3026 = vmatpush1.bf16.msra.mxu0 %v4378_v53  ;;  %3109 = vmatprep.subr.bf16.mxu1 %v4389_v56  ;;  %v4468_v53 = vld [vmem:[%s6352_s1 + $0x4dc] ss:$28 sps:$4 sm:$0xff]   ;;  %v4471_v56 = vld [vmem:[%s6352_s1 + $0xc0c] ss:$28 sps:$4 sm:$0xff]  }
  0x66   :  { %3027 = vmatprep.subr.bf16.mxu0 %v4386_v55  ;;  %v4466_v55 = vld [vmem:[%s6352_s1 + $0x4d8] ss:$28 sps:$4 sm:$0xff]  }
  0x68   :  { %3110 = vmatpush1.bf16.msra.mxu1 %v4387_v58  ;;  %v4469_v58 = vld [vmem:[%s6352_s1 + $0xc08] ss:$28 sps:$4 sm:$0xff]  }
  0x69   :  { %3028 = vmatpush1.bf16.msra.mxu0 %v4384_v57  ;;  %3111 = vmatprep.subr.bf16.mxu1 %v4395_v61  ;;  %v4474_v57 = vld [vmem:[%s6352_s1 + $0x514] ss:$28 sps:$4 sm:$0xff]   ;;  %v4477_v61 = vld [vmem:[%s6352_s1 + $0xc44] ss:$28 sps:$4 sm:$0xff]  }
  0x6a   :  { %3029 = vmatprep.subr.bf16.mxu0 %v4392_v59  ;;  %v4472_v59 = vld [vmem:[%s6352_s1 + $0x510] ss:$28 sps:$4 sm:$0xff]  }
  0x6c   :  { %3112 = vmatpush1.bf16.msra.mxu1 %v4393_v63  ;;  %v4475_v63 = vld [vmem:[%s6352_s1 + $0xc40] ss:$28 sps:$4 sm:$0xff]  }
  0x6d   :  { %3030 = vmatpush1.bf16.msra.mxu0 %v4390_v62  ;;  %3113 = vmatprep.subr.bf16.mxu1 %v4401_v2  ;;  %v4480_v62 = vld [vmem:[%s6352_s1 + $0x54c] ss:$28 sps:$4 sm:$0xff]   ;;  %v4483_v2 = vld [vmem:[%s6352_s1 + $0xc7c] ss:$28 sps:$4 sm:$0xff]  }
  0x6e   :  { %3031 = vmatprep.subr.bf16.mxu0 %v4398_v1  ;;  %v4478_v1 = vld [vmem:[%s6352_s1 + $0x548] ss:$28 sps:$4 sm:$0xff]  }
  0x70   :  { %3114 = vmatpush1.bf16.msra.mxu1 %v4399_v4  ;;  %v4481_v4 = vld [vmem:[%s6352_s1 + $0xc78] ss:$28 sps:$4 sm:$0xff]  }
  0x71   :  { %3032 = vmatpush1.bf16.msra.mxu0 %v4396_v3  ;;  %3115 = vmatprep.subr.bf16.mxu1 %v4407_v6  ;;  %v4486_v3 = vld [vmem:[%s6352_s1 + $0x584] ss:$28 sps:$4 sm:$0xff]   ;;  %v4489_v6 = vld [vmem:[%s6352_s1 + $0xcb4] ss:$28 sps:$4 sm:$0xff]  }
  0x72   :  { %3033 = vmatprep.subr.bf16.mxu0 %v4404_v5  ;;  %v4484_v5 = vld [vmem:[%s6352_s1 + $0x580] ss:$28 sps:$4 sm:$0xff]  }
  0x74   :  { %3116 = vmatpush1.bf16.msra.mxu1 %v4405_v8  ;;  %v4487_v8 = vld [vmem:[%s6352_s1 + $0xcb0] ss:$28 sps:$4 sm:$0xff]  }
  0x75   :  { %3034 = vmatpush1.bf16.msra.mxu0 %v4402_v7  ;;  %3117 = vmatprep.subr.bf16.mxu1 %v4413_v11  ;;  %v4492_v7 = vld [vmem:[%s6352_s1 + $0x5bc] ss:$28 sps:$4 sm:$0xff]   ;;  %v4495_v11 = vld [vmem:[%s6352_s1 + $0xcec] ss:$28 sps:$4 sm:$0xff]  }
  0x76   :  { %3035 = vmatprep.subr.bf16.mxu0 %v4410_v9  ;;  %v4490_v9 = vld [vmem:[%s6352_s1 + $0x5b8] ss:$28 sps:$4 sm:$0xff]  }
  0x78   :  { %3118 = vmatpush1.bf16.msra.mxu1 %v4411_v14  ;;  %v4493_v14 = vld [vmem:[%s6352_s1 + $0xce8] ss:$28 sps:$4 sm:$0xff]  }
  0x79   :  { %3036 = vmatpush1.bf16.msra.mxu0 %v4408_v13  ;;  %3119 = vmatprep.subr.bf16.mxu1 %v4419_v16  ;;  %v4498_v13 = vld [vmem:[%s6352_s1 + $0x5f4] ss:$28 sps:$4 sm:$0xff]   ;;  %v4501_v16 = vld [vmem:[%s6352_s1 + $0xd24] ss:$28 sps:$4 sm:$0xff]  }
  0x7a   :  { %3037 = vmatprep.subr.bf16.mxu0 %v4416_v15  ;;  %v4496_v15 = vld [vmem:[%s6352_s1 + $0x5f0] ss:$28 sps:$4 sm:$0xff]  }
  0x7c   :  { %3120 = vmatpush1.bf16.msra.mxu1 %v4417_v19  ;;  %v4499_v19 = vld [vmem:[%s6352_s1 + $0xd20] ss:$28 sps:$4 sm:$0xff]  }
  0x7d   :  { %3038 = vmatpush1.bf16.msra.mxu0 %v4414_v17  ;;  %3121 = vmatprep.subr.bf16.mxu1 %v4425_v21  ;;  %v4504_v17 = vld [vmem:[%s6352_s1 + $0x62c] ss:$28 sps:$4 sm:$0xff]   ;;  %v4507_v21 = vld [vmem:[%s6352_s1 + $0xd5c] ss:$28 sps:$4 sm:$0xff]  }
  0x7e   :  { %3039 = vmatprep.subr.bf16.mxu0 %v4422_v20  ;;  %v4502_v20 = vld [vmem:[%s6352_s1 + $0x628] ss:$28 sps:$4 sm:$0xff]  }
  0x80   :  { %3122 = vmatpush1.bf16.msra.mxu1 %v4423_v24  ;;  %v4505_v24 = vld [vmem:[%s6352_s1 + $0xd58] ss:$28 sps:$4 sm:$0xff]  }
  0x81   :  { %3040 = vmatpush1.bf16.msra.mxu0 %v4420_v23  ;;  %3132 = vmatprep.subr.bf16.mxu1 %v4432_v26  ;;  %v4510_v23 = vld [vmem:[%s6352_s1 + $0x664] ss:$28 sps:$4 sm:$0xff]   ;;  %v4513_v26 = vld [vmem:[%s6352_s1 + $0xd94] ss:$28 sps:$4 sm:$0xff]  }
  0x82   :  { %3050 = vmatprep.subr.bf16.mxu0 %v4429_v25  ;;  %v4508_v25 = vld [vmem:[%s6352_s1 + $0x660] ss:$28 sps:$4 sm:$0xff]  }
  0x83   :  { %3124 = vmatmul.mubr.bf16.vlgmr.msra.gmra.mrb[4].mxu1 %v5107_v12 }
  0x84   :  { %3042 = vmatmul.mubr.bf16.vlgmr.msra.gmra.mrb[0].mxu0 %v5328_v28  ;;  %3133 = vmatpush1.bf16.msra.mxu1 %v4430_v29  ;;  %v4511_v29 = vld [vmem:[%s6352_s1 + $0xd90] ss:$28 sps:$4 sm:$0xff]  }
  0x85   :  { %3051 = vmatpush1.bf16.msra.mxu0 %v4427_v27  ;;  %3134 = vmatprep.subr.bf16.mxu1 %v4438_v31  ;;  %v4516_v27 = vld [vmem:[%s6352_s1 + $0x69c] ss:$28 sps:$4 sm:$0xff]   ;;  %v4519_v31 = vld [vmem:[%s6352_s1 + $0xdcc] ss:$28 sps:$4 sm:$0xff]  }
  0x86   :  { %3052 = vmatprep.subr.bf16.mxu0 %v4435_v30  ;;  %3082 = vmatprep.mubr.bf16.mxu0 %v5341_v10  ;;  %v4514_v30 = vld [vmem:[%s6352_s1 + $0x698] ss:$28 sps:$4 sm:$0xff]  }
  0x87   :  { %3164 = vmatprep.mubr.bf16.mxu1 %v5072_v0 }
  0x88   :  { %3135 = vmatpush1.bf16.msra.mxu1 %v4436_v33  ;;  %v4517_v33 = vld [vmem:[%s6352_s1 + $0xdc8] ss:$28 sps:$4 sm:$0xff]  }
  0x89   :  { %3053 = vmatpush1.bf16.msra.mxu0 %v4433_v32  ;;  %3136 = vmatprep.subr.bf16.mxu1 %v4444_v35  ;;  %v4522_v32 = vld [vmem:[%s6352_s1 + $0x6d4] ss:$28 sps:$4 sm:$0xff]   ;;  %v4525_v35 = vld [vmem:[%s6352_s1 + $0x70c] ss:$28 sps:$4 sm:$0xff]  }
  0x8a   :  { %3054 = vmatprep.subr.bf16.mxu0 %v4441_v34  ;;  %v4520_v34 = vld [vmem:[%s6352_s1 + $0x6d0] ss:$28 sps:$4 sm:$0xff]  }
  0x8c   :  { %3137 = vmatpush1.bf16.msra.mxu1 %v4442_v37  ;;  %v5529_v37 = vcombine.high %v5328_v28, %v5328_v28 }
  0x8d   :  { %3055 = vmatpush1.bf16.msra.mxu0 %v4439_v36  ;;  %3138 = vmatprep.subr.bf16.mxu1 %v4450_v39  ;;  %v4528_v36 = vld [vmem:[%s6352_s1 + $0x14] ss:$28 sps:$4 sm:$0xff]  }
  0x8e   :  { %3056 = vmatprep.subr.bf16.mxu0 %v4447_v38  ;;  %v4523_v38 = vld [vmem:[%s6352_s1 + $0x708] ss:$28 sps:$4 sm:$0xff]   ;;  %v4526_v39 = vld [vmem:[%s6352_s1 + $0x10] ss:$28 sps:$4 sm:$0xff]  }
  0x90   :  { %3139 = vmatpush1.bf16.msra.mxu1 %v4448_v41  ;;  %v4534_v41 = vld [vmem:[%s6352_s1 + $0x4c] ss:$28 sps:$4 sm:$0xff]  }
  0x91   :  { %3057 = vmatpush1.bf16.msra.mxu0 %v4445_v40  ;;  %3140 = vmatprep.subr.bf16.mxu1 %v4456_v44  ;;  %v4531_v40 = vld [vmem:[%s6352_s1 + $0x744] ss:$28 sps:$4 sm:$0xff]  }
  0x92   :  { %3058 = vmatprep.subr.bf16.mxu0 %v4453_v43  ;;  %v4529_v43 = vld [vmem:[%s6352_s1 + $0x740] ss:$28 sps:$4 sm:$0xff]   ;;  %v4532_v44 = vld [vmem:[%s6352_s1 + $0x48] ss:$28 sps:$4 sm:$0xff]  }
  0x94   :  { %3141 = vmatpush1.bf16.msra.mxu1 %v4454_v46  ;;  %v4540_v46 = vld [vmem:[%s6352_s1 + $0x84] ss:$28 sps:$4 sm:$0xff]  }
  0x95   :  { %3059 = vmatpush1.bf16.msra.mxu0 %v4451_v45  ;;  %3142 = vmatprep.subr.bf16.mxu1 %v4462_v48  ;;  %v4537_v45 = vld [vmem:[%s6352_s1 + $0x77c] ss:$28 sps:$4 sm:$0xff]  }
  0x96   :  { %3060 = vmatprep.subr.bf16.mxu0 %v4459_v47  ;;  %v4535_v47 = vld [vmem:[%s6352_s1 + $0x778] ss:$28 sps:$4 sm:$0xff]   ;;  %v4538_v48 = vld [vmem:[%s6352_s1 + $0x80] ss:$28 sps:$4 sm:$0xff]  }
  0x98   :  { %3143 = vmatpush1.bf16.msra.mxu1 %v4460_v51  ;;  %v4546_v51 = vld [vmem:[%s6352_s1 + $0xbc] ss:$28 sps:$4 sm:$0xff]  }
  0x99   :  { %3061 = vmatpush1.bf16.msra.mxu0 %v4457_v50  ;;  %3144 = vmatprep.subr.bf16.mxu1 %v4468_v53  ;;  %v4543_v50 = vld [vmem:[%s6352_s1 + $0x7b4] ss:$28 sps:$4 sm:$0xff]  }
  0x9a   :  { %3062 = vmatprep.subr.bf16.mxu0 %v4465_v52  ;;  %v4541_v52 = vld [vmem:[%s6352_s1 + $0x7b0] ss:$28 sps:$4 sm:$0xff]   ;;  %v4544_v53 = vld [vmem:[%s6352_s1 + $0xb8] ss:$28 sps:$4 sm:$0xff]  }
  0x9c   :  { %3145 = vmatpush1.bf16.msra.mxu1 %v4466_v55  ;;  %v4552_v55 = vld [vmem:[%s6352_s1 + $0xf4] ss:$28 sps:$4 sm:$0xff]  }
  0x9d   :  { %3063 = vmatpush1.bf16.msra.mxu0 %v4463_v54  ;;  %3146 = vmatprep.subr.bf16.mxu1 %v4474_v57  ;;  %v4549_v54 = vld [vmem:[%s6352_s1 + $0x7ec] ss:$28 sps:$4 sm:$0xff]  }
  0x9e   :  { %3064 = vmatprep.subr.bf16.mxu0 %v4471_v56  ;;  %v4547_v56 = vld [vmem:[%s6352_s1 + $0x7e8] ss:$28 sps:$4 sm:$0xff]   ;;  %v4550_v57 = vld [vmem:[%s6352_s1 + $0xf0] ss:$28 sps:$4 sm:$0xff]  }
  0xa0   :  { %3147 = vmatpush1.bf16.msra.mxu1 %v4472_v59  ;;  %v4558_v59 = vld [vmem:[%s6352_s1 + $0x12c] ss:$28 sps:$4 sm:$0xff]  }
  0xa1   :  { %3065 = vmatpush1.bf16.msra.mxu0 %v4469_v58  ;;  %3148 = vmatprep.subr.bf16.mxu1 %v4480_v62  ;;  %v4555_v58 = vld [vmem:[%s6352_s1 + $0x824] ss:$28 sps:$4 sm:$0xff]  }
  0xa2   :  { %3066 = vmatprep.subr.bf16.mxu0 %v4477_v61  ;;  %v4553_v61 = vld [vmem:[%s6352_s1 + $0x820] ss:$28 sps:$4 sm:$0xff]   ;;  %v4556_v62 = vld [vmem:[%s6352_s1 + $0x128] ss:$28 sps:$4 sm:$0xff]  }
  0xa4   :  { %3149 = vmatpush1.bf16.msra.mxu1 %v4478_v1  ;;  %v4564_v1 = vld [vmem:[%s6352_s1 + $0x164] ss:$28 sps:$4 sm:$0xff]  }
  0xa5   :  { %3067 = vmatpush1.bf16.msra.mxu0 %v4475_v63  ;;  %3150 = vmatprep.subr.bf16.mxu1 %v4486_v3  ;;  %v4561_v63 = vld [vmem:[%s6352_s1 + $0x85c] ss:$28 sps:$4 sm:$0xff]  }
  0xa6   :  { %3068 = vmatprep.subr.bf16.mxu0 %v4483_v2  ;;  %v4559_v2 = vld [vmem:[%s6352_s1 + $0x858] ss:$28 sps:$4 sm:$0xff]   ;;  %v4562_v3 = vld [vmem:[%s6352_s1 + $0x160] ss:$28 sps:$4 sm:$0xff]  }
  0xa8   :  { %3151 = vmatpush1.bf16.msra.mxu1 %v4484_v5  ;;  %v4570_v5 = vld [vmem:[%s6352_s1 + $0x19c] ss:$28 sps:$4 sm:$0xff]  }
  0xa9   :  { %3069 = vmatpush1.bf16.msra.mxu0 %v4481_v4  ;;  %3152 = vmatprep.subr.bf16.mxu1 %v4492_v7  ;;  %v4567_v4 = vld [vmem:[%s6352_s1 + $0x894] ss:$28 sps:$4 sm:$0xff]  }
  0xaa   :  { %3070 = vmatprep.subr.bf16.mxu0 %v4489_v6  ;;  %v4565_v6 = vld [vmem:[%s6352_s1 + $0x890] ss:$28 sps:$4 sm:$0xff]   ;;  %v4568_v7 = vld [vmem:[%s6352_s1 + $0x198] ss:$28 sps:$4 sm:$0xff]  }
  0xac   :  { %3153 = vmatpush1.bf16.msra.mxu1 %v4490_v9  ;;  %v4576_v9 = vld [vmem:[%s6352_s1 + $0x1d4] ss:$28 sps:$4 sm:$0xff]  }
  0xad   :  { %3071 = vmatpush1.bf16.msra.mxu0 %v4487_v8  ;;  %3154 = vmatprep.subr.bf16.mxu1 %v4498_v13  ;;  %v4573_v8 = vld [vmem:[%s6352_s1 + $0x8cc] ss:$28 sps:$4 sm:$0xff]  }
  0xae   :  { %3072 = vmatprep.subr.bf16.mxu0 %v4495_v11  ;;  %v4571_v11 = vld [vmem:[%s6352_s1 + $0x8c8] ss:$28 sps:$4 sm:$0xff]   ;;  %v4574_v13 = vld [vmem:[%s6352_s1 + $0x1d0] ss:$28 sps:$4 sm:$0xff]  }
  0xb0   :  { %3155 = vmatpush1.bf16.msra.mxu1 %v4496_v15  ;;  %v4582_v15 = vld [vmem:[%s6352_s1 + $0x20c] ss:$28 sps:$4 sm:$0xff]  }
  0xb1   :  { %3073 = vmatpush1.bf16.msra.mxu0 %v4493_v14  ;;  %3156 = vmatprep.subr.bf16.mxu1 %v4504_v17  ;;  %v4579_v14 = vld [vmem:[%s6352_s1 + $0x904] ss:$28 sps:$4 sm:$0xff]  }
  0xb2   :  { %3074 = vmatprep.subr.bf16.mxu0 %v4501_v16  ;;  %v4577_v16 = vld [vmem:[%s6352_s1 + $0x900] ss:$28 sps:$4 sm:$0xff]   ;;  %v4580_v17 = vld [vmem:[%s6352_s1 + $0x208] ss:$28 sps:$4 sm:$0xff]  }
  0xb4   :  { %3157 = vmatpush1.bf16.msra.mxu1 %v4502_v20  ;;  %v4588_v20 = vld [vmem:[%s6352_s1 + $0x244] ss:$28 sps:$4 sm:$0xff]  }
  0xb5   :  { %3075 = vmatpush1.bf16.msra.mxu0 %v4499_v19  ;;  %3158 = vmatprep.subr.bf16.mxu1 %v4510_v23  ;;  %v4585_v19 = vld [vmem:[%s6352_s1 + $0x93c] ss:$28 sps:$4 sm:$0xff]  }
  0xb6   :  { %3076 = vmatprep.subr.bf16.mxu0 %v4507_v21  ;;  %v4583_v21 = vld [vmem:[%s6352_s1 + $0x938] ss:$28 sps:$4 sm:$0xff]   ;;  %v4586_v23 = vld [vmem:[%s6352_s1 + $0x240] ss:$28 sps:$4 sm:$0xff]  }
  0xb8   :  { %3159 = vmatpush1.bf16.msra.mxu1 %v4508_v25  ;;  %v4594_v25 = vld [vmem:[%s6352_s1 + $0x27c] ss:$28 sps:$4 sm:$0xff]  }
  0xb9   :  { %3077 = vmatpush1.bf16.msra.mxu0 %v4505_v24  ;;  %3160 = vmatprep.subr.bf16.mxu1 %v4516_v27  ;;  %v4591_v24 = vld [vmem:[%s6352_s1 + $0x974] ss:$28 sps:$4 sm:$0xff]  }
  0xba   :  { %3078 = vmatprep.subr.bf16.mxu0 %v4513_v26  ;;  %v4589_v26 = vld [vmem:[%s6352_s1 + $0x970] ss:$28 sps:$4 sm:$0xff]   ;;  %v4592_v27 = vld [vmem:[%s6352_s1 + $0x278] ss:$28 sps:$4 sm:$0xff]  }
  0xbc   :  { %3161 = vmatpush1.bf16.msra.mxu1 %v4514_v30  ;;  %v4600_v30 = vld [vmem:[%s6352_s1 + $0x2b4] ss:$28 sps:$4 sm:$0xff]  }
  0xbd   :  { %3079 = vmatpush1.bf16.msra.mxu0 %v4511_v29  ;;  %3162 = vmatprep.subr.bf16.mxu1 %v4522_v32  ;;  %v4597_v29 = vld [vmem:[%s6352_s1 + $0x9ac] ss:$28 sps:$4 sm:$0xff]  }
  0xbe   :  { %3080 = vmatprep.subr.bf16.mxu0 %v4519_v31  ;;  %v4595_v31 = vld [vmem:[%s6352_s1 + $0x9a8] ss:$28 sps:$4 sm:$0xff]   ;;  %v4598_v32 = vld [vmem:[%s6352_s1 + $0x2b0] ss:$28 sps:$4 sm:$0xff]  }
  0xc0   :  { %3163 = vmatpush1.bf16.msra.mxu1 %v4520_v34  ;;  %v4606_v34 = vld [vmem:[%s6352_s1 + $0x2ec] ss:$28 sps:$4 sm:$0xff]  }
  0xc1   :  { %3081 = vmatpush1.bf16.msra.mxu0 %v4517_v33  ;;  %3173 = vmatprep.subr.bf16.mxu1 %v4525_v35  ;;  %v4603_v33 = vld [vmem:[%s6352_s1 + $0x9e4] ss:$28 sps:$4 sm:$0xff]  }
  0xc2   :  { %3255 = vmatprep.subr.bf16.mxu0 %v4528_v36  ;;  %v4601_v35 = vld [vmem:[%s6352_s1 + $0x9e0] ss:$28 sps:$4 sm:$0xff]   ;;  %v4604_v36 = vld [vmem:[%s6352_s1 + $0x2e8] ss:$28 sps:$4 sm:$0xff]  }
  0xc3   :  { %3165 = vmatmul.mubr.bf16.vlgmr.msra.gmra.mrb[4].mxu1 %v5125_v18 }
  0xc4   :  { %3083 = vmatmul.mubr.bf16.vlgmr.msra.gmra.mrb[0].mxu0 %v5529_v37  ;;  %3174 = vmatpush1.bf16.msra.mxu1 %v4523_v38  ;;  %v4609_v38 = vld [vmem:[%s6352_s1 + $0xa1c] ss:$28 sps:$4 sm:$0xff]  }
  0xc5   :  { %3256 = vmatpush1.bf16.msra.mxu0 %v4526_v39  ;;  %3175 = vmatprep.subr.bf16.mxu1 %v4531_v40  ;;  %v4612_v39 = vld [vmem:[%s6352_s1 + $0x324] ss:$28 sps:$4 sm:$0xff]   ;;  %v4607_v40 = vld [vmem:[%s6352_s1 + $0xa18] ss:$28 sps:$4 sm:$0xff]  }
  0xc6   :  { %3257 = vmatprep.subr.bf16.mxu0 %v4534_v41  ;;  %3205 = vmatprep.mubr.bf16.mxu1 %v5137_v22  ;;  %v4610_v41 = vld [vmem:[%s6352_s1 + $0x320] ss:$28 sps:$4 sm:$0xff]  }
  0xc7   :  { %3287 = vmatprep.mubr.bf16.mxu0 %v5059_v60 }
  0xc8   :  { %3176 = vmatpush1.bf16.msra.mxu1 %v4529_v43  ;;  %v4615_v43 = vld [vmem:[%s6352_s1 + $0xa54] ss:$28 sps:$4 sm:$0xff]  }
  0xc9   :  { %3258 = vmatpush1.bf16.msra.mxu0 %v4532_v44  ;;  %3177 = vmatprep.subr.bf16.mxu1 %v4537_v45  ;;  %v4618_v44 = vld [vmem:[%s6352_s1 + $0x35c] ss:$28 sps:$4 sm:$0xff]   ;;  %v4613_v45 = vld [vmem:[%s6352_s1 + $0xa50] ss:$28 sps:$4 sm:$0xff]  }
  0xca   :  { %3259 = vmatprep.subr.bf16.mxu0 %v4540_v46  ;;  %v4616_v46 = vld [vmem:[%s6352_s1 + $0x358] ss:$28 sps:$4 sm:$0xff]  }
  0xcc   :  { %3178 = vmatpush1.bf16.msra.mxu1 %v4535_v47  ;;  %v4621_v47 = vld [vmem:[%s6352_s1 + $0xa8c] ss:$28 sps:$4 sm:$0xff]  }
  0xcd   :  { %3260 = vmatpush1.bf16.msra.mxu0 %v4538_v48  ;;  %3179 = vmatprep.subr.bf16.mxu1 %v4543_v50  ;;  %v4624_v48 = vld [vmem:[%s6352_s1 + $0x394] ss:$28 sps:$4 sm:$0xff]   ;;  %v4619_v50 = vld [vmem:[%s6352_s1 + $0xa88] ss:$28 sps:$4 sm:$0xff]  }
  0xce   :  { %3261 = vmatprep.subr.bf16.mxu0 %v4546_v51  ;;  %v4622_v51 = vld [vmem:[%s6352_s1 + $0x390] ss:$28 sps:$4 sm:$0xff]  }
  0xd0   :  { %3180 = vmatpush1.bf16.msra.mxu1 %v4541_v52  ;;  %v4627_v52 = vld [vmem:[%s6352_s1 + $0xac4] ss:$28 sps:$4 sm:$0xff]  }
  0xd1   :  { %3262 = vmatpush1.bf16.msra.mxu0 %v4544_v53  ;;  %3181 = vmatprep.subr.bf16.mxu1 %v4549_v54  ;;  %v4630_v53 = vld [vmem:[%s6352_s1 + $0x3cc] ss:$28 sps:$4 sm:$0xff]   ;;  %v4625_v54 = vld [vmem:[%s6352_s1 + $0xac0] ss:$28 sps:$4 sm:$0xff]  }
  0xd2   :  { %3263 = vmatprep.subr.bf16.mxu0 %v4552_v55  ;;  %v4628_v55 = vld [vmem:[%s6352_s1 + $0x3c8] ss:$28 sps:$4 sm:$0xff]  }
  0xd4   :  { %3182 = vmatpush1.bf16.msra.mxu1 %v4547_v56  ;;  %v4633_v56 = vld [vmem:[%s6352_s1 + $0xafc] ss:$28 sps:$4 sm:$0xff]  }
  0xd5   :  { %3264 = vmatpush1.bf16.msra.mxu0 %v4550_v57  ;;  %3183 = vmatprep.subr.bf16.mxu1 %v4555_v58  ;;  %v4636_v57 = vld [vmem:[%s6352_s1 + $0x404] ss:$28 sps:$4 sm:$0xff]   ;;  %v4631_v58 = vld [vmem:[%s6352_s1 + $0xaf8] ss:$28 sps:$4 sm:$0xff]  }
  0xd6   :  { %3265 = vmatprep.subr.bf16.mxu0 %v4558_v59  ;;  %v4634_v59 = vld [vmem:[%s6352_s1 + $0x400] ss:$28 sps:$4 sm:$0xff]  }
  0xd8   :  { %3184 = vmatpush1.bf16.msra.mxu1 %v4553_v61  ;;  %v4639_v61 = vld [vmem:[%s6352_s1 + $0xb34] ss:$28 sps:$4 sm:$0xff]  }
  0xd9   :  { %3266 = vmatpush1.bf16.msra.mxu0 %v4556_v62  ;;  %3185 = vmatprep.subr.bf16.mxu1 %v4561_v63  ;;  %v4642_v62 = vld [vmem:[%s6352_s1 + $0x43c] ss:$28 sps:$4 sm:$0xff]   ;;  %v4637_v63 = vld [vmem:[%s6352_s1 + $0xb30] ss:$28 sps:$4 sm:$0xff]  }
  0xda   :  { %3267 = vmatprep.subr.bf16.mxu0 %v4564_v1  ;;  %v4640_v1 = vld [vmem:[%s6352_s1 + $0x438] ss:$28 sps:$4 sm:$0xff]  }
  0xdc   :  { %3186 = vmatpush1.bf16.msra.mxu1 %v4559_v2  ;;  %v4645_v2 = vld [vmem:[%s6352_s1 + $0xb6c] ss:$28 sps:$4 sm:$0xff]  }
  0xdd   :  { %3268 = vmatpush1.bf16.msra.mxu0 %v4562_v3  ;;  %3187 = vmatprep.subr.bf16.mxu1 %v4567_v4  ;;  %v4648_v3 = vld [vmem:[%s6352_s1 + $0x474] ss:$28 sps:$4 sm:$0xff]   ;;  %v4643_v4 = vld [vmem:[%s6352_s1 + $0xb68] ss:$28 sps:$4 sm:$0xff]  }
  0xde   :  { %3269 = vmatprep.subr.bf16.mxu0 %v4570_v5  ;;  %v4646_v5 = vld [vmem:[%s6352_s1 + $0x470] ss:$28 sps:$4 sm:$0xff]  }
  0xe0   :  { %3188 = vmatpush1.bf16.msra.mxu1 %v4565_v6  ;;  %v4651_v6 = vld [vmem:[%s6352_s1 + $0xba4] ss:$28 sps:$4 sm:$0xff]  }
  0xe1   :  { %3270 = vmatpush1.bf16.msra.mxu0 %v4568_v7  ;;  %3189 = vmatprep.subr.bf16.mxu1 %v4573_v8  ;;  %v4654_v7 = vld [vmem:[%s6352_s1 + $0x4ac] ss:$28 sps:$4 sm:$0xff]   ;;  %v4649_v8 = vld [vmem:[%s6352_s1 + $0xba0] ss:$28 sps:$4 sm:$0xff]  }
  0xe2   :  { %3271 = vmatprep.subr.bf16.mxu0 %v4576_v9  ;;  %v4652_v9 = vld [vmem:[%s6352_s1 + $0x4a8] ss:$28 sps:$4 sm:$0xff]  }
  0xe4   :  { %3190 = vmatpush1.bf16.msra.mxu1 %v4571_v11  ;;  %v4657_v11 = vld [vmem:[%s6352_s1 + $0xbdc] ss:$28 sps:$4 sm:$0xff]  }
  0xe5   :  { %3272 = vmatpush1.bf16.msra.mxu0 %v4574_v13  ;;  %3191 = vmatprep.subr.bf16.mxu1 %v4579_v14  ;;  %v4660_v13 = vld [vmem:[%s6352_s1 + $0x4e4] ss:$28 sps:$4 sm:$0xff]  }
  0xe6   :  { %3273 = vmatprep.subr.bf16.mxu0 %v4582_v15  ;;  %v4655_v15 = vld [vmem:[%s6352_s1 + $0xbd8] ss:$28 sps:$4 sm:$0xff]  }
  0xe8   :  { %3192 = vmatpush1.bf16.msra.mxu1 %v4577_v16  ;;  %v4658_v16 = vld [vmem:[%s6352_s1 + $0x4e0] ss:$28 sps:$4 sm:$0xff]  }
  0xe9   :  { %3274 = vmatpush1.bf16.msra.mxu0 %v4580_v17  ;;  %3193 = vmatprep.subr.bf16.mxu1 %v4585_v19 }
  0xea   :  { %3275 = vmatprep.subr.bf16.mxu0 %v4588_v20  ;;  %v4663_v20 = vld [vmem:[%s6352_s1 + $0xc14] ss:$28 sps:$4 sm:$0xff]  }
  0xec   :  { %3194 = vmatpush1.bf16.msra.mxu1 %v4583_v21 }
  0xed   :  { %3276 = vmatpush1.bf16.msra.mxu0 %v4586_v23  ;;  %3195 = vmatprep.subr.bf16.mxu1 %v4591_v24  ;;  %v4666_v23 = vld [vmem:[%s6352_s1 + $0x51c] ss:$28 sps:$4 sm:$0xff]   ;;  %v4661_v24 = vld [vmem:[%s6352_s1 + $0xc10] ss:$28 sps:$4 sm:$0xff]  }
  0xee   :  { %3277 = vmatprep.subr.bf16.mxu0 %v4594_v25  ;;  %v4664_v25 = vld [vmem:[%s6352_s1 + $0x518] ss:$28 sps:$4 sm:$0xff]  }
  0xf0   :  { %3196 = vmatpush1.bf16.msra.mxu1 %v4589_v26  ;;  %v4669_v26 = vld [vmem:[%s6352_s1 + $0xc4c] ss:$28 sps:$4 sm:$0xff]  }
  0xf1   :  { %3278 = vmatpush1.bf16.msra.mxu0 %v4592_v27  ;;  %3197 = vmatprep.subr.bf16.mxu1 %v4597_v29  ;;  %v4672_v27 = vld [vmem:[%s6352_s1 + $0x554] ss:$28 sps:$4 sm:$0xff]   ;;  %v4667_v29 = vld [vmem:[%s6352_s1 + $0xc48] ss:$28 sps:$4 sm:$0xff]  }
  0xf2   :  { %3279 = vmatprep.subr.bf16.mxu0 %v4600_v30  ;;  %v4670_v30 = vld [vmem:[%s6352_s1 + $0x550] ss:$28 sps:$4 sm:$0xff]  }
  0xf4   :  { %3198 = vmatpush1.bf16.msra.mxu1 %v4595_v31  ;;  %v4675_v31 = vld [vmem:[%s6352_s1 + $0xc84] ss:$28 sps:$4 sm:$0xff]  }
  0xf5   :  { %3280 = vmatpush1.bf16.msra.mxu0 %v4598_v32  ;;  %3199 = vmatprep.subr.bf16.mxu1 %v4603_v33  ;;  %v4678_v32 = vld [vmem:[%s6352_s1 + $0x58c] ss:$28 sps:$4 sm:$0xff]   ;;  %v4673_v33 = vld [vmem:[%s6352_s1 + $0xc80] ss:$28 sps:$4 sm:$0xff]  }
  0xf6   :  { %3281 = vmatprep.subr.bf16.mxu0 %v4606_v34  ;;  %v4676_v34 = vld [vmem:[%s6352_s1 + $0x588] ss:$28 sps:$4 sm:$0xff]  }
  0xf8   :  { %3200 = vmatpush1.bf16.msra.mxu1 %v4601_v35  ;;  %v4681_v35 = vld [vmem:[%s6352_s1 + $0xcbc] ss:$28 sps:$4 sm:$0xff]  }
  0xf9   :  { %3282 = vmatpush1.bf16.msra.mxu0 %v4604_v36  ;;  %3201 = vmatprep.subr.bf16.mxu1 %v4609_v38  ;;  %v4684_v36 = vld [vmem:[%s6352_s1 + $0x5c4] ss:$28 sps:$4 sm:$0xff]   ;;  %v4679_v38 = vld [vmem:[%s6352_s1 + $0xcb8] ss:$28 sps:$4 sm:$0xff]  }
  0xfa   :  { %3283 = vmatprep.subr.bf16.mxu0 %v4612_v39  ;;  %v4682_v39 = vld [vmem:[%s6352_s1 + $0x5c0] ss:$28 sps:$4 sm:$0xff]  }
  0xfc   :  { %3202 = vmatpush1.bf16.msra.mxu1 %v4607_v40  ;;  %v4687_v40 = vld [vmem:[%s6352_s1 + $0xcf4] ss:$28 sps:$4 sm:$0xff]  }
  0xfd   :  { %3284 = vmatpush1.bf16.msra.mxu0 %v4610_v41  ;;  %3203 = vmatprep.subr.bf16.mxu1 %v4615_v43  ;;  %v4690_v41 = vld [vmem:[%s6352_s1 + $0x5fc] ss:$28 sps:$4 sm:$0xff]   ;;  %v4685_v43 = vld [vmem:[%s6352_s1 + $0xcf0] ss:$28 sps:$4 sm:$0xff]  }
  0xfe   :  { %3285 = vmatprep.subr.bf16.mxu0 %v4618_v44  ;;  %v4688_v44 = vld [vmem:[%s6352_s1 + $0x5f8] ss:$28 sps:$4 sm:$0xff]  }
 0x100   :  { %3204 = vmatpush1.bf16.msra.mxu1 %v4613_v45  ;;  %v4693_v45 = vld [vmem:[%s6352_s1 + $0xd2c] ss:$28 sps:$4 sm:$0xff]  }
 0x101   :  { %3286 = vmatpush1.bf16.msra.mxu0 %v4616_v46  ;;  %3214 = vmatprep.subr.bf16.mxu1 %v4621_v47  ;;  %v4696_v46 = vld [vmem:[%s6352_s1 + $0x634] ss:$28 sps:$4 sm:$0xff]   ;;  %v4691_v47 = vld [vmem:[%s6352_s1 + $0xd28] ss:$28 sps:$4 sm:$0xff]  }
 0x102   :  { %3296 = vmatprep.subr.bf16.mxu0 %v4624_v48  ;;  %v4694_v48 = vld [vmem:[%s6352_s1 + $0x630] ss:$28 sps:$4 sm:$0xff]  }
 0x103   :  { %3206 = vmatmul.mubr.bf16.vlgmr.msra.gmra.mrb[4].mxu1 %v5328_v28 }
 0x104   :  { %3288 = vmatmul.mubr.bf16.vlgmr.msra.gmra.mrb[4].mxu0 %v5107_v12  ;;  %3215 = vmatpush1.bf16.msra.mxu1 %v4619_v50  ;;  %v4699_v50 = vld [vmem:[%s6352_s1 + $0xd64] ss:$28 sps:$4 sm:$0xff]  }
 0x105   :  { %3297 = vmatpush1.bf16.msra.mxu0 %v4622_v51  ;;  %3216 = vmatprep.subr.bf16.mxu1 %v4627_v52  ;;  %v4702_v51 = vld [vmem:[%s6352_s1 + $0x66c] ss:$28 sps:$4 sm:$0xff]   ;;  %v4697_v52 = vld [vmem:[%s6352_s1 + $0xd60] ss:$28 sps:$4 sm:$0xff]  }
 0x106   :  { %3298 = vmatprep.subr.bf16.mxu0 %v4630_v53  ;;  %3246 = vmatprep.mubr.bf16.mxu1 %v5341_v10  ;;  %v4700_v53 = vld [vmem:[%s6352_s1 + $0x668] ss:$28 sps:$4 sm:$0xff]  }
 0x107   :  { %3328 = vmatprep.mubr.bf16.mxu0 %v5072_v0 }
 0x108   :  { %3217 = vmatpush1.bf16.msra.mxu1 %v4625_v54  ;;  %v4705_v54 = vld [vmem:[%s6352_s1 + $0xd9c] ss:$28 sps:$4 sm:$0xff]  }
 0x109   :  { %3299 = vmatpush1.bf16.msra.mxu0 %v4628_v55  ;;  %3218 = vmatprep.subr.bf16.mxu1 %v4633_v56  ;;  %v4708_v55 = vld [vmem:[%s6352_s1 + $0x6a4] ss:$28 sps:$4 sm:$0xff]   ;;  %v4703_v56 = vld [vmem:[%s6352_s1 + $0xd98] ss:$28 sps:$4 sm:$0xff]  }
 0x10a   :  { %3300 = vmatprep.subr.bf16.mxu0 %v4636_v57  ;;  %v4706_v57 = vld [vmem:[%s6352_s1 + $0x6a0] ss:$28 sps:$4 sm:$0xff]  }
 0x10c   :  { %3219 = vmatpush1.bf16.msra.mxu1 %v4631_v58  ;;  %v4711_v58 = vld [vmem:[%s6352_s1 + $0xdd4] ss:$28 sps:$4 sm:$0xff]  }
 0x10d   :  { %3301 = vmatpush1.bf16.msra.mxu0 %v4634_v59  ;;  %3220 = vmatprep.subr.bf16.mxu1 %v4639_v61  ;;  %v4714_v59 = vld [vmem:[%s6352_s1 + $0x6dc] ss:$28 sps:$4 sm:$0xff]   ;;  %v4709_v61 = vld [vmem:[%s6352_s1 + $0xdd0] ss:$28 sps:$4 sm:$0xff]  }
 0x10e   :  { %3302 = vmatprep.subr.bf16.mxu0 %v4642_v62  ;;  %v4712_v62 = vld [vmem:[%s6352_s1 + $0x6d8] ss:$28 sps:$4 sm:$0xff]  }
 0x110   :  { %3221 = vmatpush1.bf16.msra.mxu1 %v4637_v63  ;;  %v4717_v63 = vld [vmem:[%s6352_s1 + $0x714] ss:$28 sps:$4 sm:$0xff]  }
 0x111   :  { %3303 = vmatpush1.bf16.msra.mxu0 %v4640_v1  ;;  %3222 = vmatprep.subr.bf16.mxu1 %v4645_v2  ;;  %v4718_v1 = vld [vmem:[%s6352_s1 + $0x1d8] ss:$28 sps:$4 sm:$0xff]   ;;  %v4715_v2 = vld [vmem:[%s6352_s1 + $0x710] ss:$28 sps:$4 sm:$0xff]  }
 0x112   :  { %3304 = vmatprep.subr.bf16.mxu0 %v4648_v3  ;;  %v4719_v3 = vld [vmem:[%s6352_s1 + $0x18] ss:$28 sps:$4 sm:$0xff]  }
 0x114   :  { %3223 = vmatpush1.bf16.msra.mxu1 %v4643_v4  ;;  %v4722_v4 = vld [vmem:[%s6352_s1 + $0x74c] ss:$28 sps:$4 sm:$0xff]  }
 0x115   :  { %3305 = vmatpush1.bf16.msra.mxu0 %v4646_v5  ;;  %3224 = vmatprep.subr.bf16.mxu1 %v4651_v6  ;;  %v4723_v5 = vld [vmem:[%s6352_s1 + $0x210] ss:$28 sps:$4 sm:$0xff]   ;;  %v4720_v6 = vld [vmem:[%s6352_s1 + $0x748] ss:$28 sps:$4 sm:$0xff]  }
 0x116   :  { %3306 = vmatprep.subr.bf16.mxu0 %v4654_v7  ;;  %v5803_v14 = vpop.f32.mrb[0].mxu1  ;;  %v4724_v7 = vld [vmem:[%s6352_s1 + $0x50] ss:$28 sps:$4 sm:$0xff]  }
 0x117   :  { %v5811_v17 = vpop.f32.mrb[1].mxu1 }
 0x118   :  { %v2965_v19 = vpop.f32.mrb[2].mxu1  ;;  %3225 = vmatpush1.bf16.msra.mxu1 %v4649_v8  ;;  %v4727_v8 = vld [vmem:[%s6352_s1 + $0x784] ss:$28 sps:$4 sm:$0xff]  }
 0x119   :  { %3307 = vmatpush1.bf16.msra.mxu0 %v4652_v9  ;;  %v2966_v21 = vpop.f32.mrb[3].mxu1  ;;  %3226 = vmatprep.subr.bf16.mxu1 %v4657_v11  ;;  %v4728_v9 = vld [vmem:[%s6352_s1 + $0x248] ss:$28 sps:$4 sm:$0xff]   ;;  %v4725_v11 = vld [vmem:[%s6352_s1 + $0x780] ss:$28 sps:$4 sm:$0xff]  }
 0x11a   :  { %3308 = vmatprep.subr.bf16.mxu0 %v4660_v13  ;;  %v4729_v13 = vld [vmem:[%s6352_s1 + $0x88] ss:$28 sps:$4 sm:$0xff]   ;;  %v4734_v19 = vld [vmem:[%s6352_s1 + $0xc0] ss:$28 sps:$4 sm:$0xff]   ;;  %v4738_v21 = vld [vmem:[%s6352_s1 + $0x2b8] ss:$28 sps:$4 sm:$0xff]  }
 0x11c   :  { %3227 = vmatpush1.bf16.msra.mxu1 %v4655_v15  ;;  %v4732_v15 = vld [vmem:[%s6352_s1 + $0x7bc] ss:$28 sps:$4 sm:$0xff]  }
 0x11d   :  { %3309 = vmatpush1.bf16.msra.mxu0 %v4658_v16  ;;  %3228 = vmatprep.subr.bf16.mxu1 %v4663_v20  ;;  %v4730_v16 = vld [vmem:[%s6352_s1 + $0x7b8] ss:$28 sps:$4 sm:$0xff]  }
 0x11e   :  { %3310 = vmatprep.subr.bf16.mxu0 %v4666_v23  ;;  %v4737_v20 = vld [vmem:[%s6352_s1 + $0x7f4] ss:$28 sps:$4 sm:$0xff]  }
 0x11f   :  { %v4735_v23 = vld [vmem:[%s6352_s1 + $0x7f0] ss:$28 sps:$4 sm:$0xff]  }
 0x120   :  { %3229 = vmatpush1.bf16.msra.mxu1 %v4661_v24  ;;  %v4739_v24 = vld [vmem:[%s6352_s1 + $0xf8] ss:$28 sps:$4 sm:$0xff]  }
 0x121   :  { %3311 = vmatpush1.bf16.msra.mxu0 %v4664_v25  ;;  %3230 = vmatprep.subr.bf16.mxu1 %v4669_v26  ;;  %v4742_v25 = vld [vmem:[%s6352_s1 + $0x82c] ss:$28 sps:$4 sm:$0xff]  }
 0x122   :  { %3312 = vmatprep.subr.bf16.mxu0 %v4672_v27  ;;  %v4743_v26 = vld [vmem:[%s6352_s1 + $0x2f0] ss:$28 sps:$4 sm:$0xff]   ;;  %v4740_v27 = vld [vmem:[%s6352_s1 + $0x828] ss:$28 sps:$4 sm:$0xff]  }
 0x124   :  { %3231 = vmatpush1.bf16.msra.mxu1 %v4667_v29  ;;  %v4744_v29 = vld [vmem:[%s6352_s1 + $0x130] ss:$28 sps:$4 sm:$0xff]  }
 0x125   :  { %3313 = vmatpush1.bf16.msra.mxu0 %v4670_v30  ;;  %3232 = vmatprep.subr.bf16.mxu1 %v4675_v31  ;;  %v4747_v30 = vld [vmem:[%s6352_s1 + $0x864] ss:$28 sps:$4 sm:$0xff]  }
 0x126   :  { %3314 = vmatprep.subr.bf16.mxu0 %v4678_v32  ;;  %v4748_v31 = vld [vmem:[%s6352_s1 + $0x328] ss:$28 sps:$4 sm:$0xff]   ;;  %v4745_v32 = vld [vmem:[%s6352_s1 + $0x860] ss:$28 sps:$4 sm:$0xff]  }
 0x128   :  { %3233 = vmatpush1.bf16.msra.mxu1 %v4673_v33  ;;  %v4749_v33 = vld [vmem:[%s6352_s1 + $0x168] ss:$28 sps:$4 sm:$0xff]  }
 0x129   :  { %3315 = vmatpush1.bf16.msra.mxu0 %v4676_v34  ;;  %3234 = vmatprep.subr.bf16.mxu1 %v4681_v35  ;;  %v4752_v34 = vld [vmem:[%s6352_s1 + $0x89c] ss:$28 sps:$4 sm:$0xff]  }
 0x12a   :  { %3316 = vmatprep.subr.bf16.mxu0 %v4684_v36  ;;  %v4753_v35 = vld [vmem:[%s6352_s1 + $0x360] ss:$28 sps:$4 sm:$0xff]   ;;  %v4750_v36 = vld [vmem:[%s6352_s1 + $0x898] ss:$28 sps:$4 sm:$0xff]  }
 0x12c   :  { %3235 = vmatpush1.bf16.msra.mxu1 %v4679_v38  ;;  %v4754_v38 = vld [vmem:[%s6352_s1 + $0x1a0] ss:$28 sps:$4 sm:$0xff]  }
 0x12d   :  { %3317 = vmatpush1.bf16.msra.mxu0 %v4682_v39  ;;  %3236 = vmatprep.subr.bf16.mxu1 %v4687_v40  ;;  %v4757_v39 = vld [vmem:[%s6352_s1 + $0x8d4] ss:$28 sps:$4 sm:$0xff]  }
 0x12e   :  { %3318 = vmatprep.subr.bf16.mxu0 %v4690_v41  ;;  %v4758_v40 = vld [vmem:[%s6352_s1 + $0x558] ss:$28 sps:$4 sm:$0xff]   ;;  %v4755_v41 = vld [vmem:[%s6352_s1 + $0x8d0] ss:$28 sps:$4 sm:$0xff]  }
 0x130   :  { %3237 = vmatpush1.bf16.msra.mxu1 %v4685_v43  ;;  %v4759_v43 = vld [vmem:[%s6352_s1 + $0x398] ss:$28 sps:$4 sm:$0xff]  }
 0x131   :  { %3319 = vmatpush1.bf16.msra.mxu0 %v4688_v44  ;;  %3238 = vmatprep.subr.bf16.mxu1 %v4693_v45  ;;  %v4762_v44 = vld [vmem:[%s6352_s1 + $0x90c] ss:$28 sps:$4 sm:$0xff]  }
 0x132   :  { %3320 = vmatprep.subr.bf16.mxu0 %v4696_v46  ;;  %v4763_v45 = vld [vmem:[%s6352_s1 + $0x590] ss:$28 sps:$4 sm:$0xff]   ;;  %v4760_v46 = vld [vmem:[%s6352_s1 + $0x908] ss:$28 sps:$4 sm:$0xff]  }
 0x134   :  { %3239 = vmatpush1.bf16.msra.mxu1 %v4691_v47  ;;  %v4764_v47 = vld [vmem:[%s6352_s1 + $0x3d0] ss:$28 sps:$4 sm:$0xff]  }
 0x135   :  { %3321 = vmatpush1.bf16.msra.mxu0 %v4694_v48  ;;  %3240 = vmatprep.subr.bf16.mxu1 %v4699_v50  ;;  %v4767_v48 = vld [vmem:[%s6352_s1 + $0x944] ss:$28 sps:$4 sm:$0xff]  }
 0x136   :  { %3322 = vmatprep.subr.bf16.mxu0 %v4702_v51  ;;  %v4765_v50 = vld [vmem:[%s6352_s1 + $0x940] ss:$28 sps:$4 sm:$0xff]   ;;  %v4769_v51 = vld [vmem:[%s6352_s1 + $0x408] ss:$28 sps:$4 sm:$0xff]  }
 0x138   :  { %3241 = vmatpush1.bf16.msra.mxu1 %v4697_v52  ;;  %v4772_v52 = vld [vmem:[%s6352_s1 + $0x97c] ss:$28 sps:$4 sm:$0xff]  }
 0x139   :  { %3323 = vmatpush1.bf16.msra.mxu0 %v4700_v53  ;;  %3242 = vmatprep.subr.bf16.mxu1 %v4705_v54  ;;  %v4770_v53 = vld [vmem:[%s6352_s1 + $0x978] ss:$28 sps:$4 sm:$0xff]   ;;  %v4774_v54 = vld [vmem:[%s6352_s1 + $0x440] ss:$28 sps:$4 sm:$0xff]  }
 0x13a   :  { %3324 = vmatprep.subr.bf16.mxu0 %v4708_v55  ;;  %v4777_v55 = vld [vmem:[%s6352_s1 + $0x9b4] ss:$28 sps:$4 sm:$0xff]  }
 0x13c   :  { %3243 = vmatpush1.bf16.msra.mxu1 %v4703_v56  ;;  %v4778_v56 = vld [vmem:[%s6352_s1 + $0x638] ss:$28 sps:$4 sm:$0xff]  }
 0x13d   :  { %3325 = vmatpush1.bf16.msra.mxu0 %v4706_v57  ;;  %3244 = vmatprep.subr.bf16.mxu1 %v4711_v58  ;;  %v4775_v57 = vld [vmem:[%s6352_s1 + $0x9b0] ss:$28 sps:$4 sm:$0xff]   ;;  %v4779_v58 = vld [vmem:[%s6352_s1 + $0x478] ss:$28 sps:$4 sm:$0xff]  }
 0x13e   :  { %3326 = vmatprep.subr.bf16.mxu0 %v4714_v59  ;;  %v4782_v59 = vld [vmem:[%s6352_s1 + $0x9ec] ss:$28 sps:$4 sm:$0xff]  }
 0x140   :  { %3245 = vmatpush1.bf16.msra.mxu1 %v4709_v61  ;;  %v4783_v61 = vld [vmem:[%s6352_s1 + $0x670] ss:$28 sps:$4 sm:$0xff]  }
 0x141   :  { %3327 = vmatpush1.bf16.msra.mxu0 %v4712_v62  ;;  %4105 = vmatprep.subr.bf16.mxu1 %v4718_v1  ;;  %v4780_v62 = vld [vmem:[%s6352_s1 + $0x9e8] ss:$28 sps:$4 sm:$0xff]  }
 0x142   :  { %3337 = vmatprep.subr.bf16.mxu0 %v4717_v63  ;;  %v4784_v63 = vld [vmem:[%s6352_s1 + $0x4b0] ss:$28 sps:$4 sm:$0xff]   ;;  %v4787_v1 = vld [vmem:[%s6352_s1 + $0xa24] ss:$28 sps:$4 sm:$0xff]  }
 0x143   :  { %3247 = vmatmul.mubr.bf16.vlgmr.msra.gmra.mrb[4].mxu1 %v5529_v37 }
 0x144   :  { %3329 = vmatmul.mubr.bf16.vlgmr.msra.gmra.mrb[4].mxu0 %v5125_v18  ;;  %4106 = vmatpush3.bf16.msra.mxu1 %v4719_v3  ;;  %v4785_v3 = vld [vmem:[%s6352_s1 + $0xa20] ss:$28 sps:$4 sm:$0xff]  }
 0x145   :  { %3338 = vmatpush1.bf16.msra.mxu0 %v4715_v2  ;;  %4107 = vmatprep.subr.bf16.mxu1 %v4723_v5  ;;  %v4788_v2 = vld [vmem:[%s6352_s1 + $0x6a8] ss:$28 sps:$4 sm:$0xff]   ;;  %v4792_v5 = vld [vmem:[%s6352_s1 + $0xa5c] ss:$28 sps:$4 sm:$0xff]  }
 0x146   :  { %3339 = vmatprep.subr.bf16.mxu0 %v4722_v4  ;;  %3451 = vmatprep.mubr.bf16.mxu1 %v5059_v60  ;;  %v4733_v60 = vld [vmem:[%s6352_s1 + $0x280] ss:$28 sps:$4 sm:$0xff]   ;;  %v4789_v4 = vld [vmem:[%s6352_s1 + $0x4e8] ss:$28 sps:$4 sm:$0xff]  }
 0x147   :  { %3369 = vmatprep.mubr.bf16.mxu0 %v5137_v22 }
 0x148   :  { %4108 = vmatpush3.bf16.msra.mxu1 %v4724_v7  ;;  %v4790_v7 = vld [vmem:[%s6352_s1 + $0xa58] ss:$28 sps:$4 sm:$0xff]  }
 0x149   :  { %3340 = vmatpush1.bf16.msra.mxu0 %v4720_v6  ;;  %4109 = vmatprep.subr.bf16.mxu1 %v4728_v9  ;;  %v4793_v6 = vld [vmem:[%s6352_s1 + $0x6e0] ss:$28 sps:$4 sm:$0xff]   ;;  %v4797_v9 = vld [vmem:[%s6352_s1 + $0xa94] ss:$28 sps:$4 sm:$0xff]  }
 0x14a   :  { %3341 = vmatprep.subr.bf16.mxu0 %v4727_v8  ;;  %v4794_v8 = vld [vmem:[%s6352_s1 + $0x520] ss:$28 sps:$4 sm:$0xff]  }
 0x14c   :  { %4110 = vmatpush3.bf16.msra.mxu1 %v4729_v13  ;;  %v4795_v13 = vld [vmem:[%s6352_s1 + $0xa90] ss:$28 sps:$4 sm:$0xff]  }
 0x14d   :  { %3342 = vmatpush1.bf16.msra.mxu0 %v4725_v11  ;;  %4111 = vmatprep.subr.bf16.mxu1 %v4733_v60  ;;  %v4798_v11 = vld [vmem:[%s6352_s1 + $0x8d8] ss:$28 sps:$4 sm:$0xff]   ;;  %v4802_v60 = vld [vmem:[%s6352_s1 + $0xacc] ss:$28 sps:$4 sm:$0xff]  }
 0x14e   :  { %3343 = vmatprep.subr.bf16.mxu0 %v4732_v15  ;;  %v4799_v15 = vld [vmem:[%s6352_s1 + $0x718] ss:$28 sps:$4 sm:$0xff]  }
 0x150   :  { %4112 = vmatpush3.bf16.msra.mxu1 %v4734_v19  ;;  %v4800_v19 = vld [vmem:[%s6352_s1 + $0xac8] ss:$28 sps:$4 sm:$0xff]  }
 0x151   :  { %3344 = vmatpush1.bf16.msra.mxu0 %v4730_v16  ;;  %4113 = vmatprep.subr.bf16.mxu1 %v4738_v21  ;;  %v4803_v16 = vld [vmem:[%s6352_s1 + $0x910] ss:$28 sps:$4 sm:$0xff]   ;;  %v4807_v21 = vld [vmem:[%s6352_s1 + $0xb04] ss:$28 sps:$4 sm:$0xff]  }
 0x152   :  { %3345 = vmatprep.subr.bf16.mxu0 %v4737_v20  ;;  %v4804_v20 = vld [vmem:[%s6352_s1 + $0x750] ss:$28 sps:$4 sm:$0xff]  }
 0x154   :  { %4114 = vmatpush3.bf16.msra.mxu1 %v4739_v24  ;;  %v4809_v24 = vld [vmem:[%s6352_s1 + $0x788] ss:$28 sps:$4 sm:$0xff]  }
 0x155   :  { %3346 = vmatpush1.bf16.msra.mxu0 %v4735_v23  ;;  %4115 = vmatprep.subr.bf16.mxu1 %v4743_v26  ;;  %v4805_v23 = vld [vmem:[%s6352_s1 + $0xb00] ss:$28 sps:$4 sm:$0xff]   ;;  %v4810_v26 = vld [vmem:[%s6352_s1 + $0xb38] ss:$28 sps:$4 sm:$0xff]  }
 0x156   :  { %3347 = vmatprep.subr.bf16.mxu0 %v4742_v25  ;;  %v4812_v25 = vld [vmem:[%s6352_s1 + $0xb3c] ss:$28 sps:$4 sm:$0xff]  }
 0x158   :  { %4116 = vmatpush3.bf16.msra.mxu1 %v4744_v29  ;;  %v532_v29 = vsub.s32 0, %v5013_v42 }
 0x159   :  { %3348 = vmatpush1.bf16.msra.mxu0 %v4740_v27  ;;  %4117 = vmatprep.subr.bf16.mxu1 %v4748_v31  ;;  %v4814_v27 = vld [vmem:[%s6352_s1 + $0x7c0] ss:$28 sps:$4 sm:$0xff]   ;;  %v4818_v31 = vld [vmem:[%s6352_s1 + $0x9b8] ss:$28 sps:$4 sm:$0xff]  }
 0x15a   :  { %3349 = vmatprep.subr.bf16.mxu0 %v4747_v30  ;;  %v4817_v30 = vld [vmem:[%s6352_s1 + $0xb74] ss:$28 sps:$4 sm:$0xff]  }
 0x15c   :  { %4118 = vmatpush3.bf16.msra.mxu1 %v4749_v33  ;;  %v536_v33 = vsub.s32 1, %v5013_v42 }
 0x15d   :  { %3350 = vmatpush1.bf16.msra.mxu0 %v4745_v32  ;;  %4119 = vmatprep.subr.bf16.mxu1 %v4753_v35  ;;  %v6181_v32 = vld [vmem:[%s6354_s2] sm:$0xff]  ;;  %v4819_v35 = vld [vmem:[%s6352_s1 + $0x7f8] ss:$28 sps:$4 sm:$0xff]  }
 0x15e   :  { %3351 = vmatprep.subr.bf16.mxu0 %v4752_v34  ;;  %v4815_v34 = vld [vmem:[%s6352_s1 + $0xb70] ss:$28 sps:$4 sm:$0xff]  }
 0x160   :  { %4120 = vmatpush3.bf16.msra.mxu1 %v4754_v38  ;;  %v4822_v38 = vld [vmem:[%s6352_s1 + $0xbac] ss:$28 sps:$4 sm:$0xff]  }
 0x161   :  { %3352 = vmatpush1.bf16.msra.mxu0 %v4750_v36  ;;  %4127 = vmatprep.subr.bf16.mxu1 %v4758_v40  ;;  %v533_v36 = vrot.slane %v6181_v32, %v532_v29  ;;  %v537_v40 = vrot.slane %v6181_v32, %v536_v33  ;;  %v4873_v29 = vld [vmem:[%s6352_s1 + $0xde0] ss:$28 sps:$4 sm:$0xff]   ;;  %v540_v33 = vsub.s32 2, %v5013_v42 }
 0x162   :  { %3353 = vmatprep.subr.bf16.mxu0 %v4757_v39  ;;  %v4823_v39 = vld [vmem:[%s6352_s1 + $0x9f0] ss:$28 sps:$4 sm:$0xff]  }
 0x163   :  { %3452 = vmatmul.mubr.bf16.vlgmr.msra.gmra.mrb[8].mxu1 %v5107_v12  ;;  %v4768_v12 = vld [vmem:[%s6352_s1 + $0x5c8] ss:$28 sps:$4 sm:$0xff]  }
 0x164   :  { %4128 = vmatpush3.bf16.msra.mxu1 %v4759_v43  ;;  %3491 = vmatprep.mubr.bf16.mxu1 %v5072_v0  ;;  %v4773_v0 = vld [vmem:[%s6352_s1 + $0x600] ss:$28 sps:$4 sm:$0xff]   ;;  %v4824_v43 = vld [vmem:[%s6352_s1 + $0x830] ss:$28 sps:$4 sm:$0xff]  }
 0x165   :  { %3354 = vmatpush1.bf16.msra.mxu0 %v4755_v41  ;;  %4129 = vmatprep.subr.bf16.mxu1 %v4763_v45  ;;  %v4820_v41 = vld [vmem:[%s6352_s1 + $0xba8] ss:$28 sps:$4 sm:$0xff]  }
 0x166   :  { %3355 = vmatprep.subr.bf16.mxu0 %v4762_v44  ;;  %v2962_v44 = vadd.f32 %v5803_v14, %v533_v36  ;;  %v4827_v45 = vld [vmem:[%s6352_s1 + $0xbe4] ss:$28 sps:$4 sm:$0xff]  }
 0x167   :  { %v4825_v14 = vld [vmem:[%s6352_s1 + $0xbe0] ss:$28 sps:$4 sm:$0xff]  }
 0x168   :  { %4130 = vmatpush3.bf16.msra.mxu1 %v4764_v47  ;;  %v2964_v47 = vadd.f32 %v5811_v17, %v537_v40  ;;  %v4832_v17 = vld [vmem:[%s6352_s1 + $0xc1c] ss:$28 sps:$4 sm:$0xff]  }
 0x169   :  { %3356 = vmatpush1.bf16.msra.mxu0 %v4760_v46  ;;  %4131 = vmatprep.subr.bf16.mxu1 %v4768_v12  ;;  %v4828_v46 = vld [vmem:[%s6352_s1 + $0xa28] ss:$28 sps:$4 sm:$0xff]  }
 0x16a   :  { %3357 = vmatprep.subr.bf16.mxu0 %v4767_v48 }
 0x16c   :  { %4132 = vmatpush3.bf16.msra.mxu1 %v4769_v51 }
 0x16d   :  { %3358 = vmatpush1.bf16.msra.mxu0 %v4765_v50  ;;  %4133 = vmatprep.subr.bf16.mxu1 %v4773_v0  ;;  %v4829_v0 = vld [vmem:[%s6352_s1 + $0x868] ss:$28 sps:$4 sm:$0xff]  }
 0x16e   :  { %3359 = vmatprep.subr.bf16.mxu0 %v4772_v52 }
 0x170   :  { %4134 = vmatpush3.bf16.msra.mxu1 %v4774_v54 }
 0x171   :  { %3360 = vmatpush1.bf16.msra.mxu0 %v4770_v53  ;;  %4135 = vmatprep.subr.bf16.mxu1 %v4778_v56 }
 0x172   :  { %3361 = vmatprep.subr.bf16.mxu0 %v4777_v55  ;;  %v4833_v55 = vld [vmem:[%s6352_s1 + $0xa60] ss:$28 sps:$4 sm:$0xff]  }
 0x174   :  { %4136 = vmatpush3.bf16.msra.mxu1 %v4779_v58  ;;  %v4830_v58 = vld [vmem:[%s6352_s1 + $0xc18] ss:$28 sps:$4 sm:$0xff]  }
 0x175   :  { %3362 = vmatpush1.bf16.msra.mxu0 %v4775_v57  ;;  %4137 = vmatprep.subr.bf16.mxu1 %v4783_v61  ;;  %v4837_v61 = vld [vmem:[%s6352_s1 + $0xc54] ss:$28 sps:$4 sm:$0xff]  }
 0x176   :  { %3363 = vmatprep.subr.bf16.mxu0 %v4782_v59  ;;  %v4834_v59 = vld [vmem:[%s6352_s1 + $0x8a0] ss:$28 sps:$4 sm:$0xff]  }
 0x178   :  { %4138 = vmatpush3.bf16.msra.mxu1 %v4784_v63  ;;  %v4835_v63 = vld [vmem:[%s6352_s1 + $0xc50] ss:$28 sps:$4 sm:$0xff]  }
 0x179   :  { %3364 = vmatpush1.bf16.msra.mxu0 %v4780_v62  ;;  %4139 = vmatprep.subr.bf16.mxu1 %v4788_v2  ;;  %v4838_v62 = vld [vmem:[%s6352_s1 + $0xc58] ss:$28 sps:$4 sm:$0xff]   ;;  %v4842_v2 = vld [vmem:[%s6352_s1 + $0xc8c] ss:$28 sps:$4 sm:$0xff]  }
 0x17a   :  { %3365 = vmatprep.subr.bf16.mxu0 %v4787_v1  ;;  %v4839_v1 = vld [vmem:[%s6352_s1 + $0xa98] ss:$28 sps:$4 sm:$0xff]  }
 0x17c   :  { %4140 = vmatpush3.bf16.msra.mxu1 %v4789_v4  ;;  %v4840_v4 = vld [vmem:[%s6352_s1 + $0xc88] ss:$28 sps:$4 sm:$0xff]  }
 0x17d   :  { %3366 = vmatpush1.bf16.msra.mxu0 %v4785_v3  ;;  %4141 = vmatprep.subr.bf16.mxu1 %v4793_v6  ;;  %v4843_v3 = vld [vmem:[%s6352_s1 + $0xc90] ss:$28 sps:$4 sm:$0xff]   ;;  %v4847_v6 = vld [vmem:[%s6352_s1 + $0xcc4] ss:$28 sps:$4 sm:$0xff]  }
 0x17e   :  { %3367 = vmatprep.subr.bf16.mxu0 %v4792_v5  ;;  %v4844_v5 = vld [vmem:[%s6352_s1 + $0xad0] ss:$28 sps:$4 sm:$0xff]  }
 0x180   :  { %4142 = vmatpush3.bf16.msra.mxu1 %v4794_v8  ;;  %v4849_v8 = vld [vmem:[%s6352_s1 + $0xb08] ss:$28 sps:$4 sm:$0xff]  }
 0x181   :  { %3368 = vmatpush1.bf16.msra.mxu0 %v4790_v7  ;;  %4149 = vmatprep.subr.bf16.mxu1 %v4798_v11  ;;  %v4845_v7 = vld [vmem:[%s6352_s1 + $0xcc0] ss:$28 sps:$4 sm:$0xff]   ;;  %v4850_v11 = vld [vmem:[%s6352_s1 + $0xcf8] ss:$28 sps:$4 sm:$0xff]  }
 0x182   :  { %3378 = vmatprep.subr.bf16.mxu0 %v4797_v9  ;;  %v4852_v9 = vld [vmem:[%s6352_s1 + $0xcfc] ss:$28 sps:$4 sm:$0xff]  }
 0x183   :  { %3492 = vmatmul.mubr.bf16.vlgmr.msra.gmra.mrb[12].mxu1 %v5125_v18  ;;  %v4808_v18 = vld [vmem:[%s6352_s1 + $0x948] ss:$28 sps:$4 sm:$0xff]  }
 0x184   :  { %3370 = vmatmul.mubr.bf16.vlgmr.msra.gmra.mrb[4].mxu0 %v5328_v28  ;;  %4150 = vmatpush3.bf16.msra.mxu1 %v4799_v15  ;;  %v4857_v15 = vld [vmem:[%s6352_s1 + $0xd34] ss:$28 sps:$4 sm:$0xff]  }
 0x185   :  { %3379 = vmatpush1.bf16.msra.mxu0 %v4795_v13  ;;  %4151 = vmatprep.subr.bf16.mxu1 %v4803_v16  ;;  %v4854_v13 = vld [vmem:[%s6352_s1 + $0xb40] ss:$28 sps:$4 sm:$0xff]   ;;  %v4855_v16 = vld [vmem:[%s6352_s1 + $0xd30] ss:$28 sps:$4 sm:$0xff]  }
 0x186   :  { %3380 = vmatprep.subr.bf16.mxu0 %v4802_v60  ;;  %3531 = vmatprep.mubr.bf16.mxu1 %v5137_v22  ;;  %v4813_v22 = vld [vmem:[%s6352_s1 + $0x980] ss:$28 sps:$4 sm:$0xff]   ;;  %v4858_v60 = vld [vmem:[%s6352_s1 + $0xd38] ss:$28 sps:$4 sm:$0xff]  }
 0x187   :  { %3410 = vmatprep.mubr.bf16.mxu0 %v5341_v10 }
 0x188   :  { %4152 = vmatpush3.bf16.msra.mxu1 %v4804_v20  ;;  %v4862_v20 = vld [vmem:[%s6352_s1 + $0xd6c] ss:$28 sps:$4 sm:$0xff]  }
 0x189   :  { %3381 = vmatpush1.bf16.msra.mxu0 %v4800_v19  ;;  %4153 = vmatprep.subr.bf16.mxu1 %v4808_v18  ;;  %v4859_v19 = vld [vmem:[%s6352_s1 + $0xb78] ss:$28 sps:$4 sm:$0xff]   ;;  %v4860_v18 = vld [vmem:[%s6352_s1 + $0xd68] ss:$28 sps:$4 sm:$0xff]  }
 0x18a   :  { %3382 = vmatprep.subr.bf16.mxu0 %v4807_v21  ;;  %v4863_v21 = vld [vmem:[%s6352_s1 + $0xd70] ss:$28 sps:$4 sm:$0xff]  }
 0x18c   :  { %4154 = vmatpush3.bf16.msra.mxu1 %v4809_v24  ;;  %v4867_v24 = vld [vmem:[%s6352_s1 + $0xda4] ss:$28 sps:$4 sm:$0xff]  }
 0x18d   :  { %3383 = vmatpush1.bf16.msra.mxu0 %v4805_v23  ;;  %4155 = vmatprep.subr.bf16.mxu1 %v4813_v22  ;;  %v4864_v23 = vld [vmem:[%s6352_s1 + $0xbb0] ss:$28 sps:$4 sm:$0xff]   ;;  %v4865_v22 = vld [vmem:[%s6352_s1 + $0xda0] ss:$28 sps:$4 sm:$0xff]  }
 0x18e   :  { %3384 = vmatprep.subr.bf16.mxu0 %v4812_v25  ;;  %v4868_v25 = vld [vmem:[%s6352_s1 + $0xda8] ss:$28 sps:$4 sm:$0xff]  }
 0x190   :  { %4156 = vmatpush3.bf16.msra.mxu1 %v4814_v27  ;;  %v4872_v27 = vld [vmem:[%s6352_s1 + $0xddc] ss:$28 sps:$4 sm:$0xff]  }
 0x191   :  { %3385 = vmatpush1.bf16.msra.mxu0 %v4810_v26  ;;  %4157 = vmatprep.subr.bf16.mxu1 %v4818_v31  ;;  %v4869_v26 = vld [vmem:[%s6352_s1 + $0xbe8] ss:$28 sps:$4 sm:$0xff]   ;;  %v4874_v31 = vld [vmem:[%s6352_s1 + $0xc20] ss:$28 sps:$4 sm:$0xff]  }
 0x192   :  { %3386 = vmatprep.subr.bf16.mxu0 %v4817_v30  ;;  %v4870_v30 = vld [vmem:[%s6352_s1 + $0xdd8] ss:$28 sps:$4 sm:$0xff]  }
 0x194   :  { %4158 = vmatpush3.bf16.msra.mxu1 %v4819_v35  ;;  %v541_v35 = vrot.slane %v6181_v32, %v540_v33 }
 0x195   :  { %3387 = vmatpush1.bf16.msra.mxu0 %v4815_v34  ;;  %4159 = vmatprep.subr.bf16.mxu1 %v4823_v39  ;;  %v544_v34 = vsub.s32 3, %v5013_v42 }
 0x196   :  { %3388 = vmatprep.subr.bf16.mxu0 %v4822_v38 }
 0x197   :  { %v3084_v48 = vpop.f32.mrb[0].mxu0  ;;  %v545_v36 = vrot.slane %v6181_v32, %v544_v34 }
 0x198   :  { %v4194_v12 = vadd.f32 %v3084_v48, %v2962_v44  ;;  %v3086_v50 = vpop.f32.mrb[1].mxu0  ;;  %4160 = vmatpush3.bf16.msra.mxu1 %v4824_v43 }
 0x199   :  { %v4196_v51 = vadd.f32 %v3086_v50, %v2964_v47  ;;  %v3088_v52 = vpop.f32.mrb[2].mxu0  ;;  %3389 = vmatpush1.bf16.msra.mxu0 %v4820_v41  ;;  %4161 = vmatprep.subr.bf16.mxu1 %v4828_v46 }
 0x19a   :  { %v3579_v53 = vmax.f32 %v4194_v12, 0.0  ;;  %v3089_v54 = vpop.f32.mrb[3].mxu0  ;;  %3390 = vmatprep.subr.bf16.mxu0 %v4827_v45 }
 0x19b   :  { %v3580_v56 = vmax.f32 %v4196_v51, 0.0 }
 0x19c   :  { %4162 = vmatpush3.bf16.msra.mxu1 %v4829_v0 }
 0x19d   :  { %v6224_v57 = vpack.c.bf16 %v3580_v56, %v3579_v53  ;;  %3391 = vmatpush1.bf16.msra.mxu0 %v4825_v14  ;;  %4163 = vmatprep.subr.bf16.mxu1 %v4833_v55  ;;  %v556_v53 = vsub.s32 6, %v5013_v42 }
 0x19e   :  { %3392 = vmatprep.subr.bf16.mxu0 %v4832_v17 }
 0x19f   :  { %v557_v54 = vrot.slane %v6181_v32, %v556_v53 }
 0x1a0   :  { %4164 = vmatpush3.bf16.msra.mxu1 %v4834_v59 }
 0x1a1   :  { %3393 = vmatpush1.bf16.msra.mxu0 %v4830_v58  ;;  %4171 = vmatprep.subr.bf16.mxu1 %v4838_v62 }
 0x1a2   :  { %3394 = vmatprep.subr.bf16.mxu0 %v4837_v61 }
 0x1a3   :  { %3532 = vmatmul.mubr.bf16.vlgmr.msra.gmra.mrb[16].mxu1 %v5328_v28  ;;  %v4848_v28 = vld [vmem:[%s6352_s1 + $0xcc8] ss:$28 sps:$4 sm:$0xff]  }
 0x1a4   :  { %4172 = vmatpush3.bf16.msra.mxu1 %v4839_v1  ;;  %3571 = vmatprep.mubr.bf16.mxu1 %v5341_v10  ;;  %v4853_v10 = vld [vmem:[%s6352_s1 + $0xd00] ss:$28 sps:$4 sm:$0xff]  }
 0x1a5   :  { %3395 = vmatpush1.bf16.msra.mxu0 %v4835_v63  ;;  %4173 = vmatprep.subr.bf16.mxu1 %v4843_v3 }
 0x1a6   :  { %3396 = vmatprep.subr.bf16.mxu0 %v4842_v2 }
 0x1a8   :  { %4174 = vmatpush3.bf16.msra.mxu1 %v4844_v5  ;;  %v548_v5 = vsub.s32 4, %v5013_v42 }
 0x1a9   :  { %3397 = vmatpush1.bf16.msra.mxu0 %v4840_v4  ;;  %4175 = vmatprep.subr.bf16.mxu1 %v4848_v28 }
 0x1aa   :  { %3398 = vmatprep.subr.bf16.mxu0 %v4847_v6  ;;  %v552_v6 = vsub.s32 5, %v5013_v42  ;;  %v549_v28 = vrot.slane %v6181_v32, %v548_v5 }
 0x1ac   :  { %4176 = vmatpush3.bf16.msra.mxu1 %v4849_v8 }
 0x1ad   :  { %3399 = vmatpush1.bf16.msra.mxu0 %v4845_v7  ;;  %4177 = vmatprep.subr.bf16.mxu1 %v4853_v10  ;;  %v553_v7 = vrot.slane %v6181_v32, %v552_v6 }
 0x1ae   :  { %3400 = vmatprep.subr.bf16.mxu0 %v4852_v9 }
 0x1b0   :  { %4178 = vmatpush3.bf16.msra.mxu1 %v4854_v13 }
 0x1b1   :  { %3401 = vmatpush1.bf16.msra.mxu0 %v4850_v11  ;;  %4179 = vmatprep.subr.bf16.mxu1 %v4858_v60 }
 0x1b2   :  { %3402 = vmatprep.subr.bf16.mxu0 %v4857_v15 }
 0x1b4   :  { %4180 = vmatpush3.bf16.msra.mxu1 %v4859_v19 }
 0x1b5   :  { %3403 = vmatpush1.bf16.msra.mxu0 %v4855_v16  ;;  %4181 = vmatprep.subr.bf16.mxu1 %v4863_v21 }
 0x1b6   :  { %3404 = vmatprep.subr.bf16.mxu0 %v4862_v20 }
 0x1b8   :  { %4182 = vmatpush3.bf16.msra.mxu1 %v4864_v23 }
 0x1b9   :  { %3405 = vmatpush1.bf16.msra.mxu0 %v4860_v18  ;;  %4183 = vmatprep.subr.bf16.mxu1 %v4868_v25 }
 0x1ba   :  { %3406 = vmatprep.subr.bf16.mxu0 %v4867_v24 }
 0x1bc   :  { %4184 = vmatpush3.bf16.msra.mxu1 %v4869_v26 }
 0x1bd   :  { %3407 = vmatpush1.bf16.msra.mxu0 %v4865_v22  ;;  %4185 = vmatprep.subr.bf16.mxu1 %v4873_v29 }
 0x1be   :  { %3408 = vmatprep.subr.bf16.mxu0 %v4872_v27 }
 0x1c0   :  { %4186 = vmatpush3.bf16.msra.mxu1 %v4874_v31 }
 0x1c1   :  { %3409 = vmatpush1.bf16.msra.mxu0 %v4870_v30 }
 0x1c3   :  { %3572 = vmatmul.mubr.bf16.vlgmr.msra.gmra.mrb[20].mxu1 %v5529_v37 }
 0x1c4   :  { %3411 = vmatmul.mubr.bf16.vlgmr.msra.gmra.mrb[4].mxu0 %v5529_v37  ;;  %v3609_v37 = vrot.slane %v6224_v57, %v5031_v49 }
 0x216   :  { %v3248_v38 = vpop.f32.mrb[4].mxu1 }
 0x217   :  { %v4197_v39 = vadd.f32 %v3248_v38, %v541_v35  ;;  %v3250_v40 = vpop.f32.mrb[5].mxu1 }
 0x218   :  { %v4198_v41 = vadd.f32 %v3250_v40, %v545_v36  ;;  %v3252_v43 = vpop.f32.mrb[6].mxu1 }
 0x219   :  { %v3581_v44 = vmax.f32 %v4197_v39, 0.0  ;;  %v3253_v45 = vpop.f32.mrb[7].mxu1 }
 0x21a   :  { %v3582_v46 = vmax.f32 %v4198_v41, 0.0 }
 0x21c   :  { %v4103_v47 = vpack.c.bf16 %v3582_v46, %v3581_v44 }
 0x21e   :  { %v3616_v48 = vrot.slane %v4103_v47, %v5031_v49 }
 0x220   :  { %v3631_v12 = vcombine.low %v3609_v37, %v3616_v48 }
 0x222   :  { %v3639_v29 = vrot.slane %v3631_v12, %v5031_v49 }
 0x236   :  { %v4121_v50 = vpop.f32.mrb[8].mxu1 }
 0x237   :  { %v4122_v51 = vpop.f32.mrb[9].mxu1 }
 0x238   :  { %v4123_v52 = vadd.f32 %v4122_v51, %v4121_v50  ;;  %v4124_v14 = vpop.f32.mrb[10].mxu1 }
 0x239   :  { %v4125_v0 = vpop.f32.mrb[11].mxu1 }
 0x23a   :  { %v3454_v56 = vadd.f32 %v4123_v52, %v557_v54 }
 0x256   :  { %v4143_v17 = vpop.f32.mrb[12].mxu1 }
 0x257   :  { %v4144_v55 = vpop.f32.mrb[13].mxu1 }
 0x258   :  { %v4145_v58 = vadd.f32 %v4144_v55, %v4143_v17  ;;  %v4146_v59 = vpop.f32.mrb[14].mxu1 }
 0x259   :  { %v4147_v61 = vpop.f32.mrb[15].mxu1 }
 0x25a   :  { %v3494_v62 = vadd.f32 %v4145_v58, %v3454_v56 }
 0x276   :  { %v4165_v57 = vpop.f32.mrb[16].mxu1 }
 0x277   :  { %v4166_v63 = vpop.f32.mrb[17].mxu1 }
 0x278   :  { %v4167_v1 = vadd.f32 %v4166_v63, %v4165_v57  ;;  %v4168_v2 = vpop.f32.mrb[18].mxu1 }
 0x279   :  { %v4169_v3 = vpop.f32.mrb[19].mxu1 }
 0x27a   :  { %v3534_v4 = vadd.f32 %v4167_v1, %v3494_v62 }
 0x296   :  { %v4187_v9 = vpop.f32.mrb[20].mxu1 }
 0x297   :  { %v3412_v8 = vpop.f32.mrb[4].mxu0  ;;  %v4188_v13 = vpop.f32.mrb[21].mxu1 }
 0x298   :  { %v4199_v10 = vadd.f32 %v3412_v8, %v549_v28  ;;  %v3414_v11 = vpop.f32.mrb[5].mxu0  ;;  %v4189_v60 = vadd.f32 %v4188_v13, %v4187_v9  ;;  %v4190_v19 = vpop.f32.mrb[22].mxu1 }
 0x299   :  { %v4200_v15 = vadd.f32 %v3414_v11, %v553_v7  ;;  %v3416_v16 = vpop.f32.mrb[6].mxu0  ;;  %v4191_v18 = vpop.f32.mrb[23].mxu1 }
 0x29a   :  { %v3583_v20 = vmax.f32 %v4199_v10, 0.0  ;;  %v3417_v21 = vpop.f32.mrb[7].mxu0  ;;  %v3574_v24 = vadd.f32 %v4189_v60, %v3534_v4 }
 0x29b   :  { %v3584_v23 = vmax.f32 %v4200_v15, 0.0 }
 0x29c   :  { %v3585_v42 = vmax.f32 %v3574_v24, 0.0 }
 0x29d   :  { %v4104_v25 = vpack.c.bf16 %v3584_v23, %v3583_v20 }
 0x29e   :  { %v3592_v22 = vpack.c.bf16 %v3585_v42, %v3585_v42 }
 0x29f   :  { %v3623_v26 = vrot.slane %v4104_v25, %v5031_v49 }
 0x2a0   :  { %v3630_v32 = vrot.slane %v3592_v22, %v5031_v49 }
 0x2a2   :  { %v3632_v27 = vcombine.low %v3623_v26, %v3630_v32 }
 0x2a4   :  { %v3646_v30 = vrot.slane %v3632_v27, %v5031_v49 }
 0x2a6   :  { %v3647_v31 = vcombine.low %v3639_v29, %v3646_v30 }
 0x2a8   :  { %3649 = vst [vmem:[%s6355_s3] sm:$0x7f] %v3647_v31 }

// kernel: vae_forward.18
= control target key start
LH: loop header
LB: loop body
LE: loop exit
PB: predicated region body
PF: predicated region fallthrough
CT: control target
= control target key end

     0   :  { %s1517_s9 = smov 0   ;;  %s1519_s10 = smov 0   ;;  %s2025_s0 = inlined_call_operand.vmem [shape: bf16[338,32], index: 0, kind: input, shape index: {}]   ;;  %s2026_s1 = inlined_call_operand.vmem [shape: bf16[32,640], index: 1, kind: input, shape index: {}]   ;;  %s2027_s2 = inlined_call_operand.vmem [shape: f32[338,640], index: 2, kind: output, shape index: {}]  }
   0x1   :  { %s1521_s11 = smov 0  }
   0x2 LB: > { %s1530_s12 = sadd.s32 4294967295, %s1465_s11   ;;  %s1532_s13 = sadd.s32 1, %s1465_s11   ;;  %s1465_s11 = sphi %s1521_s11, %s2039_s11   ;;  %s1461_s10 = sphi %s1519_s10, %s2038_s10   ;;  %s1457_s9 = sphi %s1517_s9, %s2037_s9  }
   0x3   : > { %s63_s14 = ssub.s32 %s1465_s11, %s1532_s13  ;;  %s66_s15 = sadd.s32 1, %s1461_s10 }
   0x4   : > { %p64_p0 = scmp.eq.s32.totalorder %s63_s14, 0  ;;  %p76_p1 = scmp.ne.s32.totalorder %s1461_s10, %s1457_s9 }
   0x5   : > { %p77_p2 = scmp.eq.s32.totalorder %s1530_s12, 1  ;;  %p1155_p3 = scmp.ge.s32.totalorder %s1465_s11, 1 }
   0x6   : > { %s1540_s16 = scalar_select %p64_p0, %s1461_s10, %s66_s15  }
   0x7   : > { %p1542_p4 = por %p77_p2, %p76_p1  ;;  %p121_p5 = scmp.lt.s32.totalorder %s1465_s11, 3 }
   0x9   : > { %p122_p6 = pnand %p1155_p3, %p121_p5 }
   0xa   : > { %v1382_v0 = vld [vmem:[%s2026_s1 + $0x4] ss:$20 sps:$4 sm:$0xff] (!%p122_p6)   ;;  %s1550_s20 = smul.u32 (!%p122_p6), 22, %s1530_s12  ;;  %v1384_v1 = vld [vmem:[%s2026_s1] ss:$20 sps:$4 sm:$0xff] (!%p122_p6)   ;;  %v1499_v2 = vmov (!%p122_p6), 0  }
   0xb   : > { %125 = sbr.rel (%p122_p6) target bundleno = 452 (0x1c4), region = 28  ;;  %374 = vmatprep.mubr.bf16.mxu0 (!%p122_p6), %v1499_v2  ;;  %434 = vmatprep.mubr.bf16.mxu1 (!%p122_p6), %v1499_v2  ;;  %v1385_v3 = vld [vmem:[%s2026_s1 + $0x2c] ss:$20 sps:$4 sm:$0xff] (!%p122_p6)   ;;  %v1387_v4 = vld [vmem:[%s2026_s1 + $0x28] ss:$20 sps:$4 sm:$0xff] (!%p122_p6)   ;;  %vm308_vm0 = vcmask (!%p122_p6), 261120  }
   0xc   : > { %342 = vmatprep.subr.bf16.mxu0 (!%p122_p6), %v1382_v0  ;;  %1283 = vmatprep.subr.bf16.mxu1 (!%p122_p6), %v1382_v0  ;;  %p151_p7 = scmp.lt.s32.totalorder (!%p122_p6), %s1550_s20, 42  ;;  %v1393_v5 = vld [vmem:[%s2026_s1 + $0xc] ss:$20 sps:$4 sm:$0xff] (!%p122_p6)   ;;  %v1389_v6 = vld [vmem:[%s2026_s1 + $0x10] ss:$20 sps:$4 sm:$0xff] (!%p122_p6)   ;;  %v1500_v9 = vmov (!%p122_p6), 0.0  }
   0xd   : > { %343 = vmatpush1.bf16.msra.mxu0 (!%p122_p6), %v1384_v1  ;;  %1285 = vmatpush1.bf16.msra.mxu1 (!%p122_p6), %v1384_v1  ;;  %v1391_v7 = vld [vmem:[%s2026_s1 + $0x8] ss:$20 sps:$4 sm:$0xff] (!%p122_p6)   ;;  %v1399_v12 = vld [vmem:[%s2026_s1 + $0x38] ss:$20 sps:$4 sm:$0xff] (!%p122_p6)   ;;  %v1400_v13 = vld [vmem:[%s2026_s1 + $0x30] ss:$20 sps:$4 sm:$0xff] (!%p122_p6)  }
   0xe   : > { %344 = vmatprep.subr.bf16.mxu0 (!%p122_p6), %v1385_v3  ;;  %1284 = vmatprep.subr.bf16.mxu1 (!%p122_p6), %v1385_v3  ;;  %v1402_v11 = vld [vmem:[%s2026_s1 + $0x34] ss:$20 sps:$4 sm:$0xff] (!%p122_p6)   ;;  %vm1501_vm1 = vmmov (!%p122_p6), 0   ;;  %s143_s23 = sand.u32 (!%p122_p6), 1, %s1457_s9  }
   0xf   : > { %s1287_s24 = smul.u32 (!%p122_p6), 880, %s143_s23 }
  0x11   : > { %345 = vmatpush1.bf16.msra.mxu0 (!%p122_p6), %v1387_v4  ;;  %1286 = vmatpush1.bf16.msra.mxu1 (!%p122_p6), %v1387_v4  ;;  %s1682_s25 = scalar_lea.vmem (!%p122_p6), [#allocation2], %s1287_s24  }
  0x12   : > { %s152_s27 = scalar_select %p151_p7, %s1550_s20, 42  ;;  %1235 = vmatprep.subr.bf16.mxu0 %v1500_v9  ;;  %485 = vmatprep.subr.bf16.mxu1 %v1393_v5 }
  0x13   : > { %s867_s9 = ssub.s32 (%p1542_p4), 43, %s1550_s20  ;;  %s1289_s26 = smul.u32 (%p1542_p4), 880, %s1530_s12 }
  0x14   : > { %s1156_s30 = sshll.u32 %s152_s27, 2  ;;  %p868_p8 = scmp.lt.s32.totalorder (%p1542_p4), %s867_s9, 22 }
  0x15   : > { %s1571_s5 = scalar_lea.vmem %s2025_s0, %s1156_s30  ;;  %s1801_s29 = scalar_lea.vmem (%p1542_p4), %s2027_s2, %s1289_s26  }
  0x16   : > { %v1388_v8 = vld [vmem:[%s1571_s5] sm:$0xff]   ;;  %v1582_v10 = vld [vmem:[%s1571_s5 + $0x30] sm:$0xff]   ;;  %v1394_v14 = vld [vmem:[%s1571_s5 + $0x8] sm:$0xff]  }
  0x17   : > { %1178 = vmatmul.mubr.msk.bf16.vlgmr.msra.gmra.mrb[0].mxu0 %vm308_vm0, %v1388_v8  ;;  %1184 = vmatmul.mubr.msk.bf16.vlgmr.msra.gmra.mrb[0].mxu1 %vm308_vm0, %v1582_v10  ;;  %v1395_v15 = vld [vmem:[%s1571_s5 + $0x38] sm:$0xff]   ;;  %v1396_v16 = vld [vmem:[%s1571_s5 + $0x10] sm:$0xff]   ;;  %v1397_v17 = vld [vmem:[%s1571_s5 + $0x40] sm:$0xff]  }
  0x18   : > { %1236 = vmatpush3.bf16.msra.mxu0 %v1389_v6  ;;  %384 = vmatprep.mubr.bf16.mxu0 %v1499_v2  ;;  %v1398_v18 = vld [vmem:[%s1571_s5 + $0x18] sm:$0xff]   ;;  %v1403_v19 = vld [vmem:[%s1571_s5 + $0x48] sm:$0xff]   ;;  %v1404_v20 = vld [vmem:[%s1571_s5 + $0x20] sm:$0xff]  }
  0x19   : > { %486 = vmatpush1.bf16.msra.mxu1 %v1391_v7  ;;  %444 = vmatprep.mubr.bf16.mxu1 %v1499_v2  ;;  %v1405_v21 = vld [vmem:[%s1571_s5 + $0x50] sm:$0xff]   ;;  %v1406_v22 = vld [vmem:[%s1571_s5 + $0x28] sm:$0xff]  }
  0x1a   : > { %1237 = vmatprep.subr.bf16.mxu0 %v1500_v9  ;;  %487 = vmatprep.subr.bf16.mxu1 %v1402_v11 }
  0x1c   : > { %1238 = vmatpush3.bf16.msra.mxu0 %v1399_v12 }
  0x1d   : > { %488 = vmatpush1.bf16.msra.mxu1 %v1400_v13 }
  0x1f   : > { %1179 = vmatmul.mubr.msk.bf16.gmra.mrb[4].mxu0 %vm308_vm0, %v1394_v14  ;;  %1185 = vmatmul.mubr.msk.bf16.gmra.mrb[4].mxu1 %vm308_vm0, %v1395_v15 }
  0x20   : > { %394 = vmatprep.mubr.bf16.mxu0 %v1499_v2  ;;  %454 = vmatprep.mubr.bf16.mxu1 %v1499_v2 }
  0x27   : > { %1180 = vmatmul.mubr.msk.bf16.gmra.mrb[8].mxu0 %vm308_vm0, %v1396_v16  ;;  %1186 = vmatmul.mubr.msk.bf16.gmra.mrb[8].mxu1 %vm308_vm0, %v1397_v17 }
  0x28   : > { %404 = vmatprep.mubr.bf16.mxu0 %v1499_v2  ;;  %464 = vmatprep.mubr.bf16.mxu1 %v1499_v2 }
  0x2f   : > { %1181 = vmatmul.mubr.msk.bf16.gmra.mrb[12].mxu0 %vm308_vm0, %v1398_v18  ;;  %1187 = vmatmul.mubr.msk.bf16.gmra.mrb[12].mxu1 %vm308_vm0, %v1403_v19 }
  0x30   : > { %414 = vmatprep.mubr.bf16.mxu0 %v1499_v2  ;;  %474 = vmatprep.mubr.bf16.mxu1 %v1499_v2 }
  0x37   : > { %1182 = vmatmul.mubr.msk.bf16.gmra.mrb[16].mxu0 %vm308_vm0, %v1404_v20  ;;  %1188 = vmatmul.mubr.msk.bf16.gmra.mrb[16].mxu1 %vm308_vm0, %v1405_v21 }
  0x38   : > { %424 = vmatprep.mubr.bf16.mxu0 %v1499_v2  ;;  %517 = vmatprep.mubr.bf16.mxu1 %v1499_v2 }
  0x3f   : > { %1183 = vmatmul.mubr.msk.bf16.gmra.mrb[20].mxu0 %vm308_vm0, %v1406_v22  ;;  %1189 = vmatmul.mubr.msk.bf16.vlgmr.msra.gmra.mrb[20].mxu1 %vm308_vm0, %v1388_v8 }
  0x40   : > { %1239 = vmatprep.mubr.msk.bf16.mxu0 %vm1501_vm1, %v1500_v9  ;;  %527 = vmatprep.mubr.bf16.mxu1 %v1499_v2 }
  0x47   : > { %1240 = vmatmul.mubr.msk.bf16.vlgmr.msra.gmra.mrb[24].mxu0 %vm308_vm0, %v1388_v8  ;;  %1190 = vmatmul.mubr.msk.bf16.gmra.mrb[24].mxu1 %vm308_vm0, %v1394_v14 }
  0x48   : > { %1243 = vmatprep.mubr.msk.bf16.mxu0 %vm1501_vm1, %v1500_v9  ;;  %537 = vmatprep.mubr.bf16.mxu1 %v1499_v2 }
  0x4f   : > { %1244 = vmatmul.mubr.msk.bf16.gmra.mrb[28].mxu0 %vm308_vm0, %v1394_v14  ;;  %1191 = vmatmul.mubr.msk.bf16.gmra.mrb[28].mxu1 %vm308_vm0, %v1396_v16 }
  0x50   : > { %1247 = vmatprep.mubr.msk.bf16.mxu0 %vm1501_vm1, %v1500_v9  ;;  %547 = vmatprep.mubr.bf16.mxu1 %v1499_v2 }
  0x57   : > { %1248 = vmatmul.mubr.msk.bf16.gmra.mrb[32].mxu0 %vm308_vm0, %v1396_v16  ;;  %1192 = vmatmul.mubr.msk.bf16.gmra.mrb[32].mxu1 %vm308_vm0, %v1398_v18 }
  0x58   : > { %1251 = vmatprep.mubr.msk.bf16.mxu0 %vm1501_vm1, %v1500_v9  ;;  %557 = vmatprep.mubr.bf16.mxu1 %v1499_v2 }
  0x5f   : > { %1252 = vmatmul.mubr.msk.bf16.gmra.mrb[36].mxu0 %vm308_vm0, %v1398_v18  ;;  %1193 = vmatmul.mubr.msk.bf16.gmra.mrb[36].mxu1 %vm308_vm0, %v1404_v20 }
  0x60   : > { %1255 = vmatprep.mubr.msk.bf16.mxu0 %vm1501_vm1, %v1500_v9  ;;  %567 = vmatprep.mubr.bf16.mxu1 %v1499_v2 }
  0x67   : > { %1256 = vmatmul.mubr.msk.bf16.gmra.mrb[40].mxu0 %vm308_vm0, %v1404_v20  ;;  %1194 = vmatmul.mubr.msk.bf16.gmra.mrb[40].mxu1 %vm308_vm0, %v1406_v22 }
  0x68   : > { %1259 = vmatprep.mubr.msk.bf16.mxu0 %vm1501_vm1, %v1500_v9  ;;  %577 = vmatprep.mubr.bf16.mxu1 %v1499_v2 }
  0x6f   : > { %1260 = vmatmul.mubr.msk.bf16.gmra.mrb[44].mxu0 %vm308_vm0, %v1406_v22  ;;  %1195 = vmatmul.mubr.msk.bf16.gmra.mrb[44].mxu1 %vm308_vm0, %v1582_v10 }
  0x70   : > { %1263 = vmatprep.mubr.msk.bf16.mxu0 %vm1501_vm1, %v1500_v9  ;;  %587 = vmatprep.mubr.bf16.mxu1 %v1499_v2 }
  0x77   : > { %1264 = vmatmul.mubr.msk.bf16.gmra.mrb[48].mxu0 %vm308_vm0, %v1582_v10  ;;  %1196 = vmatmul.mubr.msk.bf16.gmra.mrb[48].mxu1 %vm308_vm0, %v1395_v15 }
  0x78   : > { %1267 = vmatprep.mubr.msk.bf16.mxu0 %vm1501_vm1, %v1500_v9  ;;  %597 = vmatprep.mubr.bf16.mxu1 %v1499_v2 }
  0x7f   : > { %1268 = vmatmul.mubr.msk.bf16.gmra.mrb[52].mxu0 %vm308_vm0, %v1395_v15  ;;  %1197 = vmatmul.mubr.msk.bf16.gmra.mrb[52].mxu1 %vm308_vm0, %v1397_v17 }
  0x80   : > { %1271 = vmatprep.mubr.msk.bf16.mxu0 %vm1501_vm1, %v1500_v9  ;;  %607 = vmatprep.mubr.bf16.mxu1 %v1499_v2 }
  0x87   : > { %1272 = vmatmul.mubr.msk.bf16.gmra.mrb[56].mxu0 %vm308_vm0, %v1397_v17  ;;  %1198 = vmatmul.mubr.msk.bf16.gmra.mrb[56].mxu1 %vm308_vm0, %v1403_v19 }
  0x88   : > { %1275 = vmatprep.mubr.msk.bf16.mxu0 %vm1501_vm1, %v1500_v9  ;;  %617 = vmatprep.mubr.bf16.mxu1 %v1499_v2 }
  0x8f   : > { %1276 = vmatmul.mubr.msk.bf16.gmra.mrb[60].mxu0 %vm308_vm0, %v1403_v19  ;;  %1199 = vmatmul.mubr.msk.bf16.gmra.mrb[60].mxu1 %vm308_vm0, %v1405_v21 }
  0x90   : > { %1279 = vmatprep.mubr.msk.bf16.mxu0 %vm1501_vm1, %v1500_v9 }
  0x97   : > { %1280 = vmatmul.mubr.msk.bf16.gmra.mrb[64].mxu0 %vm308_vm0, %v1405_v21 }
  0xea   : > { %v376_v23 = vpop.f32.mrb[0].mxu0  ;;  %v436_v25 = vpop.f32.mrb[0].mxu1 }
  0xeb   : > { %749 = vst [vmem:[%s1682_s25] sm:$0xff] %v376_v23  ;;  %v378_v24 = vpop.f32.mrb[1].mxu0  ;;  %809 = vst [vmem:[%s1682_s25 + $0x1e0] sm:$0xff] %v436_v25  ;;  %v438_v27 = vpop.f32.mrb[1].mxu1 }
  0xec   : > { %750 = vst [vmem:[%s1682_s25 + $0x8] sm:$0xff] %v378_v24  ;;  %v380_v26 = vpop.f32.mrb[2].mxu0  ;;  %810 = vst [vmem:[%s1682_s25 + $0x1e8] sm:$0xff] %v438_v27  ;;  %v440_v29 = vpop.f32.mrb[2].mxu1 }
  0xed   : > { %754 = vst [vmem:[%s1682_s25 + $0x28] sm:$0xff] %v380_v26  ;;  %v382_v28 = vpop.f32.mrb[3].mxu0  ;;  %814 = vst [vmem:[%s1682_s25 + $0x208] sm:$0xff] %v440_v29  ;;  %v442_v30 = vpop.f32.mrb[3].mxu1 }
  0xee   : > { %755 = vst [vmem:[%s1682_s25 + $0x30] sm:$0xff] %v382_v28  ;;  %815 = vst [vmem:[%s1682_s25 + $0x210] sm:$0xff] %v442_v30 }
  0xf2   : > { %v386_v31 = vpop.f32.mrb[4].mxu0  ;;  %v446_v33 = vpop.f32.mrb[4].mxu1 }
  0xf3   : > { %759 = vst [vmem:[%s1682_s25 + $0x50] sm:$0xff] %v386_v31  ;;  %v388_v32 = vpop.f32.mrb[5].mxu0  ;;  %819 = vst [vmem:[%s1682_s25 + $0x230] sm:$0xff] %v446_v33  ;;  %v448_v35 = vpop.f32.mrb[5].mxu1 }
  0xf4   : > { %760 = vst [vmem:[%s1682_s25 + $0x58] sm:$0xff] %v388_v32  ;;  %v390_v34 = vpop.f32.mrb[6].mxu0  ;;  %820 = vst [vmem:[%s1682_s25 + $0x238] sm:$0xff] %v448_v35  ;;  %v450_v37 = vpop.f32.mrb[6].mxu1 }
  0xf5   : > { %764 = vst [vmem:[%s1682_s25 + $0x78] sm:$0xff] %v390_v34  ;;  %v392_v36 = vpop.f32.mrb[7].mxu0  ;;  %824 = vst [vmem:[%s1682_s25 + $0x258] sm:$0xff] %v450_v37  ;;  %v452_v38 = vpop.f32.mrb[7].mxu1 }
  0xf6   : > { %765 = vst [vmem:[%s1682_s25 + $0x80] sm:$0xff] %v392_v36  ;;  %825 = vst [vmem:[%s1682_s25 + $0x260] sm:$0xff] %v452_v38 }
  0xfa   : > { %v396_v39 = vpop.f32.mrb[8].mxu0  ;;  %v456_v41 = vpop.f32.mrb[8].mxu1 }
  0xfb   : > { %769 = vst [vmem:[%s1682_s25 + $0xa0] sm:$0xff] %v396_v39  ;;  %v398_v40 = vpop.f32.mrb[9].mxu0  ;;  %829 = vst [vmem:[%s1682_s25 + $0x280] sm:$0xff] %v456_v41  ;;  %v458_v43 = vpop.f32.mrb[9].mxu1 }
  0xfc   : > { %770 = vst [vmem:[%s1682_s25 + $0xa8] sm:$0xff] %v398_v40  ;;  %v400_v42 = vpop.f32.mrb[10].mxu0  ;;  %830 = vst [vmem:[%s1682_s25 + $0x288] sm:$0xff] %v458_v43  ;;  %v460_v45 = vpop.f32.mrb[10].mxu1 }
  0xfd   : > { %774 = vst [vmem:[%s1682_s25 + $0xc8] sm:$0xff] %v400_v42  ;;  %v402_v44 = vpop.f32.mrb[11].mxu0  ;;  %834 = vst [vmem:[%s1682_s25 + $0x2a8] sm:$0xff] %v460_v45  ;;  %v462_v46 = vpop.f32.mrb[11].mxu1 }
  0xfe   : > { %775 = vst [vmem:[%s1682_s25 + $0xd0] sm:$0xff] %v402_v44  ;;  %835 = vst [vmem:[%s1682_s25 + $0x2b0] sm:$0xff] %v462_v46 }
 0x102   : > { %v406_v47 = vpop.f32.mrb[12].mxu0  ;;  %v466_v49 = vpop.f32.mrb[12].mxu1 }
 0x103   : > { %779 = vst [vmem:[%s1682_s25 + $0xf0] sm:$0xff] %v406_v47  ;;  %v408_v48 = vpop.f32.mrb[13].mxu0  ;;  %839 = vst [vmem:[%s1682_s25 + $0x2d0] sm:$0xff] %v466_v49  ;;  %v468_v51 = vpop.f32.mrb[13].mxu1 }
 0x104   : > { %780 = vst [vmem:[%s1682_s25 + $0xf8] sm:$0xff] %v408_v48  ;;  %v410_v50 = vpop.f32.mrb[14].mxu0  ;;  %840 = vst [vmem:[%s1682_s25 + $0x2d8] sm:$0xff] %v468_v51  ;;  %v470_v53 = vpop.f32.mrb[14].mxu1 }
 0x105   : > { %784 = vst [vmem:[%s1682_s25 + $0x118] sm:$0xff] %v410_v50  ;;  %v412_v52 = vpop.f32.mrb[15].mxu0  ;;  %844 = vst [vmem:[%s1682_s25 + $0x2f8] sm:$0xff] %v470_v53  ;;  %v472_v54 = vpop.f32.mrb[15].mxu1 }
 0x106   : > { %785 = vst [vmem:[%s1682_s25 + $0x120] sm:$0xff] %v412_v52  ;;  %845 = vst [vmem:[%s1682_s25 + $0x300] sm:$0xff] %v472_v54 }
 0x10a   : > { %v416_v55 = vpop.f32.mrb[16].mxu0  ;;  %v476_v57 = vpop.f32.mrb[16].mxu1 }
 0x10b   : > { %789 = vst [vmem:[%s1682_s25 + $0x140] sm:$0xff] %v416_v55  ;;  %v418_v56 = vpop.f32.mrb[17].mxu0  ;;  %849 = vst [vmem:[%s1682_s25 + $0x320] sm:$0xff] %v476_v57  ;;  %v478_v59 = vpop.f32.mrb[17].mxu1 }
 0x10c   : > { %790 = vst [vmem:[%s1682_s25 + $0x148] sm:$0xff] %v418_v56  ;;  %v420_v58 = vpop.f32.mrb[18].mxu0  ;;  %850 = vst [vmem:[%s1682_s25 + $0x328] sm:$0xff] %v478_v59  ;;  %v480_v61 = vpop.f32.mrb[18].mxu1 }
 0x10d   : > { %794 = vst [vmem:[%s1682_s25 + $0x168] sm:$0xff] %v420_v58  ;;  %v422_v60 = vpop.f32.mrb[19].mxu0  ;;  %854 = vst [vmem:[%s1682_s25 + $0x348] sm:$0xff] %v480_v61  ;;  %v482_v62 = vpop.f32.mrb[19].mxu1 }
 0x10e   : > { %795 = vst [vmem:[%s1682_s25 + $0x170] sm:$0xff] %v422_v60  ;;  %855 = vst [vmem:[%s1682_s25 + $0x350] sm:$0xff] %v482_v62 }
 0x112   : > { %v426_v63 = vpop.f32.mrb[20].mxu0  ;;  %v519_v1 = vpop.f32.mrb[20].mxu1 }
 0x113   : > { %799 = vst [vmem:[%s1682_s25 + $0x190] sm:$0xff] %v426_v63  ;;  %v428_v0 = vpop.f32.mrb[21].mxu0  ;;  %751 = vst [vmem:[%s1682_s25 + $0x10] sm:$0xff] %v519_v1  ;;  %v521_v3 = vpop.f32.mrb[21].mxu1 }
 0x114   : > { %800 = vst [vmem:[%s1682_s25 + $0x198] sm:$0xff] %v428_v0  ;;  %v430_v2 = vpop.f32.mrb[22].mxu0  ;;  %752 = vst [vmem:[%s1682_s25 + $0x18] sm:$0xff] %v521_v3  ;;  %v523_v5 = vpop.f32.mrb[22].mxu1 }
 0x115   : > { %804 = vst [vmem:[%s1682_s25 + $0x1b8] sm:$0xff] %v430_v2  ;;  %v432_v4 = vpop.f32.mrb[23].mxu0  ;;  %756 = vst [vmem:[%s1682_s25 + $0x38] sm:$0xff] %v523_v5  ;;  %v525_v6 = vpop.f32.mrb[23].mxu1 }
 0x116   : > { %805 = vst [vmem:[%s1682_s25 + $0x1c0] sm:$0xff] %v432_v4  ;;  %757 = vst [vmem:[%s1682_s25 + $0x40] sm:$0xff] %v525_v6 }
 0x11a   : > { %v662_v7 = vpop.f32.mrb[24].mxu0  ;;  %v529_v9 = vpop.f32.mrb[24].mxu1 }
 0x11b   : > { %753 = vst [vmem:[%s1682_s25 + $0x20] sm:$0xff] %v662_v7  ;;  %v1241_v8 = vpop.f32.mrb[25].mxu0  ;;  %761 = vst [vmem:[%s1682_s25 + $0x60] sm:$0xff] %v529_v9  ;;  %v531_v11 = vpop.f32.mrb[25].mxu1 }
 0x11c   : > { %v665_v10 = vpop.f32.mrb[26].mxu0  ;;  %762 = vst [vmem:[%s1682_s25 + $0x68] sm:$0xff] %v531_v11  ;;  %v533_v13 = vpop.f32.mrb[26].mxu1 }
 0x11d   : > { %758 = vst [vmem:[%s1682_s25 + $0x48] sm:$0xff] %v665_v10  ;;  %v1242_v12 = vpop.f32.mrb[27].mxu0  ;;  %766 = vst [vmem:[%s1682_s25 + $0x88] sm:$0xff] %v533_v13  ;;  %v535_v14 = vpop.f32.mrb[27].mxu1 }
 0x11e   : > { %767 = vst [vmem:[%s1682_s25 + $0x90] sm:$0xff] %v535_v14 }
 0x122   : > { %v670_v15 = vpop.f32.mrb[28].mxu0  ;;  %v539_v17 = vpop.f32.mrb[28].mxu1 }
 0x123   : > { %763 = vst [vmem:[%s1682_s25 + $0x70] sm:$0xff] %v670_v15  ;;  %v1245_v16 = vpop.f32.mrb[29].mxu0  ;;  %771 = vst [vmem:[%s1682_s25 + $0xb0] sm:$0xff] %v539_v17  ;;  %v541_v19 = vpop.f32.mrb[29].mxu1 }
 0x124   : > { %v673_v18 = vpop.f32.mrb[30].mxu0  ;;  %772 = vst [vmem:[%s1682_s25 + $0xb8] sm:$0xff] %v541_v19  ;;  %v543_v21 = vpop.f32.mrb[30].mxu1 }
 0x125   : > { %768 = vst [vmem:[%s1682_s25 + $0x98] sm:$0xff] %v673_v18  ;;  %v1246_v20 = vpop.f32.mrb[31].mxu0  ;;  %776 = vst [vmem:[%s1682_s25 + $0xd8] sm:$0xff] %v543_v21  ;;  %v545_v22 = vpop.f32.mrb[31].mxu1 }
 0x126   : > { %777 = vst [vmem:[%s1682_s25 + $0xe0] sm:$0xff] %v545_v22 }
 0x12a   : > { %v678_v23 = vpop.f32.mrb[32].mxu0  ;;  %v549_v25 = vpop.f32.mrb[32].mxu1 }
 0x12b   : > { %773 = vst [vmem:[%s1682_s25 + $0xc0] sm:$0xff] %v678_v23  ;;  %v1249_v24 = vpop.f32.mrb[33].mxu0  ;;  %781 = vst [vmem:[%s1682_s25 + $0x100] sm:$0xff] %v549_v25  ;;  %v551_v27 = vpop.f32.mrb[33].mxu1 }
 0x12c   : > { %v681_v26 = vpop.f32.mrb[34].mxu0  ;;  %782 = vst [vmem:[%s1682_s25 + $0x108] sm:$0xff] %v551_v27  ;;  %v553_v29 = vpop.f32.mrb[34].mxu1 }
 0x12d   : > { %778 = vst [vmem:[%s1682_s25 + $0xe8] sm:$0xff] %v681_v26  ;;  %v1250_v28 = vpop.f32.mrb[35].mxu0  ;;  %786 = vst [vmem:[%s1682_s25 + $0x128] sm:$0xff] %v553_v29  ;;  %v555_v30 = vpop.f32.mrb[35].mxu1 }
 0x12e   : > { %787 = vst [vmem:[%s1682_s25 + $0x130] sm:$0xff] %v555_v30 }
 0x132   : > { %v686_v31 = vpop.f32.mrb[36].mxu0  ;;  %v559_v33 = vpop.f32.mrb[36].mxu1 }
 0x133   : > { %783 = vst [vmem:[%s1682_s25 + $0x110] sm:$0xff] %v686_v31  ;;  %v1253_v32 = vpop.f32.mrb[37].mxu0  ;;  %791 = vst [vmem:[%s1682_s25 + $0x150] sm:$0xff] %v559_v33  ;;  %v561_v35 = vpop.f32.mrb[37].mxu1 }
 0x134   : > { %v689_v34 = vpop.f32.mrb[38].mxu0  ;;  %792 = vst [vmem:[%s1682_s25 + $0x158] sm:$0xff] %v561_v35  ;;  %v563_v37 = vpop.f32.mrb[38].mxu1 }
 0x135   : > { %788 = vst [vmem:[%s1682_s25 + $0x138] sm:$0xff] %v689_v34  ;;  %v1254_v36 = vpop.f32.mrb[39].mxu0  ;;  %796 = vst [vmem:[%s1682_s25 + $0x178] sm:$0xff] %v563_v37  ;;  %v565_v38 = vpop.f32.mrb[39].mxu1 }
 0x136   : > { %797 = vst [vmem:[%s1682_s25 + $0x180] sm:$0xff] %v565_v38 }
 0x13a   : > { %v694_v39 = vpop.f32.mrb[40].mxu0  ;;  %v569_v41 = vpop.f32.mrb[40].mxu1 }
 0x13b   : > { %793 = vst [vmem:[%s1682_s25 + $0x160] sm:$0xff] %v694_v39  ;;  %v1257_v40 = vpop.f32.mrb[41].mxu0  ;;  %801 = vst [vmem:[%s1682_s25 + $0x1a0] sm:$0xff] %v569_v41  ;;  %v571_v43 = vpop.f32.mrb[41].mxu1 }
 0x13c   : > { %v697_v42 = vpop.f32.mrb[42].mxu0  ;;  %802 = vst [vmem:[%s1682_s25 + $0x1a8] sm:$0xff] %v571_v43  ;;  %v573_v45 = vpop.f32.mrb[42].mxu1 }
 0x13d   : > { %798 = vst [vmem:[%s1682_s25 + $0x188] sm:$0xff] %v697_v42  ;;  %v1258_v44 = vpop.f32.mrb[43].mxu0  ;;  %806 = vst [vmem:[%s1682_s25 + $0x1c8] sm:$0xff] %v573_v45  ;;  %v575_v46 = vpop.f32.mrb[43].mxu1 }
 0x13e   : > { %807 = vst [vmem:[%s1682_s25 + $0x1d0] sm:$0xff] %v575_v46 }
 0x142   : > { %v702_v47 = vpop.f32.mrb[44].mxu0  ;;  %v579_v49 = vpop.f32.mrb[44].mxu1 }
 0x143   : > { %803 = vst [vmem:[%s1682_s25 + $0x1b0] sm:$0xff] %v702_v47  ;;  %v1261_v48 = vpop.f32.mrb[45].mxu0  ;;  %811 = vst [vmem:[%s1682_s25 + $0x1f0] sm:$0xff] %v579_v49  ;;  %v581_v51 = vpop.f32.mrb[45].mxu1 }
 0x144   : > { %v705_v50 = vpop.f32.mrb[46].mxu0  ;;  %812 = vst [vmem:[%s1682_s25 + $0x1f8] sm:$0xff] %v581_v51  ;;  %v583_v53 = vpop.f32.mrb[46].mxu1 }
 0x145   : > { %808 = vst [vmem:[%s1682_s25 + $0x1d8] sm:$0xff] %v705_v50  ;;  %v1262_v52 = vpop.f32.mrb[47].mxu0  ;;  %816 = vst [vmem:[%s1682_s25 + $0x218] sm:$0xff] %v583_v53  ;;  %v585_v54 = vpop.f32.mrb[47].mxu1 }
 0x146   : > { %817 = vst [vmem:[%s1682_s25 + $0x220] sm:$0xff] %v585_v54 }
 0x14a   : > { %v710_v55 = vpop.f32.mrb[48].mxu0  ;;  %v589_v57 = vpop.f32.mrb[48].mxu1 }
 0x14b   : > { %813 = vst [vmem:[%s1682_s25 + $0x200] sm:$0xff] %v710_v55  ;;  %v1265_v56 = vpop.f32.mrb[49].mxu0  ;;  %821 = vst [vmem:[%s1682_s25 + $0x240] sm:$0xff] %v589_v57  ;;  %v591_v59 = vpop.f32.mrb[49].mxu1 }
 0x14c   : > { %v713_v58 = vpop.f32.mrb[50].mxu0  ;;  %822 = vst [vmem:[%s1682_s25 + $0x248] sm:$0xff] %v591_v59  ;;  %v593_v61 = vpop.f32.mrb[50].mxu1 }
 0x14d   : > { %818 = vst [vmem:[%s1682_s25 + $0x228] sm:$0xff] %v713_v58  ;;  %v1266_v60 = vpop.f32.mrb[51].mxu0  ;;  %826 = vst [vmem:[%s1682_s25 + $0x268] sm:$0xff] %v593_v61  ;;  %v595_v62 = vpop.f32.mrb[51].mxu1 }
 0x14e   : > { %827 = vst [vmem:[%s1682_s25 + $0x270] sm:$0xff] %v595_v62 }
 0x152   : > { %v718_v63 = vpop.f32.mrb[52].mxu0  ;;  %v599_v1 = vpop.f32.mrb[52].mxu1 }
 0x153   : > { %823 = vst [vmem:[%s1682_s25 + $0x250] sm:$0xff] %v718_v63  ;;  %v1269_v0 = vpop.f32.mrb[53].mxu0  ;;  %831 = vst [vmem:[%s1682_s25 + $0x290] sm:$0xff] %v599_v1  ;;  %v601_v3 = vpop.f32.mrb[53].mxu1 }
 0x154   : > { %v721_v2 = vpop.f32.mrb[54].mxu0  ;;  %832 = vst [vmem:[%s1682_s25 + $0x298] sm:$0xff] %v601_v3  ;;  %v603_v5 = vpop.f32.mrb[54].mxu1 }
 0x155   : > { %828 = vst [vmem:[%s1682_s25 + $0x278] sm:$0xff] %v721_v2  ;;  %v1270_v4 = vpop.f32.mrb[55].mxu0  ;;  %836 = vst [vmem:[%s1682_s25 + $0x2b8] sm:$0xff] %v603_v5  ;;  %v605_v6 = vpop.f32.mrb[55].mxu1 }
 0x156   : > { %837 = vst [vmem:[%s1682_s25 + $0x2c0] sm:$0xff] %v605_v6 }
 0x15a   : > { %v726_v7 = vpop.f32.mrb[56].mxu0  ;;  %v609_v9 = vpop.f32.mrb[56].mxu1 }
 0x15b   : > { %833 = vst [vmem:[%s1682_s25 + $0x2a0] sm:$0xff] %v726_v7  ;;  %v1273_v8 = vpop.f32.mrb[57].mxu0  ;;  %841 = vst [vmem:[%s1682_s25 + $0x2e0] sm:$0xff] %v609_v9  ;;  %v611_v11 = vpop.f32.mrb[57].mxu1 }
 0x15c   : > { %v729_v10 = vpop.f32.mrb[58].mxu0  ;;  %842 = vst [vmem:[%s1682_s25 + $0x2e8] sm:$0xff] %v611_v11  ;;  %v613_v13 = vpop.f32.mrb[58].mxu1 }
 0x15d   : > { %838 = vst [vmem:[%s1682_s25 + $0x2c8] sm:$0xff] %v729_v10  ;;  %v1274_v12 = vpop.f32.mrb[59].mxu0  ;;  %846 = vst [vmem:[%s1682_s25 + $0x308] sm:$0xff] %v613_v13  ;;  %v615_v14 = vpop.f32.mrb[59].mxu1 }
 0x15e   : > { %847 = vst [vmem:[%s1682_s25 + $0x310] sm:$0xff] %v615_v14 }
 0x162   : > { %v734_v15 = vpop.f32.mrb[60].mxu0  ;;  %v619_v17 = vpop.f32.mrb[60].mxu1 }
 0x163   : > { %843 = vst [vmem:[%s1682_s25 + $0x2f0] sm:$0xff] %v734_v15  ;;  %v1277_v16 = vpop.f32.mrb[61].mxu0  ;;  %851 = vst [vmem:[%s1682_s25 + $0x330] sm:$0xff] %v619_v17  ;;  %v621_v19 = vpop.f32.mrb[61].mxu1 }
 0x164   : > { %v737_v18 = vpop.f32.mrb[62].mxu0  ;;  %852 = vst [vmem:[%s1682_s25 + $0x338] sm:$0xff] %v621_v19  ;;  %v623_v21 = vpop.f32.mrb[62].mxu1 }
 0x165   : > { %848 = vst [vmem:[%s1682_s25 + $0x318] sm:$0xff] %v737_v18  ;;  %v1278_v20 = vpop.f32.mrb[63].mxu0  ;;  %856 = vst [vmem:[%s1682_s25 + $0x358] sm:$0xff] %v623_v21  ;;  %v625_v22 = vpop.f32.mrb[63].mxu1 }
 0x166   : > { %857 = vst [vmem:[%s1682_s25 + $0x360] sm:$0xff] %v625_v22 }
 0x167   : > { %865 = sbr.rel (!%p1542_p4) target bundleno = 452 (0x1c4), region = 32 }
 0x16a   : > { %v742_v23 = vpop.f32.mrb[64].mxu0 }
 0x16b   : > { %853 = vst [vmem:[%s1682_s25 + $0x340] sm:$0xff] %v742_v23  ;;  %v1281_v24 = vpop.f32.mrb[65].mxu0 }
 0x16c   : > { %v745_v25 = vpop.f32.mrb[66].mxu0 }
 0x16d   : > { %858 = vst [vmem:[%s1682_s25 + $0x368] sm:$0xff] %v745_v25  ;;  %v1282_v26 = vpop.f32.mrb[67].mxu0 }
 0x16e   : > { %s2041_s9 = smov (!%p868_p8, %s867_s9), 22 }
 0x16f   : > { %s1212_s30 = smul.u32 640, %s2041_s9 }
 0x171   : > { %p1215_p9 = scmp.eq.s32.totalorder %s1212_s30, 0 }
 0x172   : > { %1407 = sdivrem.u32 (!%p1215_p9), %s2041_s9, 13 }
 0x173   : > { %878 = sbr.rel (%p1215_p9) target bundleno = 452 (0x1c4), region = 36 }
 0x17b   : > { %s1807_s17 = spop.drf %1407 }
 0x17c   : > { %p1216_p10 = scmp.le.s32.totalorder %s1807_s17, 0 }
 0x17d   : > { %s2029_s12 = smov (!%p1216_p10), %s1801_s29  ;;  %s2030_s20 = smov (!%p1216_p10), %s1682_s25 }
 0x17e   : > { %1108 = sbr.rel (%p1216_p10) target bundleno = 423 (0x1a7), region = 84  ;;  %s1816_s3 = smov (!%p1216_p10), 0  }
 0x17f   : > { %s1818_s4 = smov (!%p1216_p10), 0  }
 0x185 LB: >> { %v892_v27 = vld [vmem:[%s1473_s20] sm:$0xff]  ;;  %v894_v28 = vld [vmem:[%s1473_s20 + $0x28] sm:$0xff]  ;;  %v896_v29 = vld [vmem:[%s1473_s20 + $0x50] sm:$0xff]  ;;  %s1022_s5 = sadd.s32 1, %s1477_s3  ;;  %s886_s4 = sadd.s32 1, %s1481_s4   ;;  %s1481_s4 = sphi %s1818_s4, %s886_s4   ;;  %s1477_s3 = sphi %s1816_s3, %s2033_s3   ;;  %s1473_s20 = sphi %s2030_s20, %s2032_s20   ;;  %s1469_s12 = sphi %s2029_s12, %s2031_s12  }
 0x186   : >> { %893 = vst [vmem:[%s1469_s12] sm:$0xff] %v892_v27  ;;  %895 = vst [vmem:[%s1469_s12 + $0x28] sm:$0xff] %v894_v28  ;;  %v898_v30 = vld [vmem:[%s1473_s20 + $0x78] sm:$0xff]  ;;  %v900_v31 = vld [vmem:[%s1473_s20 + $0xa0] sm:$0xff]  ;;  %p1023_p11 = scmp.ge.s32.totalorder %s1022_s5, %s1807_s17  ;;  %p885_p12 = scmp.ge.s32.totalorder %s886_s4, %s1807_s17 }
 0x187   : >> { %897 = vst [vmem:[%s1469_s12 + $0x50] sm:$0xff] %v896_v29  ;;  %v902_v32 = vld [vmem:[%s1473_s20 + $0xc8] sm:$0xff]  ;;  %899 = vst [vmem:[%s1469_s12 + $0x78] sm:$0xff] %v898_v30  ;;  %v904_v33 = vld [vmem:[%s1473_s20 + $0xf0] sm:$0xff] }
 0x188   : >> { %901 = vst [vmem:[%s1469_s12 + $0xa0] sm:$0xff] %v900_v31  ;;  %903 = vst [vmem:[%s1469_s12 + $0xc8] sm:$0xff] %v902_v32  ;;  %v906_v34 = vld [vmem:[%s1473_s20 + $0x118] sm:$0xff]  ;;  %v908_v35 = vld [vmem:[%s1473_s20 + $0x140] sm:$0xff]  ;;  %s2043_s5 = smov (%p1023_p11, %s1022_s5), 0 }
 0x189   : >> { %905 = vst [vmem:[%s1469_s12 + $0xf0] sm:$0xff] %v904_v33  ;;  %907 = vst [vmem:[%s1469_s12 + $0x118] sm:$0xff] %v906_v34  ;;  %v910_v36 = vld [vmem:[%s1473_s20 + $0x168] sm:$0xff]  ;;  %v912_v37 = vld [vmem:[%s1473_s20 + $0x190] sm:$0xff]  ;;  %s1025_s6 = smul.u32 520, %s2043_s5  ;;  %s2033_s3 = smov %s2043_s5 }
 0x18a   : >> { %909 = vst [vmem:[%s1469_s12 + $0x140] sm:$0xff] %v908_v35  ;;  %v914_v38 = vld [vmem:[%s1473_s20 + $0x1b8] sm:$0xff]  ;;  %911 = vst [vmem:[%s1469_s12 + $0x168] sm:$0xff] %v910_v36  ;;  %v916_v39 = vld [vmem:[%s1473_s20 + $0x1e0] sm:$0xff] }
 0x18b   : >> { %913 = vst [vmem:[%s1469_s12 + $0x190] sm:$0xff] %v912_v37  ;;  %915 = vst [vmem:[%s1469_s12 + $0x1b8] sm:$0xff] %v914_v38  ;;  %v918_v40 = vld [vmem:[%s1473_s20 + $0x8] sm:$0xff]  ;;  %v920_v41 = vld [vmem:[%s1473_s20 + $0x30] sm:$0xff]  ;;  %s1880_s7 = scalar_lea.vmem %s1682_s25, %s1025_s6 [#allocation2]   ;;  %s1883_s8 = scalar_lea.vmem %s1801_s29, %s1025_s6  }
 0x18c   : >> { %917 = vst [vmem:[%s1469_s12 + $0x1e0] sm:$0xff] %v916_v39  ;;  %919 = vst [vmem:[%s1469_s12 + $0x8] sm:$0xff] %v918_v40  ;;  %v922_v42 = vld [vmem:[%s1473_s20 + $0x58] sm:$0xff]  ;;  %v924_v43 = vld [vmem:[%s1473_s20 + $0x80] sm:$0xff] }
 0x18d   : >> { %921 = vst [vmem:[%s1469_s12 + $0x30] sm:$0xff] %v920_v41  ;;  %v926_v44 = vld [vmem:[%s1473_s20 + $0xa8] sm:$0xff]  ;;  %923 = vst [vmem:[%s1469_s12 + $0x58] sm:$0xff] %v922_v42  ;;  %v928_v45 = vld [vmem:[%s1473_s20 + $0xd0] sm:$0xff] }
 0x18e   : >> { %925 = vst [vmem:[%s1469_s12 + $0x80] sm:$0xff] %v924_v43  ;;  %927 = vst [vmem:[%s1469_s12 + $0xa8] sm:$0xff] %v926_v44  ;;  %v930_v46 = vld [vmem:[%s1473_s20 + $0xf8] sm:$0xff]  ;;  %v932_v47 = vld [vmem:[%s1473_s20 + $0x120] sm:$0xff] }
 0x18f   : >> { %929 = vst [vmem:[%s1469_s12 + $0xd0] sm:$0xff] %v928_v45  ;;  %931 = vst [vmem:[%s1469_s12 + $0xf8] sm:$0xff] %v930_v46  ;;  %v934_v48 = vld [vmem:[%s1473_s20 + $0x148] sm:$0xff]  ;;  %v936_v49 = vld [vmem:[%s1473_s20 + $0x170] sm:$0xff] }
 0x190   : >> { %933 = vst [vmem:[%s1469_s12 + $0x120] sm:$0xff] %v932_v47  ;;  %v938_v50 = vld [vmem:[%s1473_s20 + $0x198] sm:$0xff]  ;;  %935 = vst [vmem:[%s1469_s12 + $0x148] sm:$0xff] %v934_v48  ;;  %v940_v51 = vld [vmem:[%s1473_s20 + $0x1c0] sm:$0xff] }
 0x191   : >> { %937 = vst [vmem:[%s1469_s12 + $0x170] sm:$0xff] %v936_v49  ;;  %939 = vst [vmem:[%s1469_s12 + $0x198] sm:$0xff] %v938_v50  ;;  %v942_v52 = vld [vmem:[%s1473_s20 + $0x1e8] sm:$0xff]  ;;  %v944_v53 = vld [vmem:[%s1473_s20 + $0x10] sm:$0xff] }
 0x192   : >> { %941 = vst [vmem:[%s1469_s12 + $0x1c0] sm:$0xff] %v940_v51  ;;  %943 = vst [vmem:[%s1469_s12 + $0x1e8] sm:$0xff] %v942_v52  ;;  %v946_v54 = vld [vmem:[%s1473_s20 + $0x38] sm:$0xff]  ;;  %v948_v55 = vld [vmem:[%s1473_s20 + $0x60] sm:$0xff] }
 0x193   : >> { %945 = vst [vmem:[%s1469_s12 + $0x10] sm:$0xff] %v944_v53  ;;  %v950_v56 = vld [vmem:[%s1473_s20 + $0x88] sm:$0xff]  ;;  %947 = vst [vmem:[%s1469_s12 + $0x38] sm:$0xff] %v946_v54  ;;  %v952_v57 = vld [vmem:[%s1473_s20 + $0xb0] sm:$0xff] }
 0x194   : >> { %949 = vst [vmem:[%s1469_s12 + $0x60] sm:$0xff] %v948_v55  ;;  %951 = vst [vmem:[%s1469_s12 + $0x88] sm:$0xff] %v950_v56  ;;  %v954_v58 = vld [vmem:[%s1473_s20 + $0xd8] sm:$0xff]  ;;  %v956_v59 = vld [vmem:[%s1473_s20 + $0x100] sm:$0xff] }
 0x195   : >> { %953 = vst [vmem:[%s1469_s12 + $0xb0] sm:$0xff] %v952_v57  ;;  %955 = vst [vmem:[%s1469_s12 + $0xd8] sm:$0xff] %v954_v58  ;;  %v958_v60 = vld [vmem:[%s1473_s20 + $0x128] sm:$0xff]  ;;  %v960_v61 = vld [vmem:[%s1473_s20 + $0x150] sm:$0xff] }
 0x196   : >> { %957 = vst [vmem:[%s1469_s12 + $0x100] sm:$0xff] %v956_v59  ;;  %v962_v62 = vld [vmem:[%s1473_s20 + $0x178] sm:$0xff]  ;;  %959 = vst [vmem:[%s1469_s12 + $0x128] sm:$0xff] %v958_v60  ;;  %v964_v63 = vld [vmem:[%s1473_s20 + $0x1a0] sm:$0xff] }
 0x197   : >> { %961 = vst [vmem:[%s1469_s12 + $0x150] sm:$0xff] %v960_v61  ;;  %963 = vst [vmem:[%s1469_s12 + $0x178] sm:$0xff] %v962_v62  ;;  %v966_v0 = vld [vmem:[%s1473_s20 + $0x1c8] sm:$0xff]  ;;  %v968_v1 = vld [vmem:[%s1473_s20 + $0x1f0] sm:$0xff] }
 0x198   : >> { %965 = vst [vmem:[%s1469_s12 + $0x1a0] sm:$0xff] %v964_v63  ;;  %967 = vst [vmem:[%s1469_s12 + $0x1c8] sm:$0xff] %v966_v0  ;;  %v970_v2 = vld [vmem:[%s1473_s20 + $0x18] sm:$0xff]  ;;  %v972_v3 = vld [vmem:[%s1473_s20 + $0x40] sm:$0xff] }
 0x199   : >> { %969 = vst [vmem:[%s1469_s12 + $0x1f0] sm:$0xff] %v968_v1  ;;  %v974_v4 = vld [vmem:[%s1473_s20 + $0x68] sm:$0xff]  ;;  %971 = vst [vmem:[%s1469_s12 + $0x18] sm:$0xff] %v970_v2  ;;  %v976_v5 = vld [vmem:[%s1473_s20 + $0x90] sm:$0xff] }
 0x19a   : >> { %973 = vst [vmem:[%s1469_s12 + $0x40] sm:$0xff] %v972_v3  ;;  %975 = vst [vmem:[%s1469_s12 + $0x68] sm:$0xff] %v974_v4  ;;  %v978_v6 = vld [vmem:[%s1473_s20 + $0xb8] sm:$0xff]  ;;  %v980_v7 = vld [vmem:[%s1473_s20 + $0xe0] sm:$0xff] }
 0x19b   : >> { %977 = vst [vmem:[%s1469_s12 + $0x90] sm:$0xff] %v976_v5  ;;  %979 = vst [vmem:[%s1469_s12 + $0xb8] sm:$0xff] %v978_v6  ;;  %v982_v8 = vld [vmem:[%s1473_s20 + $0x108] sm:$0xff]  ;;  %v984_v9 = vld [vmem:[%s1473_s20 + $0x130] sm:$0xff] }
 0x19c   : >> { %981 = vst [vmem:[%s1469_s12 + $0xe0] sm:$0xff] %v980_v7  ;;  %v986_v10 = vld [vmem:[%s1473_s20 + $0x158] sm:$0xff]  ;;  %983 = vst [vmem:[%s1469_s12 + $0x108] sm:$0xff] %v982_v8  ;;  %v988_v11 = vld [vmem:[%s1473_s20 + $0x180] sm:$0xff] }
 0x19d   : >> { %985 = vst [vmem:[%s1469_s12 + $0x130] sm:$0xff] %v984_v9  ;;  %987 = vst [vmem:[%s1469_s12 + $0x158] sm:$0xff] %v986_v10  ;;  %v990_v12 = vld [vmem:[%s1473_s20 + $0x1a8] sm:$0xff]  ;;  %v992_v13 = vld [vmem:[%s1473_s20 + $0x1d0] sm:$0xff] }
 0x19e   : >> { %989 = vst [vmem:[%s1469_s12 + $0x180] sm:$0xff] %v988_v11  ;;  %991 = vst [vmem:[%s1469_s12 + $0x1a8] sm:$0xff] %v990_v12  ;;  %v994_v14 = vld [vmem:[%s1473_s20 + $0x1f8] sm:$0xff]  ;;  %v996_v15 = vld [vmem:[%s1473_s20 + $0x20] sm:$0xff] }
 0x19f   : >> { %993 = vst [vmem:[%s1469_s12 + $0x1d0] sm:$0xff] %v992_v13  ;;  %v998_v16 = vld [vmem:[%s1473_s20 + $0x48] sm:$0xff]  ;;  %995 = vst [vmem:[%s1469_s12 + $0x1f8] sm:$0xff] %v994_v14  ;;  %v1000_v17 = vld [vmem:[%s1473_s20 + $0x70] sm:$0xff] }
 0x1a0   : >> { %997 = vst [vmem:[%s1469_s12 + $0x20] sm:$0xff] %v996_v15  ;;  %999 = vst [vmem:[%s1469_s12 + $0x48] sm:$0xff] %v998_v16  ;;  %v1002_v18 = vld [vmem:[%s1473_s20 + $0x98] sm:$0xff]  ;;  %v1004_v19 = vld [vmem:[%s1473_s20 + $0xc0] sm:$0xff]  ;;  %888 = sbr.rel (!%p885_p12) target bundleno = 389 (0x185), region = 90 }
 0x1a1   : >> { %1001 = vst [vmem:[%s1469_s12 + $0x70] sm:$0xff] %v1000_v17  ;;  %1003 = vst [vmem:[%s1469_s12 + $0x98] sm:$0xff] %v1002_v18  ;;  %v1006_v20 = vld [vmem:[%s1473_s20 + $0xe8] sm:$0xff]  ;;  %v1008_v21 = vld [vmem:[%s1473_s20 + $0x110] sm:$0xff] }
 0x1a2   : >> { %1005 = vst [vmem:[%s1469_s12 + $0xc0] sm:$0xff] %v1004_v19  ;;  %v1010_v22 = vld [vmem:[%s1473_s20 + $0x138] sm:$0xff]  ;;  %1007 = vst [vmem:[%s1469_s12 + $0xe8] sm:$0xff] %v1006_v20  ;;  %v1012_v23 = vld [vmem:[%s1473_s20 + $0x160] sm:$0xff] }
 0x1a3   : >> { %1009 = vst [vmem:[%s1469_s12 + $0x110] sm:$0xff] %v1008_v21  ;;  %1011 = vst [vmem:[%s1469_s12 + $0x138] sm:$0xff] %v1010_v22  ;;  %v1014_v24 = vld [vmem:[%s1473_s20 + $0x188] sm:$0xff]  ;;  %v1016_v25 = vld [vmem:[%s1473_s20 + $0x1b0] sm:$0xff] }
 0x1a4   : >> { %1013 = vst [vmem:[%s1469_s12 + $0x160] sm:$0xff] %v1012_v23  ;;  %1015 = vst [vmem:[%s1469_s12 + $0x188] sm:$0xff] %v1014_v24  ;;  %v1018_v26 = vld [vmem:[%s1473_s20 + $0x1d8] sm:$0xff]  ;;  %v1020_v27 = vld [vmem:[%s1473_s20 + $0x200] sm:$0xff]  ;;  %s2032_s20 = smov %s1880_s7 }
 0x1a5   : >> { %1017 = vst [vmem:[%s1469_s12 + $0x1b0] sm:$0xff] %v1016_v25  ;;  %1019 = vst [vmem:[%s1469_s12 + $0x1d8] sm:$0xff] %v1018_v26 }
 0x1a6   : >> { %1021 = vst [vmem:[%s1469_s12 + $0x200] sm:$0xff] %v1020_v27  ;;  %s2031_s12 = smov %s1883_s8 }
 0x1a7 PF: > { %1409 = sdivrem.u32 %s2041_s9, 13 }
 0x1a8   : > { %s1217_s11 = smul.u32 520, %s1807_s17 }
 0x1aa   : > { %s1986_s14 = scalar_lea.vmem %s1682_s25, %s1217_s11 [#allocation2]   ;;  %s1989_s15 = scalar_lea.vmem %s1801_s29, %s1217_s11  }
 0x1b0   : > { %s1991_s18 = spop.drf %1409 }
 0x1b1   : > { %p1219_p13 = scmp.le.s32.totalorder %s1991_s18, 0 }
 0x1b2   : > { %s2034_s19 = smov (!%p1219_p13), %s1989_s15  ;;  %s2035_s21 = smov (!%p1219_p13), %s1986_s14 }
 0x1b3   : > { %1122 = sbr.rel (%p1219_p13) target bundleno = 452 (0x1c4), region = 95  ;;  %s2000_s22 = smov (!%p1219_p13), 0  }
 0x1b4   : > { %s1495_s23 = smov (!%p1219_p13), 0  }
 0x1ba LB: >> { %v1045_v28 = vld [vmem:[%s1489_s21] sm:$0xff]  ;;  %v1047_v29 = vld [vmem:[%s1489_s21 + $0x8] sm:$0xff]  ;;  %v1049_v30 = vld [vmem:[%s1489_s21 + $0x10] sm:$0xff]  ;;  %s1055_s24 = sadd.s32 1, %s1493_s22  ;;  %s1039_s23 = sadd.s32 1, %s1497_s23   ;;  %s1497_s23 = sphi %s1495_s23, %s1039_s23   ;;  %s1493_s22 = sphi %s2000_s22, %s2036_s22   ;;  %s1489_s21 = sphi %s2035_s21, %s1060_s21   ;;  %s1485_s19 = sphi %s2034_s19, %s1061_s19  }
 0x1bb   : >> { %1046 = vst [vmem:[%s1485_s19] sm:$0xff] %v1045_v28  ;;  %1048 = vst [vmem:[%s1485_s19 + $0x8] sm:$0xff] %v1047_v29  ;;  %v1051_v31 = vld [vmem:[%s1489_s21 + $0x18] sm:$0xff]  ;;  %v1053_v32 = vld [vmem:[%s1489_s21 + $0x20] sm:$0xff]  ;;  %p1056_p0 = scmp.ge.s32.totalorder %s1055_s24, %s1991_s18  ;;  %p1038_p1 = scmp.ge.s32.totalorder %s1039_s23, %s1991_s18 }
 0x1bc   : >> { %1050 = vst [vmem:[%s1485_s19 + $0x10] sm:$0xff] %v1049_v30  ;;  %1052 = vst [vmem:[%s1485_s19 + $0x18] sm:$0xff] %v1051_v31 }
 0x1bd   : >> { %1054 = vst [vmem:[%s1485_s19 + $0x20] sm:$0xff] %v1053_v32  ;;  %s2045_s24 = smov (%p1056_p0, %s1055_s24), 0  ;;  %1041 = sbr.rel (!%p1038_p1) target bundleno = 442 (0x1ba), region = 101 }
 0x1be   : >> { %s1058_s25 = smul.u32 40, %s2045_s24  ;;  %s2036_s22 = smov %s2045_s24 }
 0x1c0   : >> { %s1060_s21 = scalar_lea.vmem %s1986_s14, %s1058_s25 [#allocation2]   ;;  %s1061_s19 = scalar_lea.vmem %s1989_s15, %s1058_s25  }
 0x1c4 PF: > { %p9_p2 = scmp.ge.s32.totalorder %s1532_s13, 4   ;;  %s2037_s9 = smov %s1461_s10 }
 0x1c5   : > { %s2038_s10 = smov %s1540_s16  ;;  %s2039_s11 = smov %s1532_s13 }
 0x1c6   :  { %11 = sbr.rel (!%p9_p2) target bundleno = 2 (0x2), region = 112 }

// kernel: vae_forward.19
= control target key start
LH: loop header
LB: loop body
LE: loop exit
PB: predicated region body
PF: predicated region fallthrough
CT: control target
= control target key end

     0   :  { %s1732_s9 = smov 0   ;;  %s1734_s10 = smov 0   ;;  %s2111_s0 = inlined_call_operand.vmem [shape: bf16[1800,16], index: 0, kind: input, shape index: {}]   ;;  %s2112_s1 = inlined_call_operand.vmem [shape: bf16[16,128], index: 1, kind: input, shape index: {}]   ;;  %s2113_s2 = inlined_call_operand.vmem [shape: f32[1800,128], index: 2, kind: output, shape index: {}]  }
   0x1   :  { %s1736_s11 = smov 0  }
   0x2 LB: > { %s1745_s12 = sadd.s32 4294967295, %s1683_s11   ;;  %s1747_s13 = sadd.s32 1, %s1683_s11   ;;  %s1683_s11 = sphi %s1736_s11, %s2122_s11   ;;  %s1679_s10 = sphi %s1734_s10, %s2121_s10   ;;  %s1675_s9 = sphi %s1732_s9, %s2120_s9  }
   0x3   : > { %s63_s14 = ssub.s32 %s1683_s11, %s1747_s13  ;;  %s66_s15 = sadd.s32 1, %s1679_s10 }
   0x4   : > { %p64_p0 = scmp.eq.s32.totalorder %s63_s14, 0  ;;  %p76_p1 = scmp.ne.s32.totalorder %s1679_s10, %s1675_s9 }
   0x5   : > { %p77_p2 = scmp.eq.s32.totalorder %s1745_s12, 3  ;;  %p1318_p3 = scmp.ge.s32.totalorder %s1683_s11, 1 }
   0x6   : > { %s1755_s16 = scalar_select %p64_p0, %s1679_s10, %s66_s15  }
   0x7   : > { %p1757_p4 = por %p77_p2, %p76_p1  ;;  %p121_p5 = scmp.lt.s32.totalorder %s1683_s11, 5 }
   0x9   : > { %p122_p6 = pnand %p1318_p3, %p121_p5 }
   0xa   : > { %v1596_v0 = vld [vmem:[%s2112_s1] sm:$0xff] (!%p122_p6)   ;;  %s1765_s20 = sshll.u32 (!%p122_p6), %s1745_s12, 6  ;;  %vm398_vm0 = vcmask (!%p122_p6), 130048   ;;  %s143_s26 = sand.u32 (!%p122_p6), 1, %s1675_s9  }
   0xb   : > { %125 = sbr.rel (%p122_p6) target bundleno = 369 (0x171), region = 28  ;;  %p151_p7 = scmp.lt.s32.totalorder (!%p122_p6), %s1765_s20, 224  ;;  %1440 = vmatprep.subr.bf16.mxu0 (!%p122_p6), %v1596_v0  ;;  %1506 = vmatprep.subr.bf16.mxu1 (!%p122_p6), %v1596_v0 }
   0xc   : > { %1441 = vmatpush3.bf16.msra.mxu0 (!%p122_p6), %v1596_v0  ;;  %1507 = vmatpush3.bf16.msra.mxu1 (!%p122_p6), %v1596_v0  ;;  %s1319_s27 = sshll.u32 (!%p122_p6), %s143_s26, 9 }
   0xd   : > { %s1839_s28 = scalar_lea.vmem (!%p122_p6), [#allocation2], %s1319_s27  }
  0x12   : > { %s152_s21 = scalar_select %p151_p7, %s1765_s20, 224 }
  0x13   : > { %s856_s29 = ssub.s32 (%p1757_p4), 225, %s1765_s20  ;;  %s1404_s30 = sshll.u32 (%p1757_p4), %s1745_s12, 9 }
  0x14   : > { %s1321_s22 = sshll.u32 %s152_s21, 2  ;;  %p857_p8 = scmp.lt.s32.totalorder (%p1757_p4), %s856_s29, 64 }
  0x15   : > { %s1772_s25 = scalar_lea.vmem %s2111_s0, %s1321_s22  ;;  %s1912_s5 = scalar_lea.vmem (%p1757_p4), %s2113_s2, %s1404_s30  }
  0x16   : > { %v1597_v1 = vld [vmem:[%s1772_s25] sm:$0xff]   ;;  %v1599_v3 = vld [vmem:[%s1772_s25 + $0x8] sm:$0xff]   ;;  %v1601_v5 = vld [vmem:[%s1772_s25 + $0x10] sm:$0xff]  }
  0x17   : > { %v1598_v2 = vld [vmem:[%s1772_s25 + $0x80] sm:$0xff]   ;;  %1442 = vmatprep.mubr.msk.bf16.mxu0 %vm398_vm0, %v1597_v1  ;;  %v1600_v4 = vld [vmem:[%s1772_s25 + $0x88] sm:$0xff]   ;;  %v1602_v6 = vld [vmem:[%s1772_s25 + $0x90] sm:$0xff]  }
  0x18   : > { %1474 = vmatprep.mubr.msk.bf16.mxu1 %vm398_vm0, %v1598_v2  ;;  %1443 = vmatmul.mubr.msk.bf16.vlgmr.msra.gmra.mrb[0].mxu0 %vm398_vm0, %v1599_v3  ;;  %v1603_v7 = vld [vmem:[%s1772_s25 + $0x18] sm:$0xff]   ;;  %v1605_v9 = vld [vmem:[%s1772_s25 + $0x20] sm:$0xff]   ;;  %v1607_v11 = vld [vmem:[%s1772_s25 + $0x28] sm:$0xff]  }
  0x19   : > { %1475 = vmatmul.mubr.msk.bf16.vlgmr.msra.gmra.mrb[0].mxu1 %vm398_vm0, %v1600_v4  ;;  %1446 = vmatprep.mubr.msk.bf16.mxu0 %vm398_vm0, %v1601_v5  ;;  %v1604_v8 = vld [vmem:[%s1772_s25 + $0x98] sm:$0xff]   ;;  %v1606_v10 = vld [vmem:[%s1772_s25 + $0xa0] sm:$0xff]   ;;  %v1608_v12 = vld [vmem:[%s1772_s25 + $0xa8] sm:$0xff]  }
  0x1a   : > { %1478 = vmatprep.mubr.msk.bf16.mxu1 %vm398_vm0, %v1602_v6  ;;  %v1609_v13 = vld [vmem:[%s1772_s25 + $0x30] sm:$0xff]   ;;  %v1611_v15 = vld [vmem:[%s1772_s25 + $0x38] sm:$0xff]   ;;  %v1613_v17 = vld [vmem:[%s1772_s25 + $0x40] sm:$0xff]  }
  0x1b   : > { %v1610_v14 = vld [vmem:[%s1772_s25 + $0xb0] sm:$0xff]   ;;  %v1612_v16 = vld [vmem:[%s1772_s25 + $0xb8] sm:$0xff]   ;;  %v1614_v18 = vld [vmem:[%s1772_s25 + $0xc0] sm:$0xff]  }
  0x1c   : > { %v1615_v19 = vld [vmem:[%s1772_s25 + $0x48] sm:$0xff]   ;;  %v1617_v21 = vld [vmem:[%s1772_s25 + $0x50] sm:$0xff]   ;;  %v1619_v23 = vld [vmem:[%s1772_s25 + $0x58] sm:$0xff]  }
  0x1d   : > { %v1616_v20 = vld [vmem:[%s1772_s25 + $0xc8] sm:$0xff]   ;;  %v1618_v22 = vld [vmem:[%s1772_s25 + $0xd0] sm:$0xff]   ;;  %v1620_v24 = vld [vmem:[%s1772_s25 + $0xd8] sm:$0xff]  }
  0x1e   : > { %v1621_v25 = vld [vmem:[%s1772_s25 + $0x60] sm:$0xff]   ;;  %v1623_v27 = vld [vmem:[%s1772_s25 + $0x68] sm:$0xff]   ;;  %v1625_v29 = vld [vmem:[%s1772_s25 + $0x70] sm:$0xff]  }
  0x1f   : > { %v1622_v26 = vld [vmem:[%s1772_s25 + $0xe0] sm:$0xff]   ;;  %v1624_v28 = vld [vmem:[%s1772_s25 + $0xe8] sm:$0xff]   ;;  %v1626_v30 = vld [vmem:[%s1772_s25 + $0xf0] sm:$0xff]  }
  0x20   : > { %1447 = vmatmul.mubr.msk.bf16.gmra.mrb[4].mxu0 %vm398_vm0, %v1603_v7  ;;  %v1627_v31 = vld [vmem:[%s1772_s25 + $0x78] sm:$0xff]  }
  0x21   : > { %1479 = vmatmul.mubr.msk.bf16.gmra.mrb[4].mxu1 %vm398_vm0, %v1604_v8  ;;  %1450 = vmatprep.mubr.msk.bf16.mxu0 %vm398_vm0, %v1605_v9  ;;  %v1628_v32 = vld [vmem:[%s1772_s25 + $0xf8] sm:$0xff]  }
  0x22   : > { %1482 = vmatprep.mubr.msk.bf16.mxu1 %vm398_vm0, %v1606_v10 }
  0x28   : > { %1451 = vmatmul.mubr.msk.bf16.gmra.mrb[8].mxu0 %vm398_vm0, %v1607_v11 }
  0x29   : > { %1483 = vmatmul.mubr.msk.bf16.gmra.mrb[8].mxu1 %vm398_vm0, %v1608_v12  ;;  %1454 = vmatprep.mubr.msk.bf16.mxu0 %vm398_vm0, %v1609_v13 }
  0x2a   : > { %1486 = vmatprep.mubr.msk.bf16.mxu1 %vm398_vm0, %v1610_v14 }
  0x30   : > { %1455 = vmatmul.mubr.msk.bf16.gmra.mrb[12].mxu0 %vm398_vm0, %v1611_v15 }
  0x31   : > { %1487 = vmatmul.mubr.msk.bf16.gmra.mrb[12].mxu1 %vm398_vm0, %v1612_v16  ;;  %1458 = vmatprep.mubr.msk.bf16.mxu0 %vm398_vm0, %v1613_v17 }
  0x32   : > { %1490 = vmatprep.mubr.msk.bf16.mxu1 %vm398_vm0, %v1614_v18 }
  0x38   : > { %1459 = vmatmul.mubr.msk.bf16.gmra.mrb[16].mxu0 %vm398_vm0, %v1615_v19 }
  0x39   : > { %1491 = vmatmul.mubr.msk.bf16.gmra.mrb[16].mxu1 %vm398_vm0, %v1616_v20  ;;  %1462 = vmatprep.mubr.msk.bf16.mxu0 %vm398_vm0, %v1617_v21 }
  0x3a   : > { %1494 = vmatprep.mubr.msk.bf16.mxu1 %vm398_vm0, %v1618_v22 }
  0x40   : > { %1463 = vmatmul.mubr.msk.bf16.gmra.mrb[20].mxu0 %vm398_vm0, %v1619_v23 }
  0x41   : > { %1495 = vmatmul.mubr.msk.bf16.gmra.mrb[20].mxu1 %vm398_vm0, %v1620_v24  ;;  %1466 = vmatprep.mubr.msk.bf16.mxu0 %vm398_vm0, %v1621_v25 }
  0x42   : > { %1498 = vmatprep.mubr.msk.bf16.mxu1 %vm398_vm0, %v1622_v26 }
  0x48   : > { %1467 = vmatmul.mubr.msk.bf16.gmra.mrb[24].mxu0 %vm398_vm0, %v1623_v27 }
  0x49   : > { %1499 = vmatmul.mubr.msk.bf16.gmra.mrb[24].mxu1 %vm398_vm0, %v1624_v28  ;;  %1470 = vmatprep.mubr.msk.bf16.mxu0 %vm398_vm0, %v1625_v29 }
  0x4a   : > { %1502 = vmatprep.mubr.msk.bf16.mxu1 %vm398_vm0, %v1626_v30 }
  0x50   : > { %1471 = vmatmul.mubr.msk.bf16.gmra.mrb[28].mxu0 %vm398_vm0, %v1627_v31 }
  0x51   : > { %1503 = vmatmul.mubr.msk.bf16.gmra.mrb[28].mxu1 %vm398_vm0, %v1628_v32 }
  0xeb   : > { %v1444_v33 = vpop.f32.mrb[0].mxu0 }
  0xec   : > { %786 = vst [vmem:[%s1839_s28 + $0x10] sm:$0xff] %v1444_v33  ;;  %v1476_v34 = vpop.f32.mrb[0].mxu1  ;;  %v529_v35 = vpop.f32.mrb[1].mxu0 }
  0xed   : > { %818 = vst [vmem:[%s1839_s28 + $0x110] sm:$0xff] %v1476_v34  ;;  %784 = vst [vmem:[%s1839_s28] sm:$0xff] %v529_v35  ;;  %v657_v36 = vpop.f32.mrb[1].mxu1  ;;  %v1445_v37 = vpop.f32.mrb[2].mxu0 }
  0xee   : > { %816 = vst [vmem:[%s1839_s28 + $0x100] sm:$0xff] %v657_v36  ;;  %787 = vst [vmem:[%s1839_s28 + $0x18] sm:$0xff] %v1445_v37  ;;  %v1477_v38 = vpop.f32.mrb[2].mxu1  ;;  %v532_v39 = vpop.f32.mrb[3].mxu0 }
  0xef   : > { %819 = vst [vmem:[%s1839_s28 + $0x118] sm:$0xff] %v1477_v38  ;;  %785 = vst [vmem:[%s1839_s28 + $0x8] sm:$0xff] %v532_v39  ;;  %v660_v40 = vpop.f32.mrb[3].mxu1 }
  0xf0   : > { %817 = vst [vmem:[%s1839_s28 + $0x108] sm:$0xff] %v660_v40 }
  0xf3   : > { %v1448_v41 = vpop.f32.mrb[4].mxu0 }
  0xf4   : > { %790 = vst [vmem:[%s1839_s28 + $0x30] sm:$0xff] %v1448_v41  ;;  %v1480_v42 = vpop.f32.mrb[4].mxu1  ;;  %v545_v43 = vpop.f32.mrb[5].mxu0 }
  0xf5   : > { %822 = vst [vmem:[%s1839_s28 + $0x130] sm:$0xff] %v1480_v42  ;;  %788 = vst [vmem:[%s1839_s28 + $0x20] sm:$0xff] %v545_v43  ;;  %v673_v44 = vpop.f32.mrb[5].mxu1  ;;  %v1449_v45 = vpop.f32.mrb[6].mxu0 }
  0xf6   : > { %820 = vst [vmem:[%s1839_s28 + $0x120] sm:$0xff] %v673_v44  ;;  %791 = vst [vmem:[%s1839_s28 + $0x38] sm:$0xff] %v1449_v45  ;;  %v1481_v46 = vpop.f32.mrb[6].mxu1  ;;  %v548_v47 = vpop.f32.mrb[7].mxu0 }
  0xf7   : > { %823 = vst [vmem:[%s1839_s28 + $0x138] sm:$0xff] %v1481_v46  ;;  %789 = vst [vmem:[%s1839_s28 + $0x28] sm:$0xff] %v548_v47  ;;  %v676_v48 = vpop.f32.mrb[7].mxu1 }
  0xf8   : > { %821 = vst [vmem:[%s1839_s28 + $0x128] sm:$0xff] %v676_v48 }
  0xfb   : > { %v1452_v49 = vpop.f32.mrb[8].mxu0 }
  0xfc   : > { %794 = vst [vmem:[%s1839_s28 + $0x50] sm:$0xff] %v1452_v49  ;;  %v1484_v50 = vpop.f32.mrb[8].mxu1  ;;  %v561_v51 = vpop.f32.mrb[9].mxu0 }
  0xfd   : > { %826 = vst [vmem:[%s1839_s28 + $0x150] sm:$0xff] %v1484_v50  ;;  %792 = vst [vmem:[%s1839_s28 + $0x40] sm:$0xff] %v561_v51  ;;  %v689_v52 = vpop.f32.mrb[9].mxu1  ;;  %v1453_v53 = vpop.f32.mrb[10].mxu0 }
  0xfe   : > { %824 = vst [vmem:[%s1839_s28 + $0x140] sm:$0xff] %v689_v52  ;;  %795 = vst [vmem:[%s1839_s28 + $0x58] sm:$0xff] %v1453_v53  ;;  %v1485_v54 = vpop.f32.mrb[10].mxu1  ;;  %v564_v55 = vpop.f32.mrb[11].mxu0 }
  0xff   : > { %827 = vst [vmem:[%s1839_s28 + $0x158] sm:$0xff] %v1485_v54  ;;  %793 = vst [vmem:[%s1839_s28 + $0x48] sm:$0xff] %v564_v55  ;;  %v692_v56 = vpop.f32.mrb[11].mxu1 }
 0x100   : > { %825 = vst [vmem:[%s1839_s28 + $0x148] sm:$0xff] %v692_v56 }
 0x103   : > { %v1456_v57 = vpop.f32.mrb[12].mxu0 }
 0x104   : > { %798 = vst [vmem:[%s1839_s28 + $0x70] sm:$0xff] %v1456_v57  ;;  %v1488_v58 = vpop.f32.mrb[12].mxu1  ;;  %v577_v59 = vpop.f32.mrb[13].mxu0 }
 0x105   : > { %830 = vst [vmem:[%s1839_s28 + $0x170] sm:$0xff] %v1488_v58  ;;  %796 = vst [vmem:[%s1839_s28 + $0x60] sm:$0xff] %v577_v59  ;;  %v705_v60 = vpop.f32.mrb[13].mxu1  ;;  %v1457_v61 = vpop.f32.mrb[14].mxu0 }
 0x106   : > { %828 = vst [vmem:[%s1839_s28 + $0x160] sm:$0xff] %v705_v60  ;;  %799 = vst [vmem:[%s1839_s28 + $0x78] sm:$0xff] %v1457_v61  ;;  %v1489_v62 = vpop.f32.mrb[14].mxu1  ;;  %v580_v63 = vpop.f32.mrb[15].mxu0 }
 0x107   : > { %831 = vst [vmem:[%s1839_s28 + $0x178] sm:$0xff] %v1489_v62  ;;  %797 = vst [vmem:[%s1839_s28 + $0x68] sm:$0xff] %v580_v63  ;;  %v708_v0 = vpop.f32.mrb[15].mxu1 }
 0x108   : > { %829 = vst [vmem:[%s1839_s28 + $0x168] sm:$0xff] %v708_v0 }
 0x10b   : > { %v1460_v1 = vpop.f32.mrb[16].mxu0 }
 0x10c   : > { %802 = vst [vmem:[%s1839_s28 + $0x90] sm:$0xff] %v1460_v1  ;;  %v1492_v2 = vpop.f32.mrb[16].mxu1  ;;  %v593_v3 = vpop.f32.mrb[17].mxu0 }
 0x10d   : > { %834 = vst [vmem:[%s1839_s28 + $0x190] sm:$0xff] %v1492_v2  ;;  %800 = vst [vmem:[%s1839_s28 + $0x80] sm:$0xff] %v593_v3  ;;  %v721_v4 = vpop.f32.mrb[17].mxu1  ;;  %v1461_v5 = vpop.f32.mrb[18].mxu0 }
 0x10e   : > { %832 = vst [vmem:[%s1839_s28 + $0x180] sm:$0xff] %v721_v4  ;;  %803 = vst [vmem:[%s1839_s28 + $0x98] sm:$0xff] %v1461_v5  ;;  %v1493_v6 = vpop.f32.mrb[18].mxu1  ;;  %v596_v7 = vpop.f32.mrb[19].mxu0 }
 0x10f   : > { %835 = vst [vmem:[%s1839_s28 + $0x198] sm:$0xff] %v1493_v6  ;;  %801 = vst [vmem:[%s1839_s28 + $0x88] sm:$0xff] %v596_v7  ;;  %v724_v8 = vpop.f32.mrb[19].mxu1 }
 0x110   : > { %833 = vst [vmem:[%s1839_s28 + $0x188] sm:$0xff] %v724_v8 }
 0x113   : > { %v1464_v9 = vpop.f32.mrb[20].mxu0 }
 0x114   : > { %806 = vst [vmem:[%s1839_s28 + $0xb0] sm:$0xff] %v1464_v9  ;;  %v1496_v10 = vpop.f32.mrb[20].mxu1  ;;  %v609_v11 = vpop.f32.mrb[21].mxu0 }
 0x115   : > { %838 = vst [vmem:[%s1839_s28 + $0x1b0] sm:$0xff] %v1496_v10  ;;  %804 = vst [vmem:[%s1839_s28 + $0xa0] sm:$0xff] %v609_v11  ;;  %v737_v12 = vpop.f32.mrb[21].mxu1  ;;  %v1465_v13 = vpop.f32.mrb[22].mxu0 }
 0x116   : > { %836 = vst [vmem:[%s1839_s28 + $0x1a0] sm:$0xff] %v737_v12  ;;  %807 = vst [vmem:[%s1839_s28 + $0xb8] sm:$0xff] %v1465_v13  ;;  %v1497_v14 = vpop.f32.mrb[22].mxu1  ;;  %v612_v15 = vpop.f32.mrb[23].mxu0 }
 0x117   : > { %839 = vst [vmem:[%s1839_s28 + $0x1b8] sm:$0xff] %v1497_v14  ;;  %805 = vst [vmem:[%s1839_s28 + $0xa8] sm:$0xff] %v612_v15  ;;  %v740_v16 = vpop.f32.mrb[23].mxu1 }
 0x118   : > { %837 = vst [vmem:[%s1839_s28 + $0x1a8] sm:$0xff] %v740_v16 }
 0x11b   : > { %v1468_v17 = vpop.f32.mrb[24].mxu0 }
 0x11c   : > { %810 = vst [vmem:[%s1839_s28 + $0xd0] sm:$0xff] %v1468_v17  ;;  %v1500_v18 = vpop.f32.mrb[24].mxu1  ;;  %v625_v19 = vpop.f32.mrb[25].mxu0 }
 0x11d   : > { %842 = vst [vmem:[%s1839_s28 + $0x1d0] sm:$0xff] %v1500_v18  ;;  %808 = vst [vmem:[%s1839_s28 + $0xc0] sm:$0xff] %v625_v19  ;;  %v753_v20 = vpop.f32.mrb[25].mxu1  ;;  %v1469_v21 = vpop.f32.mrb[26].mxu0 }
 0x11e   : > { %840 = vst [vmem:[%s1839_s28 + $0x1c0] sm:$0xff] %v753_v20  ;;  %811 = vst [vmem:[%s1839_s28 + $0xd8] sm:$0xff] %v1469_v21  ;;  %v1501_v22 = vpop.f32.mrb[26].mxu1  ;;  %v628_v23 = vpop.f32.mrb[27].mxu0 }
 0x11f   : > { %843 = vst [vmem:[%s1839_s28 + $0x1d8] sm:$0xff] %v1501_v22  ;;  %809 = vst [vmem:[%s1839_s28 + $0xc8] sm:$0xff] %v628_v23  ;;  %v756_v24 = vpop.f32.mrb[27].mxu1 }
 0x120   : > { %841 = vst [vmem:[%s1839_s28 + $0x1c8] sm:$0xff] %v756_v24 }
 0x122   : > { %854 = sbr.rel (!%p1757_p4) target bundleno = 369 (0x171), region = 32 }
 0x123   : > { %v1472_v25 = vpop.f32.mrb[28].mxu0 }
 0x124   : > { %814 = vst [vmem:[%s1839_s28 + $0xf0] sm:$0xff] %v1472_v25  ;;  %v1504_v26 = vpop.f32.mrb[28].mxu1  ;;  %v641_v27 = vpop.f32.mrb[29].mxu0 }
 0x125   : > { %846 = vst [vmem:[%s1839_s28 + $0x1f0] sm:$0xff] %v1504_v26  ;;  %812 = vst [vmem:[%s1839_s28 + $0xe0] sm:$0xff] %v641_v27  ;;  %v769_v28 = vpop.f32.mrb[29].mxu1  ;;  %v1473_v29 = vpop.f32.mrb[30].mxu0 }
 0x126   : > { %844 = vst [vmem:[%s1839_s28 + $0x1e0] sm:$0xff] %v769_v28  ;;  %815 = vst [vmem:[%s1839_s28 + $0xf8] sm:$0xff] %v1473_v29  ;;  %v1505_v30 = vpop.f32.mrb[30].mxu1  ;;  %v644_v31 = vpop.f32.mrb[31].mxu0 }
 0x127   : > { %847 = vst [vmem:[%s1839_s28 + $0x1f8] sm:$0xff] %v1505_v30  ;;  %813 = vst [vmem:[%s1839_s28 + $0xe8] sm:$0xff] %v644_v31  ;;  %v772_v32 = vpop.f32.mrb[31].mxu1 }
 0x128   : > { %845 = vst [vmem:[%s1839_s28 + $0x1e8] sm:$0xff] %v772_v32 }
 0x129   : > { %s2124_s29 = smov (!%p857_p8, %s856_s29), 64 }
 0x12a   : > { %s1389_s6 = sshll.u32 %s2124_s29, 7 }
 0x12b   : > { %p1392_p9 = scmp.eq.s32.totalorder %s1389_s6, 0 }
 0x12c   : > { %s1918_s7 = sshrl.u32 (!%p1392_p9), %s2124_s29, 6 }
 0x12d   : > { %865 = sbr.rel (%p1392_p9) target bundleno = 369 (0x171), region = 36  ;;  %p1393_p10 = scmp.le.s32.totalorder (!%p1392_p9), %s1918_s7, 0 }
 0x134   : > { %1271 = sbr.rel (%p1393_p10) target bundleno = 348 (0x15c), region = 112  ;;  %s2115_s8 = smov (!%p1393_p10), %s1912_s5 }
 0x135   : > { %s2116_s9 = smov (!%p1393_p10), %s1839_s28  ;;  %s1927_s11 = smov (!%p1393_p10), 0  }
 0x136   : > { %s1929_s12 = smov (!%p1393_p10), 0  }
 0x13b LB: >> { %v1053_v33 = vld [vmem:[%s1691_s9] sm:$0xff]  ;;  %v1055_v34 = vld [vmem:[%s1691_s9 + $0x8] sm:$0xff]  ;;  %v1057_v35 = vld [vmem:[%s1691_s9 + $0x10] sm:$0xff]  ;;  %s1181_s14 = sadd.s32 1, %s1695_s11  ;;  %s1047_s12 = sadd.s32 1, %s1699_s12   ;;  %s1699_s12 = sphi %s1929_s12, %s1047_s12   ;;  %s1695_s11 = sphi %s1927_s11, %s2119_s11   ;;  %s1691_s9 = sphi %s2116_s9, %s2118_s9   ;;  %s1687_s8 = sphi %s2115_s8, %s2117_s8  }
 0x13c   : >> { %1054 = vst [vmem:[%s1687_s8] sm:$0xff] %v1053_v33  ;;  %1056 = vst [vmem:[%s1687_s8 + $0x8] sm:$0xff] %v1055_v34  ;;  %v1059_v36 = vld [vmem:[%s1691_s9 + $0x18] sm:$0xff]  ;;  %v1061_v37 = vld [vmem:[%s1691_s9 + $0x20] sm:$0xff]  ;;  %p1182_p11 = scmp.ge.s32.totalorder %s1181_s14, %s1918_s7  ;;  %p1046_p12 = scmp.ge.s32.totalorder %s1047_s12, %s1918_s7 }
 0x13d   : >> { %1058 = vst [vmem:[%s1687_s8 + $0x10] sm:$0xff] %v1057_v35  ;;  %v1063_v38 = vld [vmem:[%s1691_s9 + $0x28] sm:$0xff]  ;;  %1060 = vst [vmem:[%s1687_s8 + $0x18] sm:$0xff] %v1059_v36  ;;  %v1065_v39 = vld [vmem:[%s1691_s9 + $0x30] sm:$0xff] }
 0x13e   : >> { %1062 = vst [vmem:[%s1687_s8 + $0x20] sm:$0xff] %v1061_v37  ;;  %1064 = vst [vmem:[%s1687_s8 + $0x28] sm:$0xff] %v1063_v38  ;;  %v1067_v40 = vld [vmem:[%s1691_s9 + $0x38] sm:$0xff]  ;;  %v1069_v41 = vld [vmem:[%s1691_s9 + $0x40] sm:$0xff]  ;;  %s2126_s14 = smov (%p1182_p11, %s1181_s14), 0 }
 0x13f   : >> { %1066 = vst [vmem:[%s1687_s8 + $0x30] sm:$0xff] %v1065_v39  ;;  %1068 = vst [vmem:[%s1687_s8 + $0x38] sm:$0xff] %v1067_v40  ;;  %v1071_v42 = vld [vmem:[%s1691_s9 + $0x48] sm:$0xff]  ;;  %v1073_v43 = vld [vmem:[%s1691_s9 + $0x50] sm:$0xff]  ;;  %s1394_s15 = sshll.u32 %s2126_s14, 9  ;;  %s2119_s11 = smov %s2126_s14 }
 0x140   : >> { %1070 = vst [vmem:[%s1687_s8 + $0x40] sm:$0xff] %v1069_v41  ;;  %v1075_v44 = vld [vmem:[%s1691_s9 + $0x58] sm:$0xff]  ;;  %1072 = vst [vmem:[%s1687_s8 + $0x48] sm:$0xff] %v1071_v42  ;;  %v1077_v45 = vld [vmem:[%s1691_s9 + $0x60] sm:$0xff]  ;;  %s1985_s17 = scalar_lea.vmem %s1839_s28, %s1394_s15 [#allocation2]   ;;  %s1988_s18 = scalar_lea.vmem %s1912_s5, %s1394_s15  }
 0x141   : >> { %1074 = vst [vmem:[%s1687_s8 + $0x50] sm:$0xff] %v1073_v43  ;;  %1076 = vst [vmem:[%s1687_s8 + $0x58] sm:$0xff] %v1075_v44  ;;  %v1079_v46 = vld [vmem:[%s1691_s9 + $0x68] sm:$0xff]  ;;  %v1081_v47 = vld [vmem:[%s1691_s9 + $0x70] sm:$0xff] }
 0x142   : >> { %1078 = vst [vmem:[%s1687_s8 + $0x60] sm:$0xff] %v1077_v45  ;;  %1080 = vst [vmem:[%s1687_s8 + $0x68] sm:$0xff] %v1079_v46  ;;  %v1083_v48 = vld [vmem:[%s1691_s9 + $0x78] sm:$0xff]  ;;  %v1085_v49 = vld [vmem:[%s1691_s9 + $0x80] sm:$0xff] }
 0x143   : >> { %1082 = vst [vmem:[%s1687_s8 + $0x70] sm:$0xff] %v1081_v47  ;;  %v1087_v50 = vld [vmem:[%s1691_s9 + $0x88] sm:$0xff]  ;;  %1084 = vst [vmem:[%s1687_s8 + $0x78] sm:$0xff] %v1083_v48  ;;  %v1089_v51 = vld [vmem:[%s1691_s9 + $0x90] sm:$0xff] }
 0x144   : >> { %1086 = vst [vmem:[%s1687_s8 + $0x80] sm:$0xff] %v1085_v49  ;;  %1088 = vst [vmem:[%s1687_s8 + $0x88] sm:$0xff] %v1087_v50  ;;  %v1091_v52 = vld [vmem:[%s1691_s9 + $0x98] sm:$0xff]  ;;  %v1093_v53 = vld [vmem:[%s1691_s9 + $0xa0] sm:$0xff] }
 0x145   : >> { %1090 = vst [vmem:[%s1687_s8 + $0x90] sm:$0xff] %v1089_v51  ;;  %1092 = vst [vmem:[%s1687_s8 + $0x98] sm:$0xff] %v1091_v52  ;;  %v1095_v54 = vld [vmem:[%s1691_s9 + $0xa8] sm:$0xff]  ;;  %v1097_v55 = vld [vmem:[%s1691_s9 + $0xb0] sm:$0xff] }
 0x146   : >> { %1094 = vst [vmem:[%s1687_s8 + $0xa0] sm:$0xff] %v1093_v53  ;;  %v1099_v56 = vld [vmem:[%s1691_s9 + $0xb8] sm:$0xff]  ;;  %1096 = vst [vmem:[%s1687_s8 + $0xa8] sm:$0xff] %v1095_v54  ;;  %v1101_v57 = vld [vmem:[%s1691_s9 + $0xc0] sm:$0xff] }
 0x147   : >> { %1098 = vst [vmem:[%s1687_s8 + $0xb0] sm:$0xff] %v1097_v55  ;;  %1100 = vst [vmem:[%s1687_s8 + $0xb8] sm:$0xff] %v1099_v56  ;;  %v1103_v58 = vld [vmem:[%s1691_s9 + $0xc8] sm:$0xff]  ;;  %v1105_v59 = vld [vmem:[%s1691_s9 + $0xd0] sm:$0xff] }
 0x148   : >> { %1102 = vst [vmem:[%s1687_s8 + $0xc0] sm:$0xff] %v1101_v57  ;;  %1104 = vst [vmem:[%s1687_s8 + $0xc8] sm:$0xff] %v1103_v58  ;;  %v1107_v60 = vld [vmem:[%s1691_s9 + $0xd8] sm:$0xff]  ;;  %v1109_v61 = vld [vmem:[%s1691_s9 + $0xe0] sm:$0xff] }
 0x149   : >> { %1106 = vst [vmem:[%s1687_s8 + $0xd0] sm:$0xff] %v1105_v59  ;;  %v1111_v62 = vld [vmem:[%s1691_s9 + $0xe8] sm:$0xff]  ;;  %1108 = vst [vmem:[%s1687_s8 + $0xd8] sm:$0xff] %v1107_v60  ;;  %v1113_v63 = vld [vmem:[%s1691_s9 + $0xf0] sm:$0xff] }
 0x14a   : >> { %1110 = vst [vmem:[%s1687_s8 + $0xe0] sm:$0xff] %v1109_v61  ;;  %1112 = vst [vmem:[%s1687_s8 + $0xe8] sm:$0xff] %v1111_v62  ;;  %v1115_v0 = vld [vmem:[%s1691_s9 + $0xf8] sm:$0xff]  ;;  %v1117_v1 = vld [vmem:[%s1691_s9 + $0x100] sm:$0xff] }
 0x14b   : >> { %1114 = vst [vmem:[%s1687_s8 + $0xf0] sm:$0xff] %v1113_v63  ;;  %1116 = vst [vmem:[%s1687_s8 + $0xf8] sm:$0xff] %v1115_v0  ;;  %v1119_v2 = vld [vmem:[%s1691_s9 + $0x108] sm:$0xff]  ;;  %v1121_v3 = vld [vmem:[%s1691_s9 + $0x110] sm:$0xff] }
 0x14c   : >> { %1118 = vst [vmem:[%s1687_s8 + $0x100] sm:$0xff] %v1117_v1  ;;  %v1123_v4 = vld [vmem:[%s1691_s9 + $0x118] sm:$0xff]  ;;  %1120 = vst [vmem:[%s1687_s8 + $0x108] sm:$0xff] %v1119_v2  ;;  %v1125_v5 = vld [vmem:[%s1691_s9 + $0x120] sm:$0xff] }
 0x14d   : >> { %1122 = vst [vmem:[%s1687_s8 + $0x110] sm:$0xff] %v1121_v3  ;;  %1124 = vst [vmem:[%s1687_s8 + $0x118] sm:$0xff] %v1123_v4  ;;  %v1127_v6 = vld [vmem:[%s1691_s9 + $0x128] sm:$0xff]  ;;  %v1129_v7 = vld [vmem:[%s1691_s9 + $0x130] sm:$0xff] }
 0x14e   : >> { %1126 = vst [vmem:[%s1687_s8 + $0x120] sm:$0xff] %v1125_v5  ;;  %1128 = vst [vmem:[%s1687_s8 + $0x128] sm:$0xff] %v1127_v6  ;;  %v1131_v8 = vld [vmem:[%s1691_s9 + $0x138] sm:$0xff]  ;;  %v1133_v9 = vld [vmem:[%s1691_s9 + $0x140] sm:$0xff] }
 0x14f   : >> { %1130 = vst [vmem:[%s1687_s8 + $0x130] sm:$0xff] %v1129_v7  ;;  %v1135_v10 = vld [vmem:[%s1691_s9 + $0x148] sm:$0xff]  ;;  %1132 = vst [vmem:[%s1687_s8 + $0x138] sm:$0xff] %v1131_v8  ;;  %v1137_v11 = vld [vmem:[%s1691_s9 + $0x150] sm:$0xff] }
 0x150   : >> { %1134 = vst [vmem:[%s1687_s8 + $0x140] sm:$0xff] %v1133_v9  ;;  %1136 = vst [vmem:[%s1687_s8 + $0x148] sm:$0xff] %v1135_v10  ;;  %v1139_v12 = vld [vmem:[%s1691_s9 + $0x158] sm:$0xff]  ;;  %v1141_v13 = vld [vmem:[%s1691_s9 + $0x160] sm:$0xff] }
 0x151   : >> { %1138 = vst [vmem:[%s1687_s8 + $0x150] sm:$0xff] %v1137_v11  ;;  %1140 = vst [vmem:[%s1687_s8 + $0x158] sm:$0xff] %v1139_v12  ;;  %v1143_v14 = vld [vmem:[%s1691_s9 + $0x168] sm:$0xff]  ;;  %v1145_v15 = vld [vmem:[%s1691_s9 + $0x170] sm:$0xff] }
 0x152   : >> { %1142 = vst [vmem:[%s1687_s8 + $0x160] sm:$0xff] %v1141_v13  ;;  %v1147_v16 = vld [vmem:[%s1691_s9 + $0x178] sm:$0xff]  ;;  %1144 = vst [vmem:[%s1687_s8 + $0x168] sm:$0xff] %v1143_v14  ;;  %v1149_v17 = vld [vmem:[%s1691_s9 + $0x180] sm:$0xff] }
 0x153   : >> { %1146 = vst [vmem:[%s1687_s8 + $0x170] sm:$0xff] %v1145_v15  ;;  %1148 = vst [vmem:[%s1687_s8 + $0x178] sm:$0xff] %v1147_v16  ;;  %v1151_v18 = vld [vmem:[%s1691_s9 + $0x188] sm:$0xff]  ;;  %v1153_v19 = vld [vmem:[%s1691_s9 + $0x190] sm:$0xff] }
 0x154   : >> { %1150 = vst [vmem:[%s1687_s8 + $0x180] sm:$0xff] %v1149_v17  ;;  %1152 = vst [vmem:[%s1687_s8 + $0x188] sm:$0xff] %v1151_v18  ;;  %v1155_v20 = vld [vmem:[%s1691_s9 + $0x198] sm:$0xff]  ;;  %v1157_v21 = vld [vmem:[%s1691_s9 + $0x1a0] sm:$0xff] }
 0x155   : >> { %1154 = vst [vmem:[%s1687_s8 + $0x190] sm:$0xff] %v1153_v19  ;;  %v1159_v22 = vld [vmem:[%s1691_s9 + $0x1a8] sm:$0xff]  ;;  %1156 = vst [vmem:[%s1687_s8 + $0x198] sm:$0xff] %v1155_v20  ;;  %v1161_v23 = vld [vmem:[%s1691_s9 + $0x1b0] sm:$0xff]  ;;  %1049 = sbr.rel (!%p1046_p12) target bundleno = 315 (0x13b), region = 118 }
 0x156   : >> { %1158 = vst [vmem:[%s1687_s8 + $0x1a0] sm:$0xff] %v1157_v21  ;;  %1160 = vst [vmem:[%s1687_s8 + $0x1a8] sm:$0xff] %v1159_v22  ;;  %v1163_v24 = vld [vmem:[%s1691_s9 + $0x1b8] sm:$0xff]  ;;  %v1165_v25 = vld [vmem:[%s1691_s9 + $0x1c0] sm:$0xff] }
 0x157   : >> { %1162 = vst [vmem:[%s1687_s8 + $0x1b0] sm:$0xff] %v1161_v23  ;;  %1164 = vst [vmem:[%s1687_s8 + $0x1b8] sm:$0xff] %v1163_v24  ;;  %v1167_v26 = vld [vmem:[%s1691_s9 + $0x1c8] sm:$0xff]  ;;  %v1169_v27 = vld [vmem:[%s1691_s9 + $0x1d0] sm:$0xff] }
 0x158   : >> { %1166 = vst [vmem:[%s1687_s8 + $0x1c0] sm:$0xff] %v1165_v25  ;;  %v1171_v28 = vld [vmem:[%s1691_s9 + $0x1d8] sm:$0xff]  ;;  %1168 = vst [vmem:[%s1687_s8 + $0x1c8] sm:$0xff] %v1167_v26  ;;  %v1173_v29 = vld [vmem:[%s1691_s9 + $0x1e0] sm:$0xff] }
 0x159   : >> { %1170 = vst [vmem:[%s1687_s8 + $0x1d0] sm:$0xff] %v1169_v27  ;;  %1172 = vst [vmem:[%s1687_s8 + $0x1d8] sm:$0xff] %v1171_v28  ;;  %v1175_v30 = vld [vmem:[%s1691_s9 + $0x1e8] sm:$0xff]  ;;  %v1177_v31 = vld [vmem:[%s1691_s9 + $0x1f0] sm:$0xff] }
 0x15a   : >> { %1174 = vst [vmem:[%s1687_s8 + $0x1e0] sm:$0xff] %v1173_v29  ;;  %1176 = vst [vmem:[%s1687_s8 + $0x1e8] sm:$0xff] %v1175_v30  ;;  %v1179_v32 = vld [vmem:[%s1691_s9 + $0x1f8] sm:$0xff]  ;;  %s2118_s9 = smov %s1985_s17 }
 0x15b   : >> { %1178 = vst [vmem:[%s1687_s8 + $0x1f0] sm:$0xff] %v1177_v31  ;;  %1180 = vst [vmem:[%s1687_s8 + $0x1f8] sm:$0xff] %v1179_v32  ;;  %s2117_s8 = smov %s1988_s18 }
 0x15c PF: > { %s2093_s19 = sand.u32 63, %s2124_s29   ;;  %s1405_s20 = sshll.u32 %s1918_s7, 9 }
 0x15d   : > { %s1192_s21 = scalar_lea.vmem %s1839_s28, %s1405_s20 [#allocation2]   ;;  %s1194_s22 = scalar_lea.vmem %s1912_s5, %s1405_s20  }
 0x15e   : > { %p1399_p13 = scmp.le.s32.totalorder %s2093_s19, 0 }
 0x15f   : > { %s1701_s23 = smov (!%p1399_p13), %s1194_s22   ;;  %s1705_s24 = smov (!%p1399_p13), %s1192_s21  }
 0x160   : > { %1285 = sbr.rel (%p1399_p13) target bundleno = 369 (0x171), region = 123  ;;  %s1709_s25 = smov (!%p1399_p13), 0  }
 0x161   : > { %s1713_s26 = smov (!%p1399_p13), 0  }
 0x167 LB: >> { %v1204_v33 = vld [vmem:[%s1707_s24] sm:$0xff]  ;;  %s1206_s27 = sadd.s32 1, %s1711_s25  ;;  %s1198_s26 = sadd.s32 1, %s1715_s26   ;;  %s1715_s26 = sphi %s1713_s26, %s1198_s26   ;;  %s1711_s25 = sphi %s1709_s25, %s1710_s25   ;;  %s1707_s24 = sphi %s1705_s24, %s1211_s24   ;;  %s1703_s23 = sphi %s1701_s23, %s1212_s23  }
 0x168   : >> { %1205 = vst [vmem:[%s1703_s23] sm:$0xff] %v1204_v33  ;;  %p1207_p0 = scmp.ge.s32.totalorder %s1206_s27, %s2093_s19  ;;  %p1197_p1 = scmp.ge.s32.totalorder %s1198_s26, %s2093_s19 }
 0x16a   : >> { %s2128_s27 = smov (%p1207_p0, %s1206_s27), 0  ;;  %1200 = sbr.rel (!%p1197_p1) target bundleno = 359 (0x167), region = 129 }
 0x16b   : >> { %s1400_s28 = sshll.u32 %s2128_s27, 3  ;;  %s1710_s25 = smov %s2128_s27  }
 0x16c   : >> { %s1211_s24 = scalar_lea.vmem %s1192_s21, %s1400_s28 [#allocation2]   ;;  %s1212_s23 = scalar_lea.vmem %s1194_s22, %s1400_s28  }
 0x171 PF: > { %p9_p2 = scmp.ge.s32.totalorder %s1747_s13, 6   ;;  %s2120_s9 = smov %s1679_s10 }
 0x172   : > { %s2121_s10 = smov %s1755_s16  ;;  %s2122_s11 = smov %s1747_s13 }
 0x173   :  { %11 = sbr.rel (!%p9_p2) target bundleno = 2 (0x2), region = 140 }

</bundles_post_ra>
